<compile_context>
chip_gen: v6e
topology: v6e:2x2x1
jax: 0.10.0
libtpu: 0.0.40
codegen_flags: <defaults>
</compile_context>

<pallas_src>
import functools
import math

import jax
import jax.numpy as jnp
from jax.experimental import pallas as pl
from jax.experimental.pallas import tpu as pltpu


LANE = 128
_DEF_MATMUL_DTYPE = jnp.bfloat16
# First layer is computed on the VPU (f32 broadcast FMAs) when fan_in <= this.
_VPU_FIRST_LAYER_MAX_FAN_IN = 8

# sin() range-reduction constants (Cody-Waite split of 2*pi).
_INV_TWO_PI = 0.15915494309189535
_TWO_PI_HI = 6.28125                    # exactly representable, low bits clear
_TWO_PI_LO = 1.9353071795864769e-03     # 2*pi - _TWO_PI_HI
_PI = math.pi
_HALF_PI = 0.5 * math.pi


def _round_up(x, m):
    return ((x + m - 1) // m) * m


# ------------------------------- VPU sine -------------------------------------
def _sin_vpu(y):
    """sin(y) using only VPU mul/add/round/select ops (no EUP).

    Cody-Waite reduction to [-pi, pi], fold to [-pi/2, pi/2] via
    sin(r) = sin(sign(r)*pi - r), then a degree-9 odd polynomial
    (max abs error ~4e-6 for |y| up to a few hundred)."""
    k = jnp.round(y * _INV_TWO_PI)
    r = y - k * _TWO_PI_HI
    r = r - k * _TWO_PI_LO                        # r in ~[-pi, pi]
    need_fold = jnp.abs(r) > _HALF_PI
    pi_signed = jnp.where(r >= 0.0, _PI, -_PI)
    r = jnp.where(need_fold, pi_signed - r, r)    # r in [-pi/2, pi/2]
    r2 = r * r
    p = 2.7557319e-06                             # 1/9!
    p = p * r2 + (-1.9841270e-04)                 # -1/7!
    p = p * r2 + 8.3333333e-03                    # 1/5!
    p = p * r2 + (-1.6666667e-01)                 # -1/3!
    return r + r * r2 * p


# ----------------------------- Pallas kernel ----------------------------------
def _siren_fused_kernel(x_ref, *rest, n_layers, out_features,
                        first_layer_on_vpu, matmul_dtype):
    """Fused SIREN MLP over one batch tile.

    rest = (w_0, b_0, ..., w_{L-1}, b_{L-1}, o_ref).  Weights already have w0
    folded in; fan_out dims are zero-padded to 128 lanes; hidden/output layer
    weights are pre-cast to the MXU operand dtype, layer-0 weights stay f32
    when computed on the VPU.  Biases are f32."""
    o_ref = rest[-1]
    wb = rest[:-1]

    h = x_ref[...].astype(jnp.float32)            # (tile_n, d_in)
    for layer in range(n_layers):
        w_ref = wb[2 * layer]
        b_ref = wb[2 * layer + 1]
        if layer == 0 and first_layer_on_vpu:
            # K = d_in is tiny: broadcast FMAs on the VPU in f32.  No MXU
            # fill/drain for a K=2 matmul, and no bf16 rounding of the
            # w0_initial-scaled weights.
            d_in = h.shape[1]
            y = b_ref[...].astype(jnp.float32) + h[:, 0:1] * w_ref[0:1, :]
            for j in range(1, d_in):
                y = y + h[:, j:j + 1] * w_ref[j:j + 1, :]
        else:
            # MXU matmul: bf16 operands, f32 accumulation.
            y = jnp.dot(h.astype(matmul_dtype), w_ref[...],
                        preferred_element_type=jnp.float32)
            y = y + b_ref[...]                    # bias add in f32
        # w0 is folded into W/b, so this is sin(w0*(x@W+b)) on the VPU.
        h = _sin_vpu(y) if layer < n_layers - 1 else y

    # Only the real output columns are stored (o_ref last dim == out_features),
    # so the writeback is lane-slim instead of a 128-lane padded f32 slab.
    o_ref[...] = h[:, :out_features].astype(o_ref.dtype)


# --------------------------- parameter handling --------------------------------
def siren_init_params(key, layers, in_features, out_features, c=6.0):
    """SIREN init (matches the torch reference): W ~ U(+-sqrt(c/fan_in)),
    b ~ U(+-1/sqrt(fan_in)).  Weights stored [fan_in, fan_out]."""
    dims = [in_features] + list(layers) + [out_features]
    params = []
    for fan_in, fan_out in zip(dims[:-1], dims[1:]):
        key, kw, kb = jax.random.split(key, 3)
        w_bound = math.sqrt(c / fan_in)
        b_bound = 1.0 / math.sqrt(fan_in)
        w = jax.random.uniform(kw, (fan_in, fan_out), jnp.float32, -w_bound, w_bound)
        b = jax.random.uniform(kb, (1, fan_out), jnp.float32, -b_bound, b_bound)
        params.append((w, b))
    return params


def siren_prepare_params(params, *, w0=1.0, w0_initial=30.0,
                         matmul_dtype=_DEF_MATMUL_DTYPE):
    """Fold w0 into W/b, zero-pad fan_out dims to multiples of 128 (pad lanes
    are exactly zero so they are inert: sin(0)=0, padded weight rows are 0),
    cast MXU-layer weights to the MXU operand dtype.  Layer 0 stays f32 when
    it will run on the VPU (narrow fan_in).  Done once, outside the kernel."""
    n_layers = len(params)
    prepped = []
    for idx, (w, b) in enumerate(params):
        fan_in, fan_out = w.shape
        last = idx == n_layers - 1
        scale = 1.0 if last else (w0_initial if idx == 0 else w0)
        w = w * scale
        b = b * scale
        # layer 0's fan_in matches the raw input; later layers match the
        # lane-padded activations of the previous layer.
        fan_in_p = fan_in if idx == 0 else _round_up(fan_in, LANE)
        fan_out_p = _round_up(fan_out, LANE)
        w_p = jnp.zeros((fan_in_p, fan_out_p), jnp.float32).at[:fan_in, :fan_out].set(w)
        b_p = jnp.zeros((1, fan_out_p), jnp.float32).at[:, :fan_out].set(b)
        first_on_vpu = idx == 0 and fan_in <= _VPU_FIRST_LAYER_MAX_FAN_IN
        if not first_on_vpu:
            w_p = w_p.astype(matmul_dtype)
        prepped.append((w_p, b_p))                # biases stay f32
    return prepped


# ------------------------------ tiling helpers ----------------------------------
def _tpu_vmem_info():
    """Returns (usable VMEM budget, assumed TensorCores/chip, physical VMEM)."""
    phys = 64 << 20                               # conservative default (v7x/TC)
    try:
        info = pltpu.get_tpu_info()
        phys = int(getattr(info, "vmem_capacity_bytes", phys))
    except Exception:
        pass
    if phys >= (96 << 20):                        # v5e / v6e: 128 MiB, 1 TC
        return 100 << 20, 1, phys
    return 40 << 20, 2, phys                      # v7x: 64 MiB per TC, 2 TCs


def _vmem_fixed_bytes(prepped):
    """Resident weight/bias VMEM footprint (conservatively double-buffered)."""
    total = 0
    for w, b in prepped:
        wd = jnp.dtype(w.dtype).itemsize
        sub = max(8, 32 // wd)                    # sublane packing for dtype
        total += 2 * _round_up(w.shape[0], sub) * _round_up(w.shape[1], LANE) * wd
        total += 2 * 8 * _round_up(b.shape[1], LANE) * 4
    return total


def _vmem_per_row_bytes(d_in, out_features, prepped):
    """VMEM bytes consumed per batch row (lane-padded VMEM layouts)."""
    widths = [_round_up(d_in, LANE)] + [_round_up(w.shape[1], LANE) for w, _ in prepped]
    max_w = max(widths)
    per_row = 0
    per_row += 2 * _round_up(d_in, LANE) * 4          # x tile, double-buffered
    per_row += 2 * _round_up(out_features, LANE) * 4  # output tile, double-buffered
    per_row += 3 * max_w * 4                          # live activations / casts
    return per_row


def _choose_tile_n(n, max_tile, num_cores):
    """Batch-tile size: >=2 grid steps per TensorCore, even step count on
    dual-TC chips when the batch allows; tiles are multiples of 8 sublanes."""
    n8 = _round_up(max(n, 8), 8)
    target = 2 * max(1, num_cores)
    if n8 <= LANE * target:
        return min(max_tile, n8)                  # too small to split usefully
    steps = max(target, -(-n8 // max_tile))
    if num_cores > 1 and steps % 2:
        steps += 1                                # keep both TCs loaded
    tile = _round_up(-(-n8 // steps), 8)
    return max(8, min(tile, max_tile))


# ------------------------------- fused forward -----------------------------------
def siren_forward(prepped_params, x, *, out_features, tile_n=None,
                  matmul_dtype=_DEF_MATMUL_DTYPE, out_dtype=None):
    """Fused SIREN forward: a single pallas_call over batch tiles; every (W, b)
    pair has a constant index_map so weights stay resident in VMEM and the
    intermediate activations never round-trip through HBM."""
    n, d_in = x.shape
    n_layers = len(prepped_params)
    assert d_in == prepped_params[0][0].shape[0]
    out_dtype = jnp.dtype(out_dtype or x.dtype)
    first_layer_on_vpu = d_in <= _VPU_FIRST_LAYER_MAX_FAN_IN

    budget, num_cores, phys_vmem = _tpu_vmem_info()
    fixed_bytes = _vmem_fixed_bytes(prepped_params)
    per_row = _vmem_per_row_bytes(d_in, out_features, prepped_params)
    if tile_n is None:
        avail = max(budget - fixed_bytes, 4 << 20)
        max_tile = max(LANE, min(8192, (avail // per_row) // LANE * LANE))
        tile_n = _choose_tile_n(n, max_tile, num_cores)

    n_padded = _round_up(n, tile_n)
    if n_padded != n:
        x = jnp.pad(x, ((0, n_padded - n), (0, 0)))
    grid = (n_padded // tile_n,)

    flat_params = [p for wb in prepped_params for p in wb]

    kernel = functools.partial(
        _siren_fused_kernel,
        n_layers=n_layers,
        out_features=out_features,
        first_layer_on_vpu=first_layer_on_vpu,
        matmul_dtype=matmul_dtype,
    )

    # Advisory cost estimate for XLA's scheduler (sin is now VPU flops).
    flops = 0
    for idx, (w, _) in enumerate(prepped_params):
        flops += 2 * n_padded * w.shape[0] * w.shape[1]
        if idx < n_layers - 1:
            flops += 16 * n_padded * w.shape[1]
    bytes_accessed = (
        n_padded * d_in * x.dtype.itemsize
        + sum(w.size * w.dtype.itemsize + b.size * b.dtype.itemsize
              for w, b in prepped_params)
        + n_padded * out_features * out_dtype.itemsize
    )
    cost = pl.CostEstimate(flops=int(flops), transcendentals=0,
                           bytes_accessed=int(bytes_accessed))

    vmem_est = fixed_bytes + tile_n * per_row
    vmem_cap = (100 << 20) if phys_vmem >= (96 << 20) else (48 << 20)
    vmem_limit = max(32 << 20, min(int(1.3 * vmem_est) + (8 << 20), vmem_cap))

    out_shape = jax.ShapeDtypeStruct((n_padded, out_features), out_dtype)
    out_spec = pl.BlockSpec((tile_n, out_features), lambda i: (i, 0))
    x_spec = pl.BlockSpec((tile_n, d_in), lambda i: (i, 0))

    def _build_and_call(single_buffer_weights):
        in_specs = [x_spec]
        for w, b in prepped_params:
            kwargs = ({"pipeline_mode": pl.Buffered(1)}
                      if single_buffer_weights else {})
            in_specs.append(pl.BlockSpec(w.shape, lambda i: (0, 0), **kwargs))
            in_specs.append(pl.BlockSpec(b.shape, lambda i: (0, 0), **kwargs))
        return pl.pallas_call(
            kernel,
            out_shape=out_shape,
            grid_spec=pltpu.PrefetchScalarGridSpec(
                num_scalar_prefetch=0,
                grid=grid,
                in_specs=in_specs,
                out_specs=out_spec,
            ),
            compiler_params=pltpu.CompilerParams(
                dimension_semantics=("parallel",),
                vmem_limit_bytes=vmem_limit,
            ),
            cost_estimate=cost,
        )(x, *flat_params)

    try:
        # Grid-invariant weights/biases don't need double-buffering; ask for a
        # single buffer (halves resident-weight VMEM — mainly matters on v7x).
        out_padded = _build_and_call(True)
    except Exception:
        # Some JAX builds reject pipeline_mode on the top-level pipeline; the
        # default double-buffered specs are always valid.
        out_padded = _build_and_call(False)

    # TODO(synk): optional block-diagonal 4x packing of <=64-wide hidden layers
    # (dense vregs through the sin epilogue) not implemented.
    return out_padded if n_padded == n else out_padded[:n]


# ------------------------------ pure-JAX reference -------------------------------
def siren_forward_ref(params, x, *, w0=1.0, w0_initial=30.0,
                      matmul_dtype=_DEF_MATMUL_DTYPE):
    """Reference applying the same numeric treatment as the kernel (w0 folded,
    layer 0 in f32 when narrow, bf16 MXU operands elsewhere, f32
    accumulation/bias) but using jnp.sin — so the kernel's VPU sin polynomial
    is validated against the true sine."""
    n_layers = len(params)
    h = x
    for idx, (w, b) in enumerate(params):
        last = idx == n_layers - 1
        scale = 1.0 if last else (w0_initial if idx == 0 else w0)
        w_s = w * scale
        b_s = b * scale
        if idx == 0 and w.shape[0] <= _VPU_FIRST_LAYER_MAX_FAN_IN:
            y = jnp.dot(h, w_s, preferred_element_type=jnp.float32) + b_s
        else:
            y = jnp.dot(h.astype(matmul_dtype), w_s.astype(matmul_dtype),
                        preferred_element_type=jnp.float32) + b_s
        h = y if last else jnp.sin(y)
    return h


# ------------------------------------- main ---------------------------------------
if __name__ == "__main__":
    key = jax.random.PRNGKey(0)
    key_params, key_x = jax.random.split(key)

    # Small SIREN: 2 -> 32 -> 32 -> 3, batch of 256 coordinate points.
    in_features = 2
    layers = [32, 32]
    out_features = 3
    w0, w0_initial = 1.0, 30.0

    params = siren_init_params(key_params, layers, in_features, out_features, c=6.0)
    prepped = siren_prepare_params(params, w0=w0, w0_initial=w0_initial)

    x = jax.random.uniform(key_x, (256, in_features), jnp.float32, -1.0, 1.0)

    out = siren_forward(prepped, x, out_features=out_features)
    out = jax.block_until_ready(out)

    ref = siren_forward_ref(params, x, w0=w0, w0_initial=w0_initial)
    assert out.shape == (256, out_features), out.shape
    max_err = float(jnp.max(jnp.abs(out - ref)))
    assert jnp.allclose(out, ref, atol=2e-3, rtol=2e-3), f"mismatch, max_err={max_err}"

    print("KERNEL_OK")
</pallas_src>

<mosaic_0001>
module attributes {stable_mosaic.version = 11 : i64} {
  func.func @_siren_fused_kernel(%arg0: i32, %arg1: memref<256x2xf32, #tpu.memory_space<vmem>>, %arg2: memref<2x128xf32, #tpu.memory_space<vmem>>, %arg3: memref<1x128xf32, #tpu.memory_space<vmem>>, %arg4: memref<128x128xbf16, #tpu.memory_space<vmem>>, %arg5: memref<1x128xf32, #tpu.memory_space<vmem>>, %arg6: memref<128x128xbf16, #tpu.memory_space<vmem>>, %arg7: memref<1x128xf32, #tpu.memory_space<vmem>>, %arg8: memref<256x3xf32, #tpu.memory_space<vmem>>) attributes {dimension_semantics = [#tpu.dimension_semantics<parallel>], iteration_bounds = array<i64: 1>, scalar_prefetch = 0 : i64, scratch_operands = 0 : i64, tpu.core_type = #tpu.core_type<tc>, window_params = [{transform_indices = @transform_0, window_bounds = array<i64: 256, 2>}, {pipeline_mode = #tpu.pipeline_mode<synchronous>, transform_indices = @transform_1, window_bounds = array<i64: 2, 128>}, {pipeline_mode = #tpu.pipeline_mode<synchronous>, transform_indices = @transform_2, window_bounds = array<i64: 1, 128>}, {pipeline_mode = #tpu.pipeline_mode<synchronous>, transform_indices = @transform_3, window_bounds = array<i64: 128, 128>}, {pipeline_mode = #tpu.pipeline_mode<synchronous>, transform_indices = @transform_4, window_bounds = array<i64: 1, 128>}, {pipeline_mode = #tpu.pipeline_mode<synchronous>, transform_indices = @transform_5, window_bounds = array<i64: 128, 128>}, {pipeline_mode = #tpu.pipeline_mode<synchronous>, transform_indices = @transform_6, window_bounds = array<i64: 1, 128>}, {transform_indices = @transform_7, window_bounds = array<i64: 256, 3>}]} {
    %c0 = arith.constant 0 : index
    %c0_0 = arith.constant 0 : index
    %0 = vector.load %arg1[%c0, %c0_0] : memref<256x2xf32, #tpu.memory_space<vmem>>, vector<256x2xf32>
    %c0_1 = arith.constant 0 : index
    %c0_2 = arith.constant 0 : index
    %1 = vector.load %arg3[%c0_1, %c0_2] : memref<1x128xf32, #tpu.memory_space<vmem>>, vector<1x128xf32>
    %2 = vector.extract_strided_slice %0 {offsets = [0, 0], sizes = [256, 1], strides = [1, 1]} : vector<256x2xf32> to vector<256x1xf32>
    %c0_3 = arith.constant 0 : index
    %c0_4 = arith.constant 0 : index
    %3 = vector.load %arg2[%c0_3, %c0_4] : memref<2x128xf32, #tpu.memory_space<vmem>>, vector<1x128xf32>
    %4 = vector.broadcast %2 : vector<256x1xf32> to vector<256x128xf32>
    %5 = vector.broadcast %3 : vector<1x128xf32> to vector<256x128xf32>
    %6 = arith.mulf %4, %5 : vector<256x128xf32>
    %7 = vector.broadcast %1 : vector<1x128xf32> to vector<256x128xf32>
    %8 = arith.addf %7, %6 : vector<256x128xf32>
    %9 = vector.extract_strided_slice %0 {offsets = [0, 1], sizes = [256, 1], strides = [1, 1]} : vector<256x2xf32> to vector<256x1xf32>
    %c1 = arith.constant 1 : index
    %c0_5 = arith.constant 0 : index
    %10 = vector.load %arg2[%c1, %c0_5] : memref<2x128xf32, #tpu.memory_space<vmem>>, vector<1x128xf32>
    %11 = vector.broadcast %9 : vector<256x1xf32> to vector<256x128xf32>
    %12 = vector.broadcast %10 : vector<1x128xf32> to vector<256x128xf32>
    %13 = arith.mulf %11, %12 : vector<256x128xf32>
    %14 = arith.addf %8, %13 : vector<256x128xf32>
    %cst = arith.constant 0.159154937 : f32
    %15 = vector.broadcast %cst : f32 to vector<256x128xf32>
    %16 = arith.mulf %14, %15 : vector<256x128xf32>
    %17 = math.roundeven %16 : vector<256x128xf32>
    %cst_6 = arith.constant 6.281250e+00 : f32
    %18 = vector.broadcast %cst_6 : f32 to vector<256x128xf32>
    %19 = arith.mulf %17, %18 : vector<256x128xf32>
    %20 = arith.subf %14, %19 : vector<256x128xf32>
    %cst_7 = arith.constant 0.00193530717 : f32
    %21 = vector.broadcast %cst_7 : f32 to vector<256x128xf32>
    %22 = arith.mulf %17, %21 : vector<256x128xf32>
    %23 = arith.subf %20, %22 : vector<256x128xf32>
    %24 = math.absf %23 : vector<256x128xf32>
    %cst_8 = arith.constant 1.57079637 : f32
    %25 = vector.broadcast %cst_8 : f32 to vector<256x128xf32>
    %26 = arith.cmpf ogt, %24, %25 : vector<256x128xf32>
    %cst_9 = arith.constant 0.000000e+00 : f32
    %27 = vector.broadcast %cst_9 : f32 to vector<256x128xf32>
    %28 = arith.cmpf oge, %23, %27 : vector<256x128xf32>
    %cst_10 = arith.constant 3.14159274 : f32
    %cst_11 = arith.constant -3.14159274 : f32
    %29 = vector.broadcast %cst_10 : f32 to vector<256x128xf32>
    %30 = vector.broadcast %cst_11 : f32 to vector<256x128xf32>
    %31 = arith.select %28, %29, %30 : vector<256x128xi1>, vector<256x128xf32>
    %32 = arith.subf %31, %23 : vector<256x128xf32>
    %33 = arith.select %26, %32, %23 : vector<256x128xi1>, vector<256x128xf32>
    %34 = arith.mulf %33, %33 : vector<256x128xf32>
    %cst_12 = arith.constant 2.75573188E-6 : f32
    %35 = vector.broadcast %cst_12 : f32 to vector<256x128xf32>
    %36 = arith.mulf %35, %34 : vector<256x128xf32>
    %cst_13 = arith.constant -1.98412701E-4 : f32
    %37 = vector.broadcast %cst_13 : f32 to vector<256x128xf32>
    %38 = arith.addf %36, %37 : vector<256x128xf32>
    %39 = arith.mulf %38, %34 : vector<256x128xf32>
    %cst_14 = arith.constant 0.00833333284 : f32
    %40 = vector.broadcast %cst_14 : f32 to vector<256x128xf32>
    %41 = arith.addf %39, %40 : vector<256x128xf32>
    %42 = arith.mulf %41, %34 : vector<256x128xf32>
    %cst_15 = arith.constant -0.166666672 : f32
    %43 = vector.broadcast %cst_15 : f32 to vector<256x128xf32>
    %44 = arith.addf %42, %43 : vector<256x128xf32>
    %45 = arith.mulf %33, %34 : vector<256x128xf32>
    %46 = arith.mulf %45, %44 : vector<256x128xf32>
    %47 = arith.addf %33, %46 : vector<256x128xf32>
    %48 = arith.truncf %47 : vector<256x128xf32> to vector<256x128xbf16>
    %c0_16 = arith.constant 0 : index
    %c0_17 = arith.constant 0 : index
    %49 = vector.load %arg4[%c0_16, %c0_17] : memref<128x128xbf16, #tpu.memory_space<vmem>>, vector<128x128xbf16>
    %cst_18 = arith.constant dense<0.000000e+00> : vector<256x128xf32>
    %50 = tpu.matmul %48, %49, %cst_18 {dimension_numbers = #tpu.dot_dimension_numbers<[1], [0], [0], [1], [0, 0, 1, 1], [], []>} : vector<256x128xbf16>, vector<128x128xbf16>, vector<256x128xf32> -> vector<256x128xf32>
    %c0_19 = arith.constant 0 : index
    %c0_20 = arith.constant 0 : index
    %51 = vector.load %arg5[%c0_19, %c0_20] : memref<1x128xf32, #tpu.memory_space<vmem>>, vector<1x128xf32>
    %52 = vector.broadcast %51 : vector<1x128xf32> to vector<256x128xf32>
    %53 = arith.addf %50, %52 : vector<256x128xf32>
    %cst_21 = arith.constant 0.159154937 : f32
    %54 = vector.broadcast %cst_21 : f32 to vector<256x128xf32>
    %55 = arith.mulf %53, %54 : vector<256x128xf32>
    %56 = math.roundeven %55 : vector<256x128xf32>
    %cst_22 = arith.constant 6.281250e+00 : f32
    %57 = vector.broadcast %cst_22 : f32 to vector<256x128xf32>
    %58 = arith.mulf %56, %57 : vector<256x128xf32>
    %59 = arith.subf %53, %58 : vector<256x128xf32>
    %cst_23 = arith.constant 0.00193530717 : f32
    %60 = vector.broadcast %cst_23 : f32 to vector<256x128xf32>
    %61 = arith.mulf %56, %60 : vector<256x128xf32>
    %62 = arith.subf %59, %61 : vector<256x128xf32>
    %63 = math.absf %62 : vector<256x128xf32>
    %cst_24 = arith.constant 1.57079637 : f32
    %64 = vector.broadcast %cst_24 : f32 to vector<256x128xf32>
    %65 = arith.cmpf ogt, %63, %64 : vector<256x128xf32>
    %cst_25 = arith.constant 0.000000e+00 : f32
    %66 = vector.broadcast %cst_25 : f32 to vector<256x128xf32>
    %67 = arith.cmpf oge, %62, %66 : vector<256x128xf32>
    %cst_26 = arith.constant 3.14159274 : f32
    %cst_27 = arith.constant -3.14159274 : f32
    %68 = vector.broadcast %cst_26 : f32 to vector<256x128xf32>
    %69 = vector.broadcast %cst_27 : f32 to vector<256x128xf32>
    %70 = arith.select %67, %68, %69 : vector<256x128xi1>, vector<256x128xf32>
    %71 = arith.subf %70, %62 : vector<256x128xf32>
    %72 = arith.select %65, %71, %62 : vector<256x128xi1>, vector<256x128xf32>
    %73 = arith.mulf %72, %72 : vector<256x128xf32>
    %cst_28 = arith.constant 2.75573188E-6 : f32
    %74 = vector.broadcast %cst_28 : f32 to vector<256x128xf32>
    %75 = arith.mulf %74, %73 : vector<256x128xf32>
    %cst_29 = arith.constant -1.98412701E-4 : f32
    %76 = vector.broadcast %cst_29 : f32 to vector<256x128xf32>
    %77 = arith.addf %75, %76 : vector<256x128xf32>
    %78 = arith.mulf %77, %73 : vector<256x128xf32>
    %cst_30 = arith.constant 0.00833333284 : f32
    %79 = vector.broadcast %cst_30 : f32 to vector<256x128xf32>
    %80 = arith.addf %78, %79 : vector<256x128xf32>
    %81 = arith.mulf %80, %73 : vector<256x128xf32>
    %cst_31 = arith.constant -0.166666672 : f32
    %82 = vector.broadcast %cst_31 : f32 to vector<256x128xf32>
    %83 = arith.addf %81, %82 : vector<256x128xf32>
    %84 = arith.mulf %72, %73 : vector<256x128xf32>
    %85 = arith.mulf %84, %83 : vector<256x128xf32>
    %86 = arith.addf %72, %85 : vector<256x128xf32>
    %87 = arith.truncf %86 : vector<256x128xf32> to vector<256x128xbf16>
    %c0_32 = arith.constant 0 : index
    %c0_33 = arith.constant 0 : index
    %88 = vector.load %arg6[%c0_32, %c0_33] : memref<128x128xbf16, #tpu.memory_space<vmem>>, vector<128x128xbf16>
    %cst_34 = arith.constant dense<0.000000e+00> : vector<256x128xf32>
    %89 = tpu.matmul %87, %88, %cst_34 {dimension_numbers = #tpu.dot_dimension_numbers<[1], [0], [0], [1], [0, 0, 1, 1], [], []>} : vector<256x128xbf16>, vector<128x128xbf16>, vector<256x128xf32> -> vector<256x128xf32>
    %c0_35 = arith.constant 0 : index
    %c0_36 = arith.constant 0 : index
    %90 = vector.load %arg7[%c0_35, %c0_36] : memref<1x128xf32, #tpu.memory_space<vmem>>, vector<1x128xf32>
    %91 = vector.broadcast %90 : vector<1x128xf32> to vector<256x128xf32>
    %92 = arith.addf %89, %91 : vector<256x128xf32>
    %93 = vector.extract_strided_slice %92 {offsets = [0, 0], sizes = [256, 3], strides = [1, 1]} : vector<256x128xf32> to vector<256x3xf32>
    %c0_37 = arith.constant 0 : index
    %c0_38 = arith.constant 0 : index
    %94 = vector.load %arg8[%c0_37, %c0_38] : memref<256x3xf32, #tpu.memory_space<vmem>>, vector<256x3xf32>
    tpu.vector_store %arg8[%c0_37, %c0_38], %93 {strides = array<i32>} : memref<256x3xf32, #tpu.memory_space<vmem>>, vector<256x3xf32>,
    return
  }
  func.func @transform_0(%arg0: i32) -> (i32, i32) {
    %c0_i32 = arith.constant 0 : i32
    %c0_i32_0 = arith.constant 0 : i32
    return %arg0, %c0_i32 : i32, i32
  }
  func.func @transform_1(%arg0: i32) -> (i32, i32) {
    %c0_i32 = arith.constant 0 : i32
    %c0_i32_0 = arith.constant 0 : i32
    %c0_i32_1 = arith.constant 0 : i32
    return %c0_i32, %c0_i32_0 : i32, i32
  }
  func.func @transform_2(%arg0: i32) -> (i32, i32) {
    %c0_i32 = arith.constant 0 : i32
    %c0_i32_0 = arith.constant 0 : i32
    %c0_i32_1 = arith.constant 0 : i32
    return %c0_i32, %c0_i32_0 : i32, i32
  }
  func.func @transform_3(%arg0: i32) -> (i32, i32) {
    %c0_i32 = arith.constant 0 : i32
    %c0_i32_0 = arith.constant 0 : i32
    %c0_i32_1 = arith.constant 0 : i32
    return %c0_i32, %c0_i32_0 : i32, i32
  }
  func.func @transform_4(%arg0: i32) -> (i32, i32) {
    %c0_i32 = arith.constant 0 : i32
    %c0_i32_0 = arith.constant 0 : i32
    %c0_i32_1 = arith.constant 0 : i32
    return %c0_i32, %c0_i32_0 : i32, i32
  }
  func.func @transform_5(%arg0: i32) -> (i32, i32) {
    %c0_i32 = arith.constant 0 : i32
    %c0_i32_0 = arith.constant 0 : i32
    %c0_i32_1 = arith.constant 0 : i32
    return %c0_i32, %c0_i32_0 : i32, i32
  }
  func.func @transform_6(%arg0: i32) -> (i32, i32) {
    %c0_i32 = arith.constant 0 : i32
    %c0_i32_0 = arith.constant 0 : i32
    %c0_i32_1 = arith.constant 0 : i32
    return %c0_i32, %c0_i32_0 : i32, i32
  }
  func.func @transform_7(%arg0: i32) -> (i32, i32) {
    %c0_i32 = arith.constant 0 : i32
    %c0_i32_0 = arith.constant 0 : i32
    return %arg0, %c0_i32 : i32, i32
  }
}

module attributes {stable_mosaic.version = 11 : i64} {
  func.func @_siren_fused_kernel(%arg0: i32, %arg1: memref<256x2xf32, #tpu.memory_space<vmem>>, %arg2: memref<2x128xf32, #tpu.memory_space<vmem>>, %arg3: memref<1x128xf32, #tpu.memory_space<vmem>>, %arg4: memref<128x128xbf16, #tpu.memory_space<vmem>>, %arg5: memref<1x128xf32, #tpu.memory_space<vmem>>, %arg6: memref<128x128xbf16, #tpu.memory_space<vmem>>, %arg7: memref<1x128xf32, #tpu.memory_space<vmem>>, %arg8: memref<256x3xf32, #tpu.memory_space<vmem>>) attributes {dimension_semantics = [#tpu.dimension_semantics<parallel>], iteration_bounds = array<i64: 1>, scalar_prefetch = 0 : i64, scratch_operands = 0 : i64, tpu.core_type = #tpu.core_type<tc>, window_params = [{transform_indices = @transform_0, window_bounds = array<i64: 256, 2>}, {pipeline_mode = #tpu.pipeline_mode<synchronous>, transform_indices = @transform_1, window_bounds = array<i64: 2, 128>}, {pipeline_mode = #tpu.pipeline_mode<synchronous>, transform_indices = @transform_2, window_bounds = array<i64: 1, 128>}, {pipeline_mode = #tpu.pipeline_mode<synchronous>, transform_indices = @transform_3, window_bounds = array<i64: 128, 128>}, {pipeline_mode = #tpu.pipeline_mode<synchronous>, transform_indices = @transform_4, window_bounds = array<i64: 1, 128>}, {pipeline_mode = #tpu.pipeline_mode<synchronous>, transform_indices = @transform_5, window_bounds = array<i64: 128, 128>}, {pipeline_mode = #tpu.pipeline_mode<synchronous>, transform_indices = @transform_6, window_bounds = array<i64: 1, 128>}, {transform_indices = @transform_7, window_bounds = array<i64: 256, 3>}]} {
    %c0 = arith.constant 0 : index
    %c0_0 = arith.constant 0 : index
    %0 = vector.load %arg1[%c0, %c0_0] : memref<256x2xf32, #tpu.memory_space<vmem>>, vector<256x2xf32>
    %c0_1 = arith.constant 0 : index
    %c0_2 = arith.constant 0 : index
    %1 = vector.load %arg3[%c0_1, %c0_2] : memref<1x128xf32, #tpu.memory_space<vmem>>, vector<1x128xf32>
    %2 = vector.extract_strided_slice %0 {offsets = [0, 0], sizes = [256, 1], strides = [1, 1]} : vector<256x2xf32> to vector<256x1xf32>
    %c0_3 = arith.constant 0 : index
    %c0_4 = arith.constant 0 : index
    %3 = vector.load %arg2[%c0_3, %c0_4] : memref<2x128xf32, #tpu.memory_space<vmem>>, vector<1x128xf32>
    %4 = vector.broadcast %2 : vector<256x1xf32> to vector<256x128xf32>
    %5 = vector.broadcast %3 : vector<1x128xf32> to vector<256x128xf32>
    %6 = arith.mulf %4, %5 : vector<256x128xf32>
    %7 = vector.broadcast %1 : vector<1x128xf32> to vector<256x128xf32>
    %8 = arith.addf %7, %6 : vector<256x128xf32>
    %9 = vector.extract_strided_slice %0 {offsets = [0, 1], sizes = [256, 1], strides = [1, 1]} : vector<256x2xf32> to vector<256x1xf32>
    %c1 = arith.constant 1 : index
    %c0_5 = arith.constant 0 : index
    %10 = vector.load %arg2[%c1, %c0_5] : memref<2x128xf32, #tpu.memory_space<vmem>>, vector<1x128xf32>
    %11 = vector.broadcast %9 : vector<256x1xf32> to vector<256x128xf32>
    %12 = vector.broadcast %10 : vector<1x128xf32> to vector<256x128xf32>
    %13 = arith.mulf %11, %12 : vector<256x128xf32>
    %14 = arith.addf %8, %13 : vector<256x128xf32>
    %cst = arith.constant 0.159154937 : f32
    %15 = vector.broadcast %cst : f32 to vector<256x128xf32>
    %16 = arith.mulf %14, %15 : vector<256x128xf32>
    %17 = math.roundeven %16 : vector<256x128xf32>
    %cst_6 = arith.constant 6.281250e+00 : f32
    %18 = vector.broadcast %cst_6 : f32 to vector<256x128xf32>
    %19 = arith.mulf %17, %18 : vector<256x128xf32>
    %20 = arith.subf %14, %19 : vector<256x128xf32>
    %cst_7 = arith.constant 0.00193530717 : f32
    %21 = vector.broadcast %cst_7 : f32 to vector<256x128xf32>
    %22 = arith.mulf %17, %21 : vector<256x128xf32>
    %23 = arith.subf %20, %22 : vector<256x128xf32>
    %24 = math.absf %23 : vector<256x128xf32>
    %cst_8 = arith.constant 1.57079637 : f32
    %25 = vector.broadcast %cst_8 : f32 to vector<256x128xf32>
    %26 = arith.cmpf ogt, %24, %25 : vector<256x128xf32>
    %cst_9 = arith.constant 0.000000e+00 : f32
    %27 = vector.broadcast %cst_9 : f32 to vector<256x128xf32>
    %28 = arith.cmpf oge, %23, %27 : vector<256x128xf32>
    %cst_10 = arith.constant 3.14159274 : f32
    %cst_11 = arith.constant -3.14159274 : f32
    %29 = vector.broadcast %cst_10 : f32 to vector<256x128xf32>
    %30 = vector.broadcast %cst_11 : f32 to vector<256x128xf32>
    %31 = arith.select %28, %29, %30 : vector<256x128xi1>, vector<256x128xf32>
    %32 = arith.subf %31, %23 : vector<256x128xf32>
    %33 = arith.select %26, %32, %23 : vector<256x128xi1>, vector<256x128xf32>
    %34 = arith.mulf %33, %33 : vector<256x128xf32>
    %cst_12 = arith.constant 2.75573188E-6 : f32
    %35 = vector.broadcast %cst_12 : f32 to vector<256x128xf32>
    %36 = arith.mulf %35, %34 : vector<256x128xf32>
    %cst_13 = arith.constant -1.98412701E-4 : f32
    %37 = vector.broadcast %cst_13 : f32 to vector<256x128xf32>
    %38 = arith.addf %36, %37 : vector<256x128xf32>
    %39 = arith.mulf %38, %34 : vector<256x128xf32>
    %cst_14 = arith.constant 0.00833333284 : f32
    %40 = vector.broadcast %cst_14 : f32 to vector<256x128xf32>
    %41 = arith.addf %39, %40 : vector<256x128xf32>
    %42 = arith.mulf %41, %34 : vector<256x128xf32>
    %cst_15 = arith.constant -0.166666672 : f32
    %43 = vector.broadcast %cst_15 : f32 to vector<256x128xf32>
    %44 = arith.addf %42, %43 : vector<256x128xf32>
    %45 = arith.mulf %33, %34 : vector<256x128xf32>
    %46 = arith.mulf %45, %44 : vector<256x128xf32>
    %47 = arith.addf %33, %46 : vector<256x128xf32>
    %48 = arith.truncf %47 : vector<256x128xf32> to vector<256x128xbf16>
    %c0_16 = arith.constant 0 : index
    %c0_17 = arith.constant 0 : index
    %49 = vector.load %arg4[%c0_16, %c0_17] : memref<128x128xbf16, #tpu.memory_space<vmem>>, vector<128x128xbf16>
    %cst_18 = arith.constant dense<0.000000e+00> : vector<256x128xf32>
    %50 = tpu.matmul %48, %49, %cst_18 {dimension_numbers = #tpu.dot_dimension_numbers<[1], [0], [0], [1], [0, 0, 1, 1], [], []>} : vector<256x128xbf16>, vector<128x128xbf16>, vector<256x128xf32> -> vector<256x128xf32>
    %c0_19 = arith.constant 0 : index
    %c0_20 = arith.constant 0 : index
    %51 = vector.load %arg5[%c0_19, %c0_20] : memref<1x128xf32, #tpu.memory_space<vmem>>, vector<1x128xf32>
    %52 = vector.broadcast %51 : vector<1x128xf32> to vector<256x128xf32>
    %53 = arith.addf %50, %52 : vector<256x128xf32>
    %cst_21 = arith.constant 0.159154937 : f32
    %54 = vector.broadcast %cst_21 : f32 to vector<256x128xf32>
    %55 = arith.mulf %53, %54 : vector<256x128xf32>
    %56 = math.roundeven %55 : vector<256x128xf32>
    %cst_22 = arith.constant 6.281250e+00 : f32
    %57 = vector.broadcast %cst_22 : f32 to vector<256x128xf32>
    %58 = arith.mulf %56, %57 : vector<256x128xf32>
    %59 = arith.subf %53, %58 : vector<256x128xf32>
    %cst_23 = arith.constant 0.00193530717 : f32
    %60 = vector.broadcast %cst_23 : f32 to vector<256x128xf32>
    %61 = arith.mulf %56, %60 : vector<256x128xf32>
    %62 = arith.subf %59, %61 : vector<256x128xf32>
    %63 = math.absf %62 : vector<256x128xf32>
    %cst_24 = arith.constant 1.57079637 : f32
    %64 = vector.broadcast %cst_24 : f32 to vector<256x128xf32>
    %65 = arith.cmpf ogt, %63, %64 : vector<256x128xf32>
    %cst_25 = arith.constant 0.000000e+00 : f32
    %66 = vector.broadcast %cst_25 : f32 to vector<256x128xf32>
    %67 = arith.cmpf oge, %62, %66 : vector<256x128xf32>
    %cst_26 = arith.constant 3.14159274 : f32
    %cst_27 = arith.constant -3.14159274 : f32
    %68 = vector.broadcast %cst_26 : f32 to vector<256x128xf32>
    %69 = vector.broadcast %cst_27 : f32 to vector<256x128xf32>
    %70 = arith.select %67, %68, %69 : vector<256x128xi1>, vector<256x128xf32>
    %71 = arith.subf %70, %62 : vector<256x128xf32>
    %72 = arith.select %65, %71, %62 : vector<256x128xi1>, vector<256x128xf32>
    %73 = arith.mulf %72, %72 : vector<256x128xf32>
    %cst_28 = arith.constant 2.75573188E-6 : f32
    %74 = vector.broadcast %cst_28 : f32 to vector<256x128xf32>
    %75 = arith.mulf %74, %73 : vector<256x128xf32>
    %cst_29 = arith.constant -1.98412701E-4 : f32
    %76 = vector.broadcast %cst_29 : f32 to vector<256x128xf32>
    %77 = arith.addf %75, %76 : vector<256x128xf32>
    %78 = arith.mulf %77, %73 : vector<256x128xf32>
    %cst_30 = arith.constant 0.00833333284 : f32
    %79 = vector.broadcast %cst_30 : f32 to vector<256x128xf32>
    %80 = arith.addf %78, %79 : vector<256x128xf32>
    %81 = arith.mulf %80, %73 : vector<256x128xf32>
    %cst_31 = arith.constant -0.166666672 : f32
    %82 = vector.broadcast %cst_31 : f32 to vector<256x128xf32>
    %83 = arith.addf %81, %82 : vector<256x128xf32>
    %84 = arith.mulf %72, %73 : vector<256x128xf32>
    %85 = arith.mulf %84, %83 : vector<256x128xf32>
    %86 = arith.addf %72, %85 : vector<256x128xf32>
    %87 = arith.truncf %86 : vector<256x128xf32> to vector<256x128xbf16>
    %c0_32 = arith.constant 0 : index
    %c0_33 = arith.constant 0 : index
    %88 = vector.load %arg6[%c0_32, %c0_33] : memref<128x128xbf16, #tpu.memory_space<vmem>>, vector<128x128xbf16>
    %cst_34 = arith.constant dense<0.000000e+00> : vector<256x128xf32>
    %89 = tpu.matmul %87, %88, %cst_34 {dimension_numbers = #tpu.dot_dimension_numbers<[1], [0], [0], [1], [0, 0, 1, 1], [], []>} : vector<256x128xbf16>, vector<128x128xbf16>, vector<256x128xf32> -> vector<256x128xf32>
    %c0_35 = arith.constant 0 : index
    %c0_36 = arith.constant 0 : index
    %90 = vector.load %arg7[%c0_35, %c0_36] : memref<1x128xf32, #tpu.memory_space<vmem>>, vector<1x128xf32>
    %91 = vector.broadcast %90 : vector<1x128xf32> to vector<256x128xf32>
    %92 = arith.addf %89, %91 : vector<256x128xf32>
    %93 = vector.extract_strided_slice %92 {offsets = [0, 0], sizes = [256, 3], strides = [1, 1]} : vector<256x128xf32> to vector<256x3xf32>
    %c0_37 = arith.constant 0 : index
    %c0_38 = arith.constant 0 : index
    %94 = vector.load %arg8[%c0_37, %c0_38] : memref<256x3xf32, #tpu.memory_space<vmem>>, vector<256x3xf32>
    tpu.vector_store %arg8[%c0_37, %c0_38], %93 {strides = array<i32>} : memref<256x3xf32, #tpu.memory_space<vmem>>, vector<256x3xf32>,
    return
  }
  func.func @transform_0(%arg0: i32) -> (i32, i32) {
    %c0_i32 = arith.constant 0 : i32
    %c0_i32_0 = arith.constant 0 : i32
    return %arg0, %c0_i32 : i32, i32
  }
  func.func @transform_1(%arg0: i32) -> (i32, i32) {
    %c0_i32 = arith.constant 0 : i32
    %c0_i32_0 = arith.constant 0 : i32
    %c0_i32_1 = arith.constant 0 : i32
    return %c0_i32, %c0_i32_0 : i32, i32
  }
  func.func @transform_2(%arg0: i32) -> (i32, i32) {
    %c0_i32 = arith.constant 0 : i32
    %c0_i32_0 = arith.constant 0 : i32
    %c0_i32_1 = arith.constant 0 : i32
    return %c0_i32, %c0_i32_0 : i32, i32
  }
  func.func @transform_3(%arg0: i32) -> (i32, i32) {
    %c0_i32 = arith.constant 0 : i32
    %c0_i32_0 = arith.constant 0 : i32
    %c0_i32_1 = arith.constant 0 : i32
    return %c0_i32, %c0_i32_0 : i32, i32
  }
  func.func @transform_4(%arg0: i32) -> (i32, i32) {
    %c0_i32 = arith.constant 0 : i32
    %c0_i32_0 = arith.constant 0 : i32
    %c0_i32_1 = arith.constant 0 : i32
    return %c0_i32, %c0_i32_0 : i32, i32
  }
  func.func @transform_5(%arg0: i32) -> (i32, i32) {
    %c0_i32 = arith.constant 0 : i32
    %c0_i32_0 = arith.constant 0 : i32
    %c0_i32_1 = arith.constant 0 : i32
    return %c0_i32, %c0_i32_0 : i32, i32
  }
  func.func @transform_6(%arg0: i32) -> (i32, i32) {
    %c0_i32 = arith.constant 0 : i32
    %c0_i32_0 = arith.constant 0 : i32
    %c0_i32_1 = arith.constant 0 : i32
    return %c0_i32, %c0_i32_0 : i32, i32
  }
  func.func @transform_7(%arg0: i32) -> (i32, i32) {
    %c0_i32 = arith.constant 0 : i32
    %c0_i32_0 = arith.constant 0 : i32
    return %arg0, %c0_i32 : i32, i32
  }
}

</mosaic_0001>

<bundles_post_ra>
// kernel: tpu_custom_call.1
= control target key start
LH: loop header
LB: loop body
LE: loop exit
PB: predicated region body
PF: predicated region fallthrough
CT: control target
= control target key end

     0   :  { %v3151_v0 = vmov 0   ;;  %v3152_v6 = vmov 1   ;;  %s5406_s0 = inlined_call_operand.vmem [shape: f32[256,2], index: 0, kind: input, shape index: {}]   ;;  %s5407_s3 = inlined_call_operand.vmem [shape: bf16[128,128], index: 3, kind: input, shape index: {}]   ;;  %s5408_s1 = inlined_call_operand.vmem [shape: f32[2,128], index: 1, kind: input, shape index: {}]   ;;  %s5409_s2 = inlined_call_operand.vmem [shape: f32[1,128], index: 2, kind: input, shape index: {}]   ;;  %s5410_s5 = inlined_call_operand.vmem [shape: bf16[128,128], index: 5, kind: input, shape index: {}]   ;;  %s5411_s4 = inlined_call_operand.vmem [shape: f32[1,128], index: 4, kind: input, shape index: {}]   ;;  %s5412_s6 = inlined_call_operand.vmem [shape: f32[1,128], index: 6, kind: input, shape index: {}]   ;;  %s5413_s7 = inlined_call_operand.vmem [shape: f32[256,3], index: 7, kind: output, shape index: {}]  }
   0x1   :  { %3114 = vset.pattern.permute.xlu1 %v3151_v0  ;;  %3113 = vset.pattern.permute.xlu0 %v3151_v0  ;;  %v29_v1 = vld [vmem:[%s5406_s0 + $0x10] sm:$0xff]  ;;  %v27_v2 = vld [vmem:[%s5406_s0] sm:$0xff]  ;;  %v30_v3 = vld [vmem:[%s5406_s0 + $0x18] sm:$0xff] }
   0x2   :  { %73 = vperm.xlu1 %3114, %v29_v1   ;;  %63 = vperm.xlu0 %3113, %v27_v2   ;;  %v28_v4 = vld [vmem:[%s5406_s0 + $0x8] sm:$0xff]  ;;  %v31_v9 = vld [vmem:[%s5406_s0 + $0x20] sm:$0xff]  ;;  %v33_v11 = vld [vmem:[%s5406_s0 + $0x30] sm:$0xff] }
   0x3   :  { %v32_v5 = vld [vmem:[%s5406_s0 + $0x28] sm:$0xff]  ;;  %v34_v13 = vld [vmem:[%s5406_s0 + $0x38] sm:$0xff]  ;;  %v35_v16 = vld [vmem:[%s5406_s0 + $0x40] sm:$0xff] }
   0x4   :  { %v36_v7 = vld [vmem:[%s5406_s0 + $0x48] sm:$0xff]  ;;  %v37_v17 = vld [vmem:[%s5406_s0 + $0x50] sm:$0xff]  ;;  %v38_v18 = vld [vmem:[%s5406_s0 + $0x58] sm:$0xff] }
   0x5   :  { %v3218_v8 = vld [vmem:[%s5406_s0 + $0x68] sm:$0xff]  ;;  %v3131_v19 = vld [vmem:[%s5407_s3 + $0x38] sm:$0xff]   ;;  %v39_v20 = vld [vmem:[%s5406_s0 + $0x60] sm:$0xff] }
   0x6   :  { %78 = vperm.xlu1 %3114, %v30_v3   ;;  %68 = vperm.xlu0 %3113, %v28_v4   ;;  %v3228_v10 = vld [vmem:[%s5406_s0 + $0x88] sm:$0xff]  ;;  %v3132_v21 = vld [vmem:[%s5407_s3 + $0x30] sm:$0xff]   ;;  %v42_v23 = vld [vmem:[%s5406_s0 + $0x78] sm:$0xff] }
   0x7   :  { %v3237_v12 = vld [vmem:[%s5406_s0 + $0xa8] sm:$0xff]  ;;  %2502 = vmatprep.subr.bf16.mxu0 %v3131_v19  ;;  %v41_v22 = vld [vmem:[%s5406_s0 + $0x70] sm:$0xff]  ;;  %v43_v24 = vld [vmem:[%s5406_s0 + $0x80] sm:$0xff] }
   0x8   :  { %v3246_v14 = vld [vmem:[%s5406_s0 + $0xc8] sm:$0xff]  ;;  %2503 = vmatpush3.bf16.msra.mxu0 %v3131_v19  ;;  %v46_v26 = vld [vmem:[%s5406_s0 + $0x98] sm:$0xff]  ;;  %v3134_v27 = vld [vmem:[%s5407_s3 + $0x20] sm:$0xff]  }
   0x9   :  { %v3252_v15 = vld [vmem:[%s5406_s0 + $0xe8] sm:$0xff]  ;;  %2504 = vmatprep.subr.bf16.mxu0 %v3132_v21  ;;  %v47_v28 = vld [vmem:[%s5406_s0 + $0xa0] sm:$0xff]  ;;  %v3135_v29 = vld [vmem:[%s5407_s3 + $0x18] sm:$0xff]  }
   0xa   :  { %3115 = vset.pattern.permute.xlu1 %v3152_v6  ;;  %88 = vperm.xlu0 %3113, %v32_v5   ;;  %v3133_v25 = vld [vmem:[%s5407_s3 + $0x28] sm:$0xff]   ;;  %v50_v30 = vld [vmem:[%s5406_s0 + $0xb8] sm:$0xff]  ;;  %v3136_v31 = vld [vmem:[%s5407_s3 + $0x10] sm:$0xff]  }
   0xb   :  { %301 = vperm.xlu1 %3115, %v28_v4   ;;  %v51_v32 = vld [vmem:[%s5406_s0 + $0xc0] sm:$0xff]  ;;  %v3137_v33 = vld [vmem:[%s5407_s3 + $0x8] sm:$0xff]   ;;  %v45_v34 = vld [vmem:[%s5406_s0 + $0x90] sm:$0xff] }
   0xc   :  { %2505 = vmatpush3.bf16.msra.mxu0 %v3132_v21  ;;  %v54_v35 = vld [vmem:[%s5406_s0 + $0xd8] sm:$0xff]  ;;  %v3138_v36 = vld [vmem:[%s5407_s3] sm:$0xff]   ;;  %v49_v39 = vld [vmem:[%s5406_s0 + $0xb0] sm:$0xff] }
   0xd   :  { %2506 = vmatprep.subr.bf16.mxu0 %v3133_v25  ;;  %v3329_v37 = vld [vmem:[%s5406_s0 + $0xe0] sm:$0xff]  ;;  %v3335_v38 = vld [vmem:[%s5406_s0 + $0xf8] sm:$0xff]  ;;  %v53_v46 = vld [vmem:[%s5406_s0 + $0xd0] sm:$0xff] }
   0xe   :  { %108 = vperm.xlu0 %3113, %v36_v7   ;;  %v3351_v42 = vld [vmem:[%s5408_s1] ss:$0 sm:$0xff]  ;;  %v3368_v48 = vld [vmem:[%s5408_s1 + $0x1] ss:$0 sm:$0xff] }
   0xf   :  { %305 = vperm.xlu1 %3115, %v29_v1   ;;  %v3363_v47 = vld [vmem:[%s5409_s2] ss:$0 sm:$0xff] }
  0x10   :  { %2507 = vmatpush3.bf16.msra.mxu0 %v3133_v25 }
  0x11   :  { %2508 = vmatprep.subr.bf16.mxu0 %v3134_v27 }
  0x12   :  { %128 = vperm.xlu0 %3113, %v3218_v8  }
  0x13   :  { %3116 = vset.pattern.permute.xlu1 %v3151_v0 }
  0x14   :  { %83 = vperm.xlu1 %3116, %v31_v9   ;;  %2509 = vmatpush3.bf16.msra.mxu0 %v3134_v27 }
  0x15   :  { %2510 = vmatprep.subr.bf16.mxu0 %v3135_v29 }
  0x16   :  { %148 = vperm.xlu0 %3113, %v3228_v10  }
  0x18   :  { %93 = vperm.xlu1 %3116, %v33_v11   ;;  %2511 = vmatpush3.bf16.msra.mxu0 %v3135_v29 }
  0x19   :  { %2512 = vmatprep.subr.bf16.mxu0 %v3136_v31 }
  0x1a   :  { %168 = vperm.xlu0 %3113, %v3237_v12  }
  0x1c   :  { %98 = vperm.xlu1 %3116, %v34_v13   ;;  %2513 = vmatpush3.bf16.msra.mxu0 %v3136_v31 }
  0x1d   :  { %2514 = vmatprep.subr.bf16.mxu0 %v3137_v33 }
  0x1e   :  { %188 = vperm.xlu0 %3113, %v3246_v14  }
  0x20   :  { %3117 = vset.pattern.permute.xlu1 %v3152_v6  ;;  %2515 = vmatpush3.bf16.msra.mxu0 %v3137_v33 }
  0x21   :  { %317 = vperm.xlu1 %3117, %v32_v5   ;;  %2516 = vmatprep.subr.bf16.mxu0 %v3138_v36 }
  0x22   :  { %208 = vperm.xlu0 %3113, %v3252_v15  }
  0x24   :  { %2517 = vmatpush3.bf16.msra.mxu0 %v3138_v36  ;;  %v3153_v36 = vmov -3.1415927  }
  0x25   :  { %321 = vperm.xlu1 %3117, %v33_v11  }
  0x26   :  { %3129 = vset.pattern.permute.xlu0 %v3152_v6 }
  0x27   :  { %297 = vperm.xlu0 %3129, %v27_v2  }
  0x29   :  { %3118 = vset.pattern.permute.xlu1 %v3151_v0 }
  0x2a   :  { %103 = vperm.xlu1 %3118, %v35_v16  }
  0x2b   :  { %309 = vperm.xlu0 %3129, %v30_v3  }
  0x2e   :  { %113 = vperm.xlu1 %3118, %v37_v17  }
  0x2f   :  { %313 = vperm.xlu0 %3129, %v31_v9  }
  0x32   :  { %118 = vperm.xlu1 %3118, %v38_v18  }
  0x33   :  { %325 = vperm.xlu0 %3129, %v34_v13  }
  0x36   :  { %3119 = vset.pattern.permute.xlu1 %v3152_v6 }
  0x37   :  { %333 = vperm.xlu1 %3119, %v36_v7   ;;  %329 = vperm.xlu0 %3129, %v35_v16  }
  0x3b   :  { %337 = vperm.xlu1 %3119, %v37_v17   ;;  %341 = vperm.xlu0 %3129, %v38_v18  }
  0x3f   :  { %3120 = vset.pattern.permute.xlu1 %v3151_v0  ;;  %345 = vperm.xlu0 %3129, %v39_v20  }
  0x40   :  { %123 = vperm.xlu1 %3120, %v39_v20  }
  0x43   :  { %357 = vperm.xlu0 %3129, %v42_v23  }
  0x44   :  { %133 = vperm.xlu1 %3120, %v41_v22  }
  0x47   :  { %361 = vperm.xlu0 %3129, %v43_v24  }
  0x48   :  { %138 = vperm.xlu1 %3120, %v42_v23  }
  0x4b   :  { %373 = vperm.xlu0 %3129, %v46_v26  }
  0x4c   :  { %3121 = vset.pattern.permute.xlu1 %v3152_v6 }
  0x4d   :  { %349 = vperm.xlu1 %3121, %v3218_v8  }
  0x4f   :  { %377 = vperm.xlu0 %3129, %v47_v28  }
  0x51   :  { %353 = vperm.xlu1 %3121, %v41_v22  }
  0x53   :  { %389 = vperm.xlu0 %3129, %v50_v30  }
  0x55   :  { %3122 = vset.pattern.permute.xlu1 %v3151_v0 }
  0x56   :  { %143 = vperm.xlu1 %3122, %v43_v24  }
  0x57   :  { %393 = vperm.xlu0 %3129, %v51_v32  }
  0x5a   :  { %153 = vperm.xlu1 %3122, %v45_v34  }
  0x5b   :  { %405 = vperm.xlu0 %3129, %v54_v35  }
  0x5e   :  { %158 = vperm.xlu1 %3122, %v46_v26   ;;  %v57_v26 = vld [vmem:[%s5406_s0 + $0xf0] sm:$0xff] }
  0x5f   :  { %409 = vperm.xlu0 %3129, %v3329_v37  }
  0x62   :  { %3123 = vset.pattern.permute.xlu1 %v3152_v6 }
  0x63   :  { %365 = vperm.xlu1 %3123, %v3228_v10   ;;  %421 = vperm.xlu0 %3129, %v3335_v38  }
  0x67   :  { %369 = vperm.xlu1 %3123, %v45_v34  }
  0x6b   :  { %3124 = vset.pattern.permute.xlu1 %v3151_v0 }
  0x6c   :  { %163 = vperm.xlu1 %3124, %v47_v28  }
  0x70   :  { %173 = vperm.xlu1 %3124, %v49_v39  }
  0x74   :  { %178 = vperm.xlu1 %3124, %v50_v30  }
  0x78   :  { %3125 = vset.pattern.permute.xlu1 %v3152_v6 }
  0x79   :  { %381 = vperm.xlu1 %3125, %v3237_v12  }
  0x7d   :  { %v74_v40 = vpop.permute.xlu1 %73  ;;  %385 = vperm.xlu1 %3125, %v49_v39   ;;  %v3346_v41 = vpop.permute.xlu0 %63 }
  0x7e   :  { %v227_v52 = vmul.f32 %v3351_v42, %v74_v40  ;;  %v225_v39 = vmul.f32 %v3351_v42, %v3346_v41 }
  0x80   :  { %v265_v57 = vadd.f32 %v3363_v47, %v227_v52 }
  0x81   :  { %v3353_v43 = vpop.permute.xlu1 %78  ;;  %3126 = vset.pattern.permute.xlu1 %v3151_v0  ;;  %v69_v44 = vpop.permute.xlu0 %68 }
  0x82   :  { %183 = vperm.xlu1 %3126, %v51_v32   ;;  %v226_v45 = vmul.f32 %v3351_v42, %v69_v44 }
  0x84   :  { %v264_v49 = vadd.f32 %v3363_v47, %v226_v45 }
  0x85   :  { %v89_v50 = vpop.permute.xlu0 %88 }
  0x86   :  { %193 = vperm.xlu1 %3126, %v53_v46   ;;  %v302_v51 = vpop.permute.xlu1 %301 }
  0x87   :  { %v429_v53 = vmul.f32 %v3368_v48, %v302_v51 }
  0x89   :  { %v461_v54 = vadd.f32 %v429_v53, %v264_v49  ;;  %v3373_v55 = vpop.permute.xlu0 %108  ;;  %v263_v53 = vadd.f32 %v3363_v47, %v225_v39 }
  0x8a   :  { %198 = vperm.xlu1 %3126, %v54_v35   ;;  %v306_v56 = vpop.permute.xlu1 %305 }
  0x8b   :  { %v493_v58 = vmul.f32 0.15915494, %v461_v54  ;;  %v430_v59 = vmul.f32 %v3368_v48, %v306_v56 }
  0x8d   :  { %v2608_v60 = vcvt.f32.s32 %v493_v58  ;;  %v462_v61 = vadd.f32 %v430_v59, %v265_v57  ;;  %v129_v62 = vpop.permute.xlu0 %128  ;;  %v2606_v3 = vand.u32 2147483647, %v493_v58  ;;  %v2611_v5 = vand.u32 2147483648, %v493_v58 }
  0x8e   :  { %3127 = vset.pattern.permute.xlu1 %v3152_v6 }
  0x8f   :  { %v2609_v63 = vcvt.s32.f32 %v2608_v60  ;;  %v494_v1 = vmul.f32 0.15915494, %v462_v61  ;;  %397 = vperm.xlu1 %3127, %v3246_v14   ;;  %v3379_v2 = vpop.permute.xlu1 %83  ;;  %vm2607_vm0 = vcmp.lt.f32.partialorder %v2606_v3, 8388608.0  ;;  %v230_v14 = vmul.f32 %v3351_v42, %v89_v50 }
  0x90   :  { %v234_v50 = vmul.f32 %v3351_v42, %v3373_v55  ;;  %v229_v60 = vmul.f32 %v3351_v42, %v3379_v2 }
  0x91   :  { %v2610_v4 = vand.u32 2147483647, %v2609_v63  ;;  %v2616_v7 = vcvt.f32.s32 %v494_v1  ;;  %v149_v8 = vpop.permute.xlu0 %148  ;;  %v2614_v12 = vand.u32 2147483647, %v494_v1  ;;  %v2619_v17 = vand.u32 2147483648, %v494_v1 }
  0x92   :  { %v268_v29 = vadd.f32 %v3363_v47, %v230_v14  ;;  %v3419_v59 = vadd.f32 %v3363_v47, %v234_v50 }
  0x93   :  { %v2612_v9 = vor.u32 %v2611_v5, %v2610_v4  ;;  %v2617_v10 = vcvt.s32.f32 %v2616_v7  ;;  %401 = vperm.xlu1 %3127, %v53_v46   ;;  %v94_v11 = vpop.permute.xlu1 %93  ;;  %vm2615_vm1 = vcmp.lt.f32.partialorder %v2614_v12, 8388608.0  ;;  %v228_v46 = vmul.f32 %v3351_v42, %v3353_v43 }
  0x94   :  { %v231_v33 = vmul.f32 %v3351_v42, %v94_v11  ;;  %v238_v43 = vmul.f32 %v3351_v42, %v129_v62 }
  0x95   :  { %v2613_v13 = vsel %vm2607_vm0, %v2612_v9, %v493_v58  ;;  %v2618_v16 = vand.u32 2147483647, %v2617_v10  ;;  %v169_v18 = vpop.permute.xlu0 %168  ;;  %v266_v55 = vadd.f32 %v3363_v47, %v228_v46 }
  0x96   :  { %v557_v19 = vmul.f32 6.28125, %v2613_v13  ;;  %v621_v23 = vmul.f32 0.0019353072, %v2613_v13  ;;  %v269_v51 = vadd.f32 %v3363_v47, %v231_v33  ;;  %v3439_v5 = vadd.f32 %v3363_v47, %v238_v43 }
  0x97   :  { %v2620_v20 = vor.u32 %v2619_v17, %v2618_v16  ;;  %3128 = vset.pattern.permute.xlu1 %v3151_v0  ;;  %v99_v21 = vpop.permute.xlu1 %98  ;;  %v246_v7 = vmul.f32 %v3351_v42, %v169_v18  ;;  %v267_v13 = vadd.f32 %v3363_v47, %v229_v60 }
  0x98   :  { %v589_v22 = vsub.f32 %v461_v54, %v557_v19  ;;  %203 = vperm.xlu1 %3128, %v3329_v37  }
  0x99   :  { %v2621_v24 = vsel %vm2615_vm1, %v2620_v20, %v494_v1  ;;  %v189_v25 = vpop.permute.xlu0 %188 }
  0x9a   :  { %v653_v27 = vsub.f32 %v589_v22, %v621_v23  ;;  %v558_v28 = vmul.f32 6.28125, %v2621_v24  ;;  %v622_v32 = vmul.f32 0.0019353072, %v2621_v24  ;;  %v250_v9 = vmul.f32 %v3351_v42, %v189_v25 }
  0x9b   :  { %v3460_v23 = vadd.f32 %v3363_v47, %v246_v7 }
  0x9c   :  { %v590_v30 = vsub.f32 %v462_v61, %v558_v28  ;;  %213 = vperm.xlu1 %3128, %v57_v26   ;;  %v318_v31 = vpop.permute.xlu1 %317  ;;  %v685_v0 = vand.u32 2147483647, %v653_v27  ;;  %vm749_vm2 = vcmp.ge.f32.partialorder %v653_v27, 0.0  ;;  %v242_v61 = vmul.f32 %v3351_v42, %v149_v8 }
  0x9d   :  { %v433_v34 = vmul.f32 %v3368_v48, %v318_v31  ;;  %v209_v35 = vpop.permute.xlu0 %208  ;;  %v781_v37 = vsel %vm749_vm2, 3.1415927, %v3153_v36  ;;  %v3466_v28 = vadd.f32 %v3363_v47, %v250_v9 }
  0x9e   :  { %v3393_v40 = vsub.f32 %v590_v30, %v622_v32  ;;  %v813_v45 = vsub.f32 %v781_v37, %v653_v27  ;;  %vm717_vm3 = vcmp.gt.f32.partialorder %v685_v0, 1.5707964  ;;  %v3451_v16 = vadd.f32 %v3363_v47, %v242_v61 }
  0x9f   :  { %v3395_v44 = vadd.f32 %v433_v34, %v268_v29  ;;  %v254_v17 = vmul.f32 %v3351_v42, %v209_v35 }
  0xa0   :  { %218 = vperm.xlu1 %3128, %v3335_v38   ;;  %v322_v49 = vpop.permute.xlu1 %321  ;;  %vm750_vm4 = vcmp.ge.f32.partialorder %v3393_v40, 0.0  ;;  %v3412_v56 = vsel %vm717_vm3, %v813_v45, %v653_v27  ;;  %v686_v4 = vand.u32 2147483647, %v3393_v40 }
  0xa1   :  { %v3404_v52 = vmul.f32 0.15915494, %v3395_v44  ;;  %v434_v41 = vmul.f32 %v3368_v48, %v322_v49  ;;  %v782_v2 = vsel %vm750_vm4, 3.1415927, %v3153_v36  ;;  %v3477_v37 = vadd.f32 %v3363_v47, %v254_v17 }
  0xa2   :  { %v298_v54 = vpop.permute.xlu0 %297  ;;  %v814_v19 = vsub.f32 %v782_v2, %v3393_v40  ;;  %vm718_vm5 = vcmp.gt.f32.partialorder %v686_v4, 1.5707964 }
  0xa3   :  { %v3410_v38 = vadd.f32 %v434_v41, %v269_v51  ;;  %v2640_v57 = vcvt.f32.s32 %v3404_v52  ;;  %v428_v58 = vmul.f32 %v3368_v48, %v298_v54  ;;  %v2638_v24 = vand.u32 2147483647, %v3404_v52 }
  0xa4   :  { %3130 = vset.pattern.permute.xlu1 %v3152_v6  ;;  %v3432_v6 = vmul.f32 %v3412_v56, %v3412_v56  ;;  %v3473_v34 = vsel %vm718_vm5, %v814_v19, %v3393_v40  ;;  %v2643_v35 = vand.u32 2147483648, %v3404_v52 }
  0xa5   :  { %v3425_v62 = vmul.f32 0.15915494, %v3410_v38  ;;  %413 = vperm.xlu1 %3130, %v3252_v15   ;;  %v104_v63 = vpop.permute.xlu1 %103  ;;  %v3428_v1 = vadd.f32 %v428_v58, %v263_v53  ;;  %v232_v15 = vmul.f32 %v3351_v42, %v99_v21  ;;  %v2641_v10 = vcvt.s32.f32 %v2640_v57 }
  0xa6   :  { %v310_v3 = vpop.permute.xlu0 %309  ;;  %v909_v22 = vmul.f32 2.7557319e-06, %v3432_v6  ;;  %v233_v30 = vmul.f32 %v3351_v42, %v104_v63  ;;  %vm3480_vm6 = vcmp.lt.f32.partialorder %v2638_v24, 8388608.0  ;;  %v3486_v41 = vmul.f32 %v3432_v6, %v3412_v56 }
  0xa7   :  { %v2648_v8 = vcvt.f32.s32 %v3425_v62  ;;  %v3446_v11 = vmul.f32 0.15915494, %v3428_v1  ;;  %v431_v12 = vmul.f32 %v3368_v48, %v310_v3  ;;  %v2642_v29 = vand.u32 2147483647, %v2641_v10 }
  0xa8   :  { %v2646_v39 = vand.u32 2147483647, %v3425_v62  ;;  %v941_v46 = vadd.f32 -0.0001984127, %v909_v22  ;;  %v2651_v53 = vand.u32 2147483648, %v3425_v62  ;;  %v271_v54 = vadd.f32 %v3363_v47, %v233_v30 }
  0xa9   :  { %417 = vperm.xlu1 %3130, %v57_v26   ;;  %v114_v18 = vpop.permute.xlu1 %113  ;;  %v2600_v14 = vcvt.f32.s32 %v3446_v11  ;;  %v3456_v20 = vadd.f32 %v431_v12, %v266_v55  ;;  %v2649_v25 = vcvt.s32.f32 %v2648_v8  ;;  %v270_v26 = vadd.f32 %v3363_v47, %v232_v15 }
  0xaa   :  { %v314_v21 = vpop.permute.xlu0 %313  ;;  %v2644_v40 = vor.u32 %v2643_v35, %v2642_v29  ;;  %v3492_v43 = vmul.f32 %v3473_v34, %v3473_v34  ;;  %v2603_v57 = vand.u32 2147483648, %v3446_v11  ;;  %vm3498_vm7 = vcmp.lt.f32.partialorder %v2646_v39, 8388608.0 }
  0xab   :  { %v432_v27 = vmul.f32 %v3368_v48, %v314_v21  ;;  %v2601_v31 = vcvt.s32.f32 %v2600_v14  ;;  %v495_v0 = vmul.f32 0.15915494, %v3456_v20  ;;  %v2650_v50 = vand.u32 2147483647, %v2649_v25 }
  0xac   :  { %v2598_v63 = vand.u32 2147483647, %v3446_v11  ;;  %v3505_v2 = vmul.f32 %v941_v46, %v3432_v6  ;;  %v2645_v12 = vsel %vm3480_vm6, %v2644_v40, %v3404_v52  ;;  %v3514_v19 = vmul.f32 2.7557319e-06, %v3492_v43 }
  0xad   :  { %v3470_v32 = vadd.f32 %v432_v27, %v267_v13  ;;  %v119_v33 = vpop.permute.xlu1 %118  ;;  %v2624_v51 = vcvt.f32.s32 %v495_v0  ;;  %v2602_v55 = vand.u32 2147483647, %v2601_v31  ;;  %v2652_v7 = vor.u32 %v2651_v53, %v2650_v50 }
  0xae   :  { %v326_v45 = vpop.permute.xlu0 %325  ;;  %v2627_v8 = vand.u32 2147483648, %v495_v0  ;;  %v2622_v13 = vand.u32 2147483647, %v495_v0  ;;  %vm2599_vm8 = vcmp.lt.f32.partialorder %v2598_v63, 8388608.0  ;;  %v235_v25 = vmul.f32 %v3351_v42, %v114_v18 }
  0xaf   :  { %v2625_v58 = vcvt.s32.f32 %v2624_v51  ;;  %v3496_v60 = vmul.f32 0.15915494, %v3470_v32  ;;  %v435_v3 = vmul.f32 %v3368_v48, %v326_v45  ;;  %v2604_v14 = vor.u32 %v2603_v57, %v2602_v55 }
  0xb0   :  { %v561_v52 = vmul.f32 6.28125, %v2645_v12  ;;  %v625_v31 = vmul.f32 0.0019353072, %v2645_v12  ;;  %vm2623_vm9 = vcmp.lt.f32.partialorder %v2622_v13, 8388608.0  ;;  %v236_v45 = vmul.f32 %v3351_v42, %v119_v33 }
  0xb1   :  { %v2626_v15 = vand.u32 2147483647, %v2625_v58  ;;  %v2632_v9 = vcvt.f32.s32 %v3496_v60  ;;  %v3511_v17 = vadd.f32 %v435_v3, %v270_v26  ;;  %v2653_v26 = vsel %vm3498_vm7, %v2652_v7, %v3425_v62 }
  0xb2   :  { %v334_v4 = vpop.permute.xlu1 %333  ;;  %v330_v10 = vpop.permute.xlu0 %329  ;;  %v2605_v18 = vsel %vm2599_vm8, %v2604_v14, %v3446_v11  ;;  %v562_v40 = vmul.f32 6.28125, %v2653_v26  ;;  %v2635_v53 = vand.u32 2147483648, %v3496_v60  ;;  %v593_v55 = vsub.f32 %v3395_v44, %v561_v52 }
  0xb3   :  { %v2628_v21 = vor.u32 %v2627_v8, %v2626_v15  ;;  %v2633_v22 = vcvt.s32.f32 %v2632_v9  ;;  %v437_v24 = vmul.f32 %v3368_v48, %v334_v4  ;;  %v499_v27 = vmul.f32 0.15915494, %v3511_v17 }
  0xb4   :  { %v436_v29 = vmul.f32 %v3368_v48, %v330_v10  ;;  %v273_v57 = vadd.f32 %v3363_v47, %v235_v25  ;;  %v2630_v33 = vand.u32 2147483647, %v3496_v60  ;;  %v556_v61 = vmul.f32 6.28125, %v2605_v18 }
  0xb5   :  { %v3524_v35 = vadd.f32 %v437_v24, %v3419_v59  ;;  %v2634_v39 = vand.u32 2147483647, %v2633_v22  ;;  %v2656_v46 = vcvt.f32.s32 %v499_v27  ;;  %v2629_v49 = vsel %vm2623_vm9, %v2628_v21, %v495_v0 }
  0xb6   :  { %v338_v30 = vpop.permute.xlu1 %337  ;;  %v3531_v51 = vadd.f32 %v436_v29, %v271_v54  ;;  %v342_v0 = vpop.permute.xlu0 %341  ;;  %v559_v63 = vmul.f32 6.28125, %v2629_v49  ;;  %v2659_v4 = vand.u32 2147483648, %v499_v27  ;;  %v594_v44 = vsub.f32 %v3410_v38, %v562_v40 }
  0xb7   :  { %v3529_v50 = vmul.f32 0.15915494, %v3524_v35  ;;  %v2657_v62 = vcvt.s32.f32 %v2656_v46  ;;  %v438_v59 = vmul.f32 %v3368_v48, %v338_v30  ;;  %v2636_v54 = vor.u32 %v2635_v53, %v2634_v39 }
  0xb8   :  { %v3540_v15 = vmul.f32 0.15915494, %v3531_v51  ;;  %v274_v9 = vadd.f32 %v3363_v47, %v236_v45  ;;  %v2654_v10 = vand.u32 2147483647, %v499_v27  ;;  %v439_v12 = vmul.f32 %v3368_v48, %v342_v0 }
  0xb9   :  { %v2672_v11 = vcvt.f32.s32 %v3529_v50  ;;  %v2658_v3 = vand.u32 2147483647, %v2657_v62  ;;  %v3542_v8 = vadd.f32 %v438_v59, %v273_v57  ;;  %v620_v13 = vmul.f32 0.0019353072, %v2605_v18 }
  0xba   :  { %vm2631_vm10 = vcmp.lt.f32.partialorder %v2630_v33, 8388608.0  ;;  %v2664_v21 = vcvt.f32.s32 %v3540_v15  ;;  %v588_v24 = vsub.f32 %v3428_v1, %v556_v61  ;;  %v3555_v38 = vadd.f32 %v439_v12, %v274_v9 }
  0xbb   :  { %v124_v58 = vpop.permute.xlu1 %123  ;;  %v2673_v7 = vcvt.s32.f32 %v2672_v11  ;;  %v2660_v14 = vor.u32 %v2659_v4, %v2658_v3  ;;  %v2637_v25 = vsel %vm2631_vm10, %v2636_v54, %v3496_v60  ;;  %v3553_v29 = vmul.f32 0.15915494, %v3542_v8 }
  0xbc   :  { %v626_v30 = vmul.f32 0.0019353072, %v2653_v26  ;;  %v591_v52 = vsub.f32 %v3456_v20, %v559_v63  ;;  %v623_v39 = vmul.f32 0.0019353072, %v2629_v49  ;;  %vm2655_vm11 = vcmp.lt.f32.partialorder %v2654_v10, 8388608.0  ;;  %v346_v49 = vpop.permute.xlu0 %345 }
  0xbd   :  { %v2674_v45 = vand.u32 2147483647, %v2673_v7  ;;  %v2670_v46 = vand.u32 2147483647, %v3529_v50  ;;  %v2665_v18 = vcvt.s32.f32 %v2664_v21  ;;  %v2680_v40 = vcvt.f32.s32 %v3553_v29 }
  0xbe   :  { %v560_v53 = vmul.f32 6.28125, %v2637_v25  ;;  %v2661_v1 = vsel %vm2655_vm11, %v2660_v14, %v499_v27  ;;  %v2675_v60 = vand.u32 2147483648, %v3529_v50  ;;  %v503_v62 = vmul.f32 0.15915494, %v3555_v38 }
  0xbf   :  { %v3548_v22 = vpop.permute.xlu1 %133  ;;  %v3562_v57 = vsub.f32 %v593_v55, %v625_v31  ;;  %v3564_v26 = vsub.f32 %v594_v44, %v626_v30  ;;  %v3566_v20 = vsub.f32 %v588_v24, %v620_v13  ;;  %v3569_v33 = vadd.f32 0.008333333, %v3505_v2 }
  0xc0   :  { %v3571_v11 = vsub.f32 %v591_v52, %v623_v39  ;;  %v2676_v0 = vor.u32 %v2675_v60, %v2674_v45  ;;  %v2681_v61 = vcvt.s32.f32 %v2680_v40  ;;  %v2688_v27 = vcvt.f32.s32 %v503_v62  ;;  %v358_v12 = vpop.permute.xlu0 %357 }
  0xc1   :  { %v624_v63 = vmul.f32 0.0019353072, %v2637_v25  ;;  %v563_v54 = vmul.f32 6.28125, %v2661_v1  ;;  %v2666_v3 = vand.u32 2147483647, %v2665_v18  ;;  %v237_v4 = vmul.f32 %v3351_v42, %v124_v58 }
  0xc2   :  { %v592_v31 = vsub.f32 %v3470_v32, %v560_v53  ;;  %vm2671_vm12 = vcmp.lt.f32.partialorder %v2670_v46, 8388608.0  ;;  %v2682_v55 = vand.u32 2147483647, %v2681_v61  ;;  %v2689_v7 = vcvt.s32.f32 %v2688_v27 }
  0xc3   :  { %v139_v59 = vpop.permute.xlu1 %138  ;;  %v2662_v44 = vand.u32 2147483647, %v3540_v15  ;;  %v2667_v2 = vand.u32 2147483648, %v3540_v15  ;;  %v275_v9 = vadd.f32 %v3363_v47, %v237_v4  ;;  %v440_v10 = vmul.f32 %v3368_v48, %v346_v49 }
  0xc4   :  { %v2677_v14 = vsel %vm2671_vm12, %v2676_v0, %v3529_v50  ;;  %v2678_v21 = vand.u32 2147483647, %v3553_v29  ;;  %v2683_v58 = vand.u32 2147483648, %v3553_v29  ;;  %v2690_v32 = vand.u32 2147483647, %v2689_v7 }
  0xc5   :  { %v595_v24 = vsub.f32 %v3511_v17, %v563_v54  ;;  %v2668_v25 = vor.u32 %v2667_v2, %v2666_v3  ;;  %v3583_v30 = vadd.f32 %v440_v10, %v275_v9  ;;  %v240_v52 = vmul.f32 %v3351_v42, %v139_v59 }
  0xc6   :  { %v627_v39 = vmul.f32 0.0019353072, %v2661_v1  ;;  %v2684_v45 = vor.u32 %v2683_v58, %v2682_v55  ;;  %v2691_v46 = vand.u32 2147483648, %v503_v62  ;;  %v443_v18 = vmul.f32 %v3368_v48, %v358_v12 }
  0xc7   :  { %v3587_v40 = vsub.f32 %v592_v31, %v624_v63  ;;  %v3589_v50 = vmul.f32 6.28125, %v2677_v14  ;;  %v2686_v53 = vand.u32 2147483647, %v503_v62  ;;  %v504_v60 = vmul.f32 0.15915494, %v3583_v30 }
  0xc8   :  { %v350_v13 = vpop.permute.xlu1 %349  ;;  %vm2663_vm13 = vcmp.lt.f32.partialorder %v2662_v44, 8388608.0  ;;  %v2692_v49 = vor.u32 %v2691_v46, %v2690_v32  ;;  %v278_v17 = vadd.f32 %v3363_v47, %v240_v52  ;;  %v3594_v59 = vsub.f32 %v595_v24, %v627_v39  ;;  %v362_v32 = vpop.permute.xlu0 %361 }
  0xc9   :  { %v441_v0 = vmul.f32 %v3368_v48, %v350_v13  ;;  %v3596_v1 = vmul.f32 0.0019353072, %v2677_v14  ;;  %v2669_v27 = vsel %vm2663_vm13, %v2668_v25, %v3540_v15  ;;  %vm2679_vm14 = vcmp.lt.f32.partialorder %v2678_v21, 8388608.0 }
  0xca   :  { %v2685_v63 = vsel %vm2679_vm14, %v2684_v45, %v3553_v29  ;;  %v2696_v54 = vcvt.f32.s32 %v504_v60  ;;  %v239_v3 = vmul.f32 %v3351_v42, %v3548_v22  ;;  %v3602_v4 = vadd.f32 %v443_v18, %v278_v17 }
  0xcb   :  { %v597_v31 = vsub.f32 %v3524_v35, %v3589_v50  ;;  %vm2687_vm15 = vcmp.lt.f32.partialorder %v2686_v53, 8388608.0  ;;  %v2694_v55 = vand.u32 2147483647, %v504_v60  ;;  %v3607_v7 = vadd.f32 %v441_v0, %v3439_v5 }
  0xcc   :  { %v354_v61 = vpop.permute.xlu1 %353  ;;  %v2693_v44 = vsel %vm2687_vm15, %v2692_v49, %v503_v62  ;;  %v2697_v2 = vcvt.s32.f32 %v2696_v54  ;;  %v507_v15 = vmul.f32 0.15915494, %v3602_v4  ;;  %v564_v9 = vmul.f32 6.28125, %v2669_v27 }
  0xcd   :  { %v442_v29 = vmul.f32 %v3368_v48, %v354_v61  ;;  %v628_v10 = vmul.f32 0.0019353072, %v2669_v27  ;;  %v566_v12 = vmul.f32 6.28125, %v2685_v63  ;;  %v505_v22 = vmul.f32 0.15915494, %v3607_v7 }
  0xce   :  { %v2698_v13 = vand.u32 2147483647, %v2697_v2  ;;  %v2699_v14 = vand.u32 2147483648, %v504_v60  ;;  %v277_v21 = vadd.f32 %v3363_v47, %v239_v3  ;;  %v2720_v58 = vcvt.f32.s32 %v507_v15 }
  0xcf   :  { %v567_v5 = vmul.f32 6.28125, %v2693_v44  ;;  %vm2695_vm0 = vcmp.lt.f32.partialorder %v2694_v55, 8388608.0  ;;  %v2704_v62 = vcvt.f32.s32 %v505_v22  ;;  %v444_v25 = vmul.f32 %v3368_v48, %v362_v32 }
  0xd0   :  { %v2700_v52 = vor.u32 %v2699_v14, %v2698_v13  ;;  %v2718_v39 = vand.u32 2147483647, %v507_v15  ;;  %v2721_v45 = vcvt.s32.f32 %v2720_v58  ;;  %v3614_v46 = vadd.f32 %v442_v29, %v277_v21 }
  0xd1   :  { %v144_v24 = vpop.permute.xlu1 %143  ;;  %v2723_v18 = vand.u32 2147483648, %v507_v15  ;;  %v2702_v53 = vand.u32 2147483647, %v505_v22  ;;  %v2705_v49 = vcvt.s32.f32 %v2704_v62  ;;  %v2707_v27 = vand.u32 2147483648, %v505_v22 }
  0xd2   :  { %v241_v17 = vmul.f32 %v3351_v42, %v144_v24  ;;  %v2701_v0 = vsel %vm2695_vm0, %v2700_v52, %v504_v60  ;;  %v2722_v61 = vand.u32 2147483647, %v2721_v45  ;;  %v506_v54 = vmul.f32 0.15915494, %v3614_v46 }
  0xd3   :  { %v2706_v3 = vand.u32 2147483647, %v2705_v49  ;;  %v684_v2 = vand.u32 2147483647, %v3566_v20  ;;  %vm748_vm1 = vcmp.ge.f32.partialorder %v3566_v20, 0.0  ;;  %v596_v29 = vsub.f32 %v3531_v51, %v564_v9 }
  0xd4   :  { %v279_v55 = vadd.f32 %v3363_v47, %v241_v17  ;;  %v630_v13 = vmul.f32 0.0019353072, %v2685_v63  ;;  %v2724_v14 = vor.u32 %v2723_v18, %v2722_v61  ;;  %v2712_v21 = vcvt.f32.s32 %v506_v54  ;;  %v374_v17 = vpop.permute.xlu0 %373 }
  0xd5   :  { %vm751_vm2 = vcmp.ge.f32.partialorder %v3571_v11, 0.0  ;;  %v568_v58 = vmul.f32 6.28125, %v2701_v0  ;;  %vm2719_vm3 = vcmp.lt.f32.partialorder %v2718_v39, 8388608.0  ;;  %v2708_v60 = vor.u32 %v2707_v27, %v2706_v3 }
  0xd6   :  { %v3623_v32 = vadd.f32 %v444_v25, %v279_v55  ;;  %v2725_v24 = vsel %vm2719_vm3, %v2724_v14, %v507_v15  ;;  %vm2703_vm4 = vcmp.lt.f32.partialorder %v2702_v53, 8388608.0  ;;  %v2713_v62 = vcvt.s32.f32 %v2712_v21 }
  0xd7   :  { %v780_v52 = vsel %vm748_vm1, 3.1415927, %v3153_v36  ;;  %v598_v45 = vsub.f32 %v3542_v8, %v566_v12  ;;  %v599_v49 = vsub.f32 %v3555_v38, %v567_v5  ;;  %v2709_v51 = vsel %vm2703_vm4, %v2708_v60, %v505_v22  ;;  %v3640_v5 = vpop.permute.xlu1 %153 }
  0xd8   :  { %vm716_vm5 = vcmp.gt.f32.partialorder %v684_v2, 1.5707964  ;;  %v571_v63 = vmul.f32 6.28125, %v2725_v24  ;;  %v2714_v9 = vand.u32 2147483647, %v2713_v62  ;;  %v2715_v18 = vand.u32 2147483648, %v506_v54 }
  0xd9   :  { %v812_v39 = vsub.f32 %v780_v52, %v3566_v20  ;;  %v600_v25 = vsub.f32 %v3583_v30, %v568_v58  ;;  %v569_v61 = vmul.f32 6.28125, %v2709_v51  ;;  %v2710_v15 = vand.u32 2147483647, %v506_v54 }
  0xda   :  { %v508_v53 = vmul.f32 0.15915494, %v3623_v32  ;;  %v3635_v8 = vsub.f32 %v597_v31, %v3596_v1  ;;  %v631_v38 = vmul.f32 0.0019353072, %v2693_v44  ;;  %v2716_v12 = vor.u32 %v2715_v18, %v2714_v9 }
  0xdb   :  { %v3638_v22 = vsel %vm716_vm5, %v812_v39, %v3566_v20  ;;  %v3642_v27 = vsub.f32 %v596_v29, %v628_v10  ;;  %v3644_v30 = vsub.f32 %v598_v45, %v630_v13  ;;  %v632_v3 = vmul.f32 0.0019353072, %v2701_v0  ;;  %v378_v29 = vpop.permute.xlu0 %377  ;;  %v159_v52 = vpop.permute.xlu1 %158 }
  0xdc   :  { %v2728_v55 = vcvt.f32.s32 %v508_v53  ;;  %v3646_v2 = vsub.f32 %v599_v49, %v631_v38  ;;  %v603_v14 = vsub.f32 %v3602_v4, %v571_v63  ;;  %v447_v35 = vmul.f32 %v3368_v48, %v374_v17 }
  0xdd   :  { %v876_v50 = vmul.f32 %v3638_v22, %v3638_v22  ;;  %vm752_vm6 = vcmp.ge.f32.partialorder %v3587_v40, 0.0  ;;  %v3653_v20 = vsub.f32 %v600_v25, %v632_v3  ;;  %v635_v1 = vmul.f32 0.0019353072, %v2725_v24 }
  0xde   :  { %v601_v31 = vsub.f32 %v3607_v7, %v569_v61  ;;  %vm2711_vm7 = vcmp.lt.f32.partialorder %v2710_v15, 8388608.0  ;;  %vm753_vm8 = vcmp.ge.f32.partialorder %v3562_v57, 0.0  ;;  %v2729_v10 = vcvt.s32.f32 %v2728_v55 }
  0xdf   :  { %v2717_v44 = vsel %vm2711_vm7, %v2716_v12, %v506_v54  ;;  %v908_v0 = vmul.f32 2.7557319e-06, %v876_v50  ;;  %v1037_v4 = vmul.f32 %v3569_v33, %v3432_v6  ;;  %v633_v13 = vmul.f32 0.0019353072, %v2709_v51 }
  0xe0   :  { %v2726_v21 = vand.u32 2147483647, %v508_v53  ;;  %v3660_v58 = vmul.f32 %v3368_v48, %v378_v29  ;;  %v687_v60 = vand.u32 2147483647, %v3571_v11  ;;  %v3663_v24 = vsub.f32 %v603_v14, %v635_v1 }
  0xe1   :  { %v2730_v7 = vand.u32 2147483647, %v2729_v10  ;;  %v940_v62 = vadd.f32 -0.0001984127, %v908_v0  ;;  %v783_v54 = vsel %vm751_vm2, 3.1415927, %v3153_v36  ;;  %v3668_v45 = vsub.f32 %v601_v31, %v633_v13 }
  0xe2   :  { %v570_v6 = vmul.f32 6.28125, %v2717_v44  ;;  %v2731_v33 = vand.u32 2147483648, %v508_v53  ;;  %vm719_vm9 = vcmp.gt.f32.partialorder %v687_v60, 1.5707964  ;;  %v1069_v51 = vadd.f32 -0.16666667, %v1037_v4 }
  0xe3   :  { %v972_v49 = vmul.f32 %v940_v62, %v876_v50  ;;  %v815_v63 = vsub.f32 %v783_v54, %v3571_v11  ;;  %v942_v9 = vadd.f32 -0.0001984127, %v3514_v19  ;;  %v634_v18 = vmul.f32 0.0019353072, %v2717_v44 }
  0xe4   :  { %v2732_v17 = vor.u32 %v2731_v33, %v2730_v7  ;;  %v244_v39 = vmul.f32 %v3351_v42, %v159_v52  ;;  %v688_v25 = vand.u32 2147483647, %v3587_v40  ;;  %vm2727_vm10 = vcmp.lt.f32.partialorder %v2726_v21, 8388608.0 }
  0xe5   :  { %v1004_v61 = vadd.f32 0.008333333, %v972_v49  ;;  %v3675_v15 = vsel %vm719_vm9, %v815_v63, %v3571_v11  ;;  %v974_v38 = vmul.f32 %v942_v9, %v3492_v43  ;;  %v602_v12 = vsub.f32 %v3614_v46, %v570_v6  ;;  %v366_v46 = vpop.permute.xlu1 %365 }
  0xe6   :  { %v1100_v3 = vmul.f32 %v876_v50, %v3638_v22  ;;  %v879_v19 = vmul.f32 %v3675_v15, %v3675_v15  ;;  %v282_v55 = vadd.f32 %v3363_v47, %v244_v39  ;;  %vm754_vm11 = vcmp.ge.f32.partialorder %v3564_v26, 0.0 }
  0xe7   :  { %v1036_v14 = vmul.f32 %v1004_v61, %v876_v50  ;;  %v1133_v1 = vmul.f32 %v3486_v41, %v1069_v51  ;;  %v1006_v31 = vadd.f32 0.008333333, %v974_v38  ;;  %v689_v11 = vand.u32 2147483647, %v3562_v57 }
  0xe8   :  { %v2733_v44 = vsel %vm2727_vm10, %v2732_v17, %v508_v53  ;;  %v911_v10 = vmul.f32 2.7557319e-06, %v879_v19  ;;  %v3686_v0 = vadd.f32 %v447_v35, %v282_v55  ;;  %vm3688_vm12 = vcmp.gt.f32.partialorder %v688_v25, 1.5707964 }
  0xe9   :  { %vm755_vm13 = vcmp.ge.f32.partialorder %v3594_v59, 0.0  ;;  %v1068_v4 = vadd.f32 -0.16666667, %v1036_v14  ;;  %v1038_v29 = vmul.f32 %v1006_v31, %v3492_v43  ;;  %vm3694_vm14 = vcmp.gt.f32.partialorder %v689_v11, 1.5707964 }
  0xea   :  { %v784_v41 = vsel %vm752_vm6, 3.1415927, %v3153_v36  ;;  %v243_v53 = vmul.f32 %v3351_v42, %v3640_v5  ;;  %v943_v35 = vadd.f32 -0.0001984127, %v911_v10  ;;  %v3704_v13 = vmul.f32 0.15915494, %v3686_v0 }
  0xeb   :  { %v785_v21 = vsel %vm753_vm8, 3.1415927, %v3153_v36  ;;  %v1132_v60 = vmul.f32 %v1100_v3, %v1068_v4  ;;  %v1102_v7 = vmul.f32 %v3492_v43, %v3473_v34  ;;  %v816_v62 = vsub.f32 %v784_v41, %v3587_v40 }
  0xec   :  { %v817_v54 = vsub.f32 %v785_v21, %v3562_v57  ;;  %v3713_v52 = vmul.f32 6.28125, %v2733_v44  ;;  %v1165_v42 = vadd.f32 %v1133_v1, %v3412_v56  ;;  %v975_v5 = vmul.f32 %v943_v35, %v879_v19 }
  0xed   :  { %v2752_v6 = vcvt.f32.s32 %v3704_v13  ;;  %v1164_v33 = vadd.f32 %v1132_v60, %v3638_v22  ;;  %v1070_v49 = vadd.f32 -0.16666667, %v1038_v29  ;;  %v3721_v51 = vsel %vm3688_vm12, %v816_v62, %v3587_v40 }
  0xee   :  { %v3726_v43 = vsel %vm3694_vm14, %v817_v54, %v3562_v57  ;;  %v3728_v63 = vsub.f32 %v602_v12, %v634_v18  ;;  %v3731_v56 = vadd.f32 %v3363_v47, %v243_v53  ;;  %v1007_v9 = vadd.f32 0.008333333, %v975_v5  ;;  %v390_v54 = vpop.permute.xlu0 %389 }
  0xef   :  { %v880_v22 = vmul.f32 %v3721_v51, %v3721_v51  ;;  %v3735_v17 = vmul.f32 0.0019353072, %v2733_v44  ;;  %v1196_v39 = vpack.c.bf16 %v1165_v42, %v1164_v33  ;;  %v2753_v25 = vcvt.s32.f32 %v2752_v6 }
  0xf0   :  { %v881_v40 = vmul.f32 %v3726_v43, %v3726_v43  ;;  %v604_v57 = vsub.f32 %v3623_v32, %v3713_v52  ;;  %v1039_v61 = vmul.f32 %v1007_v9, %v879_v19  ;;  %v2750_v18 = vand.u32 2147483647, %v3704_v13 }
  0xf1   :  { %v912_v38 = vmul.f32 2.7557319e-06, %v880_v22  ;;  %2518 = vmatprep.mubr.bf16.mxu0 %v1196_v39  ;;  %v1134_v47 = vmul.f32 %v1102_v7, %v1070_v49  ;;  %v690_v3 = vand.u32 2147483647, %v3564_v26  ;;  %v691_v55 = vand.u32 2147483647, %v3594_v59 }
  0xf2   :  { %v913_v12 = vmul.f32 2.7557319e-06, %v881_v40  ;;  %v1071_v14 = vadd.f32 -0.16666667, %v1039_v61  ;;  %v1103_v1 = vmul.f32 %v879_v19, %v3675_v15  ;;  %v786_v11 = vsel %vm754_vm11, 3.1415927, %v3153_v36 }
  0xf3   :  { %v944_v31 = vadd.f32 -0.0001984127, %v912_v38  ;;  %v2754_v32 = vand.u32 2147483647, %v2753_v25  ;;  %vm722_vm15 = vcmp.gt.f32.partialorder %v690_v3, 1.5707964  ;;  %v818_v10 = vsub.f32 %v786_v11, %v3564_v26  ;;  %v394_v11 = vpop.permute.xlu0 %393 }
  0xf4   :  { %v945_v44 = vadd.f32 -0.0001984127, %v913_v12  ;;  %v1135_v4 = vmul.f32 %v1103_v1, %v1071_v14  ;;  %vm723_vm0 = vcmp.gt.f32.partialorder %v691_v55, 1.5707964  ;;  %v787_v50 = vsel %vm755_vm13, 3.1415927, %v3153_v36  ;;  %v370_v1 = vpop.permute.xlu1 %369 }
  0xf5   :  { %v976_v29 = vmul.f32 %v944_v31, %v880_v22  ;;  %vm756_vm1 = vcmp.ge.f32.partialorder %v3642_v27, 0.0  ;;  %v1166_v19 = vadd.f32 %v1134_v47, %v3473_v34  ;;  %v2755_v41 = vand.u32 2147483648, %v3704_v13 }
  0xf6   :  { %v977_v53 = vmul.f32 %v945_v44, %v881_v40  ;;  %v819_v35 = vsub.f32 %v787_v50, %v3594_v59  ;;  %vm757_vm2 = vcmp.ge.f32.partialorder %v3635_v8, 0.0  ;;  %v1167_v21 = vadd.f32 %v1135_v4, %v3675_v15 }
  0xf7   :  { %v1008_v60 = vadd.f32 0.008333333, %v976_v29  ;;  %v3759_v7 = vsel %vm722_vm15, %v818_v10, %v3564_v26  ;;  %v445_v62 = vmul.f32 %v3368_v48, %v366_v46  ;;  %v2756_v52 = vor.u32 %v2755_v41, %v2754_v32 }
  0xf8   :  { %v1009_v42 = vadd.f32 0.008333333, %v977_v53  ;;  %v3763_v34 = vsel %vm723_vm0, %v819_v35, %v3594_v59  ;;  %v882_v5 = vmul.f32 %v3759_v7, %v3759_v7  ;;  %v1197_v6 = vpack.c.bf16 %v1167_v21, %v1166_v19 }
  0xf9   :  { %v1040_v33 = vmul.f32 %v1008_v60, %v880_v22  ;;  %v883_v15 = vmul.f32 %v3763_v34, %v3763_v34  ;;  %v3770_v49 = vadd.f32 %v445_v62, %v3451_v16  ;;  %vm2751_vm3 = vcmp.lt.f32.partialorder %v2750_v18, 8388608.0 }
  0xfa   :  { %v1041_v26 = vmul.f32 %v1009_v42, %v881_v40  ;;  %v1104_v9 = vmul.f32 %v880_v22, %v3721_v51  ;;  %v914_v39 = vmul.f32 2.7557319e-06, %v882_v5  ;;  %2519 = vmatmul.mubr.bf16.vlgmr.msra.gmra.mxu0 %v1197_v6  ;;  %v1105_v59 = vmul.f32 %v881_v40, %v3726_v43 }
  0xfb   :  { %v1072_v25 = vadd.f32 -0.16666667, %v1040_v33  ;;  %v915_v61 = vmul.f32 2.7557319e-06, %v883_v15  ;;  %v3775_v38 = vmul.f32 0.15915494, %v3770_v49  ;;  %v2757_v47 = vsel %vm2751_vm3, %v2756_v52, %v3704_v13 }
  0xfc   :  { %v1073_v12 = vadd.f32 -0.16666667, %v1041_v26  ;;  %v946_v3 = vadd.f32 -0.0001984127, %v914_v39  ;;  %v692_v16 = vand.u32 2147483647, %v3642_v27  ;;  %v3780_v18 = vmul.f32 %v3368_v48, %v390_v54 }
  0xfd   :  { %v1136_v55 = vmul.f32 %v1104_v9, %v1072_v25  ;;  %v947_v22 = vadd.f32 -0.0001984127, %v915_v61  ;;  %v2736_v14 = vcvt.f32.s32 %v3775_v38  ;;  %v3784_v40 = vsub.f32 %v604_v57, %v3735_v17  ;;  %v406_v9 = vpop.permute.xlu0 %405 }
  0xfe   :  { %v1137_v31 = vmul.f32 %v1105_v59, %v1073_v12  ;;  %v978_v32 = vmul.f32 %v946_v3, %v882_v5  ;;  %v693_v13 = vand.u32 2147483647, %v3635_v8  ;;  %v575_v44 = vmul.f32 6.28125, %v2757_v47 }
  0xff   :  { %v639_v10 = vmul.f32 0.0019353072, %v2757_v47  ;;  %v1168_v46 = vadd.f32 %v1136_v55, %v3721_v51  ;;  %v979_v4 = vmul.f32 %v947_v22, %v883_v15  ;;  %v2737_v19 = vcvt.s32.f32 %v2736_v14 }
 0x100   :  { %v1169_v29 = vadd.f32 %v1137_v31, %v3726_v43  ;;  %v1010_v50 = vadd.f32 0.008333333, %v978_v32  ;;  %vm3789_vm4 = vcmp.gt.f32.partialorder %v692_v16, 1.5707964  ;;  %vm3793_vm5 = vcmp.gt.f32.partialorder %v693_v13, 1.5707964 }
 0x101   :  { %v1011_v17 = vadd.f32 0.008333333, %v979_v4  ;;  %v788_v53 = vsel %vm756_vm1, 3.1415927, %v3153_v36  ;;  %v446_v51 = vmul.f32 %v3368_v48, %v370_v1  ;;  %vm758_vm6 = vcmp.ge.f32.partialorder %v3644_v30, 0.0  ;;  %v164_v48 = vpop.permute.xlu1 %163 }
 0x102   :  { %v1198_v43 = vpack.c.bf16 %v1169_v29, %v1168_v46  ;;  %v1042_v35 = vmul.f32 %v1010_v50, %v882_v5  ;;  %v789_v21 = vsel %vm757_vm2, 3.1415927, %v3153_v36  ;;  %v820_v60 = vsub.f32 %v788_v53, %v3642_v27  ;;  %v410_v29 = vpop.permute.xlu0 %409 }
 0x103   :  { %vm759_vm7 = vcmp.ge.f32.partialorder %v3646_v2, 0.0  ;;  %v607_v62 = vsub.f32 %v3686_v0, %v575_v44  ;;  %v1043_v54 = vmul.f32 %v1011_v17, %v883_v15  ;;  %v821_v52 = vsub.f32 %v789_v21, %v3635_v8  ;;  %v3862_v21 = vld [vmem:[%s5408_s1] ss:$0 sm:$0xff] }
 0x104   :  { %v3810_v42 = vadd.f32 %v446_v51, %v3731_v56  ;;  %2522 = vmatprep.mubr.bf16.mxu0 %v1198_v43  ;;  %v1074_v6 = vadd.f32 -0.16666667, %v1042_v35  ;;  %v1106_v33 = vmul.f32 %v882_v5, %v3759_v7  ;;  %v2738_v26 = vand.u32 2147483647, %v2737_v19 }
 0x105   :  { %v3816_v39 = vsel %vm3789_vm4, %v820_v60, %v3642_v27  ;;  %v1075_v25 = vadd.f32 -0.16666667, %v1043_v54  ;;  %v1107_v0 = vmul.f32 %v883_v15, %v3763_v34  ;;  %v3822_v56 = vsel %vm3793_vm5, %v821_v52, %v3635_v8  ;;  %v3833_v15 = vld [vmem:[%s5408_s1 + $0x1] ss:$0 sm:$0xff]  ;;  %v174_v46 = vpop.permute.xlu1 %173 }
 0x106   :  { %v884_v59 = vmul.f32 %v3816_v39, %v3816_v39  ;;  %v1138_v61 = vmul.f32 %v1106_v33, %v1074_v6  ;;  %v2734_v5 = vand.u32 2147483647, %v3775_v38  ;;  %v2739_v47 = vand.u32 2147483648, %v3775_v38 }
 0x107   :  { %v885_v27 = vmul.f32 %v3822_v56, %v3822_v56  ;;  %v3836_v12 = vmul.f32 %v3833_v15, %v394_v11  ;;  %v1139_v8 = vmul.f32 %v1107_v0, %v1075_v25  ;;  %v510_v16 = vmul.f32 0.15915494, %v3810_v42 }
 0x108   :  { %v916_v3 = vmul.f32 2.7557319e-06, %v884_v59  ;;  %v3839_v55 = vsub.f32 %v607_v62, %v639_v10  ;;  %v2740_v22 = vor.u32 %v2739_v47, %v2738_v26  ;;  %v694_v1 = vand.u32 2147483647, %v3644_v30  ;;  %v3873_v26 = vld [vmem:[%s5409_s2] ss:$0 sm:$0xff] }
 0x109   :  { %v917_v14 = vmul.f32 2.7557319e-06, %v885_v27  ;;  %v1170_v31 = vadd.f32 %v1138_v61, %v3759_v7  ;;  %v1171_v32 = vadd.f32 %v1139_v8, %v3763_v34  ;;  %v2744_v44 = vcvt.f32.s32 %v510_v16 }
 0x10a   :  { %v948_v13 = vadd.f32 -0.0001984127, %v916_v3  ;;  %vm2735_vm8 = vcmp.lt.f32.partialorder %v2734_v5, 8388608.0  ;;  %v3845_v11 = vmul.f32 %v3833_v15, %v406_v9  ;;  %v695_v10 = vand.u32 2147483647, %v3646_v2 }
 0x10b   :  { %v949_v4 = vadd.f32 -0.0001984127, %v917_v14  ;;  %v1199_v50 = vpack.c.bf16 %v1171_v32, %v1170_v31  ;;  %v2745_v41 = vcvt.s32.f32 %v2744_v44  ;;  %v3849_v17 = vmul.f32 %v3833_v15, %v410_v29 }
 0x10c   :  { %v980_v19 = vmul.f32 %v948_v13, %v884_v59  ;;  %v2741_v7 = vsel %vm2735_vm8, %v2740_v22, %v3775_v38  ;;  %v2747_v57 = vand.u32 2147483648, %v510_v16  ;;  %vm3852_vm9 = vcmp.gt.f32.partialorder %v694_v1, 1.5707964 }
 0x10d   :  { %v981_v34 = vmul.f32 %v949_v4, %v885_v27  ;;  %2523 = vmatmul.mubr.bf16.gmra.mxu0 %v1199_v50  ;;  %v2746_v43 = vand.u32 2147483647, %v2745_v41  ;;  %v790_v35 = vsel %vm758_vm6, 3.1415927, %v3153_v36  ;;  %v245_v38 = vmul.f32 %v3862_v21, %v164_v48  ;;  %v179_v48 = vpop.permute.xlu1 %178 }
 0x10e   :  { %v1012_v51 = vadd.f32 0.008333333, %v980_v19  ;;  %vm727_vm10 = vcmp.gt.f32.partialorder %v695_v10, 1.5707964  ;;  %v791_v62 = vsel %vm759_vm7, 3.1415927, %v3153_v36  ;;  %v822_v54 = vsub.f32 %v790_v35, %v3644_v30 }
 0x10f   :  { %v1013_v60 = vadd.f32 0.008333333, %v981_v34  ;;  %v2742_v6 = vand.u32 2147483647, %v510_v16  ;;  %v823_v33 = vsub.f32 %v791_v62, %v3646_v2  ;;  %v283_v9 = vadd.f32 %v3873_v26, %v245_v38 }
 0x110   :  { %v1044_v52 = vmul.f32 %v1012_v51, %v884_v59  ;;  %v3876_v25 = vmul.f32 6.28125, %v2741_v7  ;;  %v2748_v61 = vor.u32 %v2747_v57, %v2746_v43  ;;  %v3881_v5 = vsel %vm3852_vm9, %v822_v54, %v3644_v30 }
 0x111   :  { %v1045_v0 = vmul.f32 %v1013_v60, %v885_v27  ;;  %v1108_v8 = vmul.f32 %v884_v59, %v3816_v39  ;;  %v3885_v3 = vsel %vm727_vm10, %v823_v33, %v3646_v2  ;;  %v886_v22 = vmul.f32 %v3881_v5, %v3881_v5  ;;  %v382_v41 = vpop.permute.xlu1 %381 }
 0x112   :  { %v1076_v47 = vadd.f32 -0.16666667, %v1044_v52  ;;  %v1109_v1 = vmul.f32 %v885_v27, %v3822_v56  ;;  %v887_v31 = vmul.f32 %v3885_v3, %v3885_v3  ;;  %v248_v32 = vmul.f32 %v3862_v21, %v179_v48 }
 0x113   :  { %v1077_v14 = vadd.f32 -0.16666667, %v1045_v0  ;;  %vm2743_vm11 = vcmp.lt.f32.partialorder %v2742_v6, 8388608.0  ;;  %v918_v30 = vmul.f32 2.7557319e-06, %v886_v22  ;;  %v3894_v44 = vadd.f32 %v3660_v58, %v283_v9 }
 0x114   :  { %v1140_v13 = vmul.f32 %v1108_v8, %v1076_v47  ;;  %v3896_v59 = vmul.f32 0.0019353072, %v2741_v7  ;;  %v3898_v4 = vsel %vm2743_vm11, %v2748_v61, %v510_v16  ;;  %v919_v29 = vmul.f32 2.7557319e-06, %v887_v31 }
 0x115   :  { %v1141_v2 = vmul.f32 %v1109_v1, %v1077_v14  ;;  %v605_v27 = vsub.f32 %v3770_v49, %v3876_v25  ;;  %v950_v50 = vadd.f32 -0.0001984127, %v918_v30  ;;  %v512_v19 = vmul.f32 0.15915494, %v3894_v44  ;;  %v386_v47 = vpop.permute.xlu1 %385 }
 0x116   :  { %v1172_v10 = vadd.f32 %v1140_v13, %v3816_v39  ;;  %v951_v57 = vadd.f32 -0.0001984127, %v919_v29  ;;  %v247_v58 = vmul.f32 %v3862_v21, %v174_v46  ;;  %v286_v7 = vadd.f32 %v3873_v26, %v248_v32 }
 0x117   :  { %v1173_v34 = vadd.f32 %v1141_v2, %v3822_v56  ;;  %vm760_vm12 = vcmp.ge.f32.partialorder %v3653_v20, 0.0  ;;  %v3909_v16 = vmul.f32 6.28125, %v3898_v4  ;;  %v982_v53 = vmul.f32 %v950_v50, %v886_v22 }
 0x118   :  { %v1110_v51 = vmul.f32 %v886_v22, %v3881_v5  ;;  %v2760_v39 = vcvt.f32.s32 %v512_v19  ;;  %vm761_vm13 = vcmp.ge.f32.partialorder %v3668_v45, 0.0  ;;  %v983_v35 = vmul.f32 %v951_v57, %v887_v31 }
 0x119   :  { %v1200_v43 = vpack.c.bf16 %v1173_v34, %v1172_v10  ;;  %v1111_v56 = vmul.f32 %v887_v31, %v3885_v3  ;;  %v3915_v38 = vadd.f32 %v3780_v18, %v286_v7  ;;  %v1014_v46 = vadd.f32 0.008333333, %v982_v53 }
 0x11a   :  { %v2758_v60 = vand.u32 2147483647, %v512_v19  ;;  %v2761_v62 = vcvt.s32.f32 %v2760_v39  ;;  %v449_v54 = vmul.f32 %v3833_v15, %v382_v41  ;;  %v1015_v52 = vadd.f32 0.008333333, %v983_v35 }
 0x11b   :  { %2526 = vmatprep.mubr.bf16.mxu0 %v1200_v43  ;;  %v2763_v6 = vand.u32 2147483648, %v512_v19  ;;  %v285_v33 = vadd.f32 %v3873_v26, %v247_v58  ;;  %v515_v9 = vmul.f32 0.15915494, %v3915_v38  ;;  %v1046_v48 = vmul.f32 %v1014_v46, %v886_v22 }
 0x11c   :  { %v2762_v0 = vand.u32 2147483647, %v2761_v62  ;;  %v3921_v61 = vadd.f32 %v449_v54, %v3460_v23  ;;  %v696_v18 = vand.u32 2147483647, %v3653_v20  ;;  %v1047_v8 = vmul.f32 %v1015_v52, %v887_v31 }
 0x11d   :  { %v2782_v14 = vand.u32 2147483647, %v515_v9  ;;  %v2784_v1 = vcvt.f32.s32 %v515_v9  ;;  %v697_v32 = vand.u32 2147483647, %v3668_v45  ;;  %v1078_v13 = vadd.f32 -0.16666667, %v1046_v48 }
 0x11e   :  { %vm2759_vm14 = vcmp.lt.f32.partialorder %v2758_v60, 8388608.0  ;;  %v2764_v30 = vor.u32 %v2763_v6, %v2762_v0  ;;  %v513_v2 = vmul.f32 0.15915494, %v3921_v61  ;;  %v1079_v29 = vadd.f32 -0.16666667, %v1047_v8  ;;  %v184_v6 = vpop.permute.xlu1 %183 }
 0x11f   :  { %v2785_v10 = vcvt.s32.f32 %v2784_v1  ;;  %v2787_v22 = vand.u32 2147483648, %v515_v9  ;;  %v450_v50 = vmul.f32 %v3833_v15, %v386_v47  ;;  %v1142_v23 = vmul.f32 %v1110_v51, %v1078_v13 }
 0x120   :  { %v2765_v41 = vsel %vm2759_vm14, %v2764_v30, %v512_v19  ;;  %v2768_v34 = vcvt.f32.s32 %v513_v2  ;;  %vm3927_vm15 = vcmp.gt.f32.partialorder %v696_v18, 1.5707964  ;;  %v1143_v31 = vmul.f32 %v1111_v56, %v1079_v29 }
 0x121   :  { %vm3931_vm0 = vcmp.lt.f32.partialorder %v2782_v14, 8388608.0  ;;  %v2786_v7 = vand.u32 2147483647, %v2785_v10  ;;  %vm3935_vm1 = vcmp.gt.f32.partialorder %v697_v32, 1.5707964  ;;  %v1174_v39 = vadd.f32 %v1142_v23, %v3881_v5 }
 0x122   :  { %v576_v43 = vmul.f32 6.28125, %v2765_v41  ;;  %v2766_v51 = vand.u32 2147483647, %v513_v2  ;;  %v2769_v19 = vcvt.s32.f32 %v2768_v34  ;;  %vm763_vm2 = vcmp.ge.f32.partialorder %v3663_v24, 0.0 }
 0x123   :  { %vm762_vm3 = vcmp.ge.f32.partialorder %v3728_v63, 0.0  ;;  %v1175_v35 = vadd.f32 %v1143_v31, %v3885_v3  ;;  %v2788_v56 = vor.u32 %v2787_v22, %v2786_v7  ;;  %v2771_v46 = vand.u32 2147483648, %v513_v2  ;;  %v194_v22 = vpop.permute.xlu1 %193 }
 0x124   :  { %v792_v60 = vsel %vm760_vm12, 3.1415927, %v3153_v36  ;;  %v2770_v62 = vand.u32 2147483647, %v2769_v19  ;;  %v793_v5 = vsel %vm761_vm13, 3.1415927, %v3153_v36  ;;  %v3950_v52 = vadd.f32 %v450_v50, %v285_v33  ;;  %v422_v33 = vpop.permute.xlu0 %421 }
 0x125   :  { %v824_v54 = vsub.f32 %v792_v60, %v3653_v20  ;;  %v3956_v3 = vsub.f32 %v605_v27, %v3896_v59  ;;  %v1201_v48 = vpack.c.bf16 %v1175_v35, %v1174_v39  ;;  %v2789_v0 = vsel %vm3931_vm0, %v2788_v56, %v515_v9 }
 0x126   :  { %v825_v18 = vsub.f32 %v793_v5, %v3668_v45  ;;  %v606_v47 = vsub.f32 %v3810_v42, %v3909_v16  ;;  %v608_v8 = vsub.f32 %v3894_v44, %v576_v43  ;;  %v2772_v14 = vor.u32 %v2771_v46, %v2770_v62 }
 0x127   :  { %v3967_v1 = vsel %vm3927_vm15, %v824_v54, %v3653_v20  ;;  %2527 = vmatmul.mubr.bf16.gmra.mxu0 %v1201_v48  ;;  %v579_v49 = vmul.f32 6.28125, %v2789_v0  ;;  %v514_v42 = vmul.f32 0.15915494, %v3950_v52  ;;  %v638_v44 = vmul.f32 0.0019353072, %v3898_v4 }
 0x128   :  { %v3972_v25 = vsel %vm3935_vm1, %v825_v18, %v3668_v45  ;;  %v888_v59 = vmul.f32 %v3967_v1, %v3967_v1  ;;  %v640_v27 = vmul.f32 0.0019353072, %v2765_v41  ;;  %vm2767_vm4 = vcmp.lt.f32.partialorder %v2766_v51, 8388608.0 }
 0x129   :  { %v889_v20 = vmul.f32 %v3972_v25, %v3972_v25  ;;  %v3981_v16 = vmul.f32 %v3833_v15, %v422_v33  ;;  %v2773_v9 = vsel %vm2767_vm4, %v2772_v14, %v513_v2  ;;  %v698_v45 = vand.u32 2147483647, %v3728_v63 }
 0x12a   :  { %v920_v32 = vmul.f32 2.7557319e-06, %v888_v59  ;;  %v3984_v13 = vsub.f32 %v606_v47, %v638_v44  ;;  %v3986_v30 = vsub.f32 %v608_v8, %v640_v27  ;;  %v643_v29 = vmul.f32 0.0019353072, %v2789_v0 }
 0x12b   :  { %v921_v10 = vmul.f32 2.7557319e-06, %v889_v20  ;;  %v611_v4 = vsub.f32 %v3915_v38, %v579_v49  ;;  %v2776_v23 = vcvt.f32.s32 %v514_v42  ;;  %v699_v41 = vand.u32 2147483647, %v3663_v24 }
 0x12c   :  { %v952_v50 = vadd.f32 -0.0001984127, %v920_v32  ;;  %v3990_v34 = vmul.f32 6.28125, %v2773_v9  ;;  %v2774_v2 = vand.u32 2147483647, %v514_v42  ;;  %v249_v31 = vmul.f32 %v3862_v21, %v184_v6  ;;  %v199_v6 = vpop.permute.xlu1 %198 }
 0x12d   :  { %v953_v57 = vadd.f32 -0.0001984127, %v921_v10  ;;  %v2777_v7 = vcvt.s32.f32 %v2776_v23  ;;  %v2779_v53 = vand.u32 2147483648, %v514_v42  ;;  %vm3993_vm5 = vcmp.gt.f32.partialorder %v698_v45, 1.5707964 }
 0x12e   :  { %v984_v58 = vmul.f32 %v952_v50, %v888_v59  ;;  %v794_v38 = vsel %vm762_vm3, 3.1415927, %v3153_v36  ;;  %v795_v51 = vsel %vm763_vm2, 3.1415927, %v3153_v36  ;;  %v287_v19 = vadd.f32 %v3873_v26, %v249_v31 }
 0x12f   :  { %v985_v43 = vmul.f32 %v953_v57, %v889_v20  ;;  %v2778_v56 = vand.u32 2147483647, %v2777_v7  ;;  %vm731_vm6 = vcmp.gt.f32.partialorder %v699_v41, 1.5707964  ;;  %v826_v46 = vsub.f32 %v794_v38, %v3728_v63 }
 0x130   :  { %v1016_v35 = vadd.f32 0.008333333, %v984_v58  ;;  %v1112_v62 = vmul.f32 %v888_v59, %v3967_v1  ;;  %v827_v5 = vsub.f32 %v795_v51, %v3663_v24  ;;  %v4008_v54 = vadd.f32 %v3836_v12, %v287_v19 }
 0x131   :  { %v1017_v60 = vadd.f32 0.008333333, %v985_v43  ;;  %vm2775_vm7 = vcmp.lt.f32.partialorder %v2774_v2, 8388608.0  ;;  %v2780_v0 = vor.u32 %v2779_v53, %v2778_v56  ;;  %v4013_v18 = vsel %vm3993_vm5, %v826_v46, %v3728_v63 }
 0x132   :  { %v1048_v48 = vmul.f32 %v1016_v35, %v888_v59  ;;  %v4016_v8 = vsel %vm731_vm6, %v827_v5, %v3663_v24  ;;  %v890_v33 = vmul.f32 %v4013_v18, %v4013_v18  ;;  %v516_v14 = vmul.f32 0.15915494, %v4008_v54 }
 0x133   :  { %v1049_v47 = vmul.f32 %v1017_v60, %v889_v20  ;;  %v2781_v49 = vsel %vm2775_vm7, %v2780_v0, %v514_v42  ;;  %v891_v59 = vmul.f32 %v4016_v8, %v4016_v8  ;;  %v251_v44 = vmul.f32 %v3862_v21, %v194_v22  ;;  %v398_v22 = vpop.permute.xlu1 %397 }
 0x134   :  { %v1080_v12 = vadd.f32 -0.16666667, %v1048_v48  ;;  %v4024_v27 = vsub.f32 %v611_v4, %v643_v29  ;;  %v4026_v63 = vmul.f32 0.0019353072, %v2773_v9  ;;  %v1113_v24 = vmul.f32 %v889_v20, %v3972_v25 }
 0x135   :  { %v1081_v32 = vadd.f32 -0.16666667, %v1049_v47  ;;  %v922_v10 = vmul.f32 2.7557319e-06, %v890_v33  ;;  %v923_v50 = vmul.f32 2.7557319e-06, %v891_v59  ;;  %v252_v23 = vmul.f32 %v3862_v21, %v199_v6 }
 0x136   :  { %v1144_v45 = vmul.f32 %v1112_v62, %v1080_v12  ;;  %vm765_vm8 = vcmp.ge.f32.partialorder %v3956_v3, 0.0  ;;  %v609_v42 = vsub.f32 %v3921_v61, %v3990_v34  ;;  %v4033_v57 = vmul.f32 6.28125, %v2781_v49 }
 0x137   :  { %v1145_v41 = vmul.f32 %v1113_v24, %v1081_v32  ;;  %v2792_v29 = vcvt.f32.s32 %v516_v14  ;;  %v4035_v9 = vmul.f32 0.0019353072, %v2781_v49  ;;  %v954_v4 = vadd.f32 -0.0001984127, %v922_v10  ;;  %v402_v0 = vpop.permute.xlu1 %401 }
 0x138   :  { %v955_v2 = vadd.f32 -0.0001984127, %v923_v50  ;;  %v4038_v20 = vadd.f32 %v3873_v26, %v251_v44  ;;  %v1176_v31 = vadd.f32 %v1144_v45, %v3967_v1  ;;  %v2790_v7 = vand.u32 2147483647, %v516_v14 }
 0x139   :  { %v1177_v58 = vadd.f32 %v1145_v41, %v3972_v25  ;;  %v2793_v53 = vcvt.s32.f32 %v2792_v29  ;;  %v986_v39 = vmul.f32 %v954_v4, %v890_v33  ;;  %v290_v38 = vadd.f32 %v3873_v26, %v252_v23 }
 0x13a   :  { %v987_v43 = vmul.f32 %v955_v2, %v891_v59  ;;  %v453_v51 = vmul.f32 %v3833_v15, %v398_v22  ;;  %v2795_v56 = vand.u32 2147483648, %v516_v14  ;;  %v700_v46 = vand.u32 2147483647, %v3784_v40 }
 0x13b   :  { %v1202_v19 = vpack.c.bf16 %v1177_v58, %v1176_v31  ;;  %v2794_v35 = vand.u32 2147483647, %v2793_v53  ;;  %v1018_v60 = vadd.f32 0.008333333, %v986_v39  ;;  %v4046_v5 = vadd.f32 %v3845_v11, %v290_v38  ;;  %v204_v58 = vpop.permute.xlu1 %203 }
 0x13c   :  { %v1019_v62 = vadd.f32 0.008333333, %v987_v43  ;;  %v4049_v1 = vadd.f32 %v453_v51, %v3466_v28  ;;  %v1114_v25 = vmul.f32 %v890_v33, %v4013_v18  ;;  %v701_v48 = vand.u32 2147483647, %v3956_v3 }
 0x13d   :  { %2530 = vmatprep.mubr.bf16.mxu0 %v1202_v19  ;;  %v2796_v6 = vor.u32 %v2795_v56, %v2794_v35  ;;  %vm764_vm9 = vcmp.ge.f32.partialorder %v3784_v40, 0.0  ;;  %v1050_v47 = vmul.f32 %v1018_v60, %v890_v33  ;;  %v519_v49 = vmul.f32 0.15915494, %v4046_v5 }
 0x13e   :  { %v1051_v12 = vmul.f32 %v1019_v62, %v891_v59  ;;  %v517_v44 = vmul.f32 0.15915494, %v4049_v1  ;;  %v610_v11 = vsub.f32 %v3950_v52, %v4033_v57  ;;  %v1115_v28 = vmul.f32 %v891_v59, %v4016_v8 }
 0x13f   :  { %vm2791_vm10 = vcmp.lt.f32.partialorder %v2790_v7, 8388608.0  ;;  %vm4059_vm11 = vcmp.gt.f32.partialorder %v700_v46, 1.5707964  ;;  %v1082_v24 = vadd.f32 -0.16666667, %v1050_v47  ;;  %v2816_v50 = vcvt.f32.s32 %v519_v49 }
 0x140   :  { %v1083_v45 = vadd.f32 -0.16666667, %v1051_v12  ;;  %v2797_v10 = vsel %vm2791_vm10, %v2796_v6, %v516_v14  ;;  %v2814_v33 = vand.u32 2147483647, %v519_v49  ;;  %v2800_v23 = vcvt.f32.s32 %v517_v44 }
 0x141   :  { %vm4063_vm12 = vcmp.gt.f32.partialorder %v701_v48, 1.5707964  ;;  %v796_v52 = vsel %vm764_vm9, 3.1415927, %v3153_v36  ;;  %v1146_v59 = vmul.f32 %v1114_v25, %v1082_v24  ;;  %v2817_v29 = vcvt.s32.f32 %v2816_v50 }
 0x142   :  { %v1147_v57 = vmul.f32 %v1115_v28, %v1083_v45  ;;  %v797_v22 = vsel %vm765_vm8, 3.1415927, %v3153_v36  ;;  %vm766_vm13 = vcmp.ge.f32.partialorder %v3984_v13, 0.0  ;;  %v4074_v14 = vmul.f32 6.28125, %v2797_v10 }
 0x143   :  { %v2819_v4 = vand.u32 2147483648, %v519_v49  ;;  %v2798_v2 = vand.u32 2147483647, %v517_v44  ;;  %v2801_v31 = vcvt.s32.f32 %v2800_v23  ;;  %v1178_v7 = vadd.f32 %v1146_v59, %v4013_v18 }
 0x144   :  { %v1179_v53 = vadd.f32 %v1147_v57, %v4016_v8  ;;  %vm2815_vm14 = vcmp.lt.f32.partialorder %v2814_v33, 8388608.0  ;;  %v2818_v39 = vand.u32 2147483647, %v2817_v29  ;;  %v2803_v38 = vand.u32 2147483648, %v517_v44 }
 0x145   :  { %v2802_v43 = vand.u32 2147483647, %v2801_v31  ;;  %v828_v51 = vsub.f32 %v796_v52, %v3784_v40  ;;  %v829_v19 = vsub.f32 %v797_v22, %v3956_v3  ;;  %vm2799_vm15 = vcmp.lt.f32.partialorder %v2798_v2, 8388608.0 }
 0x146   :  { %v1203_v35 = vpack.c.bf16 %v1179_v53, %v1178_v7  ;;  %v2820_v56 = vor.u32 %v2819_v4, %v2818_v39  ;;  %v454_v46 = vmul.f32 %v3833_v15, %v402_v0  ;;  %v702_v62 = vand.u32 2147483647, %v3984_v13 }
 0x147   :  { %v2804_v60 = vor.u32 %v2803_v38, %v2802_v43  ;;  %v4084_v18 = vsel %vm4059_vm11, %v828_v51, %v3784_v40  ;;  %v4089_v8 = vsel %vm4063_vm12, %v829_v19, %v3956_v3  ;;  %v644_v40 = vmul.f32 0.0019353072, %v2797_v10  ;;  %v214_v3 = vpop.permute.xlu1 %213 }
 0x148   :  { %2531 = vmatmul.mubr.bf16.gmra.mxu0 %v1203_v35  ;;  %v2821_v25 = vsel %vm2815_vm14, %v2820_v56, %v519_v49  ;;  %v892_v6 = vmul.f32 %v4084_v18, %v4084_v18  ;;  %v893_v48 = vmul.f32 %v4089_v8, %v4089_v8  ;;  %v4097_v0 = vadd.f32 %v454_v46, %v4038_v20 }
 0x149   :  { %v583_v47 = vmul.f32 6.28125, %v2821_v25  ;;  %v2805_v12 = vsel %vm2799_vm15, %v2804_v60, %v517_v44  ;;  %v703_v28 = vand.u32 2147483647, %v3839_v55  ;;  %v4104_v49 = vsub.f32 %v609_v42, %v4026_v63 }
 0x14a   :  { %v647_v32 = vmul.f32 0.0019353072, %v2821_v25  ;;  %v581_v24 = vmul.f32 6.28125, %v2805_v12  ;;  %v924_v45 = vmul.f32 2.7557319e-06, %v892_v6  ;;  %v4107_v50 = vsub.f32 %v610_v11, %v4035_v9 }
 0x14b   :  { %v925_v20 = vmul.f32 2.7557319e-06, %v893_v48  ;;  %v518_v10 = vmul.f32 0.15915494, %v4097_v0  ;;  %vm4110_vm0 = vcmp.gt.f32.partialorder %v702_v62, 1.5707964  ;;  %v612_v33 = vsub.f32 %v4008_v54, %v4074_v14  ;;  %v219_v22 = vpop.permute.xlu1 %218 }
 0x14c   :  { %v645_v23 = vmul.f32 0.0019353072, %v2805_v12  ;;  %v956_v61 = vadd.f32 -0.0001984127, %v924_v45  ;;  %vm767_vm1 = vcmp.ge.f32.partialorder %v3839_v55, 0.0  ;;  %v615_v34 = vsub.f32 %v4046_v5, %v583_v47 }
 0x14d   :  { %v957_v63 = vadd.f32 -0.0001984127, %v925_v20  ;;  %v1116_v42 = vmul.f32 %v892_v6, %v4084_v18  ;;  %v2808_v9 = vcvt.f32.s32 %v518_v10  ;;  %v613_v11 = vsub.f32 %v4049_v1, %v581_v24 }
 0x14e   :  { %v988_v41 = vmul.f32 %v956_v61, %v892_v6  ;;  %v1117_v52 = vmul.f32 %v893_v48, %v4089_v8  ;;  %v798_v59 = vsel %vm766_vm13, 3.1415927, %v3153_v36  ;;  %vm735_vm2 = vcmp.gt.f32.partialorder %v703_v28, 1.5707964 }
 0x14f   :  { %v989_v54 = vmul.f32 %v957_v63, %v893_v48  ;;  %v2809_v57 = vcvt.s32.f32 %v2808_v9  ;;  %v799_v29 = vsel %vm767_vm1, 3.1415927, %v3153_v36  ;;  %v2806_v14 = vand.u32 2147483647, %v518_v10  ;;  %v414_v24 = vpop.permute.xlu1 %413 }
 0x150   :  { %v1020_v5 = vadd.f32 0.008333333, %v988_v41  ;;  %v830_v4 = vsub.f32 %v798_v59, %v3984_v13  ;;  %v831_v2 = vsub.f32 %v799_v29, %v3839_v55  ;;  %v2811_v7 = vand.u32 2147483648, %v518_v10 }
 0x151   :  { %v1021_v1 = vadd.f32 0.008333333, %v989_v54  ;;  %v2810_v31 = vand.u32 2147483647, %v2809_v57  ;;  %v253_v53 = vmul.f32 %v3862_v21, %v204_v58  ;;  %v256_v51 = vmul.f32 %v3862_v21, %v219_v22 }
 0x152   :  { %v1052_v39 = vmul.f32 %v1020_v5, %v892_v6  ;;  %v4131_v43 = vsel %vm4110_vm0, %v830_v4, %v3984_v13  ;;  %v4134_v38 = vsel %vm735_vm2, %v831_v2, %v3839_v55  ;;  %vm2807_vm3 = vcmp.lt.f32.partialorder %v2806_v14, 8388608.0 }
 0x153   :  { %v1053_v19 = vmul.f32 %v1021_v1, %v893_v48  ;;  %v2812_v35 = vor.u32 %v2811_v7, %v2810_v31  ;;  %v894_v56 = vmul.f32 %v4131_v43, %v4131_v43  ;;  %v895_v46 = vmul.f32 %v4134_v38, %v4134_v38 }
 0x154   :  { %v1084_v58 = vadd.f32 -0.16666667, %v1052_v39  ;;  %v291_v60 = vadd.f32 %v3873_v26, %v253_v53  ;;  %v294_v13 = vadd.f32 %v3873_v26, %v256_v51  ;;  %v4143_v47 = vsub.f32 %v612_v33, %v644_v40 }
 0x155   :  { %v1085_v62 = vadd.f32 -0.16666667, %v1053_v19  ;;  %v2813_v25 = vsel %vm2807_vm3, %v2812_v35, %v518_v10  ;;  %v926_v55 = vmul.f32 2.7557319e-06, %v894_v56  ;;  %v927_v6 = vmul.f32 2.7557319e-06, %v895_v46 }
 0x156   :  { %v4145_v48 = vsub.f32 %v615_v34, %v647_v32  ;;  %v1148_v12 = vmul.f32 %v1116_v42, %v1084_v58  ;;  %v255_v28 = vmul.f32 %v3862_v21, %v214_v3  ;;  %v4148_v45 = vsub.f32 %v613_v11, %v645_v23 }
 0x157   :  { %v1149_v20 = vmul.f32 %v1117_v52, %v1085_v62  ;;  %v958_v44 = vadd.f32 -0.0001984127, %v926_v55  ;;  %v959_v61 = vadd.f32 -0.0001984127, %v927_v6  ;;  %v4151_v9 = vmul.f32 6.28125, %v2813_v25 }
 0x158   :  { %v1180_v63 = vadd.f32 %v1148_v12, %v4084_v18  ;;  %v4154_v10 = vadd.f32 %v3849_v17, %v291_v60  ;;  %v4157_v40 = vadd.f32 %v3981_v16, %v294_v13  ;;  %vm769_vm4 = vcmp.ge.f32.partialorder %v4104_v49, 0.0 }
 0x159   :  { %v1181_v21 = vadd.f32 %v1149_v20, %v4089_v8  ;;  %v990_v3 = vmul.f32 %v958_v44, %v894_v56  ;;  %v991_v32 = vmul.f32 %v959_v61, %v895_v46  ;;  %v457_v33 = vmul.f32 %v3833_v15, %v414_v24  ;;  %v418_v20 = vpop.permute.xlu1 %417 }
 0x15a   :  { %v646_v23 = vmul.f32 0.0019353072, %v2813_v25  ;;  %v520_v34 = vmul.f32 0.15915494, %v4154_v10  ;;  %v4164_v18 = vadd.f32 %v3873_v26, %v255_v28  ;;  %v523_v17 = vmul.f32 0.15915494, %v4157_v40 }
 0x15b   :  { %v1204_v42 = vpack.c.bf16 %v1181_v21, %v1180_v63  ;;  %v1022_v11 = vadd.f32 0.008333333, %v990_v3  ;;  %v1023_v16 = vadd.f32 0.008333333, %v991_v32  ;;  %v4168_v41 = vadd.f32 %v457_v33, %v3477_v37 }
 0x15c   :  { %v1118_v8 = vmul.f32 %v894_v56, %v4131_v43  ;;  %v1119_v52 = vmul.f32 %v895_v46, %v4134_v38  ;;  %v2822_v59 = vand.u32 2147483647, %v520_v34  ;;  %v2824_v54 = vcvt.f32.s32 %v520_v34 }
 0x15d   :  { %2534 = vmatprep.mubr.bf16.mxu0 %v1204_v42  ;;  %v614_v57 = vsub.f32 %v4097_v0, %v4151_v9  ;;  %v1054_v26 = vmul.f32 %v1022_v11, %v894_v56  ;;  %v1055_v29 = vmul.f32 %v1023_v16, %v895_v46  ;;  %v2848_v22 = vcvt.f32.s32 %v523_v17 }
 0x15e   :  { %v2825_v5 = vcvt.s32.f32 %v2824_v54  ;;  %v2846_v14 = vand.u32 2147483647, %v523_v17  ;;  %v521_v4 = vmul.f32 0.15915494, %v4168_v41  ;;  %v704_v37 = vand.u32 2147483647, %v3986_v30 }
 0x15f   :  { %v1086_v2 = vadd.f32 -0.16666667, %v1054_v26  ;;  %v1087_v1 = vadd.f32 -0.16666667, %v1055_v29  ;;  %v2827_v31 = vand.u32 2147483648, %v520_v34  ;;  %v2849_v7 = vcvt.s32.f32 %v2848_v22 }
 0x160   :  { %vm4176_vm5 = vcmp.lt.f32.partialorder %v2822_v59, 8388608.0  ;;  %v2826_v39 = vand.u32 2147483647, %v2825_v5  ;;  %v2851_v51 = vand.u32 2147483648, %v523_v17  ;;  %v2832_v0 = vcvt.f32.s32 %v521_v4 }
 0x161   :  { %v1150_v19 = vmul.f32 %v1118_v8, %v1086_v2  ;;  %v1151_v35 = vmul.f32 %v1119_v52, %v1087_v1  ;;  %v2850_v56 = vand.u32 2147483647, %v2849_v7  ;;  %v2830_v46 = vand.u32 2147483647, %v521_v4 }
 0x162   :  { %vm770_vm6 = vcmp.ge.f32.partialorder %v4107_v50, 0.0  ;;  %v2828_v58 = vor.u32 %v2827_v31, %v2826_v39  ;;  %vm2847_vm7 = vcmp.lt.f32.partialorder %v2846_v14, 8388608.0  ;;  %v2833_v60 = vcvt.s32.f32 %v2832_v0 }
 0x163   :  { %v2835_v13 = vand.u32 2147483648, %v521_v4  ;;  %v1182_v62 = vadd.f32 %v1150_v19, %v4131_v43  ;;  %v1183_v25 = vadd.f32 %v1151_v35, %v4134_v38  ;;  %v2852_v55 = vor.u32 %v2851_v51, %v2850_v56 }
 0x164   :  { %v705_v6 = vand.u32 2147483647, %v4104_v49  ;;  %v2829_v12 = vsel %vm4176_vm5, %v2828_v58, %v520_v34  ;;  %v2834_v28 = vand.u32 2147483647, %v2833_v60  ;;  %vm768_vm8 = vcmp.ge.f32.partialorder %v3986_v30, 0.0 }
 0x165   :  { %v801_v24 = vsel %vm769_vm4, 3.1415927, %v3153_v36  ;;  %v1205_v44 = vpack.c.bf16 %v1183_v25, %v1182_v62  ;;  %v584_v61 = vmul.f32 6.28125, %v2829_v12  ;;  %v2853_v63 = vsel %vm2847_vm7, %v2852_v55, %v523_v17 }
 0x166   :  { %vm2831_vm9 = vcmp.lt.f32.partialorder %v2830_v46, 8388608.0  ;;  %v587_v43 = vmul.f32 6.28125, %v2853_v63  ;;  %v2836_v38 = vor.u32 %v2835_v13, %v2834_v28  ;;  %vm736_vm10 = vcmp.gt.f32.partialorder %v704_v37, 1.5707964 }
 0x167   :  { %v800_v9 = vsel %vm768_vm8, 3.1415927, %v3153_v36  ;;  %2535 = vmatmul.mubr.bf16.gmra.mxu0 %v1205_v44  ;;  %vm737_vm11 = vcmp.gt.f32.partialorder %v705_v6, 1.5707964  ;;  %v833_v3 = vsub.f32 %v801_v24, %v4104_v49  ;;  %v458_v32 = vmul.f32 %v3833_v15, %v418_v20 }
 0x168   :  { %v832_v21 = vsub.f32 %v800_v9, %v3986_v30  ;;  %v4194_v33 = vsub.f32 %v614_v57, %v646_v23  ;;  %v616_v34 = vsub.f32 %v4154_v10, %v584_v61  ;;  %v648_v42 = vmul.f32 0.0019353072, %v2829_v12 }
 0x169   :  { %v2837_v17 = vsel %vm2831_vm9, %v2836_v38, %v521_v4  ;;  %v619_v11 = vsub.f32 %v4157_v40, %v587_v43  ;;  %v706_v52 = vand.u32 2147483647, %v4107_v50  ;;  %v4203_v59 = vsel %vm737_vm11, %v833_v3, %v4104_v49 }
 0x16a   :  { %v585_v16 = vmul.f32 6.28125, %v2837_v17  ;;  %v4199_v8 = vsel %vm736_vm10, %v832_v21, %v3986_v30  ;;  %v4208_v23 = vadd.f32 %v458_v32, %v4164_v18  ;;  %v707_v10 = vand.u32 2147483647, %v4024_v27 }
 0x16b   :  { %v896_v15 = vmul.f32 %v4199_v8, %v4199_v8  ;;  %v651_v54 = vmul.f32 0.0019353072, %v2853_v63  ;;  %v649_v57 = vmul.f32 0.0019353072, %v2837_v17  ;;  %v897_v30 = vmul.f32 %v4203_v59, %v4203_v59 }
 0x16c   :  { %v617_v40 = vsub.f32 %v4168_v41, %v585_v16  ;;  %v4214_v26 = vsub.f32 %v616_v34, %v648_v42  ;;  %v522_v49 = vmul.f32 0.15915494, %v4208_v23  ;;  %vm771_vm12 = vcmp.ge.f32.partialorder %v4024_v27, 0.0 }
 0x16d   :  { %v928_v29 = vmul.f32 2.7557319e-06, %v896_v15  ;;  %vm773_vm13 = vcmp.ge.f32.partialorder %v4148_v45, 0.0  ;;  %v4219_v18 = vsub.f32 %v619_v11, %v651_v54  ;;  %v929_v22 = vmul.f32 2.7557319e-06, %v897_v30 }
 0x16e   :  { %vm4221_vm14 = vcmp.gt.f32.partialorder %v706_v52, 1.5707964  ;;  %v802_v41 = vsel %vm770_vm6, 3.1415927, %v3153_v36  ;;  %v1120_v4 = vmul.f32 %v896_v15, %v4199_v8  ;;  %v2840_v37 = vcvt.f32.s32 %v522_v49 }
 0x16f   :  { %v960_v14 = vadd.f32 -0.0001984127, %v928_v29  ;;  %vm739_vm15 = vcmp.gt.f32.partialorder %v707_v10, 1.5707964  ;;  %v4229_v2 = vsub.f32 %v617_v40, %v649_v57  ;;  %v961_v1 = vadd.f32 -0.0001984127, %v929_v22 }
 0x170   :  { %v803_v31 = vsel %vm771_vm12, 3.1415927, %v3153_v36  ;;  %v834_v7 = vsub.f32 %v802_v41, %v4107_v50  ;;  %v2838_v39 = vand.u32 2147483647, %v522_v49  ;;  %v2841_v51 = vcvt.s32.f32 %v2840_v37 }
 0x171   :  { %v992_v53 = vmul.f32 %v960_v14, %v896_v15  ;;  %v835_v0 = vsub.f32 %v803_v31, %v4024_v27  ;;  %v993_v19 = vmul.f32 %v961_v1, %v897_v30  ;;  %v2843_v35 = vand.u32 2147483648, %v522_v49 }
 0x172   :  { %v4237_v56 = vsel %vm4221_vm14, %v834_v7, %v4107_v50  ;;  %v708_v46 = vand.u32 2147483647, %v4143_v47  ;;  %v2842_v60 = vand.u32 2147483647, %v2841_v51  ;;  %v1121_v55 = vmul.f32 %v897_v30, %v4203_v59 }
 0x173   :  { %v1024_v58 = vadd.f32 0.008333333, %v992_v53  ;;  %v4241_v13 = vsel %vm739_vm15, %v835_v0, %v4024_v27  ;;  %v898_v62 = vmul.f32 %v4237_v56, %v4237_v56  ;;  %v1025_v25 = vadd.f32 0.008333333, %v993_v19 }
 0x174   :  { %v899_v6 = vmul.f32 %v4241_v13, %v4241_v13  ;;  %v709_v12 = vand.u32 2147483647, %v4148_v45  ;;  %vm2839_vm0 = vcmp.lt.f32.partialorder %v2838_v39, 8388608.0  ;;  %v2844_v28 = vor.u32 %v2843_v35, %v2842_v60 }
 0x175   :  { %v1056_v50 = vmul.f32 %v1024_v58, %v896_v15  ;;  %v930_v24 = vmul.f32 2.7557319e-06, %v898_v62  ;;  %v1057_v20 = vmul.f32 %v1025_v25, %v897_v30  ;;  %vm4249_vm1 = vcmp.gt.f32.partialorder %v708_v46, 1.5707964 }
 0x176   :  { %v931_v44 = vmul.f32 2.7557319e-06, %v899_v6  ;;  %vm772_vm2 = vcmp.ge.f32.partialorder %v4143_v47, 0.0  ;;  %vm774_vm3 = vcmp.ge.f32.partialorder %v4194_v33, 0.0  ;;  %v2845_v63 = vsel %vm2839_vm0, %v2844_v28, %v522_v49 }
 0x177   :  { %v1088_v61 = vadd.f32 -0.16666667, %v1056_v50  ;;  %v962_v43 = vadd.f32 -0.0001984127, %v930_v24  ;;  %v804_v38 = vsel %vm772_vm2, 3.1415927, %v3153_v36  ;;  %v1122_v52 = vmul.f32 %v898_v62, %v4237_v56 }
 0x178   :  { %v1089_v9 = vadd.f32 -0.16666667, %v1057_v20  ;;  %v586_v21 = vmul.f32 6.28125, %v2845_v63  ;;  %vm4256_vm4 = vcmp.gt.f32.partialorder %v709_v12, 1.5707964  ;;  %v836_v32 = vsub.f32 %v804_v38, %v4143_v47 }
 0x179   :  { %v1152_v34 = vmul.f32 %v1120_v4, %v1088_v61  ;;  %v963_v42 = vadd.f32 -0.0001984127, %v931_v44  ;;  %v994_v17 = vmul.f32 %v962_v43, %v898_v62  ;;  %v805_v11 = vsel %vm773_vm13, 3.1415927, %v3153_v36 }
 0x17a   :  { %v1153_v16 = vmul.f32 %v1121_v55, %v1089_v9  ;;  %v837_v15 = vsub.f32 %v805_v11, %v4148_v45  ;;  %v4269_v10 = vsel %vm4249_vm1, %v836_v32, %v4143_v47  ;;  %v618_v54 = vsub.f32 %v4208_v23, %v586_v21  ;;  %v3140_v11 = vld [vmem:[%s5410_s5 + $0x30] sm:$0xff]  }
 0x17b   :  { %v995_v40 = vmul.f32 %v963_v42, %v899_v6  ;;  %v1026_v57 = vadd.f32 0.008333333, %v994_v17  ;;  %v900_v30 = vmul.f32 %v4269_v10, %v4269_v10  ;;  %v1184_v29 = vadd.f32 %v1152_v34, %v4199_v8 }
 0x17c   :  { %v1185_v49 = vadd.f32 %v1153_v16, %v4203_v59  ;;  %v4279_v22 = vsel %vm4256_vm4, %v837_v15, %v4148_v45  ;;  %v710_v5 = vand.u32 2147483647, %v4194_v33  ;;  %vm777_vm5 = vcmp.ge.f32.partialorder %v4229_v2, 0.0  ;;  %v3141_v16 = vld [vmem:[%s5410_s5 + $0x28] sm:$0xff]  }
 0x17d   :  { %v1027_v47 = vadd.f32 0.008333333, %v995_v40  ;;  %v1058_v23 = vmul.f32 %v1026_v57, %v898_v62  ;;  %v901_v41 = vmul.f32 %v4279_v22, %v4279_v22  ;;  %v932_v14 = vmul.f32 2.7557319e-06, %v900_v30 }
 0x17e   :  { %v1206_v4 = vpack.c.bf16 %v1185_v49, %v1184_v29  ;;  %v650_v37 = vmul.f32 0.0019353072, %v2845_v63  ;;  %v1123_v8 = vmul.f32 %v899_v6, %v4241_v13  ;;  %v711_v59 = vand.u32 2147483647, %v4145_v48 }
 0x17f   :  { %v1059_v1 = vmul.f32 %v1027_v47, %v899_v6  ;;  %v1090_v31 = vadd.f32 -0.16666667, %v1058_v23  ;;  %v933_v45 = vmul.f32 2.7557319e-06, %v901_v41  ;;  %v964_v7 = vadd.f32 -0.0001984127, %v932_v14 }
 0x180   :  { %2538 = vmatprep.mubr.bf16.mxu0 %v1206_v4  ;;  %v4287_v53 = vsub.f32 %v618_v54, %v650_v37  ;;  %vm4289_vm6 = vcmp.gt.f32.partialorder %v710_v5, 1.5707964  ;;  %vm4293_vm7 = vcmp.gt.f32.partialorder %v711_v59, 1.5707964  ;;  %vm775_vm8 = vcmp.ge.f32.partialorder %v4145_v48, 0.0 }
 0x181   :  { %v1091_v0 = vadd.f32 -0.16666667, %v1059_v1  ;;  %v1154_v19 = vmul.f32 %v1122_v52, %v1090_v31  ;;  %v965_v35 = vadd.f32 -0.0001984127, %v933_v45  ;;  %v996_v46 = vmul.f32 %v964_v7, %v900_v30  ;;  %v3146_v45 = vld [vmem:[%s5410_s5] sm:$0xff]  }
 0x182   :  { %v1124_v58 = vmul.f32 %v900_v30, %v4269_v10  ;;  %v806_v60 = vsel %vm774_vm3, 3.1415927, %v3153_v36  ;;  %v807_v62 = vsel %vm775_vm8, 3.1415927, %v3153_v36  ;;  %v712_v25 = vand.u32 2147483647, %v4214_v26 }
 0x183   :  { %v1155_v55 = vmul.f32 %v1123_v8, %v1091_v0  ;;  %v1186_v6 = vadd.f32 %v1154_v19, %v4237_v56  ;;  %v997_v12 = vmul.f32 %v965_v35, %v901_v41  ;;  %v1028_v50 = vadd.f32 0.008333333, %v996_v46  ;;  %v3139_v56 = vld [vmem:[%s5410_s5 + $0x38] sm:$0xff]  }
 0x184   :  { %v838_v28 = vsub.f32 %v806_v60, %v4194_v33  ;;  %v839_v24 = vsub.f32 %v807_v62, %v4145_v48  ;;  %v713_v20 = vand.u32 2147483647, %v4229_v2  ;;  %vm4308_vm9 = vcmp.gt.f32.partialorder %v712_v25, 1.5707964  ;;  %2550 = vmatprep.subr.bf16.mxu1 %v3139_v56 }
 0x185   :  { %vm778_vm10 = vcmp.ge.f32.partialorder %v4287_v53, 0.0  ;;  %v1187_v27 = vadd.f32 %v1155_v55, %v4241_v13  ;;  %v1029_v61 = vadd.f32 0.008333333, %v997_v12  ;;  %v1060_v63 = vmul.f32 %v1028_v50, %v900_v30  ;;  %2551 = vmatpush3.bf16.msra.mxu1 %v3139_v56 }
 0x186   :  { %vm776_vm11 = vcmp.ge.f32.partialorder %v4214_v26, 0.0  ;;  %v4321_v43 = vsel %vm4289_vm6, %v838_v28, %v4194_v33  ;;  %v4326_v38 = vsel %vm4293_vm7, %v839_v24, %v4145_v48  ;;  %vm4328_vm12 = vcmp.gt.f32.partialorder %v713_v20, 1.5707964  ;;  %2552 = vmatprep.subr.bf16.mxu1 %v3140_v11 }
 0x187   :  { %v808_v9 = vsel %vm776_vm11, 3.1415927, %v3153_v36  ;;  %v1207_v21 = vpack.c.bf16 %v1187_v27, %v1186_v6  ;;  %v1061_v3 = vmul.f32 %v1029_v61, %v901_v41  ;;  %v1092_v32 = vadd.f32 -0.16666667, %v1060_v63 }
 0x188   :  { %v902_v34 = vmul.f32 %v4321_v43, %v4321_v43  ;;  %v903_v33 = vmul.f32 %v4326_v38, %v4326_v38  ;;  %v809_v48 = vsel %vm777_vm5, 3.1415927, %v3153_v36  ;;  %v840_v42 = vsub.f32 %v808_v9, %v4214_v26 }
 0x189   :  { %v714_v17 = vand.u32 2147483647, %v4287_v53  ;;  %2539 = vmatmul.mubr.bf16.gmra.mxu0 %v1207_v21  ;;  %v1093_v52 = vadd.f32 -0.16666667, %v1061_v3  ;;  %v1125_v15 = vmul.f32 %v901_v41, %v4279_v22  ;;  %v1156_v54 = vmul.f32 %v1124_v58, %v1092_v32  ;;  %v3142_v41 = vld [vmem:[%s5410_s5 + $0x20] sm:$0xff]   ;;  %2553 = vmatpush3.bf16.msra.mxu1 %v3140_v11 }
 0x18a   :  { %v934_v40 = vmul.f32 2.7557319e-06, %v902_v34  ;;  %v935_v57 = vmul.f32 2.7557319e-06, %v903_v33  ;;  %v841_v30 = vsub.f32 %v809_v48, %v4229_v2  ;;  %v4353_v29 = vsel %vm4308_vm9, %v840_v42, %v4214_v26  ;;  %2554 = vmatprep.subr.bf16.mxu1 %v3141_v16 }
 0x18b   :  { %v1157_v49 = vmul.f32 %v1125_v15, %v1093_v52  ;;  %v1188_v5 = vadd.f32 %v1156_v54, %v4269_v10  ;;  %v904_v23 = vmul.f32 %v4353_v29, %v4353_v29  ;;  %v715_v26 = vand.u32 2147483647, %v4219_v18 }
 0x18c   :  { %v966_v47 = vadd.f32 -0.0001984127, %v934_v40  ;;  %v967_v14 = vadd.f32 -0.0001984127, %v935_v57  ;;  %v4364_v4 = vsel %vm4328_vm12, %v841_v30, %v4229_v2  ;;  %vm4367_vm13 = vcmp.gt.f32.partialorder %v714_v17, 1.5707964 }
 0x18d   :  { %v1189_v10 = vadd.f32 %v1157_v49, %v4279_v22  ;;  %v905_v59 = vmul.f32 %v4364_v4, %v4364_v4  ;;  %v936_v1 = vmul.f32 2.7557319e-06, %v904_v23  ;;  %vm4374_vm14 = vcmp.gt.f32.partialorder %v715_v26, 1.5707964  ;;  %v3143_v22 = vld [vmem:[%s5410_s5 + $0x18] sm:$0xff]   ;;  %2555 = vmatpush3.bf16.msra.mxu1 %v3141_v16 }
 0x18e   :  { %v998_v8 = vmul.f32 %v966_v47, %v902_v34  ;;  %v999_v31 = vmul.f32 %v967_v14, %v903_v33  ;;  %vm779_vm15 = vcmp.ge.f32.partialorder %v4219_v18, 0.0  ;;  %v810_v19 = vsel %vm778_vm10, 3.1415927, %v3153_v36  ;;  %2556 = vmatprep.subr.bf16.mxu1 %v3142_v41 }
 0x18f   :  { %v1208_v2 = vpack.c.bf16 %v1189_v10, %v1188_v5  ;;  %v937_v39 = vmul.f32 2.7557319e-06, %v905_v59  ;;  %v968_v51 = vadd.f32 -0.0001984127, %v936_v1  ;;  %v811_v35 = vsel %vm779_vm15, 3.1415927, %v3153_v36 }
 0x190   :  { %v1030_v7 = vadd.f32 0.008333333, %v998_v8  ;;  %v1031_v0 = vadd.f32 0.008333333, %v999_v31  ;;  %v842_v62 = vsub.f32 %v810_v19, %v4287_v53  ;;  %v1126_v55 = vmul.f32 %v902_v34, %v4321_v43  ;;  %v3144_v10 = vld [vmem:[%s5410_s5 + $0x10] sm:$0xff]   ;;  %v3145_v31 = vld [vmem:[%s5410_s5 + $0x8] sm:$0xff]  }
 0x191   :  { %2542 = vmatprep.mubr.bf16.mxu0 %v1208_v2  ;;  %v969_v58 = vadd.f32 -0.0001984127, %v937_v39  ;;  %v1000_v60 = vmul.f32 %v968_v51, %v904_v23  ;;  %v843_v6 = vsub.f32 %v811_v35, %v4219_v18  ;;  %v1127_v44 = vmul.f32 %v903_v33, %v4326_v38  ;;  %2557 = vmatpush3.bf16.msra.mxu1 %v3142_v41  ;;  %v4414_v2 = vld [vmem:[%s5411_s4] ss:$0 sm:$0xff] }
 0x192   :  { %v1062_v46 = vmul.f32 %v1030_v7, %v902_v34  ;;  %v1063_v25 = vmul.f32 %v1031_v0, %v903_v33  ;;  %v874_v24 = vsel %vm4367_vm13, %v842_v62, %v4287_v53  ;;  %2558 = vmatprep.subr.bf16.mxu1 %v3143_v22  ;;  %v1128_v3 = vmul.f32 %v904_v23, %v4353_v29 }
 0x193   :  { %v1001_v50 = vmul.f32 %v969_v58, %v905_v59  ;;  %v1032_v28 = vadd.f32 0.008333333, %v1000_v60  ;;  %v875_v27 = vsel %vm4374_vm14, %v843_v6, %v4219_v18  ;;  %v906_v61 = vmul.f32 %v874_v24, %v874_v24 }
 0x194   :  { %v1094_v12 = vadd.f32 -0.16666667, %v1062_v46  ;;  %v1095_v20 = vadd.f32 -0.16666667, %v1063_v25  ;;  %v907_v9 = vmul.f32 %v875_v27, %v875_v27  ;;  %v1129_v11 = vmul.f32 %v905_v59, %v4364_v4 }
 0x195   :  { %v1033_v56 = vadd.f32 0.008333333, %v1001_v50  ;;  %v1064_v13 = vmul.f32 %v1032_v28, %v904_v23  ;;  %v938_v32 = vmul.f32 2.7557319e-06, %v906_v61  ;;  %2559 = vmatpush3.bf16.msra.mxu1 %v3143_v22  ;;  %v1130_v14 = vmul.f32 %v906_v61, %v874_v24 }
 0x196   :  { %v1158_v63 = vmul.f32 %v1126_v55, %v1094_v12  ;;  %v1159_v21 = vmul.f32 %v1127_v44, %v1095_v20  ;;  %v939_v33 = vmul.f32 2.7557319e-06, %v907_v9  ;;  %v1131_v37 = vmul.f32 %v907_v9, %v875_v27  ;;  %2560 = vmatprep.subr.bf16.mxu1 %v3144_v10 }
 0x197   :  { %v1065_v34 = vmul.f32 %v1033_v56, %v905_v59  ;;  %v1096_v48 = vadd.f32 -0.16666667, %v1064_v13  ;;  %v970_v17 = vadd.f32 -0.0001984127, %v938_v32 }
 0x198   :  { %v1190_v53 = vadd.f32 %v1158_v63, %v4321_v43  ;;  %v1191_v42 = vadd.f32 %v1159_v21, %v4326_v38  ;;  %v971_v52 = vadd.f32 -0.0001984127, %v939_v33 }
 0x199   :  { %v1097_v18 = vadd.f32 -0.16666667, %v1065_v34  ;;  %v1160_v16 = vmul.f32 %v1128_v3, %v1096_v48  ;;  %v1002_v54 = vmul.f32 %v970_v17, %v906_v61  ;;  %2561 = vmatpush3.bf16.msra.mxu1 %v3144_v10 }
 0x19a   :  { %v1209_v15 = vpack.c.bf16 %v1191_v42, %v1190_v53  ;;  %v1003_v57 = vmul.f32 %v971_v52, %v907_v9  ;;  %2562 = vmatprep.subr.bf16.mxu1 %v3145_v31 }
 0x19b   :  { %v1161_v40 = vmul.f32 %v1129_v11, %v1097_v18  ;;  %v1034_v30 = vadd.f32 0.008333333, %v1002_v54  ;;  %v1192_v43 = vadd.f32 %v1160_v16, %v4353_v29 }
 0x19c   :  { %2543 = vmatmul.mubr.bf16.gmra.mxu0 %v1209_v15  ;;  %v1035_v5 = vadd.f32 0.008333333, %v1003_v57 }
 0x19d   :  { %v1193_v49 = vadd.f32 %v1161_v40, %v4364_v4  ;;  %v1066_v47 = vmul.f32 %v1034_v30, %v906_v61  ;;  %2563 = vmatpush3.bf16.msra.mxu1 %v3145_v31 }
 0x19e   :  { %v1067_v23 = vmul.f32 %v1035_v5, %v907_v9  ;;  %2564 = vmatprep.subr.bf16.mxu1 %v3146_v45 }
 0x19f   :  { %v1210_v38 = vpack.c.bf16 %v1193_v49, %v1192_v43  ;;  %v1098_v41 = vadd.f32 -0.16666667, %v1066_v47 }
 0x1a0   :  { %v1099_v26 = vadd.f32 -0.16666667, %v1067_v23 }
 0x1a1   :  { %2546 = vmatprep.mubr.bf16.mxu0 %v1210_v38  ;;  %v1162_v8 = vmul.f32 %v1130_v14, %v1098_v41  ;;  %2565 = vmatpush3.bf16.msra.mxu1 %v3146_v45 }
 0x1a2   :  { %v1163_v59 = vmul.f32 %v1131_v37, %v1099_v26 }
 0x1a3   :  { %v1194_v1 = vadd.f32 %v1162_v8, %v874_v24 }
 0x1a4   :  { %v1195_v29 = vadd.f32 %v1163_v59, %v875_v27 }
 0x1a6   :  { %v1211_v4 = vpack.c.bf16 %v1195_v29, %v1194_v1 }
 0x1a8   :  { %2547 = vmatmul.mubr.bf16.gmra.mxu0 %v1211_v4 }
 0x1ba   :  { %v2520_v7 = vpop.f32.mrf.mxu0 }
 0x1bb   :  { %v1326_v39 = vadd.f32 %v2520_v7, %v4414_v2 }
 0x1bc   :  { %v1317_v51 = vpop.f32.mrf.mxu0 }
 0x1bd   :  { %v1446_v22 = vmul.f32 0.15915494, %v1326_v39  ;;  %v1318_v0 = vadd.f32 %v4414_v2, %v1317_v51 }
 0x1be   :  { %v2521_v19 = vpop.f32.mrf.mxu0 }
 0x1bf   :  { %v2872_v35 = vcvt.f32.s32 %v1446_v22  ;;  %v1444_v46 = vmul.f32 0.15915494, %v1318_v0  ;;  %v1329_v58 = vadd.f32 %v2521_v19, %v4414_v2  ;;  %v2870_v55 = vand.u32 2147483647, %v1446_v22 }
 0x1c0   :  { %v1320_v60 = vpop.f32.mrf.mxu0  ;;  %v2875_v28 = vand.u32 2147483648, %v1446_v22 }
 0x1c1   :  { %v2873_v62 = vcvt.s32.f32 %v2872_v35  ;;  %v2856_v25 = vcvt.f32.s32 %v1444_v46  ;;  %v1447_v6 = vmul.f32 0.15915494, %v1329_v58  ;;  %v1321_v12 = vadd.f32 %v4414_v2, %v1320_v60 }
 0x1c2   :  { %v2854_v20 = vand.u32 2147483647, %v1444_v46  ;;  %v2859_v56 = vand.u32 2147483648, %v1444_v46  ;;  %vm2871_vm0 = vcmp.lt.f32.partialorder %v2870_v55, 8388608.0 }
 0x1c3   :  { %v2874_v50 = vand.u32 2147483647, %v2873_v62  ;;  %v2857_v24 = vcvt.s32.f32 %v2856_v25  ;;  %v2880_v44 = vcvt.f32.s32 %v1447_v6  ;;  %v1445_v27 = vmul.f32 0.15915494, %v1321_v12 }
 0x1c4   :  { %v2878_v32 = vand.u32 2147483647, %v1447_v6  ;;  %vm2855_vm1 = vcmp.lt.f32.partialorder %v2854_v20, 8388608.0  ;;  %v2883_v48 = vand.u32 2147483648, %v1447_v6 }
 0x1c5   :  { %v2876_v61 = vor.u32 %v2875_v28, %v2874_v50  ;;  %v2858_v63 = vand.u32 2147483647, %v2857_v24  ;;  %v2881_v13 = vcvt.s32.f32 %v2880_v44  ;;  %v2864_v9 = vcvt.f32.s32 %v1445_v27 }
 0x1c6   :  { %v2862_v11 = vand.u32 2147483647, %v1445_v27  ;;  %vm2879_vm2 = vcmp.lt.f32.partialorder %v2878_v32, 8388608.0  ;;  %v2867_v52 = vand.u32 2147483648, %v1445_v27 }
 0x1c7   :  { %v2877_v21 = vsel %vm2871_vm0, %v2876_v61, %v1446_v22  ;;  %v2860_v3 = vor.u32 %v2859_v56, %v2858_v63  ;;  %v2882_v34 = vand.u32 2147483647, %v2881_v13  ;;  %v2865_v42 = vcvt.s32.f32 %v2864_v9 }
 0x1c8   :  { %v1510_v53 = vmul.f32 6.28125, %v2877_v21  ;;  %v1574_v5 = vmul.f32 0.0019353072, %v2877_v21  ;;  %vm2863_vm3 = vcmp.lt.f32.partialorder %v2862_v11, 8388608.0 }
 0x1c9   :  { %v2861_v33 = vsel %vm2855_vm1, %v2860_v3, %v1444_v46  ;;  %v2884_v18 = vor.u32 %v2883_v48, %v2882_v34  ;;  %v2866_v16 = vand.u32 2147483647, %v2865_v42 }
 0x1ca   :  { %v1508_v17 = vmul.f32 6.28125, %v2861_v33  ;;  %v1542_v15 = vsub.f32 %v1326_v39, %v1510_v53  ;;  %v1572_v38 = vmul.f32 0.0019353072, %v2861_v33 }
 0x1cb   :  { %v2885_v54 = vsel %vm2879_vm2, %v2884_v18, %v1447_v6  ;;  %v2868_v43 = vor.u32 %v2867_v52, %v2866_v16 }
 0x1cc   :  { %v1540_v57 = vsub.f32 %v1318_v0, %v1508_v17  ;;  %v1511_v30 = vmul.f32 6.28125, %v2885_v54  ;;  %v1575_v26 = vmul.f32 0.0019353072, %v2885_v54  ;;  %v4427_v59 = vsub.f32 %v1542_v15, %v1574_v5 }
 0x1cd   :  { %v2524_v40 = vpop.f32.mrf.mxu0  ;;  %v2869_v41 = vsel %vm2863_vm3, %v2868_v43, %v1445_v27 }
 0x1ce   :  { %v4421_v49 = vadd.f32 %v2524_v40, %v4414_v2  ;;  %v1543_v23 = vsub.f32 %v1329_v58, %v1511_v30  ;;  %v1509_v37 = vmul.f32 6.28125, %v2869_v41  ;;  %v1604_v1 = vsub.f32 %v1540_v57, %v1572_v38 }
 0x1cf   :  { %v1333_v47 = vpop.f32.mrf.mxu0  ;;  %v1573_v51 = vmul.f32 0.0019353072, %v2869_v41  ;;  %vm1702_vm4 = vcmp.ge.f32.partialorder %v4427_v59, 0.0 }
 0x1d0   :  { %v1450_v14 = vmul.f32 0.15915494, %v4421_v49  ;;  %v4425_v10 = vadd.f32 %v4414_v2, %v1333_v47  ;;  %v4429_v4 = vsub.f32 %v1543_v23, %v1575_v26  ;;  %v1541_v31 = vsub.f32 %v1321_v12, %v1509_v37 }
 0x1d1   :  { %v2525_v8 = vpop.f32.mrf.mxu0  ;;  %v1636_v12 = vand.u32 2147483647, %v1604_v1  ;;  %vm1700_vm9 = vcmp.ge.f32.partialorder %v1604_v1, 0.0  ;;  %v1734_v38 = vsel %vm1702_vm4, 3.1415927, %v3153_v36 }
 0x1d2   :  { %v2904_v29 = vcvt.f32.s32 %v1450_v14  ;;  %v1448_v45 = vmul.f32 0.15915494, %v4425_v10  ;;  %v4433_v7 = vadd.f32 %v2525_v8, %v4414_v2  ;;  %v2902_v22 = vand.u32 2147483647, %v1450_v14 }
 0x1d3   :  { %v1336_v39 = vpop.f32.mrf.mxu0  ;;  %v1605_v58 = vsub.f32 %v1541_v31, %v1573_v51  ;;  %v2907_v62 = vand.u32 2147483648, %v1450_v14  ;;  %vm1703_vm5 = vcmp.ge.f32.partialorder %v4429_v4, 0.0  ;;  %v1732_v18 = vsel %vm1700_vm9, 3.1415927, %v3153_v36 }
 0x1d4   :  { %v2905_v0 = vcvt.s32.f32 %v2904_v29  ;;  %v4436_v19 = vadd.f32 %v4414_v2, %v1336_v39  ;;  %v2886_v35 = vand.u32 2147483647, %v1448_v45  ;;  %v2888_v46 = vcvt.f32.s32 %v1448_v45 }
 0x1d5   :  { %v1451_v25 = vmul.f32 0.15915494, %v4433_v7  ;;  %vm2903_vm6 = vcmp.lt.f32.partialorder %v2902_v22, 8388608.0  ;;  %v2891_v27 = vand.u32 2147483648, %v1448_v45  ;;  %v1637_v9 = vand.u32 2147483647, %v1605_v58 }
 0x1d6   :  { %v2906_v60 = vand.u32 2147483647, %v2905_v0  ;;  %v2889_v55 = vcvt.s32.f32 %v2888_v46  ;;  %v1449_v6 = vmul.f32 0.15915494, %v4436_v19  ;;  %vm4442_vm7 = vcmp.lt.f32.partialorder %v2886_v35, 8388608.0 }
 0x1d7   :  { %v2910_v28 = vand.u32 2147483647, %v1451_v25  ;;  %v2912_v24 = vcvt.f32.s32 %v1451_v25  ;;  %v2915_v13 = vand.u32 2147483648, %v1451_v25  ;;  %vm1701_vm10 = vcmp.ge.f32.partialorder %v1605_v58, 0.0 }
 0x1d8   :  { %v2908_v50 = vor.u32 %v2907_v62, %v2906_v60  ;;  %v2890_v44 = vand.u32 2147483647, %v2889_v55  ;;  %v2896_v61 = vcvt.f32.s32 %v1449_v6  ;;  %v2894_v32 = vand.u32 2147483647, %v1449_v6 }
 0x1d9   :  { %v2913_v56 = vcvt.s32.f32 %v2912_v24  ;;  %v2899_v53 = vand.u32 2147483648, %v1449_v6  ;;  %vm4446_vm8 = vcmp.lt.f32.partialorder %v2910_v28, 8388608.0  ;;  %vm1668_vm11 = vcmp.gt.f32.partialorder %v1636_v12, 1.5707964 }
 0x1da   :  { %v2909_v63 = vsel %vm2903_vm6, %v2908_v50, %v1450_v14  ;;  %v2892_v3 = vor.u32 %v2891_v27, %v2890_v44  ;;  %v2897_v33 = vcvt.s32.f32 %v2896_v61  ;;  %vm1669_vm12 = vcmp.gt.f32.partialorder %v1637_v9, 1.5707964 }
 0x1db   :  { %v1514_v21 = vmul.f32 6.28125, %v2909_v63  ;;  %v2914_v48 = vand.u32 2147483647, %v2913_v56  ;;  %v1578_v11 = vmul.f32 0.0019353072, %v2909_v63  ;;  %v1764_v40 = vsub.f32 %v1732_v18, %v1604_v1 }
 0x1dc   :  { %v2893_v17 = vsel %vm4442_vm7, %v2892_v3, %v1448_v45  ;;  %v2898_v52 = vand.u32 2147483647, %v2897_v33  ;;  %v1733_v54 = vsel %vm1701_vm10, 3.1415927, %v3153_v36  ;;  %vm2895_vm13 = vcmp.lt.f32.partialorder %v2894_v32, 8388608.0 }
 0x1dd   :  { %v1546_v42 = vsub.f32 %v4421_v49, %v1514_v21  ;;  %v2916_v16 = vor.u32 %v2915_v13, %v2914_v48  ;;  %v1512_v15 = vmul.f32 6.28125, %v2893_v17  ;;  %v1765_v49 = vsub.f32 %v1733_v54, %v1605_v58 }
 0x1de   :  { %v2900_v43 = vor.u32 %v2899_v53, %v2898_v52  ;;  %v4459_v47 = vsel %vm1668_vm11, %v1764_v40, %v1604_v1  ;;  %v1735_v23 = vsel %vm1703_vm5, 3.1415927, %v3153_v36  ;;  %v1638_v37 = vand.u32 2147483647, %v4427_v59 }
 0x1df   :  { %v4455_v57 = vsub.f32 %v1546_v42, %v1578_v11  ;;  %v2917_v30 = vsel %vm4446_vm8, %v2916_v16, %v1451_v25  ;;  %v4467_v14 = vsel %vm1669_vm12, %v1765_v49, %v1605_v58  ;;  %v1544_v8 = vsub.f32 %v4425_v10, %v1512_v15 }
 0x1e0   :  { %v1515_v5 = vmul.f32 6.28125, %v2917_v30  ;;  %v2901_v41 = vsel %vm2895_vm13, %v2900_v43, %v1449_v6  ;;  %v1828_v1 = vmul.f32 %v4459_v47, %v4459_v47  ;;  %v1829_v29 = vmul.f32 %v4467_v14, %v4467_v14 }
 0x1e1   :  { %v1513_v26 = vmul.f32 6.28125, %v2901_v41  ;;  %vm1706_vm14 = vcmp.ge.f32.partialorder %v4455_v57, 0.0  ;;  %v1766_v31 = vsub.f32 %v1734_v38, %v4427_v59  ;;  %v1767_v45 = vsub.f32 %v1735_v23, %v4429_v4 }
 0x1e2   :  { %v1547_v39 = vsub.f32 %v4433_v7, %v1515_v5  ;;  %v1639_v51 = vand.u32 2147483647, %v4429_v4  ;;  %v1576_v22 = vmul.f32 0.0019353072, %v2893_v17  ;;  %v1860_v46 = vmul.f32 2.7557319e-06, %v1828_v1 }
 0x1e3   :  { %v1545_v0 = vsub.f32 %v4436_v19, %v1513_v26  ;;  %v1861_v10 = vmul.f32 2.7557319e-06, %v1829_v29  ;;  %v4482_v58 = vsel %vm1706_vm14, 3.1415927, %v3153_v36  ;;  %v1579_v60 = vmul.f32 0.0019353072, %v2917_v30 }
 0x1e4   :  { %v1577_v62 = vmul.f32 0.0019353072, %v2901_v41  ;;  %v4487_v55 = vsub.f32 %v1544_v8, %v1576_v22  ;;  %v1892_v7 = vadd.f32 -0.0001984127, %v1860_v46  ;;  %vm1670_vm15 = vcmp.gt.f32.partialorder %v1638_v37, 1.5707964 }
 0x1e5   :  { %v1893_v12 = vadd.f32 -0.0001984127, %v1861_v10  ;;  %v4489_v50 = vsub.f32 %v1547_v39, %v1579_v60  ;;  %vm1671_vm0 = vcmp.gt.f32.partialorder %v1639_v51, 1.5707964  ;;  %v2052_v61 = vmul.f32 %v1828_v1, %v4459_v47 }
 0x1e6   :  { %v4495_v24 = vsub.f32 %v1545_v0, %v1577_v62  ;;  %v1924_v44 = vmul.f32 %v1892_v7, %v1828_v1  ;;  %v2053_v13 = vmul.f32 %v1829_v29, %v4467_v14  ;;  %v4500_v9 = vsel %vm1670_vm15, %v1766_v31, %v4427_v59 }
 0x1e7   :  { %v2528_v35 = vpop.f32.mrf.mxu0  ;;  %v1925_v27 = vmul.f32 %v1893_v12, %v1829_v29  ;;  %v4507_v34 = vsel %vm1671_vm0, %v1767_v45, %v4429_v4  ;;  %vm1704_vm2 = vcmp.ge.f32.partialorder %v4487_v55, 0.0  ;;  %v4521_v54 = vmul.f32 %v4500_v9, %v4500_v9 }
 0x1e8   :  { %v4485_v25 = vadd.f32 %v2528_v35, %v4414_v2  ;;  %v1956_v53 = vadd.f32 0.008333333, %v1924_v44  ;;  %vm1707_vm3 = vcmp.ge.f32.partialorder %v4489_v50, 0.0  ;;  %v1831_v62 = vmul.f32 %v4507_v34, %v4507_v34 }
 0x1e9   :  { %v1349_v6 = vpop.f32.mrf.mxu0  ;;  %v1957_v17 = vadd.f32 0.008333333, %v1925_v27  ;;  %vm1705_vm6 = vcmp.ge.f32.partialorder %v4495_v24, 0.0  ;;  %v1739_v18 = vsel %vm1707_vm3, 3.1415927, %v3153_v36 }
 0x1ea   :  { %v1454_v19 = vmul.f32 0.15915494, %v4485_v25  ;;  %v4493_v28 = vadd.f32 %v4414_v2, %v1349_v6  ;;  %v1988_v15 = vmul.f32 %v1956_v53, %v1828_v1 }
 0x1eb   :  { %v2529_v20 = vpop.f32.mrf.mxu0  ;;  %v1989_v41 = vmul.f32 %v1957_v17, %v1829_v29 }
 0x1ec   :  { %v2934_v63 = vand.u32 2147483647, %v1454_v19  ;;  %v2936_v56 = vcvt.f32.s32 %v1454_v19  ;;  %v1452_v21 = vmul.f32 0.15915494, %v4493_v28  ;;  %v4504_v3 = vadd.f32 %v2529_v20, %v4414_v2 }
 0x1ed   :  { %v1352_v32 = vpop.f32.mrf.mxu0  ;;  %v2939_v33 = vand.u32 2147483648, %v1454_v19  ;;  %v2020_v51 = vadd.f32 -0.16666667, %v1988_v15  ;;  %v2021_v29 = vadd.f32 -0.16666667, %v1989_v41  ;;  %v1770_v15 = vsub.f32 %v4482_v58, %v4455_v57 }
 0x1ee   :  { %v2937_v48 = vcvt.s32.f32 %v2936_v56  ;;  %v4510_v42 = vadd.f32 %v4414_v2, %v1352_v32  ;;  %vm4512_vm1 = vcmp.lt.f32.partialorder %v2934_v63, 8388608.0  ;;  %v2918_v59 = vand.u32 2147483647, %v1452_v21 }
 0x1ef   :  { %v2920_v11 = vcvt.f32.s32 %v1452_v21  ;;  %v1455_v16 = vmul.f32 0.15915494, %v4504_v3  ;;  %v2923_v30 = vand.u32 2147483648, %v1452_v21  ;;  %v2085_v27 = vmul.f32 %v2053_v13, %v2021_v29 }
 0x1f0   :  { %v2938_v52 = vand.u32 2147483647, %v2937_v48  ;;  %v1453_v4 = vmul.f32 0.15915494, %v4510_v42  ;;  %vm4524_vm4 = vcmp.lt.f32.partialorder %v2918_v59, 8388608.0 }
 0x1f1   :  { %v2921_v40 = vcvt.s32.f32 %v2920_v11  ;;  %v2942_v43 = vand.u32 2147483647, %v1455_v16  ;;  %v2944_v49 = vcvt.f32.s32 %v1455_v16  ;;  %v2947_v8 = vand.u32 2147483648, %v1455_v16 }
 0x1f2   :  { %v2940_v5 = vor.u32 %v2939_v33, %v2938_v52  ;;  %v2928_v23 = vcvt.f32.s32 %v1453_v4  ;;  %v2926_v1 = vand.u32 2147483647, %v1453_v4  ;;  %v2931_v46 = vand.u32 2147483648, %v1453_v4 }
 0x1f3   :  { %v2922_v26 = vand.u32 2147483647, %v2921_v40  ;;  %v2945_v37 = vcvt.s32.f32 %v2944_v49  ;;  %vm4530_vm5 = vcmp.lt.f32.partialorder %v2942_v43, 8388608.0  ;;  %v1862_v63 = vmul.f32 2.7557319e-06, %v4521_v54 }
 0x1f4   :  { %v2941_v31 = vsel %vm4512_vm1, %v2940_v5, %v1454_v19  ;;  %v2929_v39 = vcvt.s32.f32 %v2928_v23  ;;  %v2084_v19 = vmul.f32 %v2052_v61, %v2020_v51  ;;  %vm2927_vm7 = vcmp.lt.f32.partialorder %v2926_v1, 8388608.0 }
 0x1f5   :  { %v1518_v22 = vmul.f32 6.28125, %v2941_v31  ;;  %v2924_v0 = vor.u32 %v2923_v30, %v2922_v26  ;;  %v2946_v35 = vand.u32 2147483647, %v2945_v37  ;;  %v1582_v10 = vmul.f32 0.0019353072, %v2941_v31 }
 0x1f6   :  { %v2930_v60 = vand.u32 2147483647, %v2929_v39  ;;  %v1863_v32 = vmul.f32 2.7557319e-06, %v1831_v62  ;;  %v1736_v61 = vsel %vm1704_vm2, 3.1415927, %v3153_v36  ;;  %v2116_v33 = vadd.f32 %v2084_v19, %v4459_v47 }
 0x1f7   :  { %v1550_v6 = vsub.f32 %v4485_v25, %v1518_v22  ;;  %v2925_v7 = vsel %vm4524_vm4, %v2924_v0, %v1452_v21  ;;  %v2948_v12 = vor.u32 %v2947_v8, %v2946_v35  ;;  %v2117_v17 = vadd.f32 %v2085_v27, %v4467_v14 }
 0x1f8   :  { %v1516_v20 = vmul.f32 6.28125, %v2925_v7  ;;  %v2932_v44 = vor.u32 %v2931_v46, %v2930_v60  ;;  %v1580_v13 = vmul.f32 0.0019353072, %v2925_v7  ;;  %v1737_v59 = vsel %vm1705_vm6, 3.1415927, %v3153_v36 }
 0x1f9   :  { %v2949_v56 = vsel %vm4530_vm5, %v2948_v12, %v1455_v16  ;;  %v4543_v53 = vsub.f32 %v1550_v6, %v1582_v10  ;;  %v1894_v11 = vadd.f32 -0.0001984127, %v1862_v63  ;;  %v2148_v52 = vpack.c.bf16 %v2117_v17, %v2116_v33 }
 0x1fa   :  { %v1548_v25 = vsub.f32 %v4493_v28, %v1516_v20  ;;  %v1519_v48 = vmul.f32 6.28125, %v2949_v56  ;;  %v2933_v21 = vsel %vm2927_vm7, %v2932_v44, %v1453_v4  ;;  %v1895_v4 = vadd.f32 -0.0001984127, %v1863_v32 }
 0x1fb   :  { %v1517_v28 = vmul.f32 6.28125, %v2933_v21  ;;  %vm1710_vm8 = vcmp.ge.f32.partialorder %v4543_v53, 0.0  ;;  %v1926_v14 = vmul.f32 %v1894_v11, %v4521_v54  ;;  %v1768_v40 = vsub.f32 %v1736_v61, %v4487_v55  ;;  %2566 = vmatprep.mubr.bf16.mxu1 %v2148_v52 }
 0x1fc   :  { %v4555_v16 = vsub.f32 %v1548_v25, %v1580_v13  ;;  %v1551_v47 = vsub.f32 %v4504_v3, %v1519_v48  ;;  %v1771_v30 = vsub.f32 %v1739_v18, %v4489_v50  ;;  %v1583_v43 = vmul.f32 0.0019353072, %v2949_v56 }
 0x1fd   :  { %v1927_v49 = vmul.f32 %v1895_v4, %v1831_v62  ;;  %v1769_v5 = vsub.f32 %v1737_v59, %v4495_v24  ;;  %v1581_v38 = vmul.f32 0.0019353072, %v2933_v21  ;;  %v1958_v23 = vadd.f32 0.008333333, %v1926_v14 }
 0x1fe   :  { %v1640_v41 = vand.u32 2147483647, %v4487_v55  ;;  %v4567_v58 = vsel %vm1710_vm8, 3.1415927, %v3153_v36  ;;  %vm1708_vm9 = vcmp.ge.f32.partialorder %v4555_v16, 0.0  ;;  %v1549_v3 = vsub.f32 %v4510_v42, %v1517_v28 }
 0x1ff   :  { %v1959_v26 = vadd.f32 0.008333333, %v1927_v49  ;;  %v4571_v37 = vsub.f32 %v1551_v47, %v1583_v43  ;;  %v1990_v8 = vmul.f32 %v1958_v23, %v4521_v54  ;;  %v2054_v1 = vmul.f32 %v4521_v54, %v4500_v9 }
 0x200   :  { %v1641_v31 = vand.u32 2147483647, %v4495_v24  ;;  %v2055_v39 = vmul.f32 %v1831_v62, %v4507_v34  ;;  %vm1672_vm10 = vcmp.gt.f32.partialorder %v1640_v41, 1.5707964  ;;  %v1642_v51 = vand.u32 2147483647, %v4455_v57 }
 0x201   :  { %v1991_v45 = vmul.f32 %v1959_v26, %v1831_v62  ;;  %v2022_v22 = vadd.f32 -0.16666667, %v1990_v8  ;;  %v4580_v42 = vsel %vm1672_vm10, %v1768_v40, %v4487_v55  ;;  %v1643_v0 = vand.u32 2147483647, %v4489_v50 }
 0x202   :  { %vm1673_vm11 = vcmp.gt.f32.partialorder %v1641_v31, 1.5707964  ;;  %v1832_v54 = vmul.f32 %v4580_v42, %v4580_v42  ;;  %vm1674_vm12 = vcmp.gt.f32.partialorder %v1642_v51, 1.5707964  ;;  %v4596_v55 = vsel %vm1708_vm9, 3.1415927, %v3153_v36 }
 0x203   :  { %v2023_v35 = vadd.f32 -0.16666667, %v1991_v45  ;;  %v4584_v46 = vsel %vm1673_vm11, %v1769_v5, %v4495_v24  ;;  %v2086_v10 = vmul.f32 %v2054_v1, %v2022_v22  ;;  %vm1675_vm13 = vcmp.gt.f32.partialorder %v1643_v0, 1.5707964 }
 0x204   :  { %v1833_v60 = vmul.f32 %v4584_v46, %v4584_v46  ;;  %v4591_v29 = vsel %vm1674_vm12, %v1770_v15, %v4455_v57  ;;  %v1864_v6 = vmul.f32 2.7557319e-06, %v1832_v54  ;;  %v4599_v7 = vsel %vm1675_vm13, %v1771_v30, %v4489_v50 }
 0x205   :  { %v2087_v24 = vmul.f32 %v2055_v39, %v2023_v35  ;;  %v4601_v12 = vsub.f32 %v1549_v3, %v1581_v38  ;;  %v2118_v20 = vadd.f32 %v2086_v10, %v4500_v9  ;;  %v4610_v56 = vmul.f32 %v4591_v29, %v4591_v29 }
 0x206   :  { %v1865_v57 = vmul.f32 2.7557319e-06, %v1833_v60  ;;  %v1896_v63 = vadd.f32 -0.0001984127, %v1864_v6  ;;  %v4614_v50 = vmul.f32 %v4599_v7, %v4599_v7  ;;  %v2056_v9 = vmul.f32 %v1832_v54, %v4580_v42 }
 0x207   :  { %v2119_v27 = vadd.f32 %v2087_v24, %v4507_v34  ;;  %v2057_v13 = vmul.f32 %v1833_v60, %v4584_v46  ;;  %v1866_v33 = vmul.f32 2.7557319e-06, %v4610_v56  ;;  %vm1711_vm14 = vcmp.ge.f32.partialorder %v4571_v37, 0.0 }
 0x208   :  { %v2532_v62 = vpop.f32.mrf.mxu0  ;;  %v1897_v48 = vadd.f32 -0.0001984127, %v1865_v57  ;;  %v1928_v34 = vmul.f32 %v1896_v63, %v1832_v54  ;;  %v1867_v11 = vmul.f32 2.7557319e-06, %v4614_v50  ;;  %vm1709_vm0 = vcmp.ge.f32.partialorder %v4601_v12, 0.0 }
 0x209   :  { %v4604_v19 = vadd.f32 %v2532_v62, %v4414_v2  ;;  %v2149_v61 = vpack.c.bf16 %v2119_v27, %v2118_v20  ;;  %v1898_v43 = vadd.f32 -0.0001984127, %v1866_v33 }
 0x20a   :  { %v1365_v44 = vpop.f32.mrf.mxu0  ;;  %v1929_v15 = vmul.f32 %v1897_v48, %v1833_v60  ;;  %v1960_v47 = vadd.f32 0.008333333, %v1928_v34 }
 0x20b   :  { %v1458_v32 = vmul.f32 0.15915494, %v4604_v19  ;;  %v4618_v25 = vadd.f32 %v4414_v2, %v1365_v44  ;;  %2567 = vmatmul.mubr.bf16.vlgmr.msra.gmra.mxu1 %v2149_v61 }
 0x20c   :  { %v2533_v21 = vpop.f32.mrf.mxu0  ;;  %v1961_v23 = vadd.f32 0.008333333, %v1929_v15  ;;  %v1992_v8 = vmul.f32 %v1960_v47, %v1832_v54 }
 0x20d   :  { %v2966_v17 = vand.u32 2147483647, %v1458_v32  ;;  %v2968_v18 = vcvt.f32.s32 %v1458_v32  ;;  %v1456_v59 = vmul.f32 0.15915494, %v4618_v25  ;;  %v2971_v28 = vand.u32 2147483648, %v1458_v32 }
 0x20e   :  { %v4626_v52 = vadd.f32 %v2533_v21, %v4414_v2  ;;  %v1368_v4 = vpop.f32.mrf.mxu0  ;;  %v1993_v0 = vmul.f32 %v1961_v23, %v1833_v60  ;;  %v2024_v35 = vadd.f32 -0.16666667, %v1992_v8 }
 0x20f   :  { %v2969_v14 = vcvt.s32.f32 %v2968_v18  ;;  %v2950_v40 = vand.u32 2147483647, %v1456_v59  ;;  %v2952_v30 = vcvt.f32.s32 %v1456_v59  ;;  %vm4629_vm15 = vcmp.lt.f32.partialorder %v2966_v17, 8388608.0 }
 0x210   :  { %v1459_v5 = vmul.f32 0.15915494, %v4626_v52  ;;  %v4635_v38 = vadd.f32 %v4414_v2, %v1368_v4  ;;  %v2955_v26 = vand.u32 2147483648, %v1456_v59  ;;  %v2025_v44 = vadd.f32 -0.16666667, %v1993_v0 }
 0x211   :  { %v2970_v41 = vand.u32 2147483647, %v2969_v14  ;;  %v2953_v3 = vcvt.s32.f32 %v2952_v30  ;;  %vm4638_vm1 = vcmp.lt.f32.partialorder %v2950_v40, 8388608.0  ;;  %v2088_v34 = vmul.f32 %v2056_v9, %v2024_v35 }
 0x212   :  { %v2974_v31 = vand.u32 2147483647, %v1459_v5  ;;  %v2976_v45 = vcvt.f32.s32 %v1459_v5  ;;  %v1457_v39 = vmul.f32 0.15915494, %v4635_v38  ;;  %v2979_v24 = vand.u32 2147483648, %v1459_v5 }
 0x213   :  { %v2972_v51 = vor.u32 %v2971_v28, %v2970_v41  ;;  %v2954_v22 = vand.u32 2147483647, %v2953_v3  ;;  %v2089_v33 = vmul.f32 %v2057_v13, %v2025_v44  ;;  %v1899_v14 = vadd.f32 -0.0001984127, %v1867_v11 }
 0x214   :  { %vm4643_vm2 = vcmp.lt.f32.partialorder %v2974_v31, 8388608.0  ;;  %v2977_v62 = vcvt.s32.f32 %v2976_v45  ;;  %v2960_v6 = vcvt.f32.s32 %v1457_v39  ;;  %v2958_v57 = vand.u32 2147483647, %v1457_v39 }
 0x215   :  { %v2973_v54 = vsel %vm4629_vm15, %v2972_v51, %v1458_v32  ;;  %v2956_v20 = vor.u32 %v2955_v26, %v2954_v22  ;;  %v2963_v21 = vand.u32 2147483648, %v1457_v39  ;;  %v2120_v32 = vadd.f32 %v2088_v34, %v4580_v42 }
 0x216   :  { %v1522_v27 = vmul.f32 6.28125, %v2973_v54  ;;  %v1586_v63 = vmul.f32 0.0019353072, %v2973_v54  ;;  %v2978_v48 = vand.u32 2147483647, %v2977_v62  ;;  %v2961_v61 = vcvt.s32.f32 %v2960_v6 }
 0x217   :  { %v2957_v60 = vsel %vm4638_vm1, %v2956_v20, %v1456_v59  ;;  %v2121_v47 = vadd.f32 %v2089_v33, %v4584_v46  ;;  %v1930_v9 = vmul.f32 %v1898_v43, %v4610_v56  ;;  %v1741_v46 = vsel %vm1709_vm0, 3.1415927, %v3153_v36 }
 0x218   :  { %v1554_v17 = vsub.f32 %v4604_v19, %v1522_v27  ;;  %v1520_v18 = vmul.f32 6.28125, %v2957_v60  ;;  %v1584_v28 = vmul.f32 0.0019353072, %v2957_v60  ;;  %v2980_v4 = vor.u32 %v2979_v24, %v2978_v48 }
 0x219   :  { %v2962_v15 = vand.u32 2147483647, %v2961_v61  ;;  %v4663_v19 = vsel %vm1711_vm14, 3.1415927, %v3153_v36  ;;  %v2150_v42 = vpack.c.bf16 %v2121_v47, %v2120_v32  ;;  %v1962_v23 = vadd.f32 0.008333333, %v1930_v9 }
 0x21a   :  { %v4654_v40 = vsub.f32 %v1554_v17, %v1586_v63  ;;  %v1552_v30 = vsub.f32 %v4618_v25, %v1520_v18  ;;  %v2981_v59 = vsel %vm4643_vm2, %v2980_v4, %v1459_v5  ;;  %v1931_v25 = vmul.f32 %v1899_v14, %v4614_v50 }
 0x21b   :  { %v1523_v13 = vmul.f32 6.28125, %v2981_v59  ;;  %v2964_v49 = vor.u32 %v2963_v21, %v2962_v15  ;;  %v1774_v43 = vsub.f32 %v4567_v58, %v4543_v53  ;;  %vm2959_vm4 = vcmp.lt.f32.partialorder %v2958_v57, 8388608.0  ;;  %2570 = vmatprep.mubr.bf16.mxu1 %v2150_v42 }
 0x21c   :  { %v4668_v11 = vsub.f32 %v1552_v30, %v1584_v28  ;;  %vm1714_vm3 = vcmp.ge.f32.partialorder %v4654_v40, 0.0  ;;  %v1644_v5 = vand.u32 2147483647, %v4555_v16  ;;  %v1772_v41 = vsub.f32 %v4596_v55, %v4555_v16 }
 0x21d   :  { %v1775_v3 = vsub.f32 %v4663_v19, %v4571_v37  ;;  %v1555_v26 = vsub.f32 %v4626_v52, %v1523_v13  ;;  %v2965_v8 = vsel %vm2959_vm4, %v2964_v49, %v1457_v39  ;;  %v1773_v1 = vsub.f32 %v1741_v46, %v4601_v12 }
 0x21e   :  { %vm1712_vm5 = vcmp.ge.f32.partialorder %v4668_v11, 0.0  ;;  %v1963_v58 = vadd.f32 0.008333333, %v1931_v25  ;;  %v1994_v31 = vmul.f32 %v1962_v23, %v4610_v56  ;;  %v4684_v45 = vsel %vm1714_vm3, 3.1415927, %v3153_v36 }
 0x21f   :  { %v1587_v51 = vmul.f32 0.0019353072, %v2981_v59  ;;  %v2058_v55 = vmul.f32 %v4610_v56, %v4591_v29  ;;  %v1645_v22 = vand.u32 2147483647, %v4601_v12  ;;  %v1521_v0 = vmul.f32 6.28125, %v2965_v8 }
 0x220   :  { %v1995_v52 = vmul.f32 %v1963_v58, %v4614_v50  ;;  %v2026_v39 = vadd.f32 -0.16666667, %v1994_v31  ;;  %vm1676_vm6 = vcmp.gt.f32.partialorder %v1644_v5, 1.5707964  ;;  %v4691_v35 = vsel %vm1712_vm5, 3.1415927, %v3153_v36 }
 0x221   :  { %v4693_v10 = vsub.f32 %v1555_v26, %v1587_v51  ;;  %vm1677_vm7 = vcmp.gt.f32.partialorder %v1645_v22, 1.5707964  ;;  %v4696_v62 = vsel %vm1676_vm6, %v1772_v41, %v4555_v16  ;;  %v2059_v56 = vmul.f32 %v4614_v50, %v4599_v7 }
 0x222   :  { %v2027_v24 = vadd.f32 -0.16666667, %v1995_v52  ;;  %v2090_v6 = vmul.f32 %v2058_v55, %v2026_v39  ;;  %v4701_v54 = vsel %vm1677_vm7, %v1773_v1, %v4601_v12  ;;  %v1778_v20 = vsub.f32 %v4684_v45, %v4654_v40 }
 0x223   :  { %v1836_v57 = vmul.f32 %v4696_v62, %v4696_v62  ;;  %v1837_v44 = vmul.f32 %v4701_v54, %v4701_v54  ;;  %v1646_v16 = vand.u32 2147483647, %v4543_v53  ;;  %v1553_v27 = vsub.f32 %v4635_v38, %v1521_v0 }
 0x224   :  { %v1585_v63 = vmul.f32 0.0019353072, %v2965_v8  ;;  %v2091_v48 = vmul.f32 %v2059_v56, %v2027_v24  ;;  %v1647_v50 = vand.u32 2147483647, %v4571_v37  ;;  %v1776_v12 = vsub.f32 %v4691_v35, %v4668_v11 }
 0x225   :  { %vm1715_vm8 = vcmp.ge.f32.partialorder %v4693_v10, 0.0  ;;  %v1868_v21 = vmul.f32 2.7557319e-06, %v1836_v57  ;;  %v1869_v60 = vmul.f32 2.7557319e-06, %v1837_v44  ;;  %v2122_v34 = vadd.f32 %v2090_v6, %v4591_v29 }
 0x226   :  { %v2123_v33 = vadd.f32 %v2091_v48, %v4599_v7  ;;  %vm1678_vm9 = vcmp.gt.f32.partialorder %v1646_v16, 1.5707964  ;;  %vm1679_vm10 = vcmp.gt.f32.partialorder %v1647_v50, 1.5707964  ;;  %v4723_v4 = vsub.f32 %v1553_v27, %v1585_v63 }
 0x227   :  { %v2536_v61 = vpop.f32.mrf.mxu0  ;;  %v1900_v17 = vadd.f32 -0.0001984127, %v1868_v21  ;;  %v1901_v18 = vadd.f32 -0.0001984127, %v1869_v60  ;;  %v4721_v28 = vsel %vm1678_vm9, %v1774_v43, %v4543_v53  ;;  %v4726_v47 = vsel %vm1679_vm10, %v1775_v3, %v4571_v37 }
 0x228   :  { %v4718_v38 = vadd.f32 %v2536_v61, %v4414_v2  ;;  %v2151_v15 = vpack.c.bf16 %v2123_v33, %v2122_v34  ;;  %v4730_v29 = vmul.f32 %v4721_v28, %v4721_v28  ;;  %v4739_v53 = vsel %vm1715_vm8, 3.1415927, %v3153_v36 }
 0x229   :  { %v1381_v32 = vpop.f32.mrf.mxu0  ;;  %v1932_v30 = vmul.f32 %v1900_v17, %v1836_v57  ;;  %v1933_v59 = vmul.f32 %v1901_v18, %v1837_v44  ;;  %v2060_v37 = vmul.f32 %v1836_v57, %v4696_v62  ;;  %v2061_v19 = vmul.f32 %v1837_v44, %v4701_v54 }
 0x22a   :  { %v1462_v7 = vmul.f32 0.15915494, %v4718_v38  ;;  %v4734_v14 = vadd.f32 %v4414_v2, %v1381_v32  ;;  %2571 = vmatmul.mubr.bf16.gmra.mxu1 %v2151_v15  ;;  %v4745_v13 = vmul.f32 %v4726_v47, %v4726_v47  ;;  %v1648_v25 = vand.u32 2147483647, %v4668_v11 }
 0x22b   :  { %v2537_v9 = vpop.f32.mrf.mxu0  ;;  %v1964_v5 = vadd.f32 0.008333333, %v1932_v30  ;;  %v1965_v41 = vadd.f32 0.008333333, %v1933_v59  ;;  %v1870_v3 = vmul.f32 2.7557319e-06, %v4730_v29 }
 0x22c   :  { %v2998_v49 = vand.u32 2147483647, %v1462_v7  ;;  %v3000_v42 = vcvt.f32.s32 %v1462_v7  ;;  %v1460_v46 = vmul.f32 0.15915494, %v4734_v14  ;;  %v4750_v23 = vadd.f32 %v2537_v9, %v4414_v2 }
 0x22d   :  { %v1384_v43 = vpop.f32.mrf.mxu0  ;;  %vm1713_vm11 = vcmp.ge.f32.partialorder %v4723_v4, 0.0  ;;  %v3003_v8 = vand.u32 2147483648, %v1462_v7  ;;  %v1871_v58 = vmul.f32 2.7557319e-06, %v4745_v13  ;;  %v1996_v22 = vmul.f32 %v1964_v5, %v1836_v57 }
 0x22e   :  { %v3001_v26 = vcvt.s32.f32 %v3000_v42  ;;  %v2984_v1 = vcvt.f32.s32 %v1460_v46  ;;  %v2982_v31 = vand.u32 2147483647, %v1460_v46  ;;  %v1463_v51 = vmul.f32 0.15915494, %v4750_v23 }
 0x22f   :  { %v4757_v55 = vadd.f32 %v4414_v2, %v1384_v43  ;;  %vm4759_vm12 = vcmp.lt.f32.partialorder %v2998_v49, 8388608.0  ;;  %v1997_v24 = vmul.f32 %v1965_v41, %v1837_v44  ;;  %v2987_v56 = vand.u32 2147483648, %v1460_v46 }
 0x230   :  { %v3002_v52 = vand.u32 2147483647, %v3001_v26  ;;  %v2985_v39 = vcvt.s32.f32 %v2984_v1  ;;  %v3006_v6 = vand.u32 2147483647, %v1463_v51  ;;  %v3008_v16 = vcvt.f32.s32 %v1463_v51 }
 0x231   :  { %v1461_v27 = vmul.f32 0.15915494, %v4757_v55  ;;  %v2028_v50 = vadd.f32 -0.16666667, %v1996_v22  ;;  %v2029_v21 = vadd.f32 -0.16666667, %v1997_v24 }
 0x232   :  { %v3004_v63 = vor.u32 %v3003_v8, %v3002_v52  ;;  %v2986_v48 = vand.u32 2147483647, %v2985_v39  ;;  %vm2983_vm13 = vcmp.lt.f32.partialorder %v2982_v31, 8388608.0  ;;  %v3009_v2 = vcvt.s32.f32 %v3008_v16 }
 0x233   :  { %v3011_v60 = vand.u32 2147483648, %v1463_v51  ;;  %v2992_v57 = vcvt.f32.s32 %v1461_v27  ;;  %vm4766_vm14 = vcmp.lt.f32.partialorder %v3006_v6, 8388608.0  ;;  %v2092_v44 = vmul.f32 %v2060_v37, %v2028_v50 }
 0x234   :  { %v3005_v61 = vsel %vm4759_vm12, %v3004_v63, %v1462_v7  ;;  %v2988_v34 = vor.u32 %v2987_v56, %v2986_v48  ;;  %v3010_v18 = vand.u32 2147483647, %v3009_v2  ;;  %v2990_v15 = vand.u32 2147483647, %v1461_v27 }
 0x235   :  { %v1526_v17 = vmul.f32 6.28125, %v3005_v61  ;;  %v2995_v32 = vand.u32 2147483648, %v1461_v27  ;;  %v1590_v30 = vmul.f32 0.0019353072, %v3005_v61  ;;  %v2993_v9 = vcvt.s32.f32 %v2992_v57 }
 0x236   :  { %v2989_v59 = vsel %vm2983_vm13, %v2988_v34, %v1460_v46  ;;  %v2093_v49 = vmul.f32 %v2061_v19, %v2029_v21  ;;  %v3012_v5 = vor.u32 %v3011_v60, %v3010_v18  ;;  %v2124_v7 = vadd.f32 %v2092_v44, %v4696_v62 }
 0x237   :  { %v1558_v42 = vsub.f32 %v4718_v38, %v1526_v17  ;;  %v1524_v43 = vmul.f32 6.28125, %v2989_v59  ;;  %v2994_v41 = vand.u32 2147483647, %v2993_v9  ;;  %v1902_v8 = vadd.f32 -0.0001984127, %v1870_v3 }
 0x238   :  { %v2125_v26 = vadd.f32 %v2093_v49, %v4701_v54  ;;  %v1903_v1 = vadd.f32 -0.0001984127, %v1871_v58  ;;  %v1745_v37 = vsel %vm1713_vm11, 3.1415927, %v3153_v36  ;;  %v3013_v38 = vsel %vm4766_vm14, %v3012_v5, %v1463_v51 }
 0x239   :  { %v4776_v31 = vsub.f32 %v1558_v42, %v1590_v30  ;;  %v1556_v46 = vsub.f32 %v4734_v14, %v1524_v43  ;;  %v1527_v19 = vmul.f32 6.28125, %v3013_v38  ;;  %v2996_v22 = vor.u32 %v2995_v32, %v2994_v41 }
 0x23a   :  { %v2152_v0 = vpack.c.bf16 %v2125_v26, %v2124_v7  ;;  %v1649_v62 = vand.u32 2147483647, %v4723_v4  ;;  %v1588_v52 = vmul.f32 0.0019353072, %v2989_v59  ;;  %vm2991_vm15 = vcmp.lt.f32.partialorder %v2990_v15, 8388608.0 }
 0x23b   :  { %v1934_v54 = vmul.f32 %v1902_v8, %v4730_v29  ;;  %v1935_v3 = vmul.f32 %v1903_v1, %v4745_v13  ;;  %v1777_v58 = vsub.f32 %v1745_v37, %v4723_v4  ;;  %v1559_v39 = vsub.f32 %v4750_v23, %v1527_v19 }
 0x23c   :  { %v2997_v24 = vsel %vm2991_vm15, %v2996_v22, %v1461_v27  ;;  %2574 = vmatprep.mubr.bf16.mxu1 %v2152_v0  ;;  %vm1680_vm0 = vcmp.gt.f32.partialorder %v1648_v25, 1.5707964  ;;  %vm1718_vm1 = vcmp.ge.f32.partialorder %v4776_v31, 0.0  ;;  %v4789_v14 = vsub.f32 %v1556_v46, %v1588_v52 }
 0x23d   :  { %v1591_v51 = vmul.f32 0.0019353072, %v3013_v38  ;;  %v1525_v56 = vmul.f32 6.28125, %v2997_v24  ;;  %v1589_v6 = vmul.f32 0.0019353072, %v2997_v24  ;;  %v2062_v48 = vmul.f32 %v4730_v29, %v4721_v28 }
 0x23e   :  { %v1966_v16 = vadd.f32 0.008333333, %v1934_v54  ;;  %v1967_v63 = vadd.f32 0.008333333, %v1935_v3  ;;  %vm1681_vm2 = vcmp.gt.f32.partialorder %v1649_v62, 1.5707964  ;;  %v4800_v25 = vsel %vm1680_vm0, %v1776_v12, %v4668_v11 }
 0x23f   :  { %v4793_v50 = vsub.f32 %v1559_v39, %v1591_v51  ;;  %v1557_v23 = vsub.f32 %v4757_v55, %v1525_v56  ;;  %v4803_v27 = vsel %vm1718_vm1, 3.1415927, %v3153_v36  ;;  %v4808_v60 = vsel %vm1681_vm2, %v1777_v58, %v4723_v4 }
 0x240   :  { %v1998_v21 = vmul.f32 %v1966_v16, %v4730_v29  ;;  %v1999_v2 = vmul.f32 %v1967_v63, %v4745_v13  ;;  %vm1716_vm3 = vcmp.ge.f32.partialorder %v4789_v14, 0.0  ;;  %v1840_v57 = vmul.f32 %v4800_v25, %v4800_v25 }
 0x241   :  { %v4811_v55 = vsub.f32 %v1557_v23, %v1589_v6  ;;  %v1841_v11 = vmul.f32 %v4808_v60, %v4808_v60  ;;  %v2063_v29 = vmul.f32 %v4745_v13, %v4726_v47  ;;  %v1650_v61 = vand.u32 2147483647, %v4654_v40 }
 0x242   :  { %v2030_v35 = vadd.f32 -0.16666667, %v1998_v21  ;;  %v2031_v12 = vadd.f32 -0.16666667, %v1999_v2  ;;  %v1779_v4 = vsub.f32 %v4739_v53, %v4693_v10  ;;  %vm1719_vm4 = vcmp.ge.f32.partialorder %v4793_v50, 0.0 }
 0x243   :  { %v1872_v34 = vmul.f32 2.7557319e-06, %v1840_v57  ;;  %v1873_v33 = vmul.f32 2.7557319e-06, %v1841_v11  ;;  %v4824_v44 = vsel %vm1716_vm3, 3.1415927, %v3153_v36  ;;  %v1782_v15 = vsub.f32 %v4803_v27, %v4776_v31 }
 0x244   :  { %vm1717_vm5 = vcmp.ge.f32.partialorder %v4811_v55, 0.0  ;;  %v2094_v17 = vmul.f32 %v2062_v48, %v2030_v35  ;;  %v2095_v18 = vmul.f32 %v2063_v29, %v2031_v12  ;;  %v1651_v30 = vand.u32 2147483647, %v4693_v10 }
 0x245   :  { %v1904_v13 = vadd.f32 -0.0001984127, %v1872_v34  ;;  %v1905_v32 = vadd.f32 -0.0001984127, %v1873_v33  ;;  %v4831_v53 = vsel %vm1719_vm4, 3.1415927, %v3153_v36  ;;  %v2064_v46 = vmul.f32 %v1840_v57, %v4800_v25 }
 0x246   :  { %v2126_v59 = vadd.f32 %v2094_v17, %v4721_v28  ;;  %v2127_v9 = vadd.f32 %v2095_v18, %v4726_v47  ;;  %vm1682_vm6 = vcmp.gt.f32.partialorder %v1650_v61, 1.5707964  ;;  %vm1683_vm7 = vcmp.gt.f32.partialorder %v1651_v30, 1.5707964  ;;  %v4854_v47 = vld [vmem:[%s5411_s4] ss:$0 sm:$0xff] }
 0x247   :  { %v1936_v49 = vmul.f32 %v1904_v13, %v1840_v57  ;;  %v1937_v42 = vmul.f32 %v1905_v32, %v1841_v11  ;;  %v4839_v43 = vsel %vm1682_vm6, %v1778_v20, %v4654_v40  ;;  %v4842_v5 = vsel %vm1717_vm5, 3.1415927, %v3153_v36 }
 0x248   :  { %v2153_v7 = vpack.c.bf16 %v2127_v9, %v2126_v59  ;;  %v4845_v26 = vsel %vm1683_vm7, %v1779_v4, %v4693_v10  ;;  %v4849_v28 = vmul.f32 %v4839_v43, %v4839_v43  ;;  %v1780_v10 = vsub.f32 %v4824_v44, %v4789_v14 }
 0x249   :  { %v2540_v41 = vpop.f32.mrf.mxu0  ;;  %v1968_v45 = vadd.f32 0.008333333, %v1936_v49  ;;  %v1969_v20 = vadd.f32 0.008333333, %v1937_v42  ;;  %v4861_v8 = vmul.f32 %v4845_v26, %v4845_v26  ;;  %v1783_v1 = vsub.f32 %v4831_v53, %v4793_v50 }
 0x24a   :  { %v4857_v40 = vadd.f32 %v4854_v47, %v2540_v41  ;;  %2575 = vmatmul.mubr.bf16.gmra.mxu1 %v2153_v7  ;;  %v1874_v38 = vmul.f32 2.7557319e-06, %v4849_v28  ;;  %v1781_v52 = vsub.f32 %v4842_v5, %v4811_v55  ;;  %v2065_v3 = vmul.f32 %v1841_v11, %v4808_v60 }
 0x24b   :  { %v1397_v37 = vpop.f32.mrf.mxu0  ;;  %v2000_v0 = vmul.f32 %v1968_v45, %v1840_v57  ;;  %v2001_v62 = vmul.f32 %v1969_v20, %v1841_v11  ;;  %v1875_v58 = vmul.f32 2.7557319e-06, %v4861_v8  ;;  %v1652_v39 = vand.u32 2147483647, %v4789_v14 }
 0x24c   :  { %v1466_v19 = vmul.f32 0.15915494, %v4857_v40  ;;  %v4871_v22 = vadd.f32 %v4854_v47, %v1397_v37  ;;  %v1653_v6 = vand.u32 2147483647, %v4811_v55  ;;  %v1906_v21 = vadd.f32 -0.0001984127, %v1874_v38 }
 0x24d   :  { %v2541_v54 = vpop.f32.mrf.mxu0  ;;  %v2032_v48 = vadd.f32 -0.16666667, %v2000_v0  ;;  %v2033_v23 = vadd.f32 -0.16666667, %v2001_v62  ;;  %v1907_v35 = vadd.f32 -0.0001984127, %v1875_v58 }
 0x24e   :  { %v3030_v24 = vand.u32 2147483647, %v1466_v19  ;;  %v3032_v51 = vcvt.f32.s32 %v1466_v19  ;;  %v1464_v56 = vmul.f32 0.15915494, %v4871_v22  ;;  %v4881_v16 = vadd.f32 %v4854_v47, %v2541_v54 }
 0x24f   :  { %v1400_v63 = vpop.f32.mrf.mxu0  ;;  %v3035_v57 = vand.u32 2147483648, %v1466_v19  ;;  %v2096_v4 = vmul.f32 %v2064_v46, %v2032_v48  ;;  %v2097_v18 = vmul.f32 %v2065_v3, %v2033_v23  ;;  %vm4894_vm9 = vcmp.gt.f32.partialorder %v1652_v39, 1.5707964 }
 0x250   :  { %v3033_v2 = vcvt.s32.f32 %v3032_v51  ;;  %v3016_v11 = vcvt.f32.s32 %v1464_v56  ;;  %v3014_v12 = vand.u32 2147483647, %v1464_v56  ;;  %v1467_v29 = vmul.f32 0.15915494, %v4881_v16 }
 0x251   :  { %v4885_v61 = vadd.f32 %v4854_v47, %v1400_v63  ;;  %vm4887_vm8 = vcmp.lt.f32.partialorder %v3030_v24, 8388608.0  ;;  %v3019_v13 = vand.u32 2147483648, %v1464_v56  ;;  %v2128_v42 = vadd.f32 %v2096_v4, %v4800_v25 }
 0x252   :  { %v3034_v33 = vand.u32 2147483647, %v3033_v2  ;;  %v3017_v17 = vcvt.s32.f32 %v3016_v11  ;;  %v3038_v32 = vand.u32 2147483647, %v1467_v29  ;;  %v3040_v30 = vcvt.f32.s32 %v1467_v29 }
 0x253   :  { %v1465_v59 = vmul.f32 0.15915494, %v4885_v61  ;;  %v2129_v7 = vadd.f32 %v2097_v18, %v4808_v60  ;;  %vm4898_vm10 = vcmp.gt.f32.partialorder %v1653_v6, 1.5707964  ;;  %vm3015_vm11 = vcmp.lt.f32.partialorder %v3014_v12, 8388608.0 }
 0x254   :  { %v3036_v9 = vor.u32 %v3035_v57, %v3034_v33  ;;  %v3018_v49 = vand.u32 2147483647, %v3017_v17  ;;  %v3041_v20 = vcvt.s32.f32 %v3040_v30  ;;  %v3043_v37 = vand.u32 2147483648, %v1467_v29 }
 0x255   :  { %v3024_v46 = vcvt.f32.s32 %v1465_v59  ;;  %vm4904_vm12 = vcmp.lt.f32.partialorder %v3038_v32, 8388608.0  ;;  %v2154_v60 = vpack.c.bf16 %v2129_v7, %v2128_v42  ;;  %v3022_v3 = vand.u32 2147483647, %v1465_v59 }
 0x256   :  { %v3037_v38 = vsel %vm4887_vm8, %v3036_v9, %v1466_v19  ;;  %v3020_v0 = vor.u32 %v3019_v13, %v3018_v49  ;;  %v3042_v54 = vand.u32 2147483647, %v3041_v20  ;;  %v3027_v58 = vand.u32 2147483648, %v1465_v59 }
 0x257   :  { %v1530_v62 = vmul.f32 6.28125, %v3037_v38  ;;  %v3025_v24 = vcvt.s32.f32 %v3024_v46  ;;  %2578 = vmatprep.mubr.bf16.mxu1 %v2154_v60  ;;  %v1938_v51 = vmul.f32 %v1906_v21, %v4849_v28  ;;  %v1939_v6 = vmul.f32 %v1907_v35, %v4861_v8 }
 0x258   :  { %v3021_v39 = vsel %vm3015_vm11, %v3020_v0, %v1464_v56  ;;  %v1594_v19 = vmul.f32 0.0019353072, %v3037_v38  ;;  %v3044_v23 = vor.u32 %v3043_v37, %v3042_v54  ;;  %v2066_v12 = vmul.f32 %v4849_v28, %v4839_v43 }
 0x259   :  { %v1562_v63 = vsub.f32 %v4857_v40, %v1530_v62  ;;  %v1528_v48 = vmul.f32 6.28125, %v3021_v39  ;;  %v3026_v2 = vand.u32 2147483647, %v3025_v24  ;;  %v1970_v57 = vadd.f32 0.008333333, %v1938_v51 }
 0x25a   :  { %v1971_v11 = vadd.f32 0.008333333, %v1939_v6  ;;  %v1592_v34 = vmul.f32 0.0019353072, %v3021_v39  ;;  %v3045_v21 = vsel %vm4904_vm12, %v3044_v23, %v1467_v29  ;;  %v2067_v17 = vmul.f32 %v4861_v8, %v4845_v26 }
 0x25b   :  { %v4913_v4 = vsub.f32 %v1562_v63, %v1594_v19  ;;  %v1560_v56 = vsub.f32 %v4871_v22, %v1528_v48  ;;  %v1531_v35 = vmul.f32 6.28125, %v3045_v21  ;;  %v3028_v33 = vor.u32 %v3027_v58, %v3026_v2 }
 0x25c   :  { %v2002_v40 = vmul.f32 %v1970_v57, %v4849_v28  ;;  %v2544_v18 = vpop.f32.mrf.mxu0  ;;  %vm3023_vm13 = vcmp.lt.f32.partialorder %v3022_v3, 8388608.0  ;;  %v2003_v32 = vmul.f32 %v1971_v11, %v4861_v8  ;;  %v1595_v9 = vmul.f32 0.0019353072, %v3045_v21 }
 0x25d   :  { %v4921_v13 = vsub.f32 %v1560_v56, %v1592_v34  ;;  %v4925_v30 = vadd.f32 %v4854_v47, %v2544_v18  ;;  %v1563_v22 = vsub.f32 %v4881_v16, %v1531_v35  ;;  %v3029_v29 = vsel %vm3023_vm13, %v3028_v33, %v1465_v59 }
 0x25e   :  { %v2034_v49 = vadd.f32 -0.16666667, %v2002_v40  ;;  %v1413_v42 = vpop.f32.mrf.mxu0  ;;  %vm1722_vm14 = vcmp.ge.f32.partialorder %v4913_v4, 0.0  ;;  %v1529_v28 = vmul.f32 6.28125, %v3029_v29  ;;  %v4935_v7 = vsel %vm4894_vm9, %v1780_v10, %v4789_v14 }
 0x25f   :  { %v4943_v8 = vsel %vm4898_vm10, %v1781_v52, %v4811_v55  ;;  %vm1720_vm15 = vcmp.ge.f32.partialorder %v4921_v13, 0.0  ;;  %v4946_v16 = vsub.f32 %v1563_v22, %v1595_v9  ;;  %v2035_v59 = vadd.f32 -0.16666667, %v2003_v32 }
 0x260   :  { %v2098_v20 = vmul.f32 %v2066_v12, %v2034_v49  ;;  %v2545_v37 = vpop.f32.mrf.mxu0  ;;  %v1561_v44 = vsub.f32 %v4885_v61, %v1529_v28  ;;  %v1593_v41 = vmul.f32 0.0019353072, %v3029_v29  ;;  %v1470_v14 = vmul.f32 0.15915494, %v4925_v30 }
 0x261   :  { %v4951_v10 = vadd.f32 %v4854_v47, %v1413_v42  ;;  %v4954_v5 = vsel %vm1722_vm14, 3.1415927, %v3153_v36  ;;  %v2099_v55 = vmul.f32 %v2067_v17, %v2035_v59  ;;  %v4957_v52 = vadd.f32 %v4854_v47, %v2545_v37 }
 0x262   :  { %v4961_v45 = vmul.f32 %v4935_v7, %v4935_v7  ;;  %v4964_v46 = vsel %vm1720_vm15, 3.1415927, %v3153_v36  ;;  %v4966_v61 = vsub.f32 %v1561_v44, %v1593_v41  ;;  %v3062_v38 = vand.u32 2147483647, %v1470_v14  ;;  %v1416_v63 = vpop.f32.mrf.mxu0 }
 0x263   :  { %v3064_v0 = vcvt.f32.s32 %v1470_v14  ;;  %vm1723_vm0 = vcmp.ge.f32.partialorder %v4946_v16, 0.0  ;;  %v2130_v25 = vadd.f32 %v2098_v20, %v4839_v43  ;;  %v2131_v60 = vadd.f32 %v2099_v55, %v4845_v26 }
 0x264   :  { %v1468_v62 = vmul.f32 0.15915494, %v4951_v10  ;;  %v1786_v54 = vsub.f32 %v4954_v5, %v4913_v4  ;;  %vm1721_vm1 = vcmp.ge.f32.partialorder %v4966_v61, 0.0  ;;  %v1471_v58 = vmul.f32 0.15915494, %v4957_v52 }
 0x265   :  { %v3065_v3 = vcvt.s32.f32 %v3064_v0  ;;  %v1784_v39 = vsub.f32 %v4964_v46, %v4921_v13  ;;  %v2155_v24 = vpack.c.bf16 %v2131_v60, %v2130_v25  ;;  %v4979_v43 = vsel %vm1723_vm0, 3.1415927, %v3153_v36 }
 0x266   :  { %v3046_v51 = vand.u32 2147483647, %v1468_v62  ;;  %v3048_v6 = vcvt.f32.s32 %v1468_v62  ;;  %vm4981_vm2 = vcmp.lt.f32.partialorder %v3062_v38, 8388608.0  ;;  %v3067_v48 = vand.u32 2147483648, %v1470_v14 }
 0x267   :  { %v3066_v19 = vand.u32 2147483647, %v3065_v3  ;;  %v4986_v23 = vsel %vm1721_vm1, 3.1415927, %v3153_v36  ;;  %2579 = vmatmul.mubr.bf16.gmra.mxu1 %v2155_v24  ;;  %v3070_v57 = vand.u32 2147483647, %v1471_v58  ;;  %v3072_v11 = vcvt.f32.s32 %v1471_v58 }
 0x268   :  { %v3049_v2 = vcvt.s32.f32 %v3048_v6  ;;  %v3051_v56 = vand.u32 2147483648, %v1468_v62  ;;  %v4989_v34 = vadd.f32 %v4854_v47, %v1416_v63  ;;  %v1845_v21 = vmul.f32 %v4943_v8, %v4943_v8  ;;  %v2548_v63 = vpop.f32.mrf.mxu0 }
 0x269   :  { %v3068_v12 = vor.u32 %v3067_v48, %v3066_v19  ;;  %vm4993_vm3 = vcmp.lt.f32.partialorder %v3046_v51, 8388608.0  ;;  %v3073_v40 = vcvt.s32.f32 %v3072_v11  ;;  %v1876_v17 = vmul.f32 2.7557319e-06, %v4961_v45 }
 0x26a   :  { %v3050_v33 = vand.u32 2147483647, %v3049_v2  ;;  %v3075_v32 = vand.u32 2147483648, %v1471_v58  ;;  %v1469_v22 = vmul.f32 0.15915494, %v4989_v34  ;;  %vm3071_vm4 = vcmp.lt.f32.partialorder %v3070_v57, 8388608.0 }
 0x26b   :  { %v3069_v18 = vsel %vm4981_vm2, %v3068_v12, %v1470_v14  ;;  %v1877_v9 = vmul.f32 2.7557319e-06, %v1845_v21  ;;  %v3074_v42 = vand.u32 2147483647, %v3073_v40  ;;  %v1908_v20 = vadd.f32 -0.0001984127, %v1876_v17  ;;  %v1429_v40 = vpop.f32.mrf.mxu0 }
 0x26c   :  { %v1534_v29 = vmul.f32 6.28125, %v3069_v18  ;;  %v3052_v49 = vor.u32 %v3051_v56, %v3050_v33  ;;  %v1598_v28 = vmul.f32 0.0019353072, %v3069_v18  ;;  %v3056_v59 = vcvt.f32.s32 %v1469_v22 }
 0x26d   :  { %v2068_v37 = vmul.f32 %v4961_v45, %v4935_v7  ;;  %v3076_v14 = vor.u32 %v3075_v32, %v3074_v42  ;;  %v1909_v55 = vadd.f32 -0.0001984127, %v1877_v9  ;;  %v3054_v0 = vand.u32 2147483647, %v1469_v22 }
 0x26e   :  { %v1566_v44 = vsub.f32 %v4925_v30, %v1534_v29  ;;  %v3053_v41 = vsel %vm4993_vm3, %v3052_v49, %v1468_v62  ;;  %v3057_v25 = vcvt.s32.f32 %v3056_v59  ;;  %v3059_v60 = vand.u32 2147483648, %v1469_v22 }
 0x26f   :  { %v1532_v38 = vmul.f32 6.28125, %v3053_v41  ;;  %v3077_v24 = vsel %vm3071_vm4, %v3076_v14, %v1471_v58  ;;  %v1940_v51 = vmul.f32 %v1908_v20, %v4961_v45  ;;  %v1941_v6 = vmul.f32 %v1909_v55, %v1845_v21 }
 0x270   :  { %v5006_v3 = vsub.f32 %v1566_v44, %v1598_v28  ;;  %v1596_v19 = vmul.f32 0.0019353072, %v3053_v41  ;;  %v1535_v30 = vmul.f32 6.28125, %v3077_v24  ;;  %v3058_v48 = vand.u32 2147483647, %v3057_v25 }
 0x271   :  { %v1564_v26 = vsub.f32 %v4951_v10, %v1532_v38  ;;  %v1599_v2 = vmul.f32 0.0019353072, %v3077_v24  ;;  %v1972_v62 = vadd.f32 0.008333333, %v1940_v51  ;;  %v1973_v57 = vadd.f32 0.008333333, %v1941_v6  ;;  %v2549_v38 = vpop.f32.mrf.mxu0 }
 0x272   :  { %v2069_v11 = vmul.f32 %v1845_v21, %v4943_v8  ;;  %vm1726_vm5 = vcmp.ge.f32.partialorder %v5006_v3, 0.0  ;;  %v1567_v58 = vsub.f32 %v4957_v52, %v1535_v30  ;;  %v3060_v56 = vor.u32 %v3059_v60, %v3058_v48 }
 0x273   :  { %v5012_v12 = vsub.f32 %v1564_v26, %v1596_v19  ;;  %vm3055_vm6 = vcmp.lt.f32.partialorder %v3054_v0, 8388608.0  ;;  %v2004_v35 = vmul.f32 %v1972_v62, %v4961_v45  ;;  %v2005_v33 = vmul.f32 %v1973_v57, %v1845_v21  ;;  %v1432_v26 = vpop.f32.mrf.mxu0 }
 0x274   :  { %v1654_v10 = vand.u32 2147483647, %v4776_v31  ;;  %v5018_v17 = vsub.f32 %v1567_v58, %v1599_v2  ;;  %v3061_v18 = vsel %vm3055_vm6, %v3060_v56, %v1469_v22  ;;  %v1655_v32 = vand.u32 2147483647, %v4793_v50 }
 0x275   :  { %vm1724_vm7 = vcmp.ge.f32.partialorder %v5012_v12, 0.0  ;;  %v5022_v9 = vsel %vm1726_vm5, 3.1415927, %v3153_v36  ;;  %v1533_v29 = vmul.f32 6.28125, %v3061_v18  ;;  %v5028_v45 = vadd.f32 %v4854_v47, %v2548_v63 }
 0x276   :  { %v5025_v52 = vsel %vm1724_vm7, 3.1415927, %v3153_v36  ;;  %vm1727_vm8 = vcmp.ge.f32.partialorder %v5018_v17, 0.0  ;;  %v2036_v21 = vadd.f32 -0.16666667, %v2004_v35  ;;  %v5032_v42 = vadd.f32 %v4854_v47, %v1429_v40 }
 0x277   :  { %v2037_v49 = vadd.f32 -0.16666667, %v2005_v33  ;;  %v1565_v22 = vsub.f32 %v4989_v34, %v1533_v29  ;;  %v1597_v28 = vmul.f32 0.0019353072, %v3061_v18  ;;  %vm1686_vm9 = vcmp.gt.f32.partialorder %v1654_v10, 1.5707964 }
 0x278   :  { %vm1687_vm10 = vcmp.gt.f32.partialorder %v1655_v32, 1.5707964  ;;  %v5036_v59 = vsel %vm1727_vm8, 3.1415927, %v3153_v36  ;;  %v2100_v20 = vmul.f32 %v2068_v37, %v2036_v21  ;;  %v5042_v41 = vsel %vm1686_vm9, %v1782_v15, %v4776_v31 }
 0x279   :  { %v2101_v44 = vmul.f32 %v2069_v11, %v2037_v49  ;;  %v5044_v14 = vsub.f32 %v1565_v22, %v1597_v28  ;;  %v5050_v34 = vsel %vm1687_vm10, %v1783_v1, %v4793_v50  ;;  %v1846_v55 = vmul.f32 %v5042_v41, %v5042_v41 }
 0x27a   :  { %v1474_v37 = vmul.f32 0.15915494, %v5028_v45  ;;  %v2132_v0 = vadd.f32 %v2100_v20, %v4935_v7  ;;  %v1847_v31 = vmul.f32 %v5050_v34, %v5050_v34  ;;  %v1472_v15 = vmul.f32 0.15915494, %v5032_v42 }
 0x27b   :  { %v2133_v27 = vadd.f32 %v2101_v44, %v4943_v8  ;;  %v1787_v53 = vsub.f32 %v4979_v43, %v4946_v16  ;;  %v1785_v50 = vsub.f32 %v4986_v23, %v4966_v61  ;;  %vm1725_vm11 = vcmp.ge.f32.partialorder %v5044_v14, 0.0 }
 0x27c   :  { %v1878_v1 = vmul.f32 2.7557319e-06, %v1846_v55  ;;  %v1790_v25 = vsub.f32 %v5022_v9, %v5006_v3  ;;  %v1788_v7 = vsub.f32 %v5025_v52, %v5012_v12  ;;  %v1879_v60 = vmul.f32 2.7557319e-06, %v1847_v31 }
 0x27d   :  { %v2156_v8 = vpack.c.bf16 %v2133_v27, %v2132_v0  ;;  %v1791_v24 = vsub.f32 %v5036_v59, %v5018_v17  ;;  %v3094_v6 = vand.u32 2147483647, %v1474_v37  ;;  %v3096_v63 = vcvt.f32.s32 %v1474_v37 }
 0x27e   :  { %v1910_v51 = vadd.f32 -0.0001984127, %v1878_v1  ;;  %v5072_v19 = vsel %vm1725_vm11, 3.1415927, %v3153_v36  ;;  %v1911_v30 = vadd.f32 -0.0001984127, %v1879_v60  ;;  %v3080_v2 = vcvt.f32.s32 %v1472_v15 }
 0x27f   :  { %2582 = vmatprep.mubr.bf16.mxu1 %v2156_v8  ;;  %v3099_v48 = vand.u32 2147483648, %v1474_v37  ;;  %v3097_v57 = vcvt.s32.f32 %v3096_v63  ;;  %v3078_v11 = vand.u32 2147483647, %v1472_v15  ;;  %v5075_v58 = vadd.f32 %v4854_v47, %v2549_v38 }
 0x280   :  { %v1942_v62 = vmul.f32 %v1910_v51, %v1846_v55  ;;  %v1943_v56 = vmul.f32 %v1911_v30, %v1847_v31  ;;  %v3081_v35 = vcvt.s32.f32 %v3080_v2  ;;  %v3083_v33 = vand.u32 2147483648, %v1472_v15 }
 0x281   :  { %v5078_v10 = vadd.f32 %v4854_v47, %v1432_v26  ;;  %v2070_v18 = vmul.f32 %v1846_v55, %v5042_v41  ;;  %v3098_v32 = vand.u32 2147483647, %v3097_v57  ;;  %v1475_v29 = vmul.f32 0.15915494, %v5075_v58 }
 0x282   :  { %v1974_v40 = vadd.f32 0.008333333, %v1942_v62  ;;  %v1975_v21 = vadd.f32 0.008333333, %v1943_v56  ;;  %v2071_v49 = vmul.f32 %v1847_v31, %v5050_v34  ;;  %v3082_v22 = vand.u32 2147483647, %v3081_v35 }
 0x283   :  { %v1473_v28 = vmul.f32 0.15915494, %v5078_v10  ;;  %v3100_v44 = vor.u32 %v3099_v48, %v3098_v32  ;;  %v3102_v38 = vand.u32 2147483647, %v1475_v29  ;;  %v3104_v0 = vcvt.f32.s32 %v1475_v29 }
 0x284   :  { %v2006_v20 = vmul.f32 %v1974_v40, %v1846_v55  ;;  %v2007_v27 = vmul.f32 %v1975_v21, %v1847_v31  ;;  %vm3095_vm12 = vcmp.lt.f32.partialorder %v3094_v6, 8388608.0  ;;  %vm3079_vm13 = vcmp.lt.f32.partialorder %v3078_v11, 8388608.0 }
 0x285   :  { %v3084_v47 = vor.u32 %v3083_v33, %v3082_v22  ;;  %v3101_v8 = vsel %vm3095_vm12, %v3100_v44, %v1474_v37  ;;  %v3105_v60 = vcvt.s32.f32 %v3104_v0  ;;  %v3107_v51 = vand.u32 2147483648, %v1475_v29 }
 0x286   :  { %v2038_v1 = vadd.f32 -0.16666667, %v2006_v20  ;;  %v2039_v63 = vadd.f32 -0.16666667, %v2007_v27  ;;  %v1538_v26 = vmul.f32 6.28125, %v3101_v8  ;;  %vm5084_vm14 = vcmp.lt.f32.partialorder %v3102_v38, 8388608.0 }
 0x287   :  { %v3085_v30 = vsel %vm3079_vm13, %v3084_v47, %v1472_v15  ;;  %v3086_v2 = vand.u32 2147483647, %v1473_v28  ;;  %v3106_v55 = vand.u32 2147483647, %v3105_v60  ;;  %v1602_v6 = vmul.f32 0.0019353072, %v3101_v8 }
 0x288   :  { %v2102_v62 = vmul.f32 %v2070_v18, %v2038_v1  ;;  %v1536_v57 = vmul.f32 6.28125, %v3085_v30  ;;  %v2103_v48 = vmul.f32 %v2071_v49, %v2039_v63  ;;  %v1570_v31 = vsub.f32 %v5028_v45, %v1538_v26 }
 0x289   :  { %v3088_v11 = vcvt.f32.s32 %v1473_v28  ;;  %v1600_v33 = vmul.f32 0.0019353072, %v3085_v30  ;;  %v3108_v40 = vor.u32 %v3107_v51, %v3106_v55  ;;  %v1656_v21 = vand.u32 2147483647, %v4921_v13 }
 0x28a   :  { %v2134_v37 = vadd.f32 %v2102_v62, %v5042_v41  ;;  %v1568_v35 = vsub.f32 %v5032_v42, %v1536_v57  ;;  %v2135_v15 = vadd.f32 %v2103_v48, %v5050_v34  ;;  %v5092_v18 = vsub.f32 %v1570_v31, %v1602_v6 }
 0x28b   :  { %v3089_v32 = vcvt.s32.f32 %v3088_v11  ;;  %v1789_v49 = vsub.f32 %v5072_v19, %v5044_v14  ;;  %v3109_v45 = vsel %vm5084_vm14, %v3108_v40, %v1475_v29  ;;  %v1657_v41 = vand.u32 2147483647, %v4966_v61 }
 0x28c   :  { %v5097_v22 = vsub.f32 %v1568_v35, %v1600_v33  ;;  %v2157_v42 = vpack.c.bf16 %v2135_v15, %v2134_v37  ;;  %vm1730_vm15 = vcmp.ge.f32.partialorder %v5092_v18, 0.0  ;;  %v1539_v20 = vmul.f32 6.28125, %v3109_v45 }
 0x28d   :  { %vm5103_vm0 = vcmp.lt.f32.partialorder %v3086_v2, 8388608.0  ;;  %v3090_v44 = vand.u32 2147483647, %v3089_v32  ;;  %v3091_v38 = vand.u32 2147483648, %v1473_v28  ;;  %v1658_v0 = vand.u32 2147483647, %v4913_v4 }
 0x28e   :  { %vm1728_vm1 = vcmp.ge.f32.partialorder %v5097_v22, 0.0  ;;  %2583 = vmatmul.mubr.bf16.gmra.mxu1 %v2157_v42  ;;  %v5110_v27 = vsel %vm1730_vm15, 3.1415927, %v3153_v36  ;;  %v1571_v29 = vsub.f32 %v5075_v58, %v1539_v20  ;;  %v1603_v47 = vmul.f32 0.0019353072, %v3109_v45 }
 0x28f   :  { %vm1688_vm2 = vcmp.gt.f32.partialorder %v1656_v21, 1.5707964  ;;  %v5114_v1 = vsel %vm1728_vm1, 3.1415927, %v3153_v36  ;;  %v3092_v8 = vor.u32 %v3091_v38, %v3090_v44  ;;  %vm1689_vm3 = vcmp.gt.f32.partialorder %v1657_v41, 1.5707964 }
 0x290   :  { %v5120_v60 = vsel %vm1688_vm2, %v1784_v39, %v4921_v13  ;;  %v5122_v51 = vsub.f32 %v1571_v29, %v1603_v47  ;;  %v5128_v58 = vsel %vm1689_vm3, %v1785_v50, %v4966_v61  ;;  %v1659_v26 = vand.u32 2147483647, %v4946_v16 }
 0x291   :  { %v1848_v63 = vmul.f32 %v5120_v60, %v5120_v60  ;;  %v1794_v30 = vsub.f32 %v5110_v27, %v5092_v18  ;;  %v3093_v13 = vsel %vm5103_vm0, %v3092_v8, %v1473_v28  ;;  %v1849_v46 = vmul.f32 %v5128_v58, %v5128_v58 }
 0x292   :  { %vm1690_vm4 = vcmp.gt.f32.partialorder %v1658_v0, 1.5707964  ;;  %vm1731_vm5 = vcmp.ge.f32.partialorder %v5122_v51, 0.0  ;;  %v1537_v39 = vmul.f32 6.28125, %v3093_v13  ;;  %v1660_v23 = vand.u32 2147483647, %v5012_v12 }
 0x293   :  { %v1880_v61 = vmul.f32 2.7557319e-06, %v1848_v63  ;;  %v1792_v50 = vsub.f32 %v5114_v1, %v5097_v22  ;;  %v5144_v2 = vsel %vm1731_vm5, 3.1415927, %v3153_v36  ;;  %v1601_v62 = vmul.f32 0.0019353072, %v3093_v13 }
 0x294   :  { %v1881_v57 = vmul.f32 2.7557319e-06, %v1849_v46  ;;  %v1569_v28 = vsub.f32 %v5078_v10, %v1537_v39  ;;  %v2072_v55 = vmul.f32 %v1848_v63, %v5120_v60  ;;  %vm1691_vm6 = vcmp.gt.f32.partialorder %v1659_v26, 1.5707964 }
 0x295   :  { %v1912_v56 = vadd.f32 -0.0001984127, %v1880_v61  ;;  %v5152_v31 = vsel %vm1690_vm4, %v1786_v54, %v4913_v4  ;;  %v5158_v6 = vsel %vm1691_vm6, %v1787_v53, %v4946_v16  ;;  %v1661_v11 = vand.u32 2147483647, %v5044_v14 }
 0x296   :  { %v1913_v48 = vadd.f32 -0.0001984127, %v1881_v57  ;;  %v5161_v10 = vsub.f32 %v1569_v28, %v1601_v62  ;;  %v1850_v35 = vmul.f32 %v5152_v31, %v5152_v31  ;;  %v1851_v33 = vmul.f32 %v5158_v6, %v5158_v6 }
 0x297   :  { %v1944_v37 = vmul.f32 %v1912_v56, %v1848_v63  ;;  %v2073_v4 = vmul.f32 %v1849_v46, %v5128_v58  ;;  %vm1692_vm7 = vcmp.gt.f32.partialorder %v1660_v23, 1.5707964  ;;  %vm1693_vm8 = vcmp.gt.f32.partialorder %v1661_v11, 1.5707964 }
 0x298   :  { %v1945_v5 = vmul.f32 %v1913_v48, %v1849_v46  ;;  %v1795_v16 = vsub.f32 %v5144_v2, %v5122_v51  ;;  %vm1729_vm9 = vcmp.ge.f32.partialorder %v5161_v10, 0.0  ;;  %v1882_v43 = vmul.f32 2.7557319e-06, %v1850_v35 }
 0x299   :  { %v1976_v54 = vadd.f32 0.008333333, %v1944_v37  ;;  %v1883_v40 = vmul.f32 2.7557319e-06, %v1851_v33  ;;  %v2074_v15 = vmul.f32 %v1850_v35, %v5152_v31  ;;  %v1662_v32 = vand.u32 2147483647, %v5006_v3 }
 0x29a   :  { %v1977_v53 = vadd.f32 0.008333333, %v1945_v5  ;;  %v5174_v21 = vsel %vm1729_vm9, 3.1415927, %v3153_v36  ;;  %v1914_v41 = vadd.f32 -0.0001984127, %v1882_v43  ;;  %v5180_v42 = vsel %vm1692_vm7, %v1788_v7, %v5012_v12 }
 0x29b   :  { %v2008_v45 = vmul.f32 %v1976_v54, %v1848_v63  ;;  %v1915_v34 = vadd.f32 -0.0001984127, %v1883_v40  ;;  %v5186_v44 = vsel %vm1693_vm8, %v1789_v49, %v5044_v14  ;;  %v1852_v36 = vmul.f32 %v5180_v42, %v5180_v42 }
 0x29c   :  { %v2009_v20 = vmul.f32 %v1977_v53, %v1849_v46  ;;  %v1946_v0 = vmul.f32 %v1914_v41, %v1850_v35  ;;  %v1853_v29 = vmul.f32 %v5186_v44, %v5186_v44  ;;  %v1663_v52 = vand.u32 2147483647, %v5018_v17 }
 0x29d   :  { %v2040_v38 = vadd.f32 -0.16666667, %v2008_v45  ;;  %v1947_v7 = vmul.f32 %v1915_v34, %v1851_v33  ;;  %v2075_v47 = vmul.f32 %v1851_v33, %v5158_v6  ;;  %v1884_v8 = vmul.f32 2.7557319e-06, %v1852_v36 }
 0x29e   :  { %v2041_v12 = vadd.f32 -0.16666667, %v2009_v20  ;;  %v1793_v19 = vsub.f32 %v5174_v21, %v5161_v10  ;;  %v1978_v49 = vadd.f32 0.008333333, %v1946_v0  ;;  %v1885_v63 = vmul.f32 2.7557319e-06, %v1853_v29 }
 0x29f   :  { %v2104_v14 = vmul.f32 %v2072_v55, %v2040_v38  ;;  %v1979_v13 = vadd.f32 0.008333333, %v1947_v7  ;;  %v1916_v46 = vadd.f32 -0.0001984127, %v1884_v8  ;;  %vm1694_vm10 = vcmp.gt.f32.partialorder %v1662_v32, 1.5707964 }
 0x2a0   :  { %v2105_v26 = vmul.f32 %v2073_v4, %v2041_v12  ;;  %v2010_v61 = vmul.f32 %v1978_v49, %v1850_v35  ;;  %v1917_v23 = vadd.f32 -0.0001984127, %v1885_v63  ;;  %vm1695_vm11 = vcmp.gt.f32.partialorder %v1663_v52, 1.5707964 }
 0x2a1   :  { %v2136_v39 = vadd.f32 %v2104_v14, %v5120_v60  ;;  %v2011_v57 = vmul.f32 %v1979_v13, %v1851_v33  ;;  %v1948_v28 = vmul.f32 %v1916_v46, %v1852_v36  ;;  %v5202_v56 = vsel %vm1694_vm10, %v1790_v25, %v5006_v3 }
 0x2a2   :  { %v2137_v62 = vadd.f32 %v2105_v26, %v5128_v58  ;;  %v2042_v55 = vadd.f32 -0.16666667, %v2010_v61  ;;  %v1949_v48 = vmul.f32 %v1917_v23, %v1853_v29  ;;  %v5208_v60 = vsel %vm1695_vm11, %v1791_v24, %v5018_v17 }
 0x2a3   :  { %v1854_v11 = vmul.f32 %v5202_v56, %v5202_v56  ;;  %v2043_v37 = vadd.f32 -0.16666667, %v2011_v57  ;;  %v1980_v35 = vadd.f32 0.008333333, %v1948_v28  ;;  %v1855_v33 = vmul.f32 %v5208_v60, %v5208_v60 }
 0x2a4   :  { %v2158_v58 = vpack.c.bf16 %v2137_v62, %v2136_v39  ;;  %v2106_v9 = vmul.f32 %v2074_v15, %v2042_v55  ;;  %v1981_v3 = vadd.f32 0.008333333, %v1949_v48  ;;  %v2076_v25 = vmul.f32 %v1852_v36, %v5180_v42 }
 0x2a5   :  { %v1886_v5 = vmul.f32 2.7557319e-06, %v1854_v11  ;;  %v2107_v4 = vmul.f32 %v2075_v47, %v2043_v37  ;;  %v2012_v54 = vmul.f32 %v1980_v35, %v1852_v36  ;;  %v2077_v17 = vmul.f32 %v1853_v29, %v5186_v44 }
 0x2a6   :  { %2586 = vmatprep.mubr.bf16.mxu1 %v2158_v58  ;;  %v1887_v59 = vmul.f32 2.7557319e-06, %v1855_v33  ;;  %v2138_v24 = vadd.f32 %v2106_v9, %v5152_v31  ;;  %v2013_v43 = vmul.f32 %v1981_v3, %v1853_v29  ;;  %v1664_v40 = vand.u32 2147483647, %v5097_v22 }
 0x2a7   :  { %v1918_v53 = vadd.f32 -0.0001984127, %v1886_v5  ;;  %v2139_v32 = vadd.f32 %v2107_v4, %v5158_v6  ;;  %v2044_v21 = vadd.f32 -0.16666667, %v2012_v54  ;;  %v1665_v45 = vand.u32 2147483647, %v5161_v10 }
 0x2a8   :  { %v1919_v15 = vadd.f32 -0.0001984127, %v1887_v59  ;;  %v2045_v41 = vadd.f32 -0.16666667, %v2013_v43  ;;  %vm1696_vm12 = vcmp.gt.f32.partialorder %v1664_v40, 1.5707964  ;;  %v2078_v13 = vmul.f32 %v1854_v11, %v5202_v56 }
 0x2a9   :  { %v1950_v20 = vmul.f32 %v1918_v53, %v1854_v11  ;;  %v1666_v34 = vand.u32 2147483647, %v5092_v18  ;;  %v2159_v36 = vpack.c.bf16 %v2139_v32, %v2138_v24  ;;  %v2108_v38 = vmul.f32 %v2076_v25, %v2044_v21 }
 0x2aa   :  { %v1951_v0 = vmul.f32 %v1919_v15, %v1855_v33  ;;  %vm1697_vm13 = vcmp.gt.f32.partialorder %v1665_v45, 1.5707964  ;;  %v2109_v31 = vmul.f32 %v2077_v17, %v2045_v41  ;;  %v1824_v6 = vsel %vm1696_vm12, %v1792_v50, %v5097_v22 }
 0x2ab   :  { %v1982_v29 = vadd.f32 0.008333333, %v1950_v20  ;;  %v1825_v52 = vsel %vm1697_vm13, %v1793_v19, %v5161_v10  ;;  %2587 = vmatmul.mubr.bf16.gmra.mxu1 %v2159_v36  ;;  %v2140_v12 = vadd.f32 %v2108_v38, %v5180_v42  ;;  %v1856_v47 = vmul.f32 %v1824_v6, %v1824_v6 }
 0x2ac   :  { %v1983_v7 = vadd.f32 0.008333333, %v1951_v0  ;;  %v1857_v8 = vmul.f32 %v1825_v52, %v1825_v52  ;;  %v2141_v14 = vadd.f32 %v2109_v31, %v5186_v44  ;;  %v1667_v63 = vand.u32 2147483647, %v5122_v51  ;;  %v5244_v31 = vld [vmem:[%s5412_s6] ss:$0 sm:$0xff] }
 0x2ad   :  { %v2014_v49 = vmul.f32 %v1982_v29, %v1854_v11  ;;  %vm1698_vm14 = vcmp.gt.f32.partialorder %v1666_v34, 1.5707964  ;;  %v1888_v46 = vmul.f32 2.7557319e-06, %v1856_v47  ;;  %v2079_v10 = vmul.f32 %v1855_v33, %v5208_v60 }
 0x2ae   :  { %v2015_v26 = vmul.f32 %v1983_v7, %v1855_v33  ;;  %v1889_v1 = vmul.f32 2.7557319e-06, %v1857_v8  ;;  %v2160_v22 = vpack.c.bf16 %v2141_v14, %v2140_v12  ;;  %vm1699_vm15 = vcmp.gt.f32.partialorder %v1667_v63, 1.5707964 }
 0x2af   :  { %v2046_v50 = vadd.f32 -0.16666667, %v2014_v49  ;;  %v1920_v19 = vadd.f32 -0.0001984127, %v1888_v46  ;;  %v1826_v44 = vsel %vm1698_vm14, %v1794_v30, %v5092_v18  ;;  %v1827_v23 = vsel %vm1699_vm15, %v1795_v16, %v5122_v51 }
 0x2b0   :  { %v2047_v42 = vadd.f32 -0.16666667, %v2015_v26  ;;  %v1921_v39 = vadd.f32 -0.0001984127, %v1889_v1  ;;  %2590 = vmatprep.mubr.bf16.mxu1 %v2160_v22  ;;  %v1858_v62 = vmul.f32 %v1826_v44, %v1826_v44  ;;  %v1859_v48 = vmul.f32 %v1827_v23, %v1827_v23 }
 0x2b1   :  { %v2110_v61 = vmul.f32 %v2078_v13, %v2046_v50  ;;  %v1952_v28 = vmul.f32 %v1920_v19, %v1856_v47  ;;  %v2080_v2 = vmul.f32 %v1856_v47, %v1824_v6  ;;  %v2081_v4 = vmul.f32 %v1857_v8, %v1825_v52 }
 0x2b2   :  { %v2111_v57 = vmul.f32 %v2079_v10, %v2047_v42  ;;  %v1953_v55 = vmul.f32 %v1921_v39, %v1857_v8  ;;  %v1890_v58 = vmul.f32 2.7557319e-06, %v1858_v62  ;;  %v1891_v18 = vmul.f32 2.7557319e-06, %v1859_v48 }
 0x2b3   :  { %v2142_v11 = vadd.f32 %v2110_v61, %v5202_v56  ;;  %v1984_v35 = vadd.f32 0.008333333, %v1952_v28  ;;  %v2082_v21 = vmul.f32 %v1858_v62, %v1826_v44  ;;  %v2083_v41 = vmul.f32 %v1859_v48, %v1827_v23 }
 0x2b4   :  { %v2143_v37 = vadd.f32 %v2111_v57, %v5208_v60  ;;  %v1985_v27 = vadd.f32 0.008333333, %v1953_v55  ;;  %v1922_v30 = vadd.f32 -0.0001984127, %v1890_v58  ;;  %v1923_v25 = vadd.f32 -0.0001984127, %v1891_v18 }
 0x2b5   :  { %v2016_v9 = vmul.f32 %v1984_v35, %v1856_v47  ;;  %vm2396_vm0 = vcmask 23552  }
 0x2b6   :  { %v2161_v33 = vpack.c.bf16 %v2143_v37, %v2142_v11  ;;  %v2017_v3 = vmul.f32 %v1985_v27, %v1857_v8  ;;  %v1954_v51 = vmul.f32 %v1922_v30, %v1858_v62  ;;  %v1955_v54 = vmul.f32 %v1923_v25, %v1859_v48 }
 0x2b7   :  { %v2048_v16 = vadd.f32 -0.16666667, %v2016_v9 }
 0x2b8   :  { %2591 = vmatmul.mubr.bf16.gmra.mxu1 %v2161_v33  ;;  %v2049_v5 = vadd.f32 -0.16666667, %v2017_v3  ;;  %v1986_v17 = vadd.f32 0.008333333, %v1954_v51  ;;  %v1987_v24 = vadd.f32 0.008333333, %v1955_v54 }
 0x2b9   :  { %v2112_v56 = vmul.f32 %v2080_v2, %v2048_v16 }
 0x2ba   :  { %v2113_v59 = vmul.f32 %v2081_v4, %v2049_v5  ;;  %v2018_v60 = vmul.f32 %v1986_v17, %v1858_v62  ;;  %v2019_v40 = vmul.f32 %v1987_v24, %v1859_v48 }
 0x2bb   :  { %v2144_v43 = vadd.f32 %v2112_v56, %v1824_v6 }
 0x2bc   :  { %v2145_v53 = vadd.f32 %v2113_v59, %v1825_v52  ;;  %v2050_v32 = vadd.f32 -0.16666667, %v2018_v60  ;;  %v2051_v45 = vadd.f32 -0.16666667, %v2019_v40 }
 0x2be   :  { %v2162_v15 = vpack.c.bf16 %v2145_v53, %v2144_v43  ;;  %v2114_v20 = vmul.f32 %v2082_v21, %v2050_v32  ;;  %v2115_v34 = vmul.f32 %v2083_v41, %v2051_v45 }
 0x2c0   :  { %2594 = vmatprep.mubr.bf16.mxu1 %v2162_v15  ;;  %v2146_v36 = vadd.f32 %v2114_v20, %v1826_v44  ;;  %v2147_v38 = vadd.f32 %v2115_v34, %v1827_v23 }
 0x2c2   :  { %v2163_v0 = vpack.c.bf16 %v2147_v38, %v2146_v36 }
 0x2c4   :  { %2595 = vmatmul.mubr.bf16.gmra.mxu1 %v2163_v0 }
 0x2cb   :  { %v2568_v29 = vpop.f32.mrf.mxu1 }
 0x2cc   :  { %v2278_v6 = vadd.f32 %v2568_v29, %v5244_v31 }
 0x2cd   :  { %v2269_v52 = vpop.f32.mrf.mxu1 }
 0x2ce   :  { %2399 = vst.msk [vmem:[%s5413_s7 + $0x10] sm:$0xff] %vm2396_vm0, %v2278_v6  ;;  %v2270_v12 = vadd.f32 %v5244_v31, %v2269_v52 }
 0x2cf   :  { %v2569_v7 = vpop.f32.mrf.mxu1 }
 0x2d0   :  { %2397 = vst.msk [vmem:[%s5413_s7] sm:$0xff] %vm2396_vm0, %v2270_v12  ;;  %v2281_v47 = vadd.f32 %v2569_v7, %v5244_v31 }
 0x2d1   :  { %v2272_v8 = vpop.f32.mrf.mxu1 }
 0x2d2   :  { %2400 = vst.msk [vmem:[%s5413_s7 + $0x18] sm:$0xff] %vm2396_vm0, %v2281_v47  ;;  %v2273_v14 = vadd.f32 %v5244_v31, %v2272_v8 }
 0x2d4   :  { %2398 = vst.msk [vmem:[%s5413_s7 + $0x8] sm:$0xff] %vm2396_vm0, %v2273_v14 }
 0x2ea   :  { %v2572_v49 = vpop.f32.mrf.mxu1 }
 0x2eb   :  { %v2294_v63 = vadd.f32 %v2572_v49, %v5244_v31 }
 0x2ec   :  { %v2285_v26 = vpop.f32.mrf.mxu1 }
 0x2ed   :  { %2403 = vst.msk [vmem:[%s5413_s7 + $0x30] sm:$0xff] %vm2396_vm0, %v2294_v63  ;;  %v2286_v13 = vadd.f32 %v5244_v31, %v2285_v26 }
 0x2ee   :  { %v2573_v46 = vpop.f32.mrf.mxu1 }
 0x2ef   :  { %2401 = vst.msk [vmem:[%s5413_s7 + $0x20] sm:$0xff] %vm2396_vm0, %v2286_v13  ;;  %v2297_v1 = vadd.f32 %v2573_v46, %v5244_v31 }
 0x2f0   :  { %v2288_v22 = vpop.f32.mrf.mxu1 }
 0x2f1   :  { %2404 = vst.msk [vmem:[%s5413_s7 + $0x38] sm:$0xff] %vm2396_vm0, %v2297_v1  ;;  %v2289_v50 = vadd.f32 %v5244_v31, %v2288_v22 }
 0x2f3   :  { %2402 = vst.msk [vmem:[%s5413_s7 + $0x28] sm:$0xff] %vm2396_vm0, %v2289_v50 }
 0x30a   :  { %v2576_v10 = vpop.f32.mrf.mxu1 }
 0x30b   :  { %v2310_v42 = vadd.f32 %v2576_v10, %v5244_v31 }
 0x30c   :  { %v2301_v19 = vpop.f32.mrf.mxu1 }
 0x30d   :  { %2407 = vst.msk [vmem:[%s5413_s7 + $0x50] sm:$0xff] %vm2396_vm0, %v2310_v42  ;;  %v2302_v39 = vadd.f32 %v5244_v31, %v2301_v19 }
 0x30e   :  { %v2577_v44 = vpop.f32.mrf.mxu1 }
 0x30f   :  { %2405 = vst.msk [vmem:[%s5413_s7 + $0x40] sm:$0xff] %vm2396_vm0, %v2302_v39  ;;  %v2313_v61 = vadd.f32 %v2577_v44, %v5244_v31 }
 0x310   :  { %v2304_v23 = vpop.f32.mrf.mxu1 }
 0x311   :  { %2408 = vst.msk [vmem:[%s5413_s7 + $0x58] sm:$0xff] %vm2396_vm0, %v2313_v61  ;;  %v2305_v62 = vadd.f32 %v5244_v31, %v2304_v23 }
 0x313   :  { %2406 = vst.msk [vmem:[%s5413_s7 + $0x48] sm:$0xff] %vm2396_vm0, %v2305_v62 }
 0x327   :  { %v2580_v57 = vpop.f32.mrf.mxu1 }
 0x328   :  { %v2326_v28 = vadd.f32 %v2580_v57, %v5244_v31 }
 0x329   :  { %v2317_v55 = vpop.f32.mrf.mxu1 }
 0x32a   :  { %2411 = vst.msk [vmem:[%s5413_s7 + $0x70] sm:$0xff] %vm2396_vm0, %v2326_v28  ;;  %v2318_v48 = vadd.f32 %v5244_v31, %v2317_v55 }
 0x32b   :  { %v2581_v11 = vpop.f32.mrf.mxu1 }
 0x32c   :  { %2409 = vst.msk [vmem:[%s5413_s7 + $0x60] sm:$0xff] %vm2396_vm0, %v2318_v48  ;;  %v2329_v58 = vadd.f32 %v2581_v11, %v5244_v31 }
 0x32d   :  { %v2320_v37 = vpop.f32.mrf.mxu1 }
 0x32e   :  { %2412 = vst.msk [vmem:[%s5413_s7 + $0x78] sm:$0xff] %vm2396_vm0, %v2329_v58  ;;  %v2321_v35 = vadd.f32 %v5244_v31, %v2320_v37 }
 0x330   :  { %2410 = vst.msk [vmem:[%s5413_s7 + $0x68] sm:$0xff] %vm2396_vm0, %v2321_v35 }
 0x34e   :  { %v2584_v27 = vpop.f32.mrf.mxu1 }
 0x34f   :  { %v2342_v18 = vadd.f32 %v2584_v27, %v5244_v31 }
 0x350   :  { %v2333_v30 = vpop.f32.mrf.mxu1 }
 0x351   :  { %2415 = vst.msk [vmem:[%s5413_s7 + $0x90] sm:$0xff] %vm2396_vm0, %v2342_v18  ;;  %v2334_v33 = vadd.f32 %v5244_v31, %v2333_v30 }
 0x352   :  { %v2585_v9 = vpop.f32.mrf.mxu1 }
 0x353   :  { %2413 = vst.msk [vmem:[%s5413_s7 + $0x80] sm:$0xff] %vm2396_vm0, %v2334_v33  ;;  %v2345_v3 = vadd.f32 %v2585_v9, %v5244_v31 }
 0x354   :  { %v2336_v25 = vpop.f32.mrf.mxu1 }
 0x355   :  { %2416 = vst.msk [vmem:[%s5413_s7 + $0x98] sm:$0xff] %vm2396_vm0, %v2345_v3  ;;  %v2337_v2 = vadd.f32 %v5244_v31, %v2336_v25 }
 0x357   :  { %2414 = vst.msk [vmem:[%s5413_s7 + $0x88] sm:$0xff] %vm2396_vm0, %v2337_v2 }
 0x36b   :  { %v2588_v51 = vpop.f32.mrf.mxu1 }
 0x36c   :  { %v2358_v16 = vadd.f32 %v2588_v51, %v5244_v31 }
 0x36d   :  { %v2349_v5 = vpop.f32.mrf.mxu1 }
 0x36e   :  { %2419 = vst.msk [vmem:[%s5413_s7 + $0xb0] sm:$0xff] %vm2396_vm0, %v2358_v16  ;;  %v2350_v4 = vadd.f32 %v5244_v31, %v2349_v5 }
 0x36f   :  { %v2589_v54 = vpop.f32.mrf.mxu1 }
 0x370   :  { %2417 = vst.msk [vmem:[%s5413_s7 + $0xa0] sm:$0xff] %vm2396_vm0, %v2350_v4  ;;  %v2361_v17 = vadd.f32 %v2589_v54, %v5244_v31 }
 0x371   :  { %v2352_v56 = vpop.f32.mrf.mxu1 }
 0x372   :  { %2420 = vst.msk [vmem:[%s5413_s7 + $0xb8] sm:$0xff] %vm2396_vm0, %v2361_v17  ;;  %v2353_v59 = vadd.f32 %v5244_v31, %v2352_v56 }
 0x374   :  { %2418 = vst.msk [vmem:[%s5413_s7 + $0xa8] sm:$0xff] %vm2396_vm0, %v2353_v59 }
 0x378   :  { %v2592_v24 = vpop.f32.mrf.mxu1 }
 0x379   :  { %v2374_v60 = vadd.f32 %v2592_v24, %v5244_v31 }
 0x37a   :  { %v2365_v43 = vpop.f32.mrf.mxu1 }
 0x37b   :  { %2423 = vst.msk [vmem:[%s5413_s7 + $0xd0] sm:$0xff] %vm2396_vm0, %v2374_v60  ;;  %v2366_v53 = vadd.f32 %v5244_v31, %v2365_v43 }
 0x37c   :  { %v2593_v40 = vpop.f32.mrf.mxu1 }
 0x37d   :  { %2421 = vst.msk [vmem:[%s5413_s7 + $0xc0] sm:$0xff] %vm2396_vm0, %v2366_v53  ;;  %v2377_v32 = vadd.f32 %v2593_v40, %v5244_v31 }
 0x37e   :  { %v2368_v21 = vpop.f32.mrf.mxu1 }
 0x37f   :  { %2424 = vst.msk [vmem:[%s5413_s7 + $0xd8] sm:$0xff] %vm2396_vm0, %v2377_v32  ;;  %v2369_v15 = vadd.f32 %v5244_v31, %v2368_v21 }
 0x381   :  { %2422 = vst.msk [vmem:[%s5413_s7 + $0xc8] sm:$0xff] %vm2396_vm0, %v2369_v15 }
 0x384   :  { %v2596_v45 = vpop.f32.mrf.mxu1 }
 0x385   :  { %v2390_v41 = vadd.f32 %v2596_v45, %v5244_v31 }
 0x386   :  { %v2381_v20 = vpop.f32.mrf.mxu1 }
 0x387   :  { %2427 = vst.msk [vmem:[%s5413_s7 + $0xf0] sm:$0xff] %vm2396_vm0, %v2390_v41  ;;  %v2382_v34 = vadd.f32 %v5244_v31, %v2381_v20 }
 0x388   :  { %v2597_v36 = vpop.f32.mrf.mxu1 }
 0x389   :  { %2425 = vst.msk [vmem:[%s5413_s7 + $0xe0] sm:$0xff] %vm2396_vm0, %v2382_v34  ;;  %v2393_v38 = vadd.f32 %v2597_v36, %v5244_v31 }
 0x38a   :  { %v2384_v0 = vpop.f32.mrf.mxu1 }
 0x38b   :  { %2428 = vst.msk [vmem:[%s5413_s7 + $0xf8] sm:$0xff] %vm2396_vm0, %v2393_v38  ;;  %v2385_v29 = vadd.f32 %v5244_v31, %v2384_v0 }
 0x38d   :  { %2426 = vst.msk [vmem:[%s5413_s7 + $0xe8] sm:$0xff] %vm2396_vm0, %v2385_v29 }

// kernel: tpu_custom_call.1
= control target key start
LH: loop header
LB: loop body
LE: loop exit
PB: predicated region body
PF: predicated region fallthrough
CT: control target
= control target key end

     0   :  { %v3151_v0 = vmov 0   ;;  %v3152_v6 = vmov 1   ;;  %s5406_s0 = inlined_call_operand.vmem [shape: f32[256,2], index: 0, kind: input, shape index: {}]   ;;  %s5407_s3 = inlined_call_operand.vmem [shape: bf16[128,128], index: 3, kind: input, shape index: {}]   ;;  %s5408_s1 = inlined_call_operand.vmem [shape: f32[2,128], index: 1, kind: input, shape index: {}]   ;;  %s5409_s2 = inlined_call_operand.vmem [shape: f32[1,128], index: 2, kind: input, shape index: {}]   ;;  %s5410_s5 = inlined_call_operand.vmem [shape: bf16[128,128], index: 5, kind: input, shape index: {}]   ;;  %s5411_s4 = inlined_call_operand.vmem [shape: f32[1,128], index: 4, kind: input, shape index: {}]   ;;  %s5412_s6 = inlined_call_operand.vmem [shape: f32[1,128], index: 6, kind: input, shape index: {}]   ;;  %s5413_s7 = inlined_call_operand.vmem [shape: f32[256,3], index: 7, kind: output, shape index: {}]  }
   0x1   :  { %3114 = vset.pattern.permute.xlu1 %v3151_v0  ;;  %3113 = vset.pattern.permute.xlu0 %v3151_v0  ;;  %v29_v1 = vld [vmem:[%s5406_s0 + $0x10] sm:$0xff]  ;;  %v27_v2 = vld [vmem:[%s5406_s0] sm:$0xff]  ;;  %v30_v3 = vld [vmem:[%s5406_s0 + $0x18] sm:$0xff] }
   0x2   :  { %73 = vperm.xlu1 %3114, %v29_v1   ;;  %63 = vperm.xlu0 %3113, %v27_v2   ;;  %v28_v4 = vld [vmem:[%s5406_s0 + $0x8] sm:$0xff]  ;;  %v31_v9 = vld [vmem:[%s5406_s0 + $0x20] sm:$0xff]  ;;  %v33_v11 = vld [vmem:[%s5406_s0 + $0x30] sm:$0xff] }
   0x3   :  { %v32_v5 = vld [vmem:[%s5406_s0 + $0x28] sm:$0xff]  ;;  %v34_v13 = vld [vmem:[%s5406_s0 + $0x38] sm:$0xff]  ;;  %v35_v16 = vld [vmem:[%s5406_s0 + $0x40] sm:$0xff] }
   0x4   :  { %v36_v7 = vld [vmem:[%s5406_s0 + $0x48] sm:$0xff]  ;;  %v37_v17 = vld [vmem:[%s5406_s0 + $0x50] sm:$0xff]  ;;  %v38_v18 = vld [vmem:[%s5406_s0 + $0x58] sm:$0xff] }
   0x5   :  { %v3218_v8 = vld [vmem:[%s5406_s0 + $0x68] sm:$0xff]  ;;  %v3131_v19 = vld [vmem:[%s5407_s3 + $0x38] sm:$0xff]   ;;  %v39_v20 = vld [vmem:[%s5406_s0 + $0x60] sm:$0xff] }
   0x6   :  { %78 = vperm.xlu1 %3114, %v30_v3   ;;  %68 = vperm.xlu0 %3113, %v28_v4   ;;  %v3228_v10 = vld [vmem:[%s5406_s0 + $0x88] sm:$0xff]  ;;  %v3132_v21 = vld [vmem:[%s5407_s3 + $0x30] sm:$0xff]   ;;  %v42_v23 = vld [vmem:[%s5406_s0 + $0x78] sm:$0xff] }
   0x7   :  { %v3237_v12 = vld [vmem:[%s5406_s0 + $0xa8] sm:$0xff]  ;;  %2502 = vmatprep.subr.bf16.mxu0 %v3131_v19  ;;  %v41_v22 = vld [vmem:[%s5406_s0 + $0x70] sm:$0xff]  ;;  %v43_v24 = vld [vmem:[%s5406_s0 + $0x80] sm:$0xff] }
   0x8   :  { %v3246_v14 = vld [vmem:[%s5406_s0 + $0xc8] sm:$0xff]  ;;  %2503 = vmatpush3.bf16.msra.mxu0 %v3131_v19  ;;  %v46_v26 = vld [vmem:[%s5406_s0 + $0x98] sm:$0xff]  ;;  %v3134_v27 = vld [vmem:[%s5407_s3 + $0x20] sm:$0xff]  }
   0x9   :  { %v3252_v15 = vld [vmem:[%s5406_s0 + $0xe8] sm:$0xff]  ;;  %2504 = vmatprep.subr.bf16.mxu0 %v3132_v21  ;;  %v47_v28 = vld [vmem:[%s5406_s0 + $0xa0] sm:$0xff]  ;;  %v3135_v29 = vld [vmem:[%s5407_s3 + $0x18] sm:$0xff]  }
   0xa   :  { %3115 = vset.pattern.permute.xlu1 %v3152_v6  ;;  %88 = vperm.xlu0 %3113, %v32_v5   ;;  %v3133_v25 = vld [vmem:[%s5407_s3 + $0x28] sm:$0xff]   ;;  %v50_v30 = vld [vmem:[%s5406_s0 + $0xb8] sm:$0xff]  ;;  %v3136_v31 = vld [vmem:[%s5407_s3 + $0x10] sm:$0xff]  }
   0xb   :  { %301 = vperm.xlu1 %3115, %v28_v4   ;;  %v51_v32 = vld [vmem:[%s5406_s0 + $0xc0] sm:$0xff]  ;;  %v3137_v33 = vld [vmem:[%s5407_s3 + $0x8] sm:$0xff]   ;;  %v45_v34 = vld [vmem:[%s5406_s0 + $0x90] sm:$0xff] }
   0xc   :  { %2505 = vmatpush3.bf16.msra.mxu0 %v3132_v21  ;;  %v54_v35 = vld [vmem:[%s5406_s0 + $0xd8] sm:$0xff]  ;;  %v3138_v36 = vld [vmem:[%s5407_s3] sm:$0xff]   ;;  %v49_v39 = vld [vmem:[%s5406_s0 + $0xb0] sm:$0xff] }
   0xd   :  { %2506 = vmatprep.subr.bf16.mxu0 %v3133_v25  ;;  %v3329_v37 = vld [vmem:[%s5406_s0 + $0xe0] sm:$0xff]  ;;  %v3335_v38 = vld [vmem:[%s5406_s0 + $0xf8] sm:$0xff]  ;;  %v53_v46 = vld [vmem:[%s5406_s0 + $0xd0] sm:$0xff] }
   0xe   :  { %108 = vperm.xlu0 %3113, %v36_v7   ;;  %v3351_v42 = vld [vmem:[%s5408_s1] ss:$0 sm:$0xff]  ;;  %v3368_v48 = vld [vmem:[%s5408_s1 + $0x1] ss:$0 sm:$0xff] }
   0xf   :  { %305 = vperm.xlu1 %3115, %v29_v1   ;;  %v3363_v47 = vld [vmem:[%s5409_s2] ss:$0 sm:$0xff] }
  0x10   :  { %2507 = vmatpush3.bf16.msra.mxu0 %v3133_v25 }
  0x11   :  { %2508 = vmatprep.subr.bf16.mxu0 %v3134_v27 }
  0x12   :  { %128 = vperm.xlu0 %3113, %v3218_v8  }
  0x13   :  { %3116 = vset.pattern.permute.xlu1 %v3151_v0 }
  0x14   :  { %83 = vperm.xlu1 %3116, %v31_v9   ;;  %2509 = vmatpush3.bf16.msra.mxu0 %v3134_v27 }
  0x15   :  { %2510 = vmatprep.subr.bf16.mxu0 %v3135_v29 }
  0x16   :  { %148 = vperm.xlu0 %3113, %v3228_v10  }
  0x18   :  { %93 = vperm.xlu1 %3116, %v33_v11   ;;  %2511 = vmatpush3.bf16.msra.mxu0 %v3135_v29 }
  0x19   :  { %2512 = vmatprep.subr.bf16.mxu0 %v3136_v31 }
  0x1a   :  { %168 = vperm.xlu0 %3113, %v3237_v12  }
  0x1c   :  { %98 = vperm.xlu1 %3116, %v34_v13   ;;  %2513 = vmatpush3.bf16.msra.mxu0 %v3136_v31 }
  0x1d   :  { %2514 = vmatprep.subr.bf16.mxu0 %v3137_v33 }
  0x1e   :  { %188 = vperm.xlu0 %3113, %v3246_v14  }
  0x20   :  { %3117 = vset.pattern.permute.xlu1 %v3152_v6  ;;  %2515 = vmatpush3.bf16.msra.mxu0 %v3137_v33 }
  0x21   :  { %317 = vperm.xlu1 %3117, %v32_v5   ;;  %2516 = vmatprep.subr.bf16.mxu0 %v3138_v36 }
  0x22   :  { %208 = vperm.xlu0 %3113, %v3252_v15  }
  0x24   :  { %2517 = vmatpush3.bf16.msra.mxu0 %v3138_v36  ;;  %v3153_v36 = vmov -3.1415927  }
  0x25   :  { %321 = vperm.xlu1 %3117, %v33_v11  }
  0x26   :  { %3129 = vset.pattern.permute.xlu0 %v3152_v6 }
  0x27   :  { %297 = vperm.xlu0 %3129, %v27_v2  }
  0x29   :  { %3118 = vset.pattern.permute.xlu1 %v3151_v0 }
  0x2a   :  { %103 = vperm.xlu1 %3118, %v35_v16  }
  0x2b   :  { %309 = vperm.xlu0 %3129, %v30_v3  }
  0x2e   :  { %113 = vperm.xlu1 %3118, %v37_v17  }
  0x2f   :  { %313 = vperm.xlu0 %3129, %v31_v9  }
  0x32   :  { %118 = vperm.xlu1 %3118, %v38_v18  }
  0x33   :  { %325 = vperm.xlu0 %3129, %v34_v13  }
  0x36   :  { %3119 = vset.pattern.permute.xlu1 %v3152_v6 }
  0x37   :  { %333 = vperm.xlu1 %3119, %v36_v7   ;;  %329 = vperm.xlu0 %3129, %v35_v16  }
  0x3b   :  { %337 = vperm.xlu1 %3119, %v37_v17   ;;  %341 = vperm.xlu0 %3129, %v38_v18  }
  0x3f   :  { %3120 = vset.pattern.permute.xlu1 %v3151_v0  ;;  %345 = vperm.xlu0 %3129, %v39_v20  }
  0x40   :  { %123 = vperm.xlu1 %3120, %v39_v20  }
  0x43   :  { %357 = vperm.xlu0 %3129, %v42_v23  }
  0x44   :  { %133 = vperm.xlu1 %3120, %v41_v22  }
  0x47   :  { %361 = vperm.xlu0 %3129, %v43_v24  }
  0x48   :  { %138 = vperm.xlu1 %3120, %v42_v23  }
  0x4b   :  { %373 = vperm.xlu0 %3129, %v46_v26  }
  0x4c   :  { %3121 = vset.pattern.permute.xlu1 %v3152_v6 }
  0x4d   :  { %349 = vperm.xlu1 %3121, %v3218_v8  }
  0x4f   :  { %377 = vperm.xlu0 %3129, %v47_v28  }
  0x51   :  { %353 = vperm.xlu1 %3121, %v41_v22  }
  0x53   :  { %389 = vperm.xlu0 %3129, %v50_v30  }
  0x55   :  { %3122 = vset.pattern.permute.xlu1 %v3151_v0 }
  0x56   :  { %143 = vperm.xlu1 %3122, %v43_v24  }
  0x57   :  { %393 = vperm.xlu0 %3129, %v51_v32  }
  0x5a   :  { %153 = vperm.xlu1 %3122, %v45_v34  }
  0x5b   :  { %405 = vperm.xlu0 %3129, %v54_v35  }
  0x5e   :  { %158 = vperm.xlu1 %3122, %v46_v26   ;;  %v57_v26 = vld [vmem:[%s5406_s0 + $0xf0] sm:$0xff] }
  0x5f   :  { %409 = vperm.xlu0 %3129, %v3329_v37  }
  0x62   :  { %3123 = vset.pattern.permute.xlu1 %v3152_v6 }
  0x63   :  { %365 = vperm.xlu1 %3123, %v3228_v10   ;;  %421 = vperm.xlu0 %3129, %v3335_v38  }
  0x67   :  { %369 = vperm.xlu1 %3123, %v45_v34  }
  0x6b   :  { %3124 = vset.pattern.permute.xlu1 %v3151_v0 }
  0x6c   :  { %163 = vperm.xlu1 %3124, %v47_v28  }
  0x70   :  { %173 = vperm.xlu1 %3124, %v49_v39  }
  0x74   :  { %178 = vperm.xlu1 %3124, %v50_v30  }
  0x78   :  { %3125 = vset.pattern.permute.xlu1 %v3152_v6 }
  0x79   :  { %381 = vperm.xlu1 %3125, %v3237_v12  }
  0x7d   :  { %v74_v40 = vpop.permute.xlu1 %73  ;;  %385 = vperm.xlu1 %3125, %v49_v39   ;;  %v3346_v41 = vpop.permute.xlu0 %63 }
  0x7e   :  { %v227_v52 = vmul.f32 %v3351_v42, %v74_v40  ;;  %v225_v39 = vmul.f32 %v3351_v42, %v3346_v41 }
  0x80   :  { %v265_v57 = vadd.f32 %v3363_v47, %v227_v52 }
  0x81   :  { %v3353_v43 = vpop.permute.xlu1 %78  ;;  %3126 = vset.pattern.permute.xlu1 %v3151_v0  ;;  %v69_v44 = vpop.permute.xlu0 %68 }
  0x82   :  { %183 = vperm.xlu1 %3126, %v51_v32   ;;  %v226_v45 = vmul.f32 %v3351_v42, %v69_v44 }
  0x84   :  { %v264_v49 = vadd.f32 %v3363_v47, %v226_v45 }
  0x85   :  { %v89_v50 = vpop.permute.xlu0 %88 }
  0x86   :  { %193 = vperm.xlu1 %3126, %v53_v46   ;;  %v302_v51 = vpop.permute.xlu1 %301 }
  0x87   :  { %v429_v53 = vmul.f32 %v3368_v48, %v302_v51 }
  0x89   :  { %v461_v54 = vadd.f32 %v429_v53, %v264_v49  ;;  %v3373_v55 = vpop.permute.xlu0 %108  ;;  %v263_v53 = vadd.f32 %v3363_v47, %v225_v39 }
  0x8a   :  { %198 = vperm.xlu1 %3126, %v54_v35   ;;  %v306_v56 = vpop.permute.xlu1 %305 }
  0x8b   :  { %v493_v58 = vmul.f32 0.15915494, %v461_v54  ;;  %v430_v59 = vmul.f32 %v3368_v48, %v306_v56 }
  0x8d   :  { %v2608_v60 = vcvt.f32.s32 %v493_v58  ;;  %v462_v61 = vadd.f32 %v430_v59, %v265_v57  ;;  %v129_v62 = vpop.permute.xlu0 %128  ;;  %v2606_v3 = vand.u32 2147483647, %v493_v58  ;;  %v2611_v5 = vand.u32 2147483648, %v493_v58 }
  0x8e   :  { %3127 = vset.pattern.permute.xlu1 %v3152_v6 }
  0x8f   :  { %v2609_v63 = vcvt.s32.f32 %v2608_v60  ;;  %v494_v1 = vmul.f32 0.15915494, %v462_v61  ;;  %397 = vperm.xlu1 %3127, %v3246_v14   ;;  %v3379_v2 = vpop.permute.xlu1 %83  ;;  %vm2607_vm0 = vcmp.lt.f32.partialorder %v2606_v3, 8388608.0  ;;  %v230_v14 = vmul.f32 %v3351_v42, %v89_v50 }
  0x90   :  { %v234_v50 = vmul.f32 %v3351_v42, %v3373_v55  ;;  %v229_v60 = vmul.f32 %v3351_v42, %v3379_v2 }
  0x91   :  { %v2610_v4 = vand.u32 2147483647, %v2609_v63  ;;  %v2616_v7 = vcvt.f32.s32 %v494_v1  ;;  %v149_v8 = vpop.permute.xlu0 %148  ;;  %v2614_v12 = vand.u32 2147483647, %v494_v1  ;;  %v2619_v17 = vand.u32 2147483648, %v494_v1 }
  0x92   :  { %v268_v29 = vadd.f32 %v3363_v47, %v230_v14  ;;  %v3419_v59 = vadd.f32 %v3363_v47, %v234_v50 }
  0x93   :  { %v2612_v9 = vor.u32 %v2611_v5, %v2610_v4  ;;  %v2617_v10 = vcvt.s32.f32 %v2616_v7  ;;  %401 = vperm.xlu1 %3127, %v53_v46   ;;  %v94_v11 = vpop.permute.xlu1 %93  ;;  %vm2615_vm1 = vcmp.lt.f32.partialorder %v2614_v12, 8388608.0  ;;  %v228_v46 = vmul.f32 %v3351_v42, %v3353_v43 }
  0x94   :  { %v231_v33 = vmul.f32 %v3351_v42, %v94_v11  ;;  %v238_v43 = vmul.f32 %v3351_v42, %v129_v62 }
  0x95   :  { %v2613_v13 = vsel %vm2607_vm0, %v2612_v9, %v493_v58  ;;  %v2618_v16 = vand.u32 2147483647, %v2617_v10  ;;  %v169_v18 = vpop.permute.xlu0 %168  ;;  %v266_v55 = vadd.f32 %v3363_v47, %v228_v46 }
  0x96   :  { %v557_v19 = vmul.f32 6.28125, %v2613_v13  ;;  %v621_v23 = vmul.f32 0.0019353072, %v2613_v13  ;;  %v269_v51 = vadd.f32 %v3363_v47, %v231_v33  ;;  %v3439_v5 = vadd.f32 %v3363_v47, %v238_v43 }
  0x97   :  { %v2620_v20 = vor.u32 %v2619_v17, %v2618_v16  ;;  %3128 = vset.pattern.permute.xlu1 %v3151_v0  ;;  %v99_v21 = vpop.permute.xlu1 %98  ;;  %v246_v7 = vmul.f32 %v3351_v42, %v169_v18  ;;  %v267_v13 = vadd.f32 %v3363_v47, %v229_v60 }
  0x98   :  { %v589_v22 = vsub.f32 %v461_v54, %v557_v19  ;;  %203 = vperm.xlu1 %3128, %v3329_v37  }
  0x99   :  { %v2621_v24 = vsel %vm2615_vm1, %v2620_v20, %v494_v1  ;;  %v189_v25 = vpop.permute.xlu0 %188 }
  0x9a   :  { %v653_v27 = vsub.f32 %v589_v22, %v621_v23  ;;  %v558_v28 = vmul.f32 6.28125, %v2621_v24  ;;  %v622_v32 = vmul.f32 0.0019353072, %v2621_v24  ;;  %v250_v9 = vmul.f32 %v3351_v42, %v189_v25 }
  0x9b   :  { %v3460_v23 = vadd.f32 %v3363_v47, %v246_v7 }
  0x9c   :  { %v590_v30 = vsub.f32 %v462_v61, %v558_v28  ;;  %213 = vperm.xlu1 %3128, %v57_v26   ;;  %v318_v31 = vpop.permute.xlu1 %317  ;;  %v685_v0 = vand.u32 2147483647, %v653_v27  ;;  %vm749_vm2 = vcmp.ge.f32.partialorder %v653_v27, 0.0  ;;  %v242_v61 = vmul.f32 %v3351_v42, %v149_v8 }
  0x9d   :  { %v433_v34 = vmul.f32 %v3368_v48, %v318_v31  ;;  %v209_v35 = vpop.permute.xlu0 %208  ;;  %v781_v37 = vsel %vm749_vm2, 3.1415927, %v3153_v36  ;;  %v3466_v28 = vadd.f32 %v3363_v47, %v250_v9 }
  0x9e   :  { %v3393_v40 = vsub.f32 %v590_v30, %v622_v32  ;;  %v813_v45 = vsub.f32 %v781_v37, %v653_v27  ;;  %vm717_vm3 = vcmp.gt.f32.partialorder %v685_v0, 1.5707964  ;;  %v3451_v16 = vadd.f32 %v3363_v47, %v242_v61 }
  0x9f   :  { %v3395_v44 = vadd.f32 %v433_v34, %v268_v29  ;;  %v254_v17 = vmul.f32 %v3351_v42, %v209_v35 }
  0xa0   :  { %218 = vperm.xlu1 %3128, %v3335_v38   ;;  %v322_v49 = vpop.permute.xlu1 %321  ;;  %vm750_vm4 = vcmp.ge.f32.partialorder %v3393_v40, 0.0  ;;  %v3412_v56 = vsel %vm717_vm3, %v813_v45, %v653_v27  ;;  %v686_v4 = vand.u32 2147483647, %v3393_v40 }
  0xa1   :  { %v3404_v52 = vmul.f32 0.15915494, %v3395_v44  ;;  %v434_v41 = vmul.f32 %v3368_v48, %v322_v49  ;;  %v782_v2 = vsel %vm750_vm4, 3.1415927, %v3153_v36  ;;  %v3477_v37 = vadd.f32 %v3363_v47, %v254_v17 }
  0xa2   :  { %v298_v54 = vpop.permute.xlu0 %297  ;;  %v814_v19 = vsub.f32 %v782_v2, %v3393_v40  ;;  %vm718_vm5 = vcmp.gt.f32.partialorder %v686_v4, 1.5707964 }
  0xa3   :  { %v3410_v38 = vadd.f32 %v434_v41, %v269_v51  ;;  %v2640_v57 = vcvt.f32.s32 %v3404_v52  ;;  %v428_v58 = vmul.f32 %v3368_v48, %v298_v54  ;;  %v2638_v24 = vand.u32 2147483647, %v3404_v52 }
  0xa4   :  { %3130 = vset.pattern.permute.xlu1 %v3152_v6  ;;  %v3432_v6 = vmul.f32 %v3412_v56, %v3412_v56  ;;  %v3473_v34 = vsel %vm718_vm5, %v814_v19, %v3393_v40  ;;  %v2643_v35 = vand.u32 2147483648, %v3404_v52 }
  0xa5   :  { %v3425_v62 = vmul.f32 0.15915494, %v3410_v38  ;;  %413 = vperm.xlu1 %3130, %v3252_v15   ;;  %v104_v63 = vpop.permute.xlu1 %103  ;;  %v3428_v1 = vadd.f32 %v428_v58, %v263_v53  ;;  %v232_v15 = vmul.f32 %v3351_v42, %v99_v21  ;;  %v2641_v10 = vcvt.s32.f32 %v2640_v57 }
  0xa6   :  { %v310_v3 = vpop.permute.xlu0 %309  ;;  %v909_v22 = vmul.f32 2.7557319e-06, %v3432_v6  ;;  %v233_v30 = vmul.f32 %v3351_v42, %v104_v63  ;;  %vm3480_vm6 = vcmp.lt.f32.partialorder %v2638_v24, 8388608.0  ;;  %v3486_v41 = vmul.f32 %v3432_v6, %v3412_v56 }
  0xa7   :  { %v2648_v8 = vcvt.f32.s32 %v3425_v62  ;;  %v3446_v11 = vmul.f32 0.15915494, %v3428_v1  ;;  %v431_v12 = vmul.f32 %v3368_v48, %v310_v3  ;;  %v2642_v29 = vand.u32 2147483647, %v2641_v10 }
  0xa8   :  { %v2646_v39 = vand.u32 2147483647, %v3425_v62  ;;  %v941_v46 = vadd.f32 -0.0001984127, %v909_v22  ;;  %v2651_v53 = vand.u32 2147483648, %v3425_v62  ;;  %v271_v54 = vadd.f32 %v3363_v47, %v233_v30 }
  0xa9   :  { %417 = vperm.xlu1 %3130, %v57_v26   ;;  %v114_v18 = vpop.permute.xlu1 %113  ;;  %v2600_v14 = vcvt.f32.s32 %v3446_v11  ;;  %v3456_v20 = vadd.f32 %v431_v12, %v266_v55  ;;  %v2649_v25 = vcvt.s32.f32 %v2648_v8  ;;  %v270_v26 = vadd.f32 %v3363_v47, %v232_v15 }
  0xaa   :  { %v314_v21 = vpop.permute.xlu0 %313  ;;  %v2644_v40 = vor.u32 %v2643_v35, %v2642_v29  ;;  %v3492_v43 = vmul.f32 %v3473_v34, %v3473_v34  ;;  %v2603_v57 = vand.u32 2147483648, %v3446_v11  ;;  %vm3498_vm7 = vcmp.lt.f32.partialorder %v2646_v39, 8388608.0 }
  0xab   :  { %v432_v27 = vmul.f32 %v3368_v48, %v314_v21  ;;  %v2601_v31 = vcvt.s32.f32 %v2600_v14  ;;  %v495_v0 = vmul.f32 0.15915494, %v3456_v20  ;;  %v2650_v50 = vand.u32 2147483647, %v2649_v25 }
  0xac   :  { %v2598_v63 = vand.u32 2147483647, %v3446_v11  ;;  %v3505_v2 = vmul.f32 %v941_v46, %v3432_v6  ;;  %v2645_v12 = vsel %vm3480_vm6, %v2644_v40, %v3404_v52  ;;  %v3514_v19 = vmul.f32 2.7557319e-06, %v3492_v43 }
  0xad   :  { %v3470_v32 = vadd.f32 %v432_v27, %v267_v13  ;;  %v119_v33 = vpop.permute.xlu1 %118  ;;  %v2624_v51 = vcvt.f32.s32 %v495_v0  ;;  %v2602_v55 = vand.u32 2147483647, %v2601_v31  ;;  %v2652_v7 = vor.u32 %v2651_v53, %v2650_v50 }
  0xae   :  { %v326_v45 = vpop.permute.xlu0 %325  ;;  %v2627_v8 = vand.u32 2147483648, %v495_v0  ;;  %v2622_v13 = vand.u32 2147483647, %v495_v0  ;;  %vm2599_vm8 = vcmp.lt.f32.partialorder %v2598_v63, 8388608.0  ;;  %v235_v25 = vmul.f32 %v3351_v42, %v114_v18 }
  0xaf   :  { %v2625_v58 = vcvt.s32.f32 %v2624_v51  ;;  %v3496_v60 = vmul.f32 0.15915494, %v3470_v32  ;;  %v435_v3 = vmul.f32 %v3368_v48, %v326_v45  ;;  %v2604_v14 = vor.u32 %v2603_v57, %v2602_v55 }
  0xb0   :  { %v561_v52 = vmul.f32 6.28125, %v2645_v12  ;;  %v625_v31 = vmul.f32 0.0019353072, %v2645_v12  ;;  %vm2623_vm9 = vcmp.lt.f32.partialorder %v2622_v13, 8388608.0  ;;  %v236_v45 = vmul.f32 %v3351_v42, %v119_v33 }
  0xb1   :  { %v2626_v15 = vand.u32 2147483647, %v2625_v58  ;;  %v2632_v9 = vcvt.f32.s32 %v3496_v60  ;;  %v3511_v17 = vadd.f32 %v435_v3, %v270_v26  ;;  %v2653_v26 = vsel %vm3498_vm7, %v2652_v7, %v3425_v62 }
  0xb2   :  { %v334_v4 = vpop.permute.xlu1 %333  ;;  %v330_v10 = vpop.permute.xlu0 %329  ;;  %v2605_v18 = vsel %vm2599_vm8, %v2604_v14, %v3446_v11  ;;  %v562_v40 = vmul.f32 6.28125, %v2653_v26  ;;  %v2635_v53 = vand.u32 2147483648, %v3496_v60  ;;  %v593_v55 = vsub.f32 %v3395_v44, %v561_v52 }
  0xb3   :  { %v2628_v21 = vor.u32 %v2627_v8, %v2626_v15  ;;  %v2633_v22 = vcvt.s32.f32 %v2632_v9  ;;  %v437_v24 = vmul.f32 %v3368_v48, %v334_v4  ;;  %v499_v27 = vmul.f32 0.15915494, %v3511_v17 }
  0xb4   :  { %v436_v29 = vmul.f32 %v3368_v48, %v330_v10  ;;  %v273_v57 = vadd.f32 %v3363_v47, %v235_v25  ;;  %v2630_v33 = vand.u32 2147483647, %v3496_v60  ;;  %v556_v61 = vmul.f32 6.28125, %v2605_v18 }
  0xb5   :  { %v3524_v35 = vadd.f32 %v437_v24, %v3419_v59  ;;  %v2634_v39 = vand.u32 2147483647, %v2633_v22  ;;  %v2656_v46 = vcvt.f32.s32 %v499_v27  ;;  %v2629_v49 = vsel %vm2623_vm9, %v2628_v21, %v495_v0 }
  0xb6   :  { %v338_v30 = vpop.permute.xlu1 %337  ;;  %v3531_v51 = vadd.f32 %v436_v29, %v271_v54  ;;  %v342_v0 = vpop.permute.xlu0 %341  ;;  %v559_v63 = vmul.f32 6.28125, %v2629_v49  ;;  %v2659_v4 = vand.u32 2147483648, %v499_v27  ;;  %v594_v44 = vsub.f32 %v3410_v38, %v562_v40 }
  0xb7   :  { %v3529_v50 = vmul.f32 0.15915494, %v3524_v35  ;;  %v2657_v62 = vcvt.s32.f32 %v2656_v46  ;;  %v438_v59 = vmul.f32 %v3368_v48, %v338_v30  ;;  %v2636_v54 = vor.u32 %v2635_v53, %v2634_v39 }
  0xb8   :  { %v3540_v15 = vmul.f32 0.15915494, %v3531_v51  ;;  %v274_v9 = vadd.f32 %v3363_v47, %v236_v45  ;;  %v2654_v10 = vand.u32 2147483647, %v499_v27  ;;  %v439_v12 = vmul.f32 %v3368_v48, %v342_v0 }
  0xb9   :  { %v2672_v11 = vcvt.f32.s32 %v3529_v50  ;;  %v2658_v3 = vand.u32 2147483647, %v2657_v62  ;;  %v3542_v8 = vadd.f32 %v438_v59, %v273_v57  ;;  %v620_v13 = vmul.f32 0.0019353072, %v2605_v18 }
  0xba   :  { %vm2631_vm10 = vcmp.lt.f32.partialorder %v2630_v33, 8388608.0  ;;  %v2664_v21 = vcvt.f32.s32 %v3540_v15  ;;  %v588_v24 = vsub.f32 %v3428_v1, %v556_v61  ;;  %v3555_v38 = vadd.f32 %v439_v12, %v274_v9 }
  0xbb   :  { %v124_v58 = vpop.permute.xlu1 %123  ;;  %v2673_v7 = vcvt.s32.f32 %v2672_v11  ;;  %v2660_v14 = vor.u32 %v2659_v4, %v2658_v3  ;;  %v2637_v25 = vsel %vm2631_vm10, %v2636_v54, %v3496_v60  ;;  %v3553_v29 = vmul.f32 0.15915494, %v3542_v8 }
  0xbc   :  { %v626_v30 = vmul.f32 0.0019353072, %v2653_v26  ;;  %v591_v52 = vsub.f32 %v3456_v20, %v559_v63  ;;  %v623_v39 = vmul.f32 0.0019353072, %v2629_v49  ;;  %vm2655_vm11 = vcmp.lt.f32.partialorder %v2654_v10, 8388608.0  ;;  %v346_v49 = vpop.permute.xlu0 %345 }
  0xbd   :  { %v2674_v45 = vand.u32 2147483647, %v2673_v7  ;;  %v2670_v46 = vand.u32 2147483647, %v3529_v50  ;;  %v2665_v18 = vcvt.s32.f32 %v2664_v21  ;;  %v2680_v40 = vcvt.f32.s32 %v3553_v29 }
  0xbe   :  { %v560_v53 = vmul.f32 6.28125, %v2637_v25  ;;  %v2661_v1 = vsel %vm2655_vm11, %v2660_v14, %v499_v27  ;;  %v2675_v60 = vand.u32 2147483648, %v3529_v50  ;;  %v503_v62 = vmul.f32 0.15915494, %v3555_v38 }
  0xbf   :  { %v3548_v22 = vpop.permute.xlu1 %133  ;;  %v3562_v57 = vsub.f32 %v593_v55, %v625_v31  ;;  %v3564_v26 = vsub.f32 %v594_v44, %v626_v30  ;;  %v3566_v20 = vsub.f32 %v588_v24, %v620_v13  ;;  %v3569_v33 = vadd.f32 0.008333333, %v3505_v2 }
  0xc0   :  { %v3571_v11 = vsub.f32 %v591_v52, %v623_v39  ;;  %v2676_v0 = vor.u32 %v2675_v60, %v2674_v45  ;;  %v2681_v61 = vcvt.s32.f32 %v2680_v40  ;;  %v2688_v27 = vcvt.f32.s32 %v503_v62  ;;  %v358_v12 = vpop.permute.xlu0 %357 }
  0xc1   :  { %v624_v63 = vmul.f32 0.0019353072, %v2637_v25  ;;  %v563_v54 = vmul.f32 6.28125, %v2661_v1  ;;  %v2666_v3 = vand.u32 2147483647, %v2665_v18  ;;  %v237_v4 = vmul.f32 %v3351_v42, %v124_v58 }
  0xc2   :  { %v592_v31 = vsub.f32 %v3470_v32, %v560_v53  ;;  %vm2671_vm12 = vcmp.lt.f32.partialorder %v2670_v46, 8388608.0  ;;  %v2682_v55 = vand.u32 2147483647, %v2681_v61  ;;  %v2689_v7 = vcvt.s32.f32 %v2688_v27 }
  0xc3   :  { %v139_v59 = vpop.permute.xlu1 %138  ;;  %v2662_v44 = vand.u32 2147483647, %v3540_v15  ;;  %v2667_v2 = vand.u32 2147483648, %v3540_v15  ;;  %v275_v9 = vadd.f32 %v3363_v47, %v237_v4  ;;  %v440_v10 = vmul.f32 %v3368_v48, %v346_v49 }
  0xc4   :  { %v2677_v14 = vsel %vm2671_vm12, %v2676_v0, %v3529_v50  ;;  %v2678_v21 = vand.u32 2147483647, %v3553_v29  ;;  %v2683_v58 = vand.u32 2147483648, %v3553_v29  ;;  %v2690_v32 = vand.u32 2147483647, %v2689_v7 }
  0xc5   :  { %v595_v24 = vsub.f32 %v3511_v17, %v563_v54  ;;  %v2668_v25 = vor.u32 %v2667_v2, %v2666_v3  ;;  %v3583_v30 = vadd.f32 %v440_v10, %v275_v9  ;;  %v240_v52 = vmul.f32 %v3351_v42, %v139_v59 }
  0xc6   :  { %v627_v39 = vmul.f32 0.0019353072, %v2661_v1  ;;  %v2684_v45 = vor.u32 %v2683_v58, %v2682_v55  ;;  %v2691_v46 = vand.u32 2147483648, %v503_v62  ;;  %v443_v18 = vmul.f32 %v3368_v48, %v358_v12 }
  0xc7   :  { %v3587_v40 = vsub.f32 %v592_v31, %v624_v63  ;;  %v3589_v50 = vmul.f32 6.28125, %v2677_v14  ;;  %v2686_v53 = vand.u32 2147483647, %v503_v62  ;;  %v504_v60 = vmul.f32 0.15915494, %v3583_v30 }
  0xc8   :  { %v350_v13 = vpop.permute.xlu1 %349  ;;  %vm2663_vm13 = vcmp.lt.f32.partialorder %v2662_v44, 8388608.0  ;;  %v2692_v49 = vor.u32 %v2691_v46, %v2690_v32  ;;  %v278_v17 = vadd.f32 %v3363_v47, %v240_v52  ;;  %v3594_v59 = vsub.f32 %v595_v24, %v627_v39  ;;  %v362_v32 = vpop.permute.xlu0 %361 }
  0xc9   :  { %v441_v0 = vmul.f32 %v3368_v48, %v350_v13  ;;  %v3596_v1 = vmul.f32 0.0019353072, %v2677_v14  ;;  %v2669_v27 = vsel %vm2663_vm13, %v2668_v25, %v3540_v15  ;;  %vm2679_vm14 = vcmp.lt.f32.partialorder %v2678_v21, 8388608.0 }
  0xca   :  { %v2685_v63 = vsel %vm2679_vm14, %v2684_v45, %v3553_v29  ;;  %v2696_v54 = vcvt.f32.s32 %v504_v60  ;;  %v239_v3 = vmul.f32 %v3351_v42, %v3548_v22  ;;  %v3602_v4 = vadd.f32 %v443_v18, %v278_v17 }
  0xcb   :  { %v597_v31 = vsub.f32 %v3524_v35, %v3589_v50  ;;  %vm2687_vm15 = vcmp.lt.f32.partialorder %v2686_v53, 8388608.0  ;;  %v2694_v55 = vand.u32 2147483647, %v504_v60  ;;  %v3607_v7 = vadd.f32 %v441_v0, %v3439_v5 }
  0xcc   :  { %v354_v61 = vpop.permute.xlu1 %353  ;;  %v2693_v44 = vsel %vm2687_vm15, %v2692_v49, %v503_v62  ;;  %v2697_v2 = vcvt.s32.f32 %v2696_v54  ;;  %v507_v15 = vmul.f32 0.15915494, %v3602_v4  ;;  %v564_v9 = vmul.f32 6.28125, %v2669_v27 }
  0xcd   :  { %v442_v29 = vmul.f32 %v3368_v48, %v354_v61  ;;  %v628_v10 = vmul.f32 0.0019353072, %v2669_v27  ;;  %v566_v12 = vmul.f32 6.28125, %v2685_v63  ;;  %v505_v22 = vmul.f32 0.15915494, %v3607_v7 }
  0xce   :  { %v2698_v13 = vand.u32 2147483647, %v2697_v2  ;;  %v2699_v14 = vand.u32 2147483648, %v504_v60  ;;  %v277_v21 = vadd.f32 %v3363_v47, %v239_v3  ;;  %v2720_v58 = vcvt.f32.s32 %v507_v15 }
  0xcf   :  { %v567_v5 = vmul.f32 6.28125, %v2693_v44  ;;  %vm2695_vm0 = vcmp.lt.f32.partialorder %v2694_v55, 8388608.0  ;;  %v2704_v62 = vcvt.f32.s32 %v505_v22  ;;  %v444_v25 = vmul.f32 %v3368_v48, %v362_v32 }
  0xd0   :  { %v2700_v52 = vor.u32 %v2699_v14, %v2698_v13  ;;  %v2718_v39 = vand.u32 2147483647, %v507_v15  ;;  %v2721_v45 = vcvt.s32.f32 %v2720_v58  ;;  %v3614_v46 = vadd.f32 %v442_v29, %v277_v21 }
  0xd1   :  { %v144_v24 = vpop.permute.xlu1 %143  ;;  %v2723_v18 = vand.u32 2147483648, %v507_v15  ;;  %v2702_v53 = vand.u32 2147483647, %v505_v22  ;;  %v2705_v49 = vcvt.s32.f32 %v2704_v62  ;;  %v2707_v27 = vand.u32 2147483648, %v505_v22 }
  0xd2   :  { %v241_v17 = vmul.f32 %v3351_v42, %v144_v24  ;;  %v2701_v0 = vsel %vm2695_vm0, %v2700_v52, %v504_v60  ;;  %v2722_v61 = vand.u32 2147483647, %v2721_v45  ;;  %v506_v54 = vmul.f32 0.15915494, %v3614_v46 }
  0xd3   :  { %v2706_v3 = vand.u32 2147483647, %v2705_v49  ;;  %v684_v2 = vand.u32 2147483647, %v3566_v20  ;;  %vm748_vm1 = vcmp.ge.f32.partialorder %v3566_v20, 0.0  ;;  %v596_v29 = vsub.f32 %v3531_v51, %v564_v9 }
  0xd4   :  { %v279_v55 = vadd.f32 %v3363_v47, %v241_v17  ;;  %v630_v13 = vmul.f32 0.0019353072, %v2685_v63  ;;  %v2724_v14 = vor.u32 %v2723_v18, %v2722_v61  ;;  %v2712_v21 = vcvt.f32.s32 %v506_v54  ;;  %v374_v17 = vpop.permute.xlu0 %373 }
  0xd5   :  { %vm751_vm2 = vcmp.ge.f32.partialorder %v3571_v11, 0.0  ;;  %v568_v58 = vmul.f32 6.28125, %v2701_v0  ;;  %vm2719_vm3 = vcmp.lt.f32.partialorder %v2718_v39, 8388608.0  ;;  %v2708_v60 = vor.u32 %v2707_v27, %v2706_v3 }
  0xd6   :  { %v3623_v32 = vadd.f32 %v444_v25, %v279_v55  ;;  %v2725_v24 = vsel %vm2719_vm3, %v2724_v14, %v507_v15  ;;  %vm2703_vm4 = vcmp.lt.f32.partialorder %v2702_v53, 8388608.0  ;;  %v2713_v62 = vcvt.s32.f32 %v2712_v21 }
  0xd7   :  { %v780_v52 = vsel %vm748_vm1, 3.1415927, %v3153_v36  ;;  %v598_v45 = vsub.f32 %v3542_v8, %v566_v12  ;;  %v599_v49 = vsub.f32 %v3555_v38, %v567_v5  ;;  %v2709_v51 = vsel %vm2703_vm4, %v2708_v60, %v505_v22  ;;  %v3640_v5 = vpop.permute.xlu1 %153 }
  0xd8   :  { %vm716_vm5 = vcmp.gt.f32.partialorder %v684_v2, 1.5707964  ;;  %v571_v63 = vmul.f32 6.28125, %v2725_v24  ;;  %v2714_v9 = vand.u32 2147483647, %v2713_v62  ;;  %v2715_v18 = vand.u32 2147483648, %v506_v54 }
  0xd9   :  { %v812_v39 = vsub.f32 %v780_v52, %v3566_v20  ;;  %v600_v25 = vsub.f32 %v3583_v30, %v568_v58  ;;  %v569_v61 = vmul.f32 6.28125, %v2709_v51  ;;  %v2710_v15 = vand.u32 2147483647, %v506_v54 }
  0xda   :  { %v508_v53 = vmul.f32 0.15915494, %v3623_v32  ;;  %v3635_v8 = vsub.f32 %v597_v31, %v3596_v1  ;;  %v631_v38 = vmul.f32 0.0019353072, %v2693_v44  ;;  %v2716_v12 = vor.u32 %v2715_v18, %v2714_v9 }
  0xdb   :  { %v3638_v22 = vsel %vm716_vm5, %v812_v39, %v3566_v20  ;;  %v3642_v27 = vsub.f32 %v596_v29, %v628_v10  ;;  %v3644_v30 = vsub.f32 %v598_v45, %v630_v13  ;;  %v632_v3 = vmul.f32 0.0019353072, %v2701_v0  ;;  %v378_v29 = vpop.permute.xlu0 %377  ;;  %v159_v52 = vpop.permute.xlu1 %158 }
  0xdc   :  { %v2728_v55 = vcvt.f32.s32 %v508_v53  ;;  %v3646_v2 = vsub.f32 %v599_v49, %v631_v38  ;;  %v603_v14 = vsub.f32 %v3602_v4, %v571_v63  ;;  %v447_v35 = vmul.f32 %v3368_v48, %v374_v17 }
  0xdd   :  { %v876_v50 = vmul.f32 %v3638_v22, %v3638_v22  ;;  %vm752_vm6 = vcmp.ge.f32.partialorder %v3587_v40, 0.0  ;;  %v3653_v20 = vsub.f32 %v600_v25, %v632_v3  ;;  %v635_v1 = vmul.f32 0.0019353072, %v2725_v24 }
  0xde   :  { %v601_v31 = vsub.f32 %v3607_v7, %v569_v61  ;;  %vm2711_vm7 = vcmp.lt.f32.partialorder %v2710_v15, 8388608.0  ;;  %vm753_vm8 = vcmp.ge.f32.partialorder %v3562_v57, 0.0  ;;  %v2729_v10 = vcvt.s32.f32 %v2728_v55 }
  0xdf   :  { %v2717_v44 = vsel %vm2711_vm7, %v2716_v12, %v506_v54  ;;  %v908_v0 = vmul.f32 2.7557319e-06, %v876_v50  ;;  %v1037_v4 = vmul.f32 %v3569_v33, %v3432_v6  ;;  %v633_v13 = vmul.f32 0.0019353072, %v2709_v51 }
  0xe0   :  { %v2726_v21 = vand.u32 2147483647, %v508_v53  ;;  %v3660_v58 = vmul.f32 %v3368_v48, %v378_v29  ;;  %v687_v60 = vand.u32 2147483647, %v3571_v11  ;;  %v3663_v24 = vsub.f32 %v603_v14, %v635_v1 }
  0xe1   :  { %v2730_v7 = vand.u32 2147483647, %v2729_v10  ;;  %v940_v62 = vadd.f32 -0.0001984127, %v908_v0  ;;  %v783_v54 = vsel %vm751_vm2, 3.1415927, %v3153_v36  ;;  %v3668_v45 = vsub.f32 %v601_v31, %v633_v13 }
  0xe2   :  { %v570_v6 = vmul.f32 6.28125, %v2717_v44  ;;  %v2731_v33 = vand.u32 2147483648, %v508_v53  ;;  %vm719_vm9 = vcmp.gt.f32.partialorder %v687_v60, 1.5707964  ;;  %v1069_v51 = vadd.f32 -0.16666667, %v1037_v4 }
  0xe3   :  { %v972_v49 = vmul.f32 %v940_v62, %v876_v50  ;;  %v815_v63 = vsub.f32 %v783_v54, %v3571_v11  ;;  %v942_v9 = vadd.f32 -0.0001984127, %v3514_v19  ;;  %v634_v18 = vmul.f32 0.0019353072, %v2717_v44 }
  0xe4   :  { %v2732_v17 = vor.u32 %v2731_v33, %v2730_v7  ;;  %v244_v39 = vmul.f32 %v3351_v42, %v159_v52  ;;  %v688_v25 = vand.u32 2147483647, %v3587_v40  ;;  %vm2727_vm10 = vcmp.lt.f32.partialorder %v2726_v21, 8388608.0 }
  0xe5   :  { %v1004_v61 = vadd.f32 0.008333333, %v972_v49  ;;  %v3675_v15 = vsel %vm719_vm9, %v815_v63, %v3571_v11  ;;  %v974_v38 = vmul.f32 %v942_v9, %v3492_v43  ;;  %v602_v12 = vsub.f32 %v3614_v46, %v570_v6  ;;  %v366_v46 = vpop.permute.xlu1 %365 }
  0xe6   :  { %v1100_v3 = vmul.f32 %v876_v50, %v3638_v22  ;;  %v879_v19 = vmul.f32 %v3675_v15, %v3675_v15  ;;  %v282_v55 = vadd.f32 %v3363_v47, %v244_v39  ;;  %vm754_vm11 = vcmp.ge.f32.partialorder %v3564_v26, 0.0 }
  0xe7   :  { %v1036_v14 = vmul.f32 %v1004_v61, %v876_v50  ;;  %v1133_v1 = vmul.f32 %v3486_v41, %v1069_v51  ;;  %v1006_v31 = vadd.f32 0.008333333, %v974_v38  ;;  %v689_v11 = vand.u32 2147483647, %v3562_v57 }
  0xe8   :  { %v2733_v44 = vsel %vm2727_vm10, %v2732_v17, %v508_v53  ;;  %v911_v10 = vmul.f32 2.7557319e-06, %v879_v19  ;;  %v3686_v0 = vadd.f32 %v447_v35, %v282_v55  ;;  %vm3688_vm12 = vcmp.gt.f32.partialorder %v688_v25, 1.5707964 }
  0xe9   :  { %vm755_vm13 = vcmp.ge.f32.partialorder %v3594_v59, 0.0  ;;  %v1068_v4 = vadd.f32 -0.16666667, %v1036_v14  ;;  %v1038_v29 = vmul.f32 %v1006_v31, %v3492_v43  ;;  %vm3694_vm14 = vcmp.gt.f32.partialorder %v689_v11, 1.5707964 }
  0xea   :  { %v784_v41 = vsel %vm752_vm6, 3.1415927, %v3153_v36  ;;  %v243_v53 = vmul.f32 %v3351_v42, %v3640_v5  ;;  %v943_v35 = vadd.f32 -0.0001984127, %v911_v10  ;;  %v3704_v13 = vmul.f32 0.15915494, %v3686_v0 }
  0xeb   :  { %v785_v21 = vsel %vm753_vm8, 3.1415927, %v3153_v36  ;;  %v1132_v60 = vmul.f32 %v1100_v3, %v1068_v4  ;;  %v1102_v7 = vmul.f32 %v3492_v43, %v3473_v34  ;;  %v816_v62 = vsub.f32 %v784_v41, %v3587_v40 }
  0xec   :  { %v817_v54 = vsub.f32 %v785_v21, %v3562_v57  ;;  %v3713_v52 = vmul.f32 6.28125, %v2733_v44  ;;  %v1165_v42 = vadd.f32 %v1133_v1, %v3412_v56  ;;  %v975_v5 = vmul.f32 %v943_v35, %v879_v19 }
  0xed   :  { %v2752_v6 = vcvt.f32.s32 %v3704_v13  ;;  %v1164_v33 = vadd.f32 %v1132_v60, %v3638_v22  ;;  %v1070_v49 = vadd.f32 -0.16666667, %v1038_v29  ;;  %v3721_v51 = vsel %vm3688_vm12, %v816_v62, %v3587_v40 }
  0xee   :  { %v3726_v43 = vsel %vm3694_vm14, %v817_v54, %v3562_v57  ;;  %v3728_v63 = vsub.f32 %v602_v12, %v634_v18  ;;  %v3731_v56 = vadd.f32 %v3363_v47, %v243_v53  ;;  %v1007_v9 = vadd.f32 0.008333333, %v975_v5  ;;  %v390_v54 = vpop.permute.xlu0 %389 }
  0xef   :  { %v880_v22 = vmul.f32 %v3721_v51, %v3721_v51  ;;  %v3735_v17 = vmul.f32 0.0019353072, %v2733_v44  ;;  %v1196_v39 = vpack.c.bf16 %v1165_v42, %v1164_v33  ;;  %v2753_v25 = vcvt.s32.f32 %v2752_v6 }
  0xf0   :  { %v881_v40 = vmul.f32 %v3726_v43, %v3726_v43  ;;  %v604_v57 = vsub.f32 %v3623_v32, %v3713_v52  ;;  %v1039_v61 = vmul.f32 %v1007_v9, %v879_v19  ;;  %v2750_v18 = vand.u32 2147483647, %v3704_v13 }
  0xf1   :  { %v912_v38 = vmul.f32 2.7557319e-06, %v880_v22  ;;  %2518 = vmatprep.mubr.bf16.mxu0 %v1196_v39  ;;  %v1134_v47 = vmul.f32 %v1102_v7, %v1070_v49  ;;  %v690_v3 = vand.u32 2147483647, %v3564_v26  ;;  %v691_v55 = vand.u32 2147483647, %v3594_v59 }
  0xf2   :  { %v913_v12 = vmul.f32 2.7557319e-06, %v881_v40  ;;  %v1071_v14 = vadd.f32 -0.16666667, %v1039_v61  ;;  %v1103_v1 = vmul.f32 %v879_v19, %v3675_v15  ;;  %v786_v11 = vsel %vm754_vm11, 3.1415927, %v3153_v36 }
  0xf3   :  { %v944_v31 = vadd.f32 -0.0001984127, %v912_v38  ;;  %v2754_v32 = vand.u32 2147483647, %v2753_v25  ;;  %vm722_vm15 = vcmp.gt.f32.partialorder %v690_v3, 1.5707964  ;;  %v818_v10 = vsub.f32 %v786_v11, %v3564_v26  ;;  %v394_v11 = vpop.permute.xlu0 %393 }
  0xf4   :  { %v945_v44 = vadd.f32 -0.0001984127, %v913_v12  ;;  %v1135_v4 = vmul.f32 %v1103_v1, %v1071_v14  ;;  %vm723_vm0 = vcmp.gt.f32.partialorder %v691_v55, 1.5707964  ;;  %v787_v50 = vsel %vm755_vm13, 3.1415927, %v3153_v36  ;;  %v370_v1 = vpop.permute.xlu1 %369 }
  0xf5   :  { %v976_v29 = vmul.f32 %v944_v31, %v880_v22  ;;  %vm756_vm1 = vcmp.ge.f32.partialorder %v3642_v27, 0.0  ;;  %v1166_v19 = vadd.f32 %v1134_v47, %v3473_v34  ;;  %v2755_v41 = vand.u32 2147483648, %v3704_v13 }
  0xf6   :  { %v977_v53 = vmul.f32 %v945_v44, %v881_v40  ;;  %v819_v35 = vsub.f32 %v787_v50, %v3594_v59  ;;  %vm757_vm2 = vcmp.ge.f32.partialorder %v3635_v8, 0.0  ;;  %v1167_v21 = vadd.f32 %v1135_v4, %v3675_v15 }
  0xf7   :  { %v1008_v60 = vadd.f32 0.008333333, %v976_v29  ;;  %v3759_v7 = vsel %vm722_vm15, %v818_v10, %v3564_v26  ;;  %v445_v62 = vmul.f32 %v3368_v48, %v366_v46  ;;  %v2756_v52 = vor.u32 %v2755_v41, %v2754_v32 }
  0xf8   :  { %v1009_v42 = vadd.f32 0.008333333, %v977_v53  ;;  %v3763_v34 = vsel %vm723_vm0, %v819_v35, %v3594_v59  ;;  %v882_v5 = vmul.f32 %v3759_v7, %v3759_v7  ;;  %v1197_v6 = vpack.c.bf16 %v1167_v21, %v1166_v19 }
  0xf9   :  { %v1040_v33 = vmul.f32 %v1008_v60, %v880_v22  ;;  %v883_v15 = vmul.f32 %v3763_v34, %v3763_v34  ;;  %v3770_v49 = vadd.f32 %v445_v62, %v3451_v16  ;;  %vm2751_vm3 = vcmp.lt.f32.partialorder %v2750_v18, 8388608.0 }
  0xfa   :  { %v1041_v26 = vmul.f32 %v1009_v42, %v881_v40  ;;  %v1104_v9 = vmul.f32 %v880_v22, %v3721_v51  ;;  %v914_v39 = vmul.f32 2.7557319e-06, %v882_v5  ;;  %2519 = vmatmul.mubr.bf16.vlgmr.msra.gmra.mxu0 %v1197_v6  ;;  %v1105_v59 = vmul.f32 %v881_v40, %v3726_v43 }
  0xfb   :  { %v1072_v25 = vadd.f32 -0.16666667, %v1040_v33  ;;  %v915_v61 = vmul.f32 2.7557319e-06, %v883_v15  ;;  %v3775_v38 = vmul.f32 0.15915494, %v3770_v49  ;;  %v2757_v47 = vsel %vm2751_vm3, %v2756_v52, %v3704_v13 }
  0xfc   :  { %v1073_v12 = vadd.f32 -0.16666667, %v1041_v26  ;;  %v946_v3 = vadd.f32 -0.0001984127, %v914_v39  ;;  %v692_v16 = vand.u32 2147483647, %v3642_v27  ;;  %v3780_v18 = vmul.f32 %v3368_v48, %v390_v54 }
  0xfd   :  { %v1136_v55 = vmul.f32 %v1104_v9, %v1072_v25  ;;  %v947_v22 = vadd.f32 -0.0001984127, %v915_v61  ;;  %v2736_v14 = vcvt.f32.s32 %v3775_v38  ;;  %v3784_v40 = vsub.f32 %v604_v57, %v3735_v17  ;;  %v406_v9 = vpop.permute.xlu0 %405 }
  0xfe   :  { %v1137_v31 = vmul.f32 %v1105_v59, %v1073_v12  ;;  %v978_v32 = vmul.f32 %v946_v3, %v882_v5  ;;  %v693_v13 = vand.u32 2147483647, %v3635_v8  ;;  %v575_v44 = vmul.f32 6.28125, %v2757_v47 }
  0xff   :  { %v639_v10 = vmul.f32 0.0019353072, %v2757_v47  ;;  %v1168_v46 = vadd.f32 %v1136_v55, %v3721_v51  ;;  %v979_v4 = vmul.f32 %v947_v22, %v883_v15  ;;  %v2737_v19 = vcvt.s32.f32 %v2736_v14 }
 0x100   :  { %v1169_v29 = vadd.f32 %v1137_v31, %v3726_v43  ;;  %v1010_v50 = vadd.f32 0.008333333, %v978_v32  ;;  %vm3789_vm4 = vcmp.gt.f32.partialorder %v692_v16, 1.5707964  ;;  %vm3793_vm5 = vcmp.gt.f32.partialorder %v693_v13, 1.5707964 }
 0x101   :  { %v1011_v17 = vadd.f32 0.008333333, %v979_v4  ;;  %v788_v53 = vsel %vm756_vm1, 3.1415927, %v3153_v36  ;;  %v446_v51 = vmul.f32 %v3368_v48, %v370_v1  ;;  %vm758_vm6 = vcmp.ge.f32.partialorder %v3644_v30, 0.0  ;;  %v164_v48 = vpop.permute.xlu1 %163 }
 0x102   :  { %v1198_v43 = vpack.c.bf16 %v1169_v29, %v1168_v46  ;;  %v1042_v35 = vmul.f32 %v1010_v50, %v882_v5  ;;  %v789_v21 = vsel %vm757_vm2, 3.1415927, %v3153_v36  ;;  %v820_v60 = vsub.f32 %v788_v53, %v3642_v27  ;;  %v410_v29 = vpop.permute.xlu0 %409 }
 0x103   :  { %vm759_vm7 = vcmp.ge.f32.partialorder %v3646_v2, 0.0  ;;  %v607_v62 = vsub.f32 %v3686_v0, %v575_v44  ;;  %v1043_v54 = vmul.f32 %v1011_v17, %v883_v15  ;;  %v821_v52 = vsub.f32 %v789_v21, %v3635_v8  ;;  %v3862_v21 = vld [vmem:[%s5408_s1] ss:$0 sm:$0xff] }
 0x104   :  { %v3810_v42 = vadd.f32 %v446_v51, %v3731_v56  ;;  %2522 = vmatprep.mubr.bf16.mxu0 %v1198_v43  ;;  %v1074_v6 = vadd.f32 -0.16666667, %v1042_v35  ;;  %v1106_v33 = vmul.f32 %v882_v5, %v3759_v7  ;;  %v2738_v26 = vand.u32 2147483647, %v2737_v19 }
 0x105   :  { %v3816_v39 = vsel %vm3789_vm4, %v820_v60, %v3642_v27  ;;  %v1075_v25 = vadd.f32 -0.16666667, %v1043_v54  ;;  %v1107_v0 = vmul.f32 %v883_v15, %v3763_v34  ;;  %v3822_v56 = vsel %vm3793_vm5, %v821_v52, %v3635_v8  ;;  %v3833_v15 = vld [vmem:[%s5408_s1 + $0x1] ss:$0 sm:$0xff]  ;;  %v174_v46 = vpop.permute.xlu1 %173 }
 0x106   :  { %v884_v59 = vmul.f32 %v3816_v39, %v3816_v39  ;;  %v1138_v61 = vmul.f32 %v1106_v33, %v1074_v6  ;;  %v2734_v5 = vand.u32 2147483647, %v3775_v38  ;;  %v2739_v47 = vand.u32 2147483648, %v3775_v38 }
 0x107   :  { %v885_v27 = vmul.f32 %v3822_v56, %v3822_v56  ;;  %v3836_v12 = vmul.f32 %v3833_v15, %v394_v11  ;;  %v1139_v8 = vmul.f32 %v1107_v0, %v1075_v25  ;;  %v510_v16 = vmul.f32 0.15915494, %v3810_v42 }
 0x108   :  { %v916_v3 = vmul.f32 2.7557319e-06, %v884_v59  ;;  %v3839_v55 = vsub.f32 %v607_v62, %v639_v10  ;;  %v2740_v22 = vor.u32 %v2739_v47, %v2738_v26  ;;  %v694_v1 = vand.u32 2147483647, %v3644_v30  ;;  %v3873_v26 = vld [vmem:[%s5409_s2] ss:$0 sm:$0xff] }
 0x109   :  { %v917_v14 = vmul.f32 2.7557319e-06, %v885_v27  ;;  %v1170_v31 = vadd.f32 %v1138_v61, %v3759_v7  ;;  %v1171_v32 = vadd.f32 %v1139_v8, %v3763_v34  ;;  %v2744_v44 = vcvt.f32.s32 %v510_v16 }
 0x10a   :  { %v948_v13 = vadd.f32 -0.0001984127, %v916_v3  ;;  %vm2735_vm8 = vcmp.lt.f32.partialorder %v2734_v5, 8388608.0  ;;  %v3845_v11 = vmul.f32 %v3833_v15, %v406_v9  ;;  %v695_v10 = vand.u32 2147483647, %v3646_v2 }
 0x10b   :  { %v949_v4 = vadd.f32 -0.0001984127, %v917_v14  ;;  %v1199_v50 = vpack.c.bf16 %v1171_v32, %v1170_v31  ;;  %v2745_v41 = vcvt.s32.f32 %v2744_v44  ;;  %v3849_v17 = vmul.f32 %v3833_v15, %v410_v29 }
 0x10c   :  { %v980_v19 = vmul.f32 %v948_v13, %v884_v59  ;;  %v2741_v7 = vsel %vm2735_vm8, %v2740_v22, %v3775_v38  ;;  %v2747_v57 = vand.u32 2147483648, %v510_v16  ;;  %vm3852_vm9 = vcmp.gt.f32.partialorder %v694_v1, 1.5707964 }
 0x10d   :  { %v981_v34 = vmul.f32 %v949_v4, %v885_v27  ;;  %2523 = vmatmul.mubr.bf16.gmra.mxu0 %v1199_v50  ;;  %v2746_v43 = vand.u32 2147483647, %v2745_v41  ;;  %v790_v35 = vsel %vm758_vm6, 3.1415927, %v3153_v36  ;;  %v245_v38 = vmul.f32 %v3862_v21, %v164_v48  ;;  %v179_v48 = vpop.permute.xlu1 %178 }
 0x10e   :  { %v1012_v51 = vadd.f32 0.008333333, %v980_v19  ;;  %vm727_vm10 = vcmp.gt.f32.partialorder %v695_v10, 1.5707964  ;;  %v791_v62 = vsel %vm759_vm7, 3.1415927, %v3153_v36  ;;  %v822_v54 = vsub.f32 %v790_v35, %v3644_v30 }
 0x10f   :  { %v1013_v60 = vadd.f32 0.008333333, %v981_v34  ;;  %v2742_v6 = vand.u32 2147483647, %v510_v16  ;;  %v823_v33 = vsub.f32 %v791_v62, %v3646_v2  ;;  %v283_v9 = vadd.f32 %v3873_v26, %v245_v38 }
 0x110   :  { %v1044_v52 = vmul.f32 %v1012_v51, %v884_v59  ;;  %v3876_v25 = vmul.f32 6.28125, %v2741_v7  ;;  %v2748_v61 = vor.u32 %v2747_v57, %v2746_v43  ;;  %v3881_v5 = vsel %vm3852_vm9, %v822_v54, %v3644_v30 }
 0x111   :  { %v1045_v0 = vmul.f32 %v1013_v60, %v885_v27  ;;  %v1108_v8 = vmul.f32 %v884_v59, %v3816_v39  ;;  %v3885_v3 = vsel %vm727_vm10, %v823_v33, %v3646_v2  ;;  %v886_v22 = vmul.f32 %v3881_v5, %v3881_v5  ;;  %v382_v41 = vpop.permute.xlu1 %381 }
 0x112   :  { %v1076_v47 = vadd.f32 -0.16666667, %v1044_v52  ;;  %v1109_v1 = vmul.f32 %v885_v27, %v3822_v56  ;;  %v887_v31 = vmul.f32 %v3885_v3, %v3885_v3  ;;  %v248_v32 = vmul.f32 %v3862_v21, %v179_v48 }
 0x113   :  { %v1077_v14 = vadd.f32 -0.16666667, %v1045_v0  ;;  %vm2743_vm11 = vcmp.lt.f32.partialorder %v2742_v6, 8388608.0  ;;  %v918_v30 = vmul.f32 2.7557319e-06, %v886_v22  ;;  %v3894_v44 = vadd.f32 %v3660_v58, %v283_v9 }
 0x114   :  { %v1140_v13 = vmul.f32 %v1108_v8, %v1076_v47  ;;  %v3896_v59 = vmul.f32 0.0019353072, %v2741_v7  ;;  %v3898_v4 = vsel %vm2743_vm11, %v2748_v61, %v510_v16  ;;  %v919_v29 = vmul.f32 2.7557319e-06, %v887_v31 }
 0x115   :  { %v1141_v2 = vmul.f32 %v1109_v1, %v1077_v14  ;;  %v605_v27 = vsub.f32 %v3770_v49, %v3876_v25  ;;  %v950_v50 = vadd.f32 -0.0001984127, %v918_v30  ;;  %v512_v19 = vmul.f32 0.15915494, %v3894_v44  ;;  %v386_v47 = vpop.permute.xlu1 %385 }
 0x116   :  { %v1172_v10 = vadd.f32 %v1140_v13, %v3816_v39  ;;  %v951_v57 = vadd.f32 -0.0001984127, %v919_v29  ;;  %v247_v58 = vmul.f32 %v3862_v21, %v174_v46  ;;  %v286_v7 = vadd.f32 %v3873_v26, %v248_v32 }
 0x117   :  { %v1173_v34 = vadd.f32 %v1141_v2, %v3822_v56  ;;  %vm760_vm12 = vcmp.ge.f32.partialorder %v3653_v20, 0.0  ;;  %v3909_v16 = vmul.f32 6.28125, %v3898_v4  ;;  %v982_v53 = vmul.f32 %v950_v50, %v886_v22 }
 0x118   :  { %v1110_v51 = vmul.f32 %v886_v22, %v3881_v5  ;;  %v2760_v39 = vcvt.f32.s32 %v512_v19  ;;  %vm761_vm13 = vcmp.ge.f32.partialorder %v3668_v45, 0.0  ;;  %v983_v35 = vmul.f32 %v951_v57, %v887_v31 }
 0x119   :  { %v1200_v43 = vpack.c.bf16 %v1173_v34, %v1172_v10  ;;  %v1111_v56 = vmul.f32 %v887_v31, %v3885_v3  ;;  %v3915_v38 = vadd.f32 %v3780_v18, %v286_v7  ;;  %v1014_v46 = vadd.f32 0.008333333, %v982_v53 }
 0x11a   :  { %v2758_v60 = vand.u32 2147483647, %v512_v19  ;;  %v2761_v62 = vcvt.s32.f32 %v2760_v39  ;;  %v449_v54 = vmul.f32 %v3833_v15, %v382_v41  ;;  %v1015_v52 = vadd.f32 0.008333333, %v983_v35 }
 0x11b   :  { %2526 = vmatprep.mubr.bf16.mxu0 %v1200_v43  ;;  %v2763_v6 = vand.u32 2147483648, %v512_v19  ;;  %v285_v33 = vadd.f32 %v3873_v26, %v247_v58  ;;  %v515_v9 = vmul.f32 0.15915494, %v3915_v38  ;;  %v1046_v48 = vmul.f32 %v1014_v46, %v886_v22 }
 0x11c   :  { %v2762_v0 = vand.u32 2147483647, %v2761_v62  ;;  %v3921_v61 = vadd.f32 %v449_v54, %v3460_v23  ;;  %v696_v18 = vand.u32 2147483647, %v3653_v20  ;;  %v1047_v8 = vmul.f32 %v1015_v52, %v887_v31 }
 0x11d   :  { %v2782_v14 = vand.u32 2147483647, %v515_v9  ;;  %v2784_v1 = vcvt.f32.s32 %v515_v9  ;;  %v697_v32 = vand.u32 2147483647, %v3668_v45  ;;  %v1078_v13 = vadd.f32 -0.16666667, %v1046_v48 }
 0x11e   :  { %vm2759_vm14 = vcmp.lt.f32.partialorder %v2758_v60, 8388608.0  ;;  %v2764_v30 = vor.u32 %v2763_v6, %v2762_v0  ;;  %v513_v2 = vmul.f32 0.15915494, %v3921_v61  ;;  %v1079_v29 = vadd.f32 -0.16666667, %v1047_v8  ;;  %v184_v6 = vpop.permute.xlu1 %183 }
 0x11f   :  { %v2785_v10 = vcvt.s32.f32 %v2784_v1  ;;  %v2787_v22 = vand.u32 2147483648, %v515_v9  ;;  %v450_v50 = vmul.f32 %v3833_v15, %v386_v47  ;;  %v1142_v23 = vmul.f32 %v1110_v51, %v1078_v13 }
 0x120   :  { %v2765_v41 = vsel %vm2759_vm14, %v2764_v30, %v512_v19  ;;  %v2768_v34 = vcvt.f32.s32 %v513_v2  ;;  %vm3927_vm15 = vcmp.gt.f32.partialorder %v696_v18, 1.5707964  ;;  %v1143_v31 = vmul.f32 %v1111_v56, %v1079_v29 }
 0x121   :  { %vm3931_vm0 = vcmp.lt.f32.partialorder %v2782_v14, 8388608.0  ;;  %v2786_v7 = vand.u32 2147483647, %v2785_v10  ;;  %vm3935_vm1 = vcmp.gt.f32.partialorder %v697_v32, 1.5707964  ;;  %v1174_v39 = vadd.f32 %v1142_v23, %v3881_v5 }
 0x122   :  { %v576_v43 = vmul.f32 6.28125, %v2765_v41  ;;  %v2766_v51 = vand.u32 2147483647, %v513_v2  ;;  %v2769_v19 = vcvt.s32.f32 %v2768_v34  ;;  %vm763_vm2 = vcmp.ge.f32.partialorder %v3663_v24, 0.0 }
 0x123   :  { %vm762_vm3 = vcmp.ge.f32.partialorder %v3728_v63, 0.0  ;;  %v1175_v35 = vadd.f32 %v1143_v31, %v3885_v3  ;;  %v2788_v56 = vor.u32 %v2787_v22, %v2786_v7  ;;  %v2771_v46 = vand.u32 2147483648, %v513_v2  ;;  %v194_v22 = vpop.permute.xlu1 %193 }
 0x124   :  { %v792_v60 = vsel %vm760_vm12, 3.1415927, %v3153_v36  ;;  %v2770_v62 = vand.u32 2147483647, %v2769_v19  ;;  %v793_v5 = vsel %vm761_vm13, 3.1415927, %v3153_v36  ;;  %v3950_v52 = vadd.f32 %v450_v50, %v285_v33  ;;  %v422_v33 = vpop.permute.xlu0 %421 }
 0x125   :  { %v824_v54 = vsub.f32 %v792_v60, %v3653_v20  ;;  %v3956_v3 = vsub.f32 %v605_v27, %v3896_v59  ;;  %v1201_v48 = vpack.c.bf16 %v1175_v35, %v1174_v39  ;;  %v2789_v0 = vsel %vm3931_vm0, %v2788_v56, %v515_v9 }
 0x126   :  { %v825_v18 = vsub.f32 %v793_v5, %v3668_v45  ;;  %v606_v47 = vsub.f32 %v3810_v42, %v3909_v16  ;;  %v608_v8 = vsub.f32 %v3894_v44, %v576_v43  ;;  %v2772_v14 = vor.u32 %v2771_v46, %v2770_v62 }
 0x127   :  { %v3967_v1 = vsel %vm3927_vm15, %v824_v54, %v3653_v20  ;;  %2527 = vmatmul.mubr.bf16.gmra.mxu0 %v1201_v48  ;;  %v579_v49 = vmul.f32 6.28125, %v2789_v0  ;;  %v514_v42 = vmul.f32 0.15915494, %v3950_v52  ;;  %v638_v44 = vmul.f32 0.0019353072, %v3898_v4 }
 0x128   :  { %v3972_v25 = vsel %vm3935_vm1, %v825_v18, %v3668_v45  ;;  %v888_v59 = vmul.f32 %v3967_v1, %v3967_v1  ;;  %v640_v27 = vmul.f32 0.0019353072, %v2765_v41  ;;  %vm2767_vm4 = vcmp.lt.f32.partialorder %v2766_v51, 8388608.0 }
 0x129   :  { %v889_v20 = vmul.f32 %v3972_v25, %v3972_v25  ;;  %v3981_v16 = vmul.f32 %v3833_v15, %v422_v33  ;;  %v2773_v9 = vsel %vm2767_vm4, %v2772_v14, %v513_v2  ;;  %v698_v45 = vand.u32 2147483647, %v3728_v63 }
 0x12a   :  { %v920_v32 = vmul.f32 2.7557319e-06, %v888_v59  ;;  %v3984_v13 = vsub.f32 %v606_v47, %v638_v44  ;;  %v3986_v30 = vsub.f32 %v608_v8, %v640_v27  ;;  %v643_v29 = vmul.f32 0.0019353072, %v2789_v0 }
 0x12b   :  { %v921_v10 = vmul.f32 2.7557319e-06, %v889_v20  ;;  %v611_v4 = vsub.f32 %v3915_v38, %v579_v49  ;;  %v2776_v23 = vcvt.f32.s32 %v514_v42  ;;  %v699_v41 = vand.u32 2147483647, %v3663_v24 }
 0x12c   :  { %v952_v50 = vadd.f32 -0.0001984127, %v920_v32  ;;  %v3990_v34 = vmul.f32 6.28125, %v2773_v9  ;;  %v2774_v2 = vand.u32 2147483647, %v514_v42  ;;  %v249_v31 = vmul.f32 %v3862_v21, %v184_v6  ;;  %v199_v6 = vpop.permute.xlu1 %198 }
 0x12d   :  { %v953_v57 = vadd.f32 -0.0001984127, %v921_v10  ;;  %v2777_v7 = vcvt.s32.f32 %v2776_v23  ;;  %v2779_v53 = vand.u32 2147483648, %v514_v42  ;;  %vm3993_vm5 = vcmp.gt.f32.partialorder %v698_v45, 1.5707964 }
 0x12e   :  { %v984_v58 = vmul.f32 %v952_v50, %v888_v59  ;;  %v794_v38 = vsel %vm762_vm3, 3.1415927, %v3153_v36  ;;  %v795_v51 = vsel %vm763_vm2, 3.1415927, %v3153_v36  ;;  %v287_v19 = vadd.f32 %v3873_v26, %v249_v31 }
 0x12f   :  { %v985_v43 = vmul.f32 %v953_v57, %v889_v20  ;;  %v2778_v56 = vand.u32 2147483647, %v2777_v7  ;;  %vm731_vm6 = vcmp.gt.f32.partialorder %v699_v41, 1.5707964  ;;  %v826_v46 = vsub.f32 %v794_v38, %v3728_v63 }
 0x130   :  { %v1016_v35 = vadd.f32 0.008333333, %v984_v58  ;;  %v1112_v62 = vmul.f32 %v888_v59, %v3967_v1  ;;  %v827_v5 = vsub.f32 %v795_v51, %v3663_v24  ;;  %v4008_v54 = vadd.f32 %v3836_v12, %v287_v19 }
 0x131   :  { %v1017_v60 = vadd.f32 0.008333333, %v985_v43  ;;  %vm2775_vm7 = vcmp.lt.f32.partialorder %v2774_v2, 8388608.0  ;;  %v2780_v0 = vor.u32 %v2779_v53, %v2778_v56  ;;  %v4013_v18 = vsel %vm3993_vm5, %v826_v46, %v3728_v63 }
 0x132   :  { %v1048_v48 = vmul.f32 %v1016_v35, %v888_v59  ;;  %v4016_v8 = vsel %vm731_vm6, %v827_v5, %v3663_v24  ;;  %v890_v33 = vmul.f32 %v4013_v18, %v4013_v18  ;;  %v516_v14 = vmul.f32 0.15915494, %v4008_v54 }
 0x133   :  { %v1049_v47 = vmul.f32 %v1017_v60, %v889_v20  ;;  %v2781_v49 = vsel %vm2775_vm7, %v2780_v0, %v514_v42  ;;  %v891_v59 = vmul.f32 %v4016_v8, %v4016_v8  ;;  %v251_v44 = vmul.f32 %v3862_v21, %v194_v22  ;;  %v398_v22 = vpop.permute.xlu1 %397 }
 0x134   :  { %v1080_v12 = vadd.f32 -0.16666667, %v1048_v48  ;;  %v4024_v27 = vsub.f32 %v611_v4, %v643_v29  ;;  %v4026_v63 = vmul.f32 0.0019353072, %v2773_v9  ;;  %v1113_v24 = vmul.f32 %v889_v20, %v3972_v25 }
 0x135   :  { %v1081_v32 = vadd.f32 -0.16666667, %v1049_v47  ;;  %v922_v10 = vmul.f32 2.7557319e-06, %v890_v33  ;;  %v923_v50 = vmul.f32 2.7557319e-06, %v891_v59  ;;  %v252_v23 = vmul.f32 %v3862_v21, %v199_v6 }
 0x136   :  { %v1144_v45 = vmul.f32 %v1112_v62, %v1080_v12  ;;  %vm765_vm8 = vcmp.ge.f32.partialorder %v3956_v3, 0.0  ;;  %v609_v42 = vsub.f32 %v3921_v61, %v3990_v34  ;;  %v4033_v57 = vmul.f32 6.28125, %v2781_v49 }
 0x137   :  { %v1145_v41 = vmul.f32 %v1113_v24, %v1081_v32  ;;  %v2792_v29 = vcvt.f32.s32 %v516_v14  ;;  %v4035_v9 = vmul.f32 0.0019353072, %v2781_v49  ;;  %v954_v4 = vadd.f32 -0.0001984127, %v922_v10  ;;  %v402_v0 = vpop.permute.xlu1 %401 }
 0x138   :  { %v955_v2 = vadd.f32 -0.0001984127, %v923_v50  ;;  %v4038_v20 = vadd.f32 %v3873_v26, %v251_v44  ;;  %v1176_v31 = vadd.f32 %v1144_v45, %v3967_v1  ;;  %v2790_v7 = vand.u32 2147483647, %v516_v14 }
 0x139   :  { %v1177_v58 = vadd.f32 %v1145_v41, %v3972_v25  ;;  %v2793_v53 = vcvt.s32.f32 %v2792_v29  ;;  %v986_v39 = vmul.f32 %v954_v4, %v890_v33  ;;  %v290_v38 = vadd.f32 %v3873_v26, %v252_v23 }
 0x13a   :  { %v987_v43 = vmul.f32 %v955_v2, %v891_v59  ;;  %v453_v51 = vmul.f32 %v3833_v15, %v398_v22  ;;  %v2795_v56 = vand.u32 2147483648, %v516_v14  ;;  %v700_v46 = vand.u32 2147483647, %v3784_v40 }
 0x13b   :  { %v1202_v19 = vpack.c.bf16 %v1177_v58, %v1176_v31  ;;  %v2794_v35 = vand.u32 2147483647, %v2793_v53  ;;  %v1018_v60 = vadd.f32 0.008333333, %v986_v39  ;;  %v4046_v5 = vadd.f32 %v3845_v11, %v290_v38  ;;  %v204_v58 = vpop.permute.xlu1 %203 }
 0x13c   :  { %v1019_v62 = vadd.f32 0.008333333, %v987_v43  ;;  %v4049_v1 = vadd.f32 %v453_v51, %v3466_v28  ;;  %v1114_v25 = vmul.f32 %v890_v33, %v4013_v18  ;;  %v701_v48 = vand.u32 2147483647, %v3956_v3 }
 0x13d   :  { %2530 = vmatprep.mubr.bf16.mxu0 %v1202_v19  ;;  %v2796_v6 = vor.u32 %v2795_v56, %v2794_v35  ;;  %vm764_vm9 = vcmp.ge.f32.partialorder %v3784_v40, 0.0  ;;  %v1050_v47 = vmul.f32 %v1018_v60, %v890_v33  ;;  %v519_v49 = vmul.f32 0.15915494, %v4046_v5 }
 0x13e   :  { %v1051_v12 = vmul.f32 %v1019_v62, %v891_v59  ;;  %v517_v44 = vmul.f32 0.15915494, %v4049_v1  ;;  %v610_v11 = vsub.f32 %v3950_v52, %v4033_v57  ;;  %v1115_v28 = vmul.f32 %v891_v59, %v4016_v8 }
 0x13f   :  { %vm2791_vm10 = vcmp.lt.f32.partialorder %v2790_v7, 8388608.0  ;;  %vm4059_vm11 = vcmp.gt.f32.partialorder %v700_v46, 1.5707964  ;;  %v1082_v24 = vadd.f32 -0.16666667, %v1050_v47  ;;  %v2816_v50 = vcvt.f32.s32 %v519_v49 }
 0x140   :  { %v1083_v45 = vadd.f32 -0.16666667, %v1051_v12  ;;  %v2797_v10 = vsel %vm2791_vm10, %v2796_v6, %v516_v14  ;;  %v2814_v33 = vand.u32 2147483647, %v519_v49  ;;  %v2800_v23 = vcvt.f32.s32 %v517_v44 }
 0x141   :  { %vm4063_vm12 = vcmp.gt.f32.partialorder %v701_v48, 1.5707964  ;;  %v796_v52 = vsel %vm764_vm9, 3.1415927, %v3153_v36  ;;  %v1146_v59 = vmul.f32 %v1114_v25, %v1082_v24  ;;  %v2817_v29 = vcvt.s32.f32 %v2816_v50 }
 0x142   :  { %v1147_v57 = vmul.f32 %v1115_v28, %v1083_v45  ;;  %v797_v22 = vsel %vm765_vm8, 3.1415927, %v3153_v36  ;;  %vm766_vm13 = vcmp.ge.f32.partialorder %v3984_v13, 0.0  ;;  %v4074_v14 = vmul.f32 6.28125, %v2797_v10 }
 0x143   :  { %v2819_v4 = vand.u32 2147483648, %v519_v49  ;;  %v2798_v2 = vand.u32 2147483647, %v517_v44  ;;  %v2801_v31 = vcvt.s32.f32 %v2800_v23  ;;  %v1178_v7 = vadd.f32 %v1146_v59, %v4013_v18 }
 0x144   :  { %v1179_v53 = vadd.f32 %v1147_v57, %v4016_v8  ;;  %vm2815_vm14 = vcmp.lt.f32.partialorder %v2814_v33, 8388608.0  ;;  %v2818_v39 = vand.u32 2147483647, %v2817_v29  ;;  %v2803_v38 = vand.u32 2147483648, %v517_v44 }
 0x145   :  { %v2802_v43 = vand.u32 2147483647, %v2801_v31  ;;  %v828_v51 = vsub.f32 %v796_v52, %v3784_v40  ;;  %v829_v19 = vsub.f32 %v797_v22, %v3956_v3  ;;  %vm2799_vm15 = vcmp.lt.f32.partialorder %v2798_v2, 8388608.0 }
 0x146   :  { %v1203_v35 = vpack.c.bf16 %v1179_v53, %v1178_v7  ;;  %v2820_v56 = vor.u32 %v2819_v4, %v2818_v39  ;;  %v454_v46 = vmul.f32 %v3833_v15, %v402_v0  ;;  %v702_v62 = vand.u32 2147483647, %v3984_v13 }
 0x147   :  { %v2804_v60 = vor.u32 %v2803_v38, %v2802_v43  ;;  %v4084_v18 = vsel %vm4059_vm11, %v828_v51, %v3784_v40  ;;  %v4089_v8 = vsel %vm4063_vm12, %v829_v19, %v3956_v3  ;;  %v644_v40 = vmul.f32 0.0019353072, %v2797_v10  ;;  %v214_v3 = vpop.permute.xlu1 %213 }
 0x148   :  { %2531 = vmatmul.mubr.bf16.gmra.mxu0 %v1203_v35  ;;  %v2821_v25 = vsel %vm2815_vm14, %v2820_v56, %v519_v49  ;;  %v892_v6 = vmul.f32 %v4084_v18, %v4084_v18  ;;  %v893_v48 = vmul.f32 %v4089_v8, %v4089_v8  ;;  %v4097_v0 = vadd.f32 %v454_v46, %v4038_v20 }
 0x149   :  { %v583_v47 = vmul.f32 6.28125, %v2821_v25  ;;  %v2805_v12 = vsel %vm2799_vm15, %v2804_v60, %v517_v44  ;;  %v703_v28 = vand.u32 2147483647, %v3839_v55  ;;  %v4104_v49 = vsub.f32 %v609_v42, %v4026_v63 }
 0x14a   :  { %v647_v32 = vmul.f32 0.0019353072, %v2821_v25  ;;  %v581_v24 = vmul.f32 6.28125, %v2805_v12  ;;  %v924_v45 = vmul.f32 2.7557319e-06, %v892_v6  ;;  %v4107_v50 = vsub.f32 %v610_v11, %v4035_v9 }
 0x14b   :  { %v925_v20 = vmul.f32 2.7557319e-06, %v893_v48  ;;  %v518_v10 = vmul.f32 0.15915494, %v4097_v0  ;;  %vm4110_vm0 = vcmp.gt.f32.partialorder %v702_v62, 1.5707964  ;;  %v612_v33 = vsub.f32 %v4008_v54, %v4074_v14  ;;  %v219_v22 = vpop.permute.xlu1 %218 }
 0x14c   :  { %v645_v23 = vmul.f32 0.0019353072, %v2805_v12  ;;  %v956_v61 = vadd.f32 -0.0001984127, %v924_v45  ;;  %vm767_vm1 = vcmp.ge.f32.partialorder %v3839_v55, 0.0  ;;  %v615_v34 = vsub.f32 %v4046_v5, %v583_v47 }
 0x14d   :  { %v957_v63 = vadd.f32 -0.0001984127, %v925_v20  ;;  %v1116_v42 = vmul.f32 %v892_v6, %v4084_v18  ;;  %v2808_v9 = vcvt.f32.s32 %v518_v10  ;;  %v613_v11 = vsub.f32 %v4049_v1, %v581_v24 }
 0x14e   :  { %v988_v41 = vmul.f32 %v956_v61, %v892_v6  ;;  %v1117_v52 = vmul.f32 %v893_v48, %v4089_v8  ;;  %v798_v59 = vsel %vm766_vm13, 3.1415927, %v3153_v36  ;;  %vm735_vm2 = vcmp.gt.f32.partialorder %v703_v28, 1.5707964 }
 0x14f   :  { %v989_v54 = vmul.f32 %v957_v63, %v893_v48  ;;  %v2809_v57 = vcvt.s32.f32 %v2808_v9  ;;  %v799_v29 = vsel %vm767_vm1, 3.1415927, %v3153_v36  ;;  %v2806_v14 = vand.u32 2147483647, %v518_v10  ;;  %v414_v24 = vpop.permute.xlu1 %413 }
 0x150   :  { %v1020_v5 = vadd.f32 0.008333333, %v988_v41  ;;  %v830_v4 = vsub.f32 %v798_v59, %v3984_v13  ;;  %v831_v2 = vsub.f32 %v799_v29, %v3839_v55  ;;  %v2811_v7 = vand.u32 2147483648, %v518_v10 }
 0x151   :  { %v1021_v1 = vadd.f32 0.008333333, %v989_v54  ;;  %v2810_v31 = vand.u32 2147483647, %v2809_v57  ;;  %v253_v53 = vmul.f32 %v3862_v21, %v204_v58  ;;  %v256_v51 = vmul.f32 %v3862_v21, %v219_v22 }
 0x152   :  { %v1052_v39 = vmul.f32 %v1020_v5, %v892_v6  ;;  %v4131_v43 = vsel %vm4110_vm0, %v830_v4, %v3984_v13  ;;  %v4134_v38 = vsel %vm735_vm2, %v831_v2, %v3839_v55  ;;  %vm2807_vm3 = vcmp.lt.f32.partialorder %v2806_v14, 8388608.0 }
 0x153   :  { %v1053_v19 = vmul.f32 %v1021_v1, %v893_v48  ;;  %v2812_v35 = vor.u32 %v2811_v7, %v2810_v31  ;;  %v894_v56 = vmul.f32 %v4131_v43, %v4131_v43  ;;  %v895_v46 = vmul.f32 %v4134_v38, %v4134_v38 }
 0x154   :  { %v1084_v58 = vadd.f32 -0.16666667, %v1052_v39  ;;  %v291_v60 = vadd.f32 %v3873_v26, %v253_v53  ;;  %v294_v13 = vadd.f32 %v3873_v26, %v256_v51  ;;  %v4143_v47 = vsub.f32 %v612_v33, %v644_v40 }
 0x155   :  { %v1085_v62 = vadd.f32 -0.16666667, %v1053_v19  ;;  %v2813_v25 = vsel %vm2807_vm3, %v2812_v35, %v518_v10  ;;  %v926_v55 = vmul.f32 2.7557319e-06, %v894_v56  ;;  %v927_v6 = vmul.f32 2.7557319e-06, %v895_v46 }
 0x156   :  { %v4145_v48 = vsub.f32 %v615_v34, %v647_v32  ;;  %v1148_v12 = vmul.f32 %v1116_v42, %v1084_v58  ;;  %v255_v28 = vmul.f32 %v3862_v21, %v214_v3  ;;  %v4148_v45 = vsub.f32 %v613_v11, %v645_v23 }
 0x157   :  { %v1149_v20 = vmul.f32 %v1117_v52, %v1085_v62  ;;  %v958_v44 = vadd.f32 -0.0001984127, %v926_v55  ;;  %v959_v61 = vadd.f32 -0.0001984127, %v927_v6  ;;  %v4151_v9 = vmul.f32 6.28125, %v2813_v25 }
 0x158   :  { %v1180_v63 = vadd.f32 %v1148_v12, %v4084_v18  ;;  %v4154_v10 = vadd.f32 %v3849_v17, %v291_v60  ;;  %v4157_v40 = vadd.f32 %v3981_v16, %v294_v13  ;;  %vm769_vm4 = vcmp.ge.f32.partialorder %v4104_v49, 0.0 }
 0x159   :  { %v1181_v21 = vadd.f32 %v1149_v20, %v4089_v8  ;;  %v990_v3 = vmul.f32 %v958_v44, %v894_v56  ;;  %v991_v32 = vmul.f32 %v959_v61, %v895_v46  ;;  %v457_v33 = vmul.f32 %v3833_v15, %v414_v24  ;;  %v418_v20 = vpop.permute.xlu1 %417 }
 0x15a   :  { %v646_v23 = vmul.f32 0.0019353072, %v2813_v25  ;;  %v520_v34 = vmul.f32 0.15915494, %v4154_v10  ;;  %v4164_v18 = vadd.f32 %v3873_v26, %v255_v28  ;;  %v523_v17 = vmul.f32 0.15915494, %v4157_v40 }
 0x15b   :  { %v1204_v42 = vpack.c.bf16 %v1181_v21, %v1180_v63  ;;  %v1022_v11 = vadd.f32 0.008333333, %v990_v3  ;;  %v1023_v16 = vadd.f32 0.008333333, %v991_v32  ;;  %v4168_v41 = vadd.f32 %v457_v33, %v3477_v37 }
 0x15c   :  { %v1118_v8 = vmul.f32 %v894_v56, %v4131_v43  ;;  %v1119_v52 = vmul.f32 %v895_v46, %v4134_v38  ;;  %v2822_v59 = vand.u32 2147483647, %v520_v34  ;;  %v2824_v54 = vcvt.f32.s32 %v520_v34 }
 0x15d   :  { %2534 = vmatprep.mubr.bf16.mxu0 %v1204_v42  ;;  %v614_v57 = vsub.f32 %v4097_v0, %v4151_v9  ;;  %v1054_v26 = vmul.f32 %v1022_v11, %v894_v56  ;;  %v1055_v29 = vmul.f32 %v1023_v16, %v895_v46  ;;  %v2848_v22 = vcvt.f32.s32 %v523_v17 }
 0x15e   :  { %v2825_v5 = vcvt.s32.f32 %v2824_v54  ;;  %v2846_v14 = vand.u32 2147483647, %v523_v17  ;;  %v521_v4 = vmul.f32 0.15915494, %v4168_v41  ;;  %v704_v37 = vand.u32 2147483647, %v3986_v30 }
 0x15f   :  { %v1086_v2 = vadd.f32 -0.16666667, %v1054_v26  ;;  %v1087_v1 = vadd.f32 -0.16666667, %v1055_v29  ;;  %v2827_v31 = vand.u32 2147483648, %v520_v34  ;;  %v2849_v7 = vcvt.s32.f32 %v2848_v22 }
 0x160   :  { %vm4176_vm5 = vcmp.lt.f32.partialorder %v2822_v59, 8388608.0  ;;  %v2826_v39 = vand.u32 2147483647, %v2825_v5  ;;  %v2851_v51 = vand.u32 2147483648, %v523_v17  ;;  %v2832_v0 = vcvt.f32.s32 %v521_v4 }
 0x161   :  { %v1150_v19 = vmul.f32 %v1118_v8, %v1086_v2  ;;  %v1151_v35 = vmul.f32 %v1119_v52, %v1087_v1  ;;  %v2850_v56 = vand.u32 2147483647, %v2849_v7  ;;  %v2830_v46 = vand.u32 2147483647, %v521_v4 }
 0x162   :  { %vm770_vm6 = vcmp.ge.f32.partialorder %v4107_v50, 0.0  ;;  %v2828_v58 = vor.u32 %v2827_v31, %v2826_v39  ;;  %vm2847_vm7 = vcmp.lt.f32.partialorder %v2846_v14, 8388608.0  ;;  %v2833_v60 = vcvt.s32.f32 %v2832_v0 }
 0x163   :  { %v2835_v13 = vand.u32 2147483648, %v521_v4  ;;  %v1182_v62 = vadd.f32 %v1150_v19, %v4131_v43  ;;  %v1183_v25 = vadd.f32 %v1151_v35, %v4134_v38  ;;  %v2852_v55 = vor.u32 %v2851_v51, %v2850_v56 }
 0x164   :  { %v705_v6 = vand.u32 2147483647, %v4104_v49  ;;  %v2829_v12 = vsel %vm4176_vm5, %v2828_v58, %v520_v34  ;;  %v2834_v28 = vand.u32 2147483647, %v2833_v60  ;;  %vm768_vm8 = vcmp.ge.f32.partialorder %v3986_v30, 0.0 }
 0x165   :  { %v801_v24 = vsel %vm769_vm4, 3.1415927, %v3153_v36  ;;  %v1205_v44 = vpack.c.bf16 %v1183_v25, %v1182_v62  ;;  %v584_v61 = vmul.f32 6.28125, %v2829_v12  ;;  %v2853_v63 = vsel %vm2847_vm7, %v2852_v55, %v523_v17 }
 0x166   :  { %vm2831_vm9 = vcmp.lt.f32.partialorder %v2830_v46, 8388608.0  ;;  %v587_v43 = vmul.f32 6.28125, %v2853_v63  ;;  %v2836_v38 = vor.u32 %v2835_v13, %v2834_v28  ;;  %vm736_vm10 = vcmp.gt.f32.partialorder %v704_v37, 1.5707964 }
 0x167   :  { %v800_v9 = vsel %vm768_vm8, 3.1415927, %v3153_v36  ;;  %2535 = vmatmul.mubr.bf16.gmra.mxu0 %v1205_v44  ;;  %vm737_vm11 = vcmp.gt.f32.partialorder %v705_v6, 1.5707964  ;;  %v833_v3 = vsub.f32 %v801_v24, %v4104_v49  ;;  %v458_v32 = vmul.f32 %v3833_v15, %v418_v20 }
 0x168   :  { %v832_v21 = vsub.f32 %v800_v9, %v3986_v30  ;;  %v4194_v33 = vsub.f32 %v614_v57, %v646_v23  ;;  %v616_v34 = vsub.f32 %v4154_v10, %v584_v61  ;;  %v648_v42 = vmul.f32 0.0019353072, %v2829_v12 }
 0x169   :  { %v2837_v17 = vsel %vm2831_vm9, %v2836_v38, %v521_v4  ;;  %v619_v11 = vsub.f32 %v4157_v40, %v587_v43  ;;  %v706_v52 = vand.u32 2147483647, %v4107_v50  ;;  %v4203_v59 = vsel %vm737_vm11, %v833_v3, %v4104_v49 }
 0x16a   :  { %v585_v16 = vmul.f32 6.28125, %v2837_v17  ;;  %v4199_v8 = vsel %vm736_vm10, %v832_v21, %v3986_v30  ;;  %v4208_v23 = vadd.f32 %v458_v32, %v4164_v18  ;;  %v707_v10 = vand.u32 2147483647, %v4024_v27 }
 0x16b   :  { %v896_v15 = vmul.f32 %v4199_v8, %v4199_v8  ;;  %v651_v54 = vmul.f32 0.0019353072, %v2853_v63  ;;  %v649_v57 = vmul.f32 0.0019353072, %v2837_v17  ;;  %v897_v30 = vmul.f32 %v4203_v59, %v4203_v59 }
 0x16c   :  { %v617_v40 = vsub.f32 %v4168_v41, %v585_v16  ;;  %v4214_v26 = vsub.f32 %v616_v34, %v648_v42  ;;  %v522_v49 = vmul.f32 0.15915494, %v4208_v23  ;;  %vm771_vm12 = vcmp.ge.f32.partialorder %v4024_v27, 0.0 }
 0x16d   :  { %v928_v29 = vmul.f32 2.7557319e-06, %v896_v15  ;;  %vm773_vm13 = vcmp.ge.f32.partialorder %v4148_v45, 0.0  ;;  %v4219_v18 = vsub.f32 %v619_v11, %v651_v54  ;;  %v929_v22 = vmul.f32 2.7557319e-06, %v897_v30 }
 0x16e   :  { %vm4221_vm14 = vcmp.gt.f32.partialorder %v706_v52, 1.5707964  ;;  %v802_v41 = vsel %vm770_vm6, 3.1415927, %v3153_v36  ;;  %v1120_v4 = vmul.f32 %v896_v15, %v4199_v8  ;;  %v2840_v37 = vcvt.f32.s32 %v522_v49 }
 0x16f   :  { %v960_v14 = vadd.f32 -0.0001984127, %v928_v29  ;;  %vm739_vm15 = vcmp.gt.f32.partialorder %v707_v10, 1.5707964  ;;  %v4229_v2 = vsub.f32 %v617_v40, %v649_v57  ;;  %v961_v1 = vadd.f32 -0.0001984127, %v929_v22 }
 0x170   :  { %v803_v31 = vsel %vm771_vm12, 3.1415927, %v3153_v36  ;;  %v834_v7 = vsub.f32 %v802_v41, %v4107_v50  ;;  %v2838_v39 = vand.u32 2147483647, %v522_v49  ;;  %v2841_v51 = vcvt.s32.f32 %v2840_v37 }
 0x171   :  { %v992_v53 = vmul.f32 %v960_v14, %v896_v15  ;;  %v835_v0 = vsub.f32 %v803_v31, %v4024_v27  ;;  %v993_v19 = vmul.f32 %v961_v1, %v897_v30  ;;  %v2843_v35 = vand.u32 2147483648, %v522_v49 }
 0x172   :  { %v4237_v56 = vsel %vm4221_vm14, %v834_v7, %v4107_v50  ;;  %v708_v46 = vand.u32 2147483647, %v4143_v47  ;;  %v2842_v60 = vand.u32 2147483647, %v2841_v51  ;;  %v1121_v55 = vmul.f32 %v897_v30, %v4203_v59 }
 0x173   :  { %v1024_v58 = vadd.f32 0.008333333, %v992_v53  ;;  %v4241_v13 = vsel %vm739_vm15, %v835_v0, %v4024_v27  ;;  %v898_v62 = vmul.f32 %v4237_v56, %v4237_v56  ;;  %v1025_v25 = vadd.f32 0.008333333, %v993_v19 }
 0x174   :  { %v899_v6 = vmul.f32 %v4241_v13, %v4241_v13  ;;  %v709_v12 = vand.u32 2147483647, %v4148_v45  ;;  %vm2839_vm0 = vcmp.lt.f32.partialorder %v2838_v39, 8388608.0  ;;  %v2844_v28 = vor.u32 %v2843_v35, %v2842_v60 }
 0x175   :  { %v1056_v50 = vmul.f32 %v1024_v58, %v896_v15  ;;  %v930_v24 = vmul.f32 2.7557319e-06, %v898_v62  ;;  %v1057_v20 = vmul.f32 %v1025_v25, %v897_v30  ;;  %vm4249_vm1 = vcmp.gt.f32.partialorder %v708_v46, 1.5707964 }
 0x176   :  { %v931_v44 = vmul.f32 2.7557319e-06, %v899_v6  ;;  %vm772_vm2 = vcmp.ge.f32.partialorder %v4143_v47, 0.0  ;;  %vm774_vm3 = vcmp.ge.f32.partialorder %v4194_v33, 0.0  ;;  %v2845_v63 = vsel %vm2839_vm0, %v2844_v28, %v522_v49 }
 0x177   :  { %v1088_v61 = vadd.f32 -0.16666667, %v1056_v50  ;;  %v962_v43 = vadd.f32 -0.0001984127, %v930_v24  ;;  %v804_v38 = vsel %vm772_vm2, 3.1415927, %v3153_v36  ;;  %v1122_v52 = vmul.f32 %v898_v62, %v4237_v56 }
 0x178   :  { %v1089_v9 = vadd.f32 -0.16666667, %v1057_v20  ;;  %v586_v21 = vmul.f32 6.28125, %v2845_v63  ;;  %vm4256_vm4 = vcmp.gt.f32.partialorder %v709_v12, 1.5707964  ;;  %v836_v32 = vsub.f32 %v804_v38, %v4143_v47 }
 0x179   :  { %v1152_v34 = vmul.f32 %v1120_v4, %v1088_v61  ;;  %v963_v42 = vadd.f32 -0.0001984127, %v931_v44  ;;  %v994_v17 = vmul.f32 %v962_v43, %v898_v62  ;;  %v805_v11 = vsel %vm773_vm13, 3.1415927, %v3153_v36 }
 0x17a   :  { %v1153_v16 = vmul.f32 %v1121_v55, %v1089_v9  ;;  %v837_v15 = vsub.f32 %v805_v11, %v4148_v45  ;;  %v4269_v10 = vsel %vm4249_vm1, %v836_v32, %v4143_v47  ;;  %v618_v54 = vsub.f32 %v4208_v23, %v586_v21  ;;  %v3140_v11 = vld [vmem:[%s5410_s5 + $0x30] sm:$0xff]  }
 0x17b   :  { %v995_v40 = vmul.f32 %v963_v42, %v899_v6  ;;  %v1026_v57 = vadd.f32 0.008333333, %v994_v17  ;;  %v900_v30 = vmul.f32 %v4269_v10, %v4269_v10  ;;  %v1184_v29 = vadd.f32 %v1152_v34, %v4199_v8 }
 0x17c   :  { %v1185_v49 = vadd.f32 %v1153_v16, %v4203_v59  ;;  %v4279_v22 = vsel %vm4256_vm4, %v837_v15, %v4148_v45  ;;  %v710_v5 = vand.u32 2147483647, %v4194_v33  ;;  %vm777_vm5 = vcmp.ge.f32.partialorder %v4229_v2, 0.0  ;;  %v3141_v16 = vld [vmem:[%s5410_s5 + $0x28] sm:$0xff]  }
 0x17d   :  { %v1027_v47 = vadd.f32 0.008333333, %v995_v40  ;;  %v1058_v23 = vmul.f32 %v1026_v57, %v898_v62  ;;  %v901_v41 = vmul.f32 %v4279_v22, %v4279_v22  ;;  %v932_v14 = vmul.f32 2.7557319e-06, %v900_v30 }
 0x17e   :  { %v1206_v4 = vpack.c.bf16 %v1185_v49, %v1184_v29  ;;  %v650_v37 = vmul.f32 0.0019353072, %v2845_v63  ;;  %v1123_v8 = vmul.f32 %v899_v6, %v4241_v13  ;;  %v711_v59 = vand.u32 2147483647, %v4145_v48 }
 0x17f   :  { %v1059_v1 = vmul.f32 %v1027_v47, %v899_v6  ;;  %v1090_v31 = vadd.f32 -0.16666667, %v1058_v23  ;;  %v933_v45 = vmul.f32 2.7557319e-06, %v901_v41  ;;  %v964_v7 = vadd.f32 -0.0001984127, %v932_v14 }
 0x180   :  { %2538 = vmatprep.mubr.bf16.mxu0 %v1206_v4  ;;  %v4287_v53 = vsub.f32 %v618_v54, %v650_v37  ;;  %vm4289_vm6 = vcmp.gt.f32.partialorder %v710_v5, 1.5707964  ;;  %vm4293_vm7 = vcmp.gt.f32.partialorder %v711_v59, 1.5707964  ;;  %vm775_vm8 = vcmp.ge.f32.partialorder %v4145_v48, 0.0 }
 0x181   :  { %v1091_v0 = vadd.f32 -0.16666667, %v1059_v1  ;;  %v1154_v19 = vmul.f32 %v1122_v52, %v1090_v31  ;;  %v965_v35 = vadd.f32 -0.0001984127, %v933_v45  ;;  %v996_v46 = vmul.f32 %v964_v7, %v900_v30  ;;  %v3146_v45 = vld [vmem:[%s5410_s5] sm:$0xff]  }
 0x182   :  { %v1124_v58 = vmul.f32 %v900_v30, %v4269_v10  ;;  %v806_v60 = vsel %vm774_vm3, 3.1415927, %v3153_v36  ;;  %v807_v62 = vsel %vm775_vm8, 3.1415927, %v3153_v36  ;;  %v712_v25 = vand.u32 2147483647, %v4214_v26 }
 0x183   :  { %v1155_v55 = vmul.f32 %v1123_v8, %v1091_v0  ;;  %v1186_v6 = vadd.f32 %v1154_v19, %v4237_v56  ;;  %v997_v12 = vmul.f32 %v965_v35, %v901_v41  ;;  %v1028_v50 = vadd.f32 0.008333333, %v996_v46  ;;  %v3139_v56 = vld [vmem:[%s5410_s5 + $0x38] sm:$0xff]  }
 0x184   :  { %v838_v28 = vsub.f32 %v806_v60, %v4194_v33  ;;  %v839_v24 = vsub.f32 %v807_v62, %v4145_v48  ;;  %v713_v20 = vand.u32 2147483647, %v4229_v2  ;;  %vm4308_vm9 = vcmp.gt.f32.partialorder %v712_v25, 1.5707964  ;;  %2550 = vmatprep.subr.bf16.mxu1 %v3139_v56 }
 0x185   :  { %vm778_vm10 = vcmp.ge.f32.partialorder %v4287_v53, 0.0  ;;  %v1187_v27 = vadd.f32 %v1155_v55, %v4241_v13  ;;  %v1029_v61 = vadd.f32 0.008333333, %v997_v12  ;;  %v1060_v63 = vmul.f32 %v1028_v50, %v900_v30  ;;  %2551 = vmatpush3.bf16.msra.mxu1 %v3139_v56 }
 0x186   :  { %vm776_vm11 = vcmp.ge.f32.partialorder %v4214_v26, 0.0  ;;  %v4321_v43 = vsel %vm4289_vm6, %v838_v28, %v4194_v33  ;;  %v4326_v38 = vsel %vm4293_vm7, %v839_v24, %v4145_v48  ;;  %vm4328_vm12 = vcmp.gt.f32.partialorder %v713_v20, 1.5707964  ;;  %2552 = vmatprep.subr.bf16.mxu1 %v3140_v11 }
 0x187   :  { %v808_v9 = vsel %vm776_vm11, 3.1415927, %v3153_v36  ;;  %v1207_v21 = vpack.c.bf16 %v1187_v27, %v1186_v6  ;;  %v1061_v3 = vmul.f32 %v1029_v61, %v901_v41  ;;  %v1092_v32 = vadd.f32 -0.16666667, %v1060_v63 }
 0x188   :  { %v902_v34 = vmul.f32 %v4321_v43, %v4321_v43  ;;  %v903_v33 = vmul.f32 %v4326_v38, %v4326_v38  ;;  %v809_v48 = vsel %vm777_vm5, 3.1415927, %v3153_v36  ;;  %v840_v42 = vsub.f32 %v808_v9, %v4214_v26 }
 0x189   :  { %v714_v17 = vand.u32 2147483647, %v4287_v53  ;;  %2539 = vmatmul.mubr.bf16.gmra.mxu0 %v1207_v21  ;;  %v1093_v52 = vadd.f32 -0.16666667, %v1061_v3  ;;  %v1125_v15 = vmul.f32 %v901_v41, %v4279_v22  ;;  %v1156_v54 = vmul.f32 %v1124_v58, %v1092_v32  ;;  %v3142_v41 = vld [vmem:[%s5410_s5 + $0x20] sm:$0xff]   ;;  %2553 = vmatpush3.bf16.msra.mxu1 %v3140_v11 }
 0x18a   :  { %v934_v40 = vmul.f32 2.7557319e-06, %v902_v34  ;;  %v935_v57 = vmul.f32 2.7557319e-06, %v903_v33  ;;  %v841_v30 = vsub.f32 %v809_v48, %v4229_v2  ;;  %v4353_v29 = vsel %vm4308_vm9, %v840_v42, %v4214_v26  ;;  %2554 = vmatprep.subr.bf16.mxu1 %v3141_v16 }
 0x18b   :  { %v1157_v49 = vmul.f32 %v1125_v15, %v1093_v52  ;;  %v1188_v5 = vadd.f32 %v1156_v54, %v4269_v10  ;;  %v904_v23 = vmul.f32 %v4353_v29, %v4353_v29  ;;  %v715_v26 = vand.u32 2147483647, %v4219_v18 }
 0x18c   :  { %v966_v47 = vadd.f32 -0.0001984127, %v934_v40  ;;  %v967_v14 = vadd.f32 -0.0001984127, %v935_v57  ;;  %v4364_v4 = vsel %vm4328_vm12, %v841_v30, %v4229_v2  ;;  %vm4367_vm13 = vcmp.gt.f32.partialorder %v714_v17, 1.5707964 }
 0x18d   :  { %v1189_v10 = vadd.f32 %v1157_v49, %v4279_v22  ;;  %v905_v59 = vmul.f32 %v4364_v4, %v4364_v4  ;;  %v936_v1 = vmul.f32 2.7557319e-06, %v904_v23  ;;  %vm4374_vm14 = vcmp.gt.f32.partialorder %v715_v26, 1.5707964  ;;  %v3143_v22 = vld [vmem:[%s5410_s5 + $0x18] sm:$0xff]   ;;  %2555 = vmatpush3.bf16.msra.mxu1 %v3141_v16 }
 0x18e   :  { %v998_v8 = vmul.f32 %v966_v47, %v902_v34  ;;  %v999_v31 = vmul.f32 %v967_v14, %v903_v33  ;;  %vm779_vm15 = vcmp.ge.f32.partialorder %v4219_v18, 0.0  ;;  %v810_v19 = vsel %vm778_vm10, 3.1415927, %v3153_v36  ;;  %2556 = vmatprep.subr.bf16.mxu1 %v3142_v41 }
 0x18f   :  { %v1208_v2 = vpack.c.bf16 %v1189_v10, %v1188_v5  ;;  %v937_v39 = vmul.f32 2.7557319e-06, %v905_v59  ;;  %v968_v51 = vadd.f32 -0.0001984127, %v936_v1  ;;  %v811_v35 = vsel %vm779_vm15, 3.1415927, %v3153_v36 }
 0x190   :  { %v1030_v7 = vadd.f32 0.008333333, %v998_v8  ;;  %v1031_v0 = vadd.f32 0.008333333, %v999_v31  ;;  %v842_v62 = vsub.f32 %v810_v19, %v4287_v53  ;;  %v1126_v55 = vmul.f32 %v902_v34, %v4321_v43  ;;  %v3144_v10 = vld [vmem:[%s5410_s5 + $0x10] sm:$0xff]   ;;  %v3145_v31 = vld [vmem:[%s5410_s5 + $0x8] sm:$0xff]  }
 0x191   :  { %2542 = vmatprep.mubr.bf16.mxu0 %v1208_v2  ;;  %v969_v58 = vadd.f32 -0.0001984127, %v937_v39  ;;  %v1000_v60 = vmul.f32 %v968_v51, %v904_v23  ;;  %v843_v6 = vsub.f32 %v811_v35, %v4219_v18  ;;  %v1127_v44 = vmul.f32 %v903_v33, %v4326_v38  ;;  %2557 = vmatpush3.bf16.msra.mxu1 %v3142_v41  ;;  %v4414_v2 = vld [vmem:[%s5411_s4] ss:$0 sm:$0xff] }
 0x192   :  { %v1062_v46 = vmul.f32 %v1030_v7, %v902_v34  ;;  %v1063_v25 = vmul.f32 %v1031_v0, %v903_v33  ;;  %v874_v24 = vsel %vm4367_vm13, %v842_v62, %v4287_v53  ;;  %2558 = vmatprep.subr.bf16.mxu1 %v3143_v22  ;;  %v1128_v3 = vmul.f32 %v904_v23, %v4353_v29 }
 0x193   :  { %v1001_v50 = vmul.f32 %v969_v58, %v905_v59  ;;  %v1032_v28 = vadd.f32 0.008333333, %v1000_v60  ;;  %v875_v27 = vsel %vm4374_vm14, %v843_v6, %v4219_v18  ;;  %v906_v61 = vmul.f32 %v874_v24, %v874_v24 }
 0x194   :  { %v1094_v12 = vadd.f32 -0.16666667, %v1062_v46  ;;  %v1095_v20 = vadd.f32 -0.16666667, %v1063_v25  ;;  %v907_v9 = vmul.f32 %v875_v27, %v875_v27  ;;  %v1129_v11 = vmul.f32 %v905_v59, %v4364_v4 }
 0x195   :  { %v1033_v56 = vadd.f32 0.008333333, %v1001_v50  ;;  %v1064_v13 = vmul.f32 %v1032_v28, %v904_v23  ;;  %v938_v32 = vmul.f32 2.7557319e-06, %v906_v61  ;;  %2559 = vmatpush3.bf16.msra.mxu1 %v3143_v22  ;;  %v1130_v14 = vmul.f32 %v906_v61, %v874_v24 }
 0x196   :  { %v1158_v63 = vmul.f32 %v1126_v55, %v1094_v12  ;;  %v1159_v21 = vmul.f32 %v1127_v44, %v1095_v20  ;;  %v939_v33 = vmul.f32 2.7557319e-06, %v907_v9  ;;  %v1131_v37 = vmul.f32 %v907_v9, %v875_v27  ;;  %2560 = vmatprep.subr.bf16.mxu1 %v3144_v10 }
 0x197   :  { %v1065_v34 = vmul.f32 %v1033_v56, %v905_v59  ;;  %v1096_v48 = vadd.f32 -0.16666667, %v1064_v13  ;;  %v970_v17 = vadd.f32 -0.0001984127, %v938_v32 }
 0x198   :  { %v1190_v53 = vadd.f32 %v1158_v63, %v4321_v43  ;;  %v1191_v42 = vadd.f32 %v1159_v21, %v4326_v38  ;;  %v971_v52 = vadd.f32 -0.0001984127, %v939_v33 }
 0x199   :  { %v1097_v18 = vadd.f32 -0.16666667, %v1065_v34  ;;  %v1160_v16 = vmul.f32 %v1128_v3, %v1096_v48  ;;  %v1002_v54 = vmul.f32 %v970_v17, %v906_v61  ;;  %2561 = vmatpush3.bf16.msra.mxu1 %v3144_v10 }
 0x19a   :  { %v1209_v15 = vpack.c.bf16 %v1191_v42, %v1190_v53  ;;  %v1003_v57 = vmul.f32 %v971_v52, %v907_v9  ;;  %2562 = vmatprep.subr.bf16.mxu1 %v3145_v31 }
 0x19b   :  { %v1161_v40 = vmul.f32 %v1129_v11, %v1097_v18  ;;  %v1034_v30 = vadd.f32 0.008333333, %v1002_v54  ;;  %v1192_v43 = vadd.f32 %v1160_v16, %v4353_v29 }
 0x19c   :  { %2543 = vmatmul.mubr.bf16.gmra.mxu0 %v1209_v15  ;;  %v1035_v5 = vadd.f32 0.008333333, %v1003_v57 }
 0x19d   :  { %v1193_v49 = vadd.f32 %v1161_v40, %v4364_v4  ;;  %v1066_v47 = vmul.f32 %v1034_v30, %v906_v61  ;;  %2563 = vmatpush3.bf16.msra.mxu1 %v3145_v31 }
 0x19e   :  { %v1067_v23 = vmul.f32 %v1035_v5, %v907_v9  ;;  %2564 = vmatprep.subr.bf16.mxu1 %v3146_v45 }
 0x19f   :  { %v1210_v38 = vpack.c.bf16 %v1193_v49, %v1192_v43  ;;  %v1098_v41 = vadd.f32 -0.16666667, %v1066_v47 }
 0x1a0   :  { %v1099_v26 = vadd.f32 -0.16666667, %v1067_v23 }
 0x1a1   :  { %2546 = vmatprep.mubr.bf16.mxu0 %v1210_v38  ;;  %v1162_v8 = vmul.f32 %v1130_v14, %v1098_v41  ;;  %2565 = vmatpush3.bf16.msra.mxu1 %v3146_v45 }
 0x1a2   :  { %v1163_v59 = vmul.f32 %v1131_v37, %v1099_v26 }
 0x1a3   :  { %v1194_v1 = vadd.f32 %v1162_v8, %v874_v24 }
 0x1a4   :  { %v1195_v29 = vadd.f32 %v1163_v59, %v875_v27 }
 0x1a6   :  { %v1211_v4 = vpack.c.bf16 %v1195_v29, %v1194_v1 }
 0x1a8   :  { %2547 = vmatmul.mubr.bf16.gmra.mxu0 %v1211_v4 }
 0x1ba   :  { %v2520_v7 = vpop.f32.mrf.mxu0 }
 0x1bb   :  { %v1326_v39 = vadd.f32 %v2520_v7, %v4414_v2 }
 0x1bc   :  { %v1317_v51 = vpop.f32.mrf.mxu0 }
 0x1bd   :  { %v1446_v22 = vmul.f32 0.15915494, %v1326_v39  ;;  %v1318_v0 = vadd.f32 %v4414_v2, %v1317_v51 }
 0x1be   :  { %v2521_v19 = vpop.f32.mrf.mxu0 }
 0x1bf   :  { %v2872_v35 = vcvt.f32.s32 %v1446_v22  ;;  %v1444_v46 = vmul.f32 0.15915494, %v1318_v0  ;;  %v1329_v58 = vadd.f32 %v2521_v19, %v4414_v2  ;;  %v2870_v55 = vand.u32 2147483647, %v1446_v22 }
 0x1c0   :  { %v1320_v60 = vpop.f32.mrf.mxu0  ;;  %v2875_v28 = vand.u32 2147483648, %v1446_v22 }
 0x1c1   :  { %v2873_v62 = vcvt.s32.f32 %v2872_v35  ;;  %v2856_v25 = vcvt.f32.s32 %v1444_v46  ;;  %v1447_v6 = vmul.f32 0.15915494, %v1329_v58  ;;  %v1321_v12 = vadd.f32 %v4414_v2, %v1320_v60 }
 0x1c2   :  { %v2854_v20 = vand.u32 2147483647, %v1444_v46  ;;  %v2859_v56 = vand.u32 2147483648, %v1444_v46  ;;  %vm2871_vm0 = vcmp.lt.f32.partialorder %v2870_v55, 8388608.0 }
 0x1c3   :  { %v2874_v50 = vand.u32 2147483647, %v2873_v62  ;;  %v2857_v24 = vcvt.s32.f32 %v2856_v25  ;;  %v2880_v44 = vcvt.f32.s32 %v1447_v6  ;;  %v1445_v27 = vmul.f32 0.15915494, %v1321_v12 }
 0x1c4   :  { %v2878_v32 = vand.u32 2147483647, %v1447_v6  ;;  %vm2855_vm1 = vcmp.lt.f32.partialorder %v2854_v20, 8388608.0  ;;  %v2883_v48 = vand.u32 2147483648, %v1447_v6 }
 0x1c5   :  { %v2876_v61 = vor.u32 %v2875_v28, %v2874_v50  ;;  %v2858_v63 = vand.u32 2147483647, %v2857_v24  ;;  %v2881_v13 = vcvt.s32.f32 %v2880_v44  ;;  %v2864_v9 = vcvt.f32.s32 %v1445_v27 }
 0x1c6   :  { %v2862_v11 = vand.u32 2147483647, %v1445_v27  ;;  %vm2879_vm2 = vcmp.lt.f32.partialorder %v2878_v32, 8388608.0  ;;  %v2867_v52 = vand.u32 2147483648, %v1445_v27 }
 0x1c7   :  { %v2877_v21 = vsel %vm2871_vm0, %v2876_v61, %v1446_v22  ;;  %v2860_v3 = vor.u32 %v2859_v56, %v2858_v63  ;;  %v2882_v34 = vand.u32 2147483647, %v2881_v13  ;;  %v2865_v42 = vcvt.s32.f32 %v2864_v9 }
 0x1c8   :  { %v1510_v53 = vmul.f32 6.28125, %v2877_v21  ;;  %v1574_v5 = vmul.f32 0.0019353072, %v2877_v21  ;;  %vm2863_vm3 = vcmp.lt.f32.partialorder %v2862_v11, 8388608.0 }
 0x1c9   :  { %v2861_v33 = vsel %vm2855_vm1, %v2860_v3, %v1444_v46  ;;  %v2884_v18 = vor.u32 %v2883_v48, %v2882_v34  ;;  %v2866_v16 = vand.u32 2147483647, %v2865_v42 }
 0x1ca   :  { %v1508_v17 = vmul.f32 6.28125, %v2861_v33  ;;  %v1542_v15 = vsub.f32 %v1326_v39, %v1510_v53  ;;  %v1572_v38 = vmul.f32 0.0019353072, %v2861_v33 }
 0x1cb   :  { %v2885_v54 = vsel %vm2879_vm2, %v2884_v18, %v1447_v6  ;;  %v2868_v43 = vor.u32 %v2867_v52, %v2866_v16 }
 0x1cc   :  { %v1540_v57 = vsub.f32 %v1318_v0, %v1508_v17  ;;  %v1511_v30 = vmul.f32 6.28125, %v2885_v54  ;;  %v1575_v26 = vmul.f32 0.0019353072, %v2885_v54  ;;  %v4427_v59 = vsub.f32 %v1542_v15, %v1574_v5 }
 0x1cd   :  { %v2524_v40 = vpop.f32.mrf.mxu0  ;;  %v2869_v41 = vsel %vm2863_vm3, %v2868_v43, %v1445_v27 }
 0x1ce   :  { %v4421_v49 = vadd.f32 %v2524_v40, %v4414_v2  ;;  %v1543_v23 = vsub.f32 %v1329_v58, %v1511_v30  ;;  %v1509_v37 = vmul.f32 6.28125, %v2869_v41  ;;  %v1604_v1 = vsub.f32 %v1540_v57, %v1572_v38 }
 0x1cf   :  { %v1333_v47 = vpop.f32.mrf.mxu0  ;;  %v1573_v51 = vmul.f32 0.0019353072, %v2869_v41  ;;  %vm1702_vm4 = vcmp.ge.f32.partialorder %v4427_v59, 0.0 }
 0x1d0   :  { %v1450_v14 = vmul.f32 0.15915494, %v4421_v49  ;;  %v4425_v10 = vadd.f32 %v4414_v2, %v1333_v47  ;;  %v4429_v4 = vsub.f32 %v1543_v23, %v1575_v26  ;;  %v1541_v31 = vsub.f32 %v1321_v12, %v1509_v37 }
 0x1d1   :  { %v2525_v8 = vpop.f32.mrf.mxu0  ;;  %v1636_v12 = vand.u32 2147483647, %v1604_v1  ;;  %vm1700_vm9 = vcmp.ge.f32.partialorder %v1604_v1, 0.0  ;;  %v1734_v38 = vsel %vm1702_vm4, 3.1415927, %v3153_v36 }
 0x1d2   :  { %v2904_v29 = vcvt.f32.s32 %v1450_v14  ;;  %v1448_v45 = vmul.f32 0.15915494, %v4425_v10  ;;  %v4433_v7 = vadd.f32 %v2525_v8, %v4414_v2  ;;  %v2902_v22 = vand.u32 2147483647, %v1450_v14 }
 0x1d3   :  { %v1336_v39 = vpop.f32.mrf.mxu0  ;;  %v1605_v58 = vsub.f32 %v1541_v31, %v1573_v51  ;;  %v2907_v62 = vand.u32 2147483648, %v1450_v14  ;;  %vm1703_vm5 = vcmp.ge.f32.partialorder %v4429_v4, 0.0  ;;  %v1732_v18 = vsel %vm1700_vm9, 3.1415927, %v3153_v36 }
 0x1d4   :  { %v2905_v0 = vcvt.s32.f32 %v2904_v29  ;;  %v4436_v19 = vadd.f32 %v4414_v2, %v1336_v39  ;;  %v2886_v35 = vand.u32 2147483647, %v1448_v45  ;;  %v2888_v46 = vcvt.f32.s32 %v1448_v45 }
 0x1d5   :  { %v1451_v25 = vmul.f32 0.15915494, %v4433_v7  ;;  %vm2903_vm6 = vcmp.lt.f32.partialorder %v2902_v22, 8388608.0  ;;  %v2891_v27 = vand.u32 2147483648, %v1448_v45  ;;  %v1637_v9 = vand.u32 2147483647, %v1605_v58 }
 0x1d6   :  { %v2906_v60 = vand.u32 2147483647, %v2905_v0  ;;  %v2889_v55 = vcvt.s32.f32 %v2888_v46  ;;  %v1449_v6 = vmul.f32 0.15915494, %v4436_v19  ;;  %vm4442_vm7 = vcmp.lt.f32.partialorder %v2886_v35, 8388608.0 }
 0x1d7   :  { %v2910_v28 = vand.u32 2147483647, %v1451_v25  ;;  %v2912_v24 = vcvt.f32.s32 %v1451_v25  ;;  %v2915_v13 = vand.u32 2147483648, %v1451_v25  ;;  %vm1701_vm10 = vcmp.ge.f32.partialorder %v1605_v58, 0.0 }
 0x1d8   :  { %v2908_v50 = vor.u32 %v2907_v62, %v2906_v60  ;;  %v2890_v44 = vand.u32 2147483647, %v2889_v55  ;;  %v2896_v61 = vcvt.f32.s32 %v1449_v6  ;;  %v2894_v32 = vand.u32 2147483647, %v1449_v6 }
 0x1d9   :  { %v2913_v56 = vcvt.s32.f32 %v2912_v24  ;;  %v2899_v53 = vand.u32 2147483648, %v1449_v6  ;;  %vm4446_vm8 = vcmp.lt.f32.partialorder %v2910_v28, 8388608.0  ;;  %vm1668_vm11 = vcmp.gt.f32.partialorder %v1636_v12, 1.5707964 }
 0x1da   :  { %v2909_v63 = vsel %vm2903_vm6, %v2908_v50, %v1450_v14  ;;  %v2892_v3 = vor.u32 %v2891_v27, %v2890_v44  ;;  %v2897_v33 = vcvt.s32.f32 %v2896_v61  ;;  %vm1669_vm12 = vcmp.gt.f32.partialorder %v1637_v9, 1.5707964 }
 0x1db   :  { %v1514_v21 = vmul.f32 6.28125, %v2909_v63  ;;  %v2914_v48 = vand.u32 2147483647, %v2913_v56  ;;  %v1578_v11 = vmul.f32 0.0019353072, %v2909_v63  ;;  %v1764_v40 = vsub.f32 %v1732_v18, %v1604_v1 }
 0x1dc   :  { %v2893_v17 = vsel %vm4442_vm7, %v2892_v3, %v1448_v45  ;;  %v2898_v52 = vand.u32 2147483647, %v2897_v33  ;;  %v1733_v54 = vsel %vm1701_vm10, 3.1415927, %v3153_v36  ;;  %vm2895_vm13 = vcmp.lt.f32.partialorder %v2894_v32, 8388608.0 }
 0x1dd   :  { %v1546_v42 = vsub.f32 %v4421_v49, %v1514_v21  ;;  %v2916_v16 = vor.u32 %v2915_v13, %v2914_v48  ;;  %v1512_v15 = vmul.f32 6.28125, %v2893_v17  ;;  %v1765_v49 = vsub.f32 %v1733_v54, %v1605_v58 }
 0x1de   :  { %v2900_v43 = vor.u32 %v2899_v53, %v2898_v52  ;;  %v4459_v47 = vsel %vm1668_vm11, %v1764_v40, %v1604_v1  ;;  %v1735_v23 = vsel %vm1703_vm5, 3.1415927, %v3153_v36  ;;  %v1638_v37 = vand.u32 2147483647, %v4427_v59 }
 0x1df   :  { %v4455_v57 = vsub.f32 %v1546_v42, %v1578_v11  ;;  %v2917_v30 = vsel %vm4446_vm8, %v2916_v16, %v1451_v25  ;;  %v4467_v14 = vsel %vm1669_vm12, %v1765_v49, %v1605_v58  ;;  %v1544_v8 = vsub.f32 %v4425_v10, %v1512_v15 }
 0x1e0   :  { %v1515_v5 = vmul.f32 6.28125, %v2917_v30  ;;  %v2901_v41 = vsel %vm2895_vm13, %v2900_v43, %v1449_v6  ;;  %v1828_v1 = vmul.f32 %v4459_v47, %v4459_v47  ;;  %v1829_v29 = vmul.f32 %v4467_v14, %v4467_v14 }
 0x1e1   :  { %v1513_v26 = vmul.f32 6.28125, %v2901_v41  ;;  %vm1706_vm14 = vcmp.ge.f32.partialorder %v4455_v57, 0.0  ;;  %v1766_v31 = vsub.f32 %v1734_v38, %v4427_v59  ;;  %v1767_v45 = vsub.f32 %v1735_v23, %v4429_v4 }
 0x1e2   :  { %v1547_v39 = vsub.f32 %v4433_v7, %v1515_v5  ;;  %v1639_v51 = vand.u32 2147483647, %v4429_v4  ;;  %v1576_v22 = vmul.f32 0.0019353072, %v2893_v17  ;;  %v1860_v46 = vmul.f32 2.7557319e-06, %v1828_v1 }
 0x1e3   :  { %v1545_v0 = vsub.f32 %v4436_v19, %v1513_v26  ;;  %v1861_v10 = vmul.f32 2.7557319e-06, %v1829_v29  ;;  %v4482_v58 = vsel %vm1706_vm14, 3.1415927, %v3153_v36  ;;  %v1579_v60 = vmul.f32 0.0019353072, %v2917_v30 }
 0x1e4   :  { %v1577_v62 = vmul.f32 0.0019353072, %v2901_v41  ;;  %v4487_v55 = vsub.f32 %v1544_v8, %v1576_v22  ;;  %v1892_v7 = vadd.f32 -0.0001984127, %v1860_v46  ;;  %vm1670_vm15 = vcmp.gt.f32.partialorder %v1638_v37, 1.5707964 }
 0x1e5   :  { %v1893_v12 = vadd.f32 -0.0001984127, %v1861_v10  ;;  %v4489_v50 = vsub.f32 %v1547_v39, %v1579_v60  ;;  %vm1671_vm0 = vcmp.gt.f32.partialorder %v1639_v51, 1.5707964  ;;  %v2052_v61 = vmul.f32 %v1828_v1, %v4459_v47 }
 0x1e6   :  { %v4495_v24 = vsub.f32 %v1545_v0, %v1577_v62  ;;  %v1924_v44 = vmul.f32 %v1892_v7, %v1828_v1  ;;  %v2053_v13 = vmul.f32 %v1829_v29, %v4467_v14  ;;  %v4500_v9 = vsel %vm1670_vm15, %v1766_v31, %v4427_v59 }
 0x1e7   :  { %v2528_v35 = vpop.f32.mrf.mxu0  ;;  %v1925_v27 = vmul.f32 %v1893_v12, %v1829_v29  ;;  %v4507_v34 = vsel %vm1671_vm0, %v1767_v45, %v4429_v4  ;;  %vm1704_vm2 = vcmp.ge.f32.partialorder %v4487_v55, 0.0  ;;  %v4521_v54 = vmul.f32 %v4500_v9, %v4500_v9 }
 0x1e8   :  { %v4485_v25 = vadd.f32 %v2528_v35, %v4414_v2  ;;  %v1956_v53 = vadd.f32 0.008333333, %v1924_v44  ;;  %vm1707_vm3 = vcmp.ge.f32.partialorder %v4489_v50, 0.0  ;;  %v1831_v62 = vmul.f32 %v4507_v34, %v4507_v34 }
 0x1e9   :  { %v1349_v6 = vpop.f32.mrf.mxu0  ;;  %v1957_v17 = vadd.f32 0.008333333, %v1925_v27  ;;  %vm1705_vm6 = vcmp.ge.f32.partialorder %v4495_v24, 0.0  ;;  %v1739_v18 = vsel %vm1707_vm3, 3.1415927, %v3153_v36 }
 0x1ea   :  { %v1454_v19 = vmul.f32 0.15915494, %v4485_v25  ;;  %v4493_v28 = vadd.f32 %v4414_v2, %v1349_v6  ;;  %v1988_v15 = vmul.f32 %v1956_v53, %v1828_v1 }
 0x1eb   :  { %v2529_v20 = vpop.f32.mrf.mxu0  ;;  %v1989_v41 = vmul.f32 %v1957_v17, %v1829_v29 }
 0x1ec   :  { %v2934_v63 = vand.u32 2147483647, %v1454_v19  ;;  %v2936_v56 = vcvt.f32.s32 %v1454_v19  ;;  %v1452_v21 = vmul.f32 0.15915494, %v4493_v28  ;;  %v4504_v3 = vadd.f32 %v2529_v20, %v4414_v2 }
 0x1ed   :  { %v1352_v32 = vpop.f32.mrf.mxu0  ;;  %v2939_v33 = vand.u32 2147483648, %v1454_v19  ;;  %v2020_v51 = vadd.f32 -0.16666667, %v1988_v15  ;;  %v2021_v29 = vadd.f32 -0.16666667, %v1989_v41  ;;  %v1770_v15 = vsub.f32 %v4482_v58, %v4455_v57 }
 0x1ee   :  { %v2937_v48 = vcvt.s32.f32 %v2936_v56  ;;  %v4510_v42 = vadd.f32 %v4414_v2, %v1352_v32  ;;  %vm4512_vm1 = vcmp.lt.f32.partialorder %v2934_v63, 8388608.0  ;;  %v2918_v59 = vand.u32 2147483647, %v1452_v21 }
 0x1ef   :  { %v2920_v11 = vcvt.f32.s32 %v1452_v21  ;;  %v1455_v16 = vmul.f32 0.15915494, %v4504_v3  ;;  %v2923_v30 = vand.u32 2147483648, %v1452_v21  ;;  %v2085_v27 = vmul.f32 %v2053_v13, %v2021_v29 }
 0x1f0   :  { %v2938_v52 = vand.u32 2147483647, %v2937_v48  ;;  %v1453_v4 = vmul.f32 0.15915494, %v4510_v42  ;;  %vm4524_vm4 = vcmp.lt.f32.partialorder %v2918_v59, 8388608.0 }
 0x1f1   :  { %v2921_v40 = vcvt.s32.f32 %v2920_v11  ;;  %v2942_v43 = vand.u32 2147483647, %v1455_v16  ;;  %v2944_v49 = vcvt.f32.s32 %v1455_v16  ;;  %v2947_v8 = vand.u32 2147483648, %v1455_v16 }
 0x1f2   :  { %v2940_v5 = vor.u32 %v2939_v33, %v2938_v52  ;;  %v2928_v23 = vcvt.f32.s32 %v1453_v4  ;;  %v2926_v1 = vand.u32 2147483647, %v1453_v4  ;;  %v2931_v46 = vand.u32 2147483648, %v1453_v4 }
 0x1f3   :  { %v2922_v26 = vand.u32 2147483647, %v2921_v40  ;;  %v2945_v37 = vcvt.s32.f32 %v2944_v49  ;;  %vm4530_vm5 = vcmp.lt.f32.partialorder %v2942_v43, 8388608.0  ;;  %v1862_v63 = vmul.f32 2.7557319e-06, %v4521_v54 }
 0x1f4   :  { %v2941_v31 = vsel %vm4512_vm1, %v2940_v5, %v1454_v19  ;;  %v2929_v39 = vcvt.s32.f32 %v2928_v23  ;;  %v2084_v19 = vmul.f32 %v2052_v61, %v2020_v51  ;;  %vm2927_vm7 = vcmp.lt.f32.partialorder %v2926_v1, 8388608.0 }
 0x1f5   :  { %v1518_v22 = vmul.f32 6.28125, %v2941_v31  ;;  %v2924_v0 = vor.u32 %v2923_v30, %v2922_v26  ;;  %v2946_v35 = vand.u32 2147483647, %v2945_v37  ;;  %v1582_v10 = vmul.f32 0.0019353072, %v2941_v31 }
 0x1f6   :  { %v2930_v60 = vand.u32 2147483647, %v2929_v39  ;;  %v1863_v32 = vmul.f32 2.7557319e-06, %v1831_v62  ;;  %v1736_v61 = vsel %vm1704_vm2, 3.1415927, %v3153_v36  ;;  %v2116_v33 = vadd.f32 %v2084_v19, %v4459_v47 }
 0x1f7   :  { %v1550_v6 = vsub.f32 %v4485_v25, %v1518_v22  ;;  %v2925_v7 = vsel %vm4524_vm4, %v2924_v0, %v1452_v21  ;;  %v2948_v12 = vor.u32 %v2947_v8, %v2946_v35  ;;  %v2117_v17 = vadd.f32 %v2085_v27, %v4467_v14 }
 0x1f8   :  { %v1516_v20 = vmul.f32 6.28125, %v2925_v7  ;;  %v2932_v44 = vor.u32 %v2931_v46, %v2930_v60  ;;  %v1580_v13 = vmul.f32 0.0019353072, %v2925_v7  ;;  %v1737_v59 = vsel %vm1705_vm6, 3.1415927, %v3153_v36 }
 0x1f9   :  { %v2949_v56 = vsel %vm4530_vm5, %v2948_v12, %v1455_v16  ;;  %v4543_v53 = vsub.f32 %v1550_v6, %v1582_v10  ;;  %v1894_v11 = vadd.f32 -0.0001984127, %v1862_v63  ;;  %v2148_v52 = vpack.c.bf16 %v2117_v17, %v2116_v33 }
 0x1fa   :  { %v1548_v25 = vsub.f32 %v4493_v28, %v1516_v20  ;;  %v1519_v48 = vmul.f32 6.28125, %v2949_v56  ;;  %v2933_v21 = vsel %vm2927_vm7, %v2932_v44, %v1453_v4  ;;  %v1895_v4 = vadd.f32 -0.0001984127, %v1863_v32 }
 0x1fb   :  { %v1517_v28 = vmul.f32 6.28125, %v2933_v21  ;;  %vm1710_vm8 = vcmp.ge.f32.partialorder %v4543_v53, 0.0  ;;  %v1926_v14 = vmul.f32 %v1894_v11, %v4521_v54  ;;  %v1768_v40 = vsub.f32 %v1736_v61, %v4487_v55  ;;  %2566 = vmatprep.mubr.bf16.mxu1 %v2148_v52 }
 0x1fc   :  { %v4555_v16 = vsub.f32 %v1548_v25, %v1580_v13  ;;  %v1551_v47 = vsub.f32 %v4504_v3, %v1519_v48  ;;  %v1771_v30 = vsub.f32 %v1739_v18, %v4489_v50  ;;  %v1583_v43 = vmul.f32 0.0019353072, %v2949_v56 }
 0x1fd   :  { %v1927_v49 = vmul.f32 %v1895_v4, %v1831_v62  ;;  %v1769_v5 = vsub.f32 %v1737_v59, %v4495_v24  ;;  %v1581_v38 = vmul.f32 0.0019353072, %v2933_v21  ;;  %v1958_v23 = vadd.f32 0.008333333, %v1926_v14 }
 0x1fe   :  { %v1640_v41 = vand.u32 2147483647, %v4487_v55  ;;  %v4567_v58 = vsel %vm1710_vm8, 3.1415927, %v3153_v36  ;;  %vm1708_vm9 = vcmp.ge.f32.partialorder %v4555_v16, 0.0  ;;  %v1549_v3 = vsub.f32 %v4510_v42, %v1517_v28 }
 0x1ff   :  { %v1959_v26 = vadd.f32 0.008333333, %v1927_v49  ;;  %v4571_v37 = vsub.f32 %v1551_v47, %v1583_v43  ;;  %v1990_v8 = vmul.f32 %v1958_v23, %v4521_v54  ;;  %v2054_v1 = vmul.f32 %v4521_v54, %v4500_v9 }
 0x200   :  { %v1641_v31 = vand.u32 2147483647, %v4495_v24  ;;  %v2055_v39 = vmul.f32 %v1831_v62, %v4507_v34  ;;  %vm1672_vm10 = vcmp.gt.f32.partialorder %v1640_v41, 1.5707964  ;;  %v1642_v51 = vand.u32 2147483647, %v4455_v57 }
 0x201   :  { %v1991_v45 = vmul.f32 %v1959_v26, %v1831_v62  ;;  %v2022_v22 = vadd.f32 -0.16666667, %v1990_v8  ;;  %v4580_v42 = vsel %vm1672_vm10, %v1768_v40, %v4487_v55  ;;  %v1643_v0 = vand.u32 2147483647, %v4489_v50 }
 0x202   :  { %vm1673_vm11 = vcmp.gt.f32.partialorder %v1641_v31, 1.5707964  ;;  %v1832_v54 = vmul.f32 %v4580_v42, %v4580_v42  ;;  %vm1674_vm12 = vcmp.gt.f32.partialorder %v1642_v51, 1.5707964  ;;  %v4596_v55 = vsel %vm1708_vm9, 3.1415927, %v3153_v36 }
 0x203   :  { %v2023_v35 = vadd.f32 -0.16666667, %v1991_v45  ;;  %v4584_v46 = vsel %vm1673_vm11, %v1769_v5, %v4495_v24  ;;  %v2086_v10 = vmul.f32 %v2054_v1, %v2022_v22  ;;  %vm1675_vm13 = vcmp.gt.f32.partialorder %v1643_v0, 1.5707964 }
 0x204   :  { %v1833_v60 = vmul.f32 %v4584_v46, %v4584_v46  ;;  %v4591_v29 = vsel %vm1674_vm12, %v1770_v15, %v4455_v57  ;;  %v1864_v6 = vmul.f32 2.7557319e-06, %v1832_v54  ;;  %v4599_v7 = vsel %vm1675_vm13, %v1771_v30, %v4489_v50 }
 0x205   :  { %v2087_v24 = vmul.f32 %v2055_v39, %v2023_v35  ;;  %v4601_v12 = vsub.f32 %v1549_v3, %v1581_v38  ;;  %v2118_v20 = vadd.f32 %v2086_v10, %v4500_v9  ;;  %v4610_v56 = vmul.f32 %v4591_v29, %v4591_v29 }
 0x206   :  { %v1865_v57 = vmul.f32 2.7557319e-06, %v1833_v60  ;;  %v1896_v63 = vadd.f32 -0.0001984127, %v1864_v6  ;;  %v4614_v50 = vmul.f32 %v4599_v7, %v4599_v7  ;;  %v2056_v9 = vmul.f32 %v1832_v54, %v4580_v42 }
 0x207   :  { %v2119_v27 = vadd.f32 %v2087_v24, %v4507_v34  ;;  %v2057_v13 = vmul.f32 %v1833_v60, %v4584_v46  ;;  %v1866_v33 = vmul.f32 2.7557319e-06, %v4610_v56  ;;  %vm1711_vm14 = vcmp.ge.f32.partialorder %v4571_v37, 0.0 }
 0x208   :  { %v2532_v62 = vpop.f32.mrf.mxu0  ;;  %v1897_v48 = vadd.f32 -0.0001984127, %v1865_v57  ;;  %v1928_v34 = vmul.f32 %v1896_v63, %v1832_v54  ;;  %v1867_v11 = vmul.f32 2.7557319e-06, %v4614_v50  ;;  %vm1709_vm0 = vcmp.ge.f32.partialorder %v4601_v12, 0.0 }
 0x209   :  { %v4604_v19 = vadd.f32 %v2532_v62, %v4414_v2  ;;  %v2149_v61 = vpack.c.bf16 %v2119_v27, %v2118_v20  ;;  %v1898_v43 = vadd.f32 -0.0001984127, %v1866_v33 }
 0x20a   :  { %v1365_v44 = vpop.f32.mrf.mxu0  ;;  %v1929_v15 = vmul.f32 %v1897_v48, %v1833_v60  ;;  %v1960_v47 = vadd.f32 0.008333333, %v1928_v34 }
 0x20b   :  { %v1458_v32 = vmul.f32 0.15915494, %v4604_v19  ;;  %v4618_v25 = vadd.f32 %v4414_v2, %v1365_v44  ;;  %2567 = vmatmul.mubr.bf16.vlgmr.msra.gmra.mxu1 %v2149_v61 }
 0x20c   :  { %v2533_v21 = vpop.f32.mrf.mxu0  ;;  %v1961_v23 = vadd.f32 0.008333333, %v1929_v15  ;;  %v1992_v8 = vmul.f32 %v1960_v47, %v1832_v54 }
 0x20d   :  { %v2966_v17 = vand.u32 2147483647, %v1458_v32  ;;  %v2968_v18 = vcvt.f32.s32 %v1458_v32  ;;  %v1456_v59 = vmul.f32 0.15915494, %v4618_v25  ;;  %v2971_v28 = vand.u32 2147483648, %v1458_v32 }
 0x20e   :  { %v4626_v52 = vadd.f32 %v2533_v21, %v4414_v2  ;;  %v1368_v4 = vpop.f32.mrf.mxu0  ;;  %v1993_v0 = vmul.f32 %v1961_v23, %v1833_v60  ;;  %v2024_v35 = vadd.f32 -0.16666667, %v1992_v8 }
 0x20f   :  { %v2969_v14 = vcvt.s32.f32 %v2968_v18  ;;  %v2950_v40 = vand.u32 2147483647, %v1456_v59  ;;  %v2952_v30 = vcvt.f32.s32 %v1456_v59  ;;  %vm4629_vm15 = vcmp.lt.f32.partialorder %v2966_v17, 8388608.0 }
 0x210   :  { %v1459_v5 = vmul.f32 0.15915494, %v4626_v52  ;;  %v4635_v38 = vadd.f32 %v4414_v2, %v1368_v4  ;;  %v2955_v26 = vand.u32 2147483648, %v1456_v59  ;;  %v2025_v44 = vadd.f32 -0.16666667, %v1993_v0 }
 0x211   :  { %v2970_v41 = vand.u32 2147483647, %v2969_v14  ;;  %v2953_v3 = vcvt.s32.f32 %v2952_v30  ;;  %vm4638_vm1 = vcmp.lt.f32.partialorder %v2950_v40, 8388608.0  ;;  %v2088_v34 = vmul.f32 %v2056_v9, %v2024_v35 }
 0x212   :  { %v2974_v31 = vand.u32 2147483647, %v1459_v5  ;;  %v2976_v45 = vcvt.f32.s32 %v1459_v5  ;;  %v1457_v39 = vmul.f32 0.15915494, %v4635_v38  ;;  %v2979_v24 = vand.u32 2147483648, %v1459_v5 }
 0x213   :  { %v2972_v51 = vor.u32 %v2971_v28, %v2970_v41  ;;  %v2954_v22 = vand.u32 2147483647, %v2953_v3  ;;  %v2089_v33 = vmul.f32 %v2057_v13, %v2025_v44  ;;  %v1899_v14 = vadd.f32 -0.0001984127, %v1867_v11 }
 0x214   :  { %vm4643_vm2 = vcmp.lt.f32.partialorder %v2974_v31, 8388608.0  ;;  %v2977_v62 = vcvt.s32.f32 %v2976_v45  ;;  %v2960_v6 = vcvt.f32.s32 %v1457_v39  ;;  %v2958_v57 = vand.u32 2147483647, %v1457_v39 }
 0x215   :  { %v2973_v54 = vsel %vm4629_vm15, %v2972_v51, %v1458_v32  ;;  %v2956_v20 = vor.u32 %v2955_v26, %v2954_v22  ;;  %v2963_v21 = vand.u32 2147483648, %v1457_v39  ;;  %v2120_v32 = vadd.f32 %v2088_v34, %v4580_v42 }
 0x216   :  { %v1522_v27 = vmul.f32 6.28125, %v2973_v54  ;;  %v1586_v63 = vmul.f32 0.0019353072, %v2973_v54  ;;  %v2978_v48 = vand.u32 2147483647, %v2977_v62  ;;  %v2961_v61 = vcvt.s32.f32 %v2960_v6 }
 0x217   :  { %v2957_v60 = vsel %vm4638_vm1, %v2956_v20, %v1456_v59  ;;  %v2121_v47 = vadd.f32 %v2089_v33, %v4584_v46  ;;  %v1930_v9 = vmul.f32 %v1898_v43, %v4610_v56  ;;  %v1741_v46 = vsel %vm1709_vm0, 3.1415927, %v3153_v36 }
 0x218   :  { %v1554_v17 = vsub.f32 %v4604_v19, %v1522_v27  ;;  %v1520_v18 = vmul.f32 6.28125, %v2957_v60  ;;  %v1584_v28 = vmul.f32 0.0019353072, %v2957_v60  ;;  %v2980_v4 = vor.u32 %v2979_v24, %v2978_v48 }
 0x219   :  { %v2962_v15 = vand.u32 2147483647, %v2961_v61  ;;  %v4663_v19 = vsel %vm1711_vm14, 3.1415927, %v3153_v36  ;;  %v2150_v42 = vpack.c.bf16 %v2121_v47, %v2120_v32  ;;  %v1962_v23 = vadd.f32 0.008333333, %v1930_v9 }
 0x21a   :  { %v4654_v40 = vsub.f32 %v1554_v17, %v1586_v63  ;;  %v1552_v30 = vsub.f32 %v4618_v25, %v1520_v18  ;;  %v2981_v59 = vsel %vm4643_vm2, %v2980_v4, %v1459_v5  ;;  %v1931_v25 = vmul.f32 %v1899_v14, %v4614_v50 }
 0x21b   :  { %v1523_v13 = vmul.f32 6.28125, %v2981_v59  ;;  %v2964_v49 = vor.u32 %v2963_v21, %v2962_v15  ;;  %v1774_v43 = vsub.f32 %v4567_v58, %v4543_v53  ;;  %vm2959_vm4 = vcmp.lt.f32.partialorder %v2958_v57, 8388608.0  ;;  %2570 = vmatprep.mubr.bf16.mxu1 %v2150_v42 }
 0x21c   :  { %v4668_v11 = vsub.f32 %v1552_v30, %v1584_v28  ;;  %vm1714_vm3 = vcmp.ge.f32.partialorder %v4654_v40, 0.0  ;;  %v1644_v5 = vand.u32 2147483647, %v4555_v16  ;;  %v1772_v41 = vsub.f32 %v4596_v55, %v4555_v16 }
 0x21d   :  { %v1775_v3 = vsub.f32 %v4663_v19, %v4571_v37  ;;  %v1555_v26 = vsub.f32 %v4626_v52, %v1523_v13  ;;  %v2965_v8 = vsel %vm2959_vm4, %v2964_v49, %v1457_v39  ;;  %v1773_v1 = vsub.f32 %v1741_v46, %v4601_v12 }
 0x21e   :  { %vm1712_vm5 = vcmp.ge.f32.partialorder %v4668_v11, 0.0  ;;  %v1963_v58 = vadd.f32 0.008333333, %v1931_v25  ;;  %v1994_v31 = vmul.f32 %v1962_v23, %v4610_v56  ;;  %v4684_v45 = vsel %vm1714_vm3, 3.1415927, %v3153_v36 }
 0x21f   :  { %v1587_v51 = vmul.f32 0.0019353072, %v2981_v59  ;;  %v2058_v55 = vmul.f32 %v4610_v56, %v4591_v29  ;;  %v1645_v22 = vand.u32 2147483647, %v4601_v12  ;;  %v1521_v0 = vmul.f32 6.28125, %v2965_v8 }
 0x220   :  { %v1995_v52 = vmul.f32 %v1963_v58, %v4614_v50  ;;  %v2026_v39 = vadd.f32 -0.16666667, %v1994_v31  ;;  %vm1676_vm6 = vcmp.gt.f32.partialorder %v1644_v5, 1.5707964  ;;  %v4691_v35 = vsel %vm1712_vm5, 3.1415927, %v3153_v36 }
 0x221   :  { %v4693_v10 = vsub.f32 %v1555_v26, %v1587_v51  ;;  %vm1677_vm7 = vcmp.gt.f32.partialorder %v1645_v22, 1.5707964  ;;  %v4696_v62 = vsel %vm1676_vm6, %v1772_v41, %v4555_v16  ;;  %v2059_v56 = vmul.f32 %v4614_v50, %v4599_v7 }
 0x222   :  { %v2027_v24 = vadd.f32 -0.16666667, %v1995_v52  ;;  %v2090_v6 = vmul.f32 %v2058_v55, %v2026_v39  ;;  %v4701_v54 = vsel %vm1677_vm7, %v1773_v1, %v4601_v12  ;;  %v1778_v20 = vsub.f32 %v4684_v45, %v4654_v40 }
 0x223   :  { %v1836_v57 = vmul.f32 %v4696_v62, %v4696_v62  ;;  %v1837_v44 = vmul.f32 %v4701_v54, %v4701_v54  ;;  %v1646_v16 = vand.u32 2147483647, %v4543_v53  ;;  %v1553_v27 = vsub.f32 %v4635_v38, %v1521_v0 }
 0x224   :  { %v1585_v63 = vmul.f32 0.0019353072, %v2965_v8  ;;  %v2091_v48 = vmul.f32 %v2059_v56, %v2027_v24  ;;  %v1647_v50 = vand.u32 2147483647, %v4571_v37  ;;  %v1776_v12 = vsub.f32 %v4691_v35, %v4668_v11 }
 0x225   :  { %vm1715_vm8 = vcmp.ge.f32.partialorder %v4693_v10, 0.0  ;;  %v1868_v21 = vmul.f32 2.7557319e-06, %v1836_v57  ;;  %v1869_v60 = vmul.f32 2.7557319e-06, %v1837_v44  ;;  %v2122_v34 = vadd.f32 %v2090_v6, %v4591_v29 }
 0x226   :  { %v2123_v33 = vadd.f32 %v2091_v48, %v4599_v7  ;;  %vm1678_vm9 = vcmp.gt.f32.partialorder %v1646_v16, 1.5707964  ;;  %vm1679_vm10 = vcmp.gt.f32.partialorder %v1647_v50, 1.5707964  ;;  %v4723_v4 = vsub.f32 %v1553_v27, %v1585_v63 }
 0x227   :  { %v2536_v61 = vpop.f32.mrf.mxu0  ;;  %v1900_v17 = vadd.f32 -0.0001984127, %v1868_v21  ;;  %v1901_v18 = vadd.f32 -0.0001984127, %v1869_v60  ;;  %v4721_v28 = vsel %vm1678_vm9, %v1774_v43, %v4543_v53  ;;  %v4726_v47 = vsel %vm1679_vm10, %v1775_v3, %v4571_v37 }
 0x228   :  { %v4718_v38 = vadd.f32 %v2536_v61, %v4414_v2  ;;  %v2151_v15 = vpack.c.bf16 %v2123_v33, %v2122_v34  ;;  %v4730_v29 = vmul.f32 %v4721_v28, %v4721_v28  ;;  %v4739_v53 = vsel %vm1715_vm8, 3.1415927, %v3153_v36 }
 0x229   :  { %v1381_v32 = vpop.f32.mrf.mxu0  ;;  %v1932_v30 = vmul.f32 %v1900_v17, %v1836_v57  ;;  %v1933_v59 = vmul.f32 %v1901_v18, %v1837_v44  ;;  %v2060_v37 = vmul.f32 %v1836_v57, %v4696_v62  ;;  %v2061_v19 = vmul.f32 %v1837_v44, %v4701_v54 }
 0x22a   :  { %v1462_v7 = vmul.f32 0.15915494, %v4718_v38  ;;  %v4734_v14 = vadd.f32 %v4414_v2, %v1381_v32  ;;  %2571 = vmatmul.mubr.bf16.gmra.mxu1 %v2151_v15  ;;  %v4745_v13 = vmul.f32 %v4726_v47, %v4726_v47  ;;  %v1648_v25 = vand.u32 2147483647, %v4668_v11 }
 0x22b   :  { %v2537_v9 = vpop.f32.mrf.mxu0  ;;  %v1964_v5 = vadd.f32 0.008333333, %v1932_v30  ;;  %v1965_v41 = vadd.f32 0.008333333, %v1933_v59  ;;  %v1870_v3 = vmul.f32 2.7557319e-06, %v4730_v29 }
 0x22c   :  { %v2998_v49 = vand.u32 2147483647, %v1462_v7  ;;  %v3000_v42 = vcvt.f32.s32 %v1462_v7  ;;  %v1460_v46 = vmul.f32 0.15915494, %v4734_v14  ;;  %v4750_v23 = vadd.f32 %v2537_v9, %v4414_v2 }
 0x22d   :  { %v1384_v43 = vpop.f32.mrf.mxu0  ;;  %vm1713_vm11 = vcmp.ge.f32.partialorder %v4723_v4, 0.0  ;;  %v3003_v8 = vand.u32 2147483648, %v1462_v7  ;;  %v1871_v58 = vmul.f32 2.7557319e-06, %v4745_v13  ;;  %v1996_v22 = vmul.f32 %v1964_v5, %v1836_v57 }
 0x22e   :  { %v3001_v26 = vcvt.s32.f32 %v3000_v42  ;;  %v2984_v1 = vcvt.f32.s32 %v1460_v46  ;;  %v2982_v31 = vand.u32 2147483647, %v1460_v46  ;;  %v1463_v51 = vmul.f32 0.15915494, %v4750_v23 }
 0x22f   :  { %v4757_v55 = vadd.f32 %v4414_v2, %v1384_v43  ;;  %vm4759_vm12 = vcmp.lt.f32.partialorder %v2998_v49, 8388608.0  ;;  %v1997_v24 = vmul.f32 %v1965_v41, %v1837_v44  ;;  %v2987_v56 = vand.u32 2147483648, %v1460_v46 }
 0x230   :  { %v3002_v52 = vand.u32 2147483647, %v3001_v26  ;;  %v2985_v39 = vcvt.s32.f32 %v2984_v1  ;;  %v3006_v6 = vand.u32 2147483647, %v1463_v51  ;;  %v3008_v16 = vcvt.f32.s32 %v1463_v51 }
 0x231   :  { %v1461_v27 = vmul.f32 0.15915494, %v4757_v55  ;;  %v2028_v50 = vadd.f32 -0.16666667, %v1996_v22  ;;  %v2029_v21 = vadd.f32 -0.16666667, %v1997_v24 }
 0x232   :  { %v3004_v63 = vor.u32 %v3003_v8, %v3002_v52  ;;  %v2986_v48 = vand.u32 2147483647, %v2985_v39  ;;  %vm2983_vm13 = vcmp.lt.f32.partialorder %v2982_v31, 8388608.0  ;;  %v3009_v2 = vcvt.s32.f32 %v3008_v16 }
 0x233   :  { %v3011_v60 = vand.u32 2147483648, %v1463_v51  ;;  %v2992_v57 = vcvt.f32.s32 %v1461_v27  ;;  %vm4766_vm14 = vcmp.lt.f32.partialorder %v3006_v6, 8388608.0  ;;  %v2092_v44 = vmul.f32 %v2060_v37, %v2028_v50 }
 0x234   :  { %v3005_v61 = vsel %vm4759_vm12, %v3004_v63, %v1462_v7  ;;  %v2988_v34 = vor.u32 %v2987_v56, %v2986_v48  ;;  %v3010_v18 = vand.u32 2147483647, %v3009_v2  ;;  %v2990_v15 = vand.u32 2147483647, %v1461_v27 }
 0x235   :  { %v1526_v17 = vmul.f32 6.28125, %v3005_v61  ;;  %v2995_v32 = vand.u32 2147483648, %v1461_v27  ;;  %v1590_v30 = vmul.f32 0.0019353072, %v3005_v61  ;;  %v2993_v9 = vcvt.s32.f32 %v2992_v57 }
 0x236   :  { %v2989_v59 = vsel %vm2983_vm13, %v2988_v34, %v1460_v46  ;;  %v2093_v49 = vmul.f32 %v2061_v19, %v2029_v21  ;;  %v3012_v5 = vor.u32 %v3011_v60, %v3010_v18  ;;  %v2124_v7 = vadd.f32 %v2092_v44, %v4696_v62 }
 0x237   :  { %v1558_v42 = vsub.f32 %v4718_v38, %v1526_v17  ;;  %v1524_v43 = vmul.f32 6.28125, %v2989_v59  ;;  %v2994_v41 = vand.u32 2147483647, %v2993_v9  ;;  %v1902_v8 = vadd.f32 -0.0001984127, %v1870_v3 }
 0x238   :  { %v2125_v26 = vadd.f32 %v2093_v49, %v4701_v54  ;;  %v1903_v1 = vadd.f32 -0.0001984127, %v1871_v58  ;;  %v1745_v37 = vsel %vm1713_vm11, 3.1415927, %v3153_v36  ;;  %v3013_v38 = vsel %vm4766_vm14, %v3012_v5, %v1463_v51 }
 0x239   :  { %v4776_v31 = vsub.f32 %v1558_v42, %v1590_v30  ;;  %v1556_v46 = vsub.f32 %v4734_v14, %v1524_v43  ;;  %v1527_v19 = vmul.f32 6.28125, %v3013_v38  ;;  %v2996_v22 = vor.u32 %v2995_v32, %v2994_v41 }
 0x23a   :  { %v2152_v0 = vpack.c.bf16 %v2125_v26, %v2124_v7  ;;  %v1649_v62 = vand.u32 2147483647, %v4723_v4  ;;  %v1588_v52 = vmul.f32 0.0019353072, %v2989_v59  ;;  %vm2991_vm15 = vcmp.lt.f32.partialorder %v2990_v15, 8388608.0 }
 0x23b   :  { %v1934_v54 = vmul.f32 %v1902_v8, %v4730_v29  ;;  %v1935_v3 = vmul.f32 %v1903_v1, %v4745_v13  ;;  %v1777_v58 = vsub.f32 %v1745_v37, %v4723_v4  ;;  %v1559_v39 = vsub.f32 %v4750_v23, %v1527_v19 }
 0x23c   :  { %v2997_v24 = vsel %vm2991_vm15, %v2996_v22, %v1461_v27  ;;  %2574 = vmatprep.mubr.bf16.mxu1 %v2152_v0  ;;  %vm1680_vm0 = vcmp.gt.f32.partialorder %v1648_v25, 1.5707964  ;;  %vm1718_vm1 = vcmp.ge.f32.partialorder %v4776_v31, 0.0  ;;  %v4789_v14 = vsub.f32 %v1556_v46, %v1588_v52 }
 0x23d   :  { %v1591_v51 = vmul.f32 0.0019353072, %v3013_v38  ;;  %v1525_v56 = vmul.f32 6.28125, %v2997_v24  ;;  %v1589_v6 = vmul.f32 0.0019353072, %v2997_v24  ;;  %v2062_v48 = vmul.f32 %v4730_v29, %v4721_v28 }
 0x23e   :  { %v1966_v16 = vadd.f32 0.008333333, %v1934_v54  ;;  %v1967_v63 = vadd.f32 0.008333333, %v1935_v3  ;;  %vm1681_vm2 = vcmp.gt.f32.partialorder %v1649_v62, 1.5707964  ;;  %v4800_v25 = vsel %vm1680_vm0, %v1776_v12, %v4668_v11 }
 0x23f   :  { %v4793_v50 = vsub.f32 %v1559_v39, %v1591_v51  ;;  %v1557_v23 = vsub.f32 %v4757_v55, %v1525_v56  ;;  %v4803_v27 = vsel %vm1718_vm1, 3.1415927, %v3153_v36  ;;  %v4808_v60 = vsel %vm1681_vm2, %v1777_v58, %v4723_v4 }
 0x240   :  { %v1998_v21 = vmul.f32 %v1966_v16, %v4730_v29  ;;  %v1999_v2 = vmul.f32 %v1967_v63, %v4745_v13  ;;  %vm1716_vm3 = vcmp.ge.f32.partialorder %v4789_v14, 0.0  ;;  %v1840_v57 = vmul.f32 %v4800_v25, %v4800_v25 }
 0x241   :  { %v4811_v55 = vsub.f32 %v1557_v23, %v1589_v6  ;;  %v1841_v11 = vmul.f32 %v4808_v60, %v4808_v60  ;;  %v2063_v29 = vmul.f32 %v4745_v13, %v4726_v47  ;;  %v1650_v61 = vand.u32 2147483647, %v4654_v40 }
 0x242   :  { %v2030_v35 = vadd.f32 -0.16666667, %v1998_v21  ;;  %v2031_v12 = vadd.f32 -0.16666667, %v1999_v2  ;;  %v1779_v4 = vsub.f32 %v4739_v53, %v4693_v10  ;;  %vm1719_vm4 = vcmp.ge.f32.partialorder %v4793_v50, 0.0 }
 0x243   :  { %v1872_v34 = vmul.f32 2.7557319e-06, %v1840_v57  ;;  %v1873_v33 = vmul.f32 2.7557319e-06, %v1841_v11  ;;  %v4824_v44 = vsel %vm1716_vm3, 3.1415927, %v3153_v36  ;;  %v1782_v15 = vsub.f32 %v4803_v27, %v4776_v31 }
 0x244   :  { %vm1717_vm5 = vcmp.ge.f32.partialorder %v4811_v55, 0.0  ;;  %v2094_v17 = vmul.f32 %v2062_v48, %v2030_v35  ;;  %v2095_v18 = vmul.f32 %v2063_v29, %v2031_v12  ;;  %v1651_v30 = vand.u32 2147483647, %v4693_v10 }
 0x245   :  { %v1904_v13 = vadd.f32 -0.0001984127, %v1872_v34  ;;  %v1905_v32 = vadd.f32 -0.0001984127, %v1873_v33  ;;  %v4831_v53 = vsel %vm1719_vm4, 3.1415927, %v3153_v36  ;;  %v2064_v46 = vmul.f32 %v1840_v57, %v4800_v25 }
 0x246   :  { %v2126_v59 = vadd.f32 %v2094_v17, %v4721_v28  ;;  %v2127_v9 = vadd.f32 %v2095_v18, %v4726_v47  ;;  %vm1682_vm6 = vcmp.gt.f32.partialorder %v1650_v61, 1.5707964  ;;  %vm1683_vm7 = vcmp.gt.f32.partialorder %v1651_v30, 1.5707964  ;;  %v4854_v47 = vld [vmem:[%s5411_s4] ss:$0 sm:$0xff] }
 0x247   :  { %v1936_v49 = vmul.f32 %v1904_v13, %v1840_v57  ;;  %v1937_v42 = vmul.f32 %v1905_v32, %v1841_v11  ;;  %v4839_v43 = vsel %vm1682_vm6, %v1778_v20, %v4654_v40  ;;  %v4842_v5 = vsel %vm1717_vm5, 3.1415927, %v3153_v36 }
 0x248   :  { %v2153_v7 = vpack.c.bf16 %v2127_v9, %v2126_v59  ;;  %v4845_v26 = vsel %vm1683_vm7, %v1779_v4, %v4693_v10  ;;  %v4849_v28 = vmul.f32 %v4839_v43, %v4839_v43  ;;  %v1780_v10 = vsub.f32 %v4824_v44, %v4789_v14 }
 0x249   :  { %v2540_v41 = vpop.f32.mrf.mxu0  ;;  %v1968_v45 = vadd.f32 0.008333333, %v1936_v49  ;;  %v1969_v20 = vadd.f32 0.008333333, %v1937_v42  ;;  %v4861_v8 = vmul.f32 %v4845_v26, %v4845_v26  ;;  %v1783_v1 = vsub.f32 %v4831_v53, %v4793_v50 }
 0x24a   :  { %v4857_v40 = vadd.f32 %v4854_v47, %v2540_v41  ;;  %2575 = vmatmul.mubr.bf16.gmra.mxu1 %v2153_v7  ;;  %v1874_v38 = vmul.f32 2.7557319e-06, %v4849_v28  ;;  %v1781_v52 = vsub.f32 %v4842_v5, %v4811_v55  ;;  %v2065_v3 = vmul.f32 %v1841_v11, %v4808_v60 }
 0x24b   :  { %v1397_v37 = vpop.f32.mrf.mxu0  ;;  %v2000_v0 = vmul.f32 %v1968_v45, %v1840_v57  ;;  %v2001_v62 = vmul.f32 %v1969_v20, %v1841_v11  ;;  %v1875_v58 = vmul.f32 2.7557319e-06, %v4861_v8  ;;  %v1652_v39 = vand.u32 2147483647, %v4789_v14 }
 0x24c   :  { %v1466_v19 = vmul.f32 0.15915494, %v4857_v40  ;;  %v4871_v22 = vadd.f32 %v4854_v47, %v1397_v37  ;;  %v1653_v6 = vand.u32 2147483647, %v4811_v55  ;;  %v1906_v21 = vadd.f32 -0.0001984127, %v1874_v38 }
 0x24d   :  { %v2541_v54 = vpop.f32.mrf.mxu0  ;;  %v2032_v48 = vadd.f32 -0.16666667, %v2000_v0  ;;  %v2033_v23 = vadd.f32 -0.16666667, %v2001_v62  ;;  %v1907_v35 = vadd.f32 -0.0001984127, %v1875_v58 }
 0x24e   :  { %v3030_v24 = vand.u32 2147483647, %v1466_v19  ;;  %v3032_v51 = vcvt.f32.s32 %v1466_v19  ;;  %v1464_v56 = vmul.f32 0.15915494, %v4871_v22  ;;  %v4881_v16 = vadd.f32 %v4854_v47, %v2541_v54 }
 0x24f   :  { %v1400_v63 = vpop.f32.mrf.mxu0  ;;  %v3035_v57 = vand.u32 2147483648, %v1466_v19  ;;  %v2096_v4 = vmul.f32 %v2064_v46, %v2032_v48  ;;  %v2097_v18 = vmul.f32 %v2065_v3, %v2033_v23  ;;  %vm4894_vm9 = vcmp.gt.f32.partialorder %v1652_v39, 1.5707964 }
 0x250   :  { %v3033_v2 = vcvt.s32.f32 %v3032_v51  ;;  %v3016_v11 = vcvt.f32.s32 %v1464_v56  ;;  %v3014_v12 = vand.u32 2147483647, %v1464_v56  ;;  %v1467_v29 = vmul.f32 0.15915494, %v4881_v16 }
 0x251   :  { %v4885_v61 = vadd.f32 %v4854_v47, %v1400_v63  ;;  %vm4887_vm8 = vcmp.lt.f32.partialorder %v3030_v24, 8388608.0  ;;  %v3019_v13 = vand.u32 2147483648, %v1464_v56  ;;  %v2128_v42 = vadd.f32 %v2096_v4, %v4800_v25 }
 0x252   :  { %v3034_v33 = vand.u32 2147483647, %v3033_v2  ;;  %v3017_v17 = vcvt.s32.f32 %v3016_v11  ;;  %v3038_v32 = vand.u32 2147483647, %v1467_v29  ;;  %v3040_v30 = vcvt.f32.s32 %v1467_v29 }
 0x253   :  { %v1465_v59 = vmul.f32 0.15915494, %v4885_v61  ;;  %v2129_v7 = vadd.f32 %v2097_v18, %v4808_v60  ;;  %vm4898_vm10 = vcmp.gt.f32.partialorder %v1653_v6, 1.5707964  ;;  %vm3015_vm11 = vcmp.lt.f32.partialorder %v3014_v12, 8388608.0 }
 0x254   :  { %v3036_v9 = vor.u32 %v3035_v57, %v3034_v33  ;;  %v3018_v49 = vand.u32 2147483647, %v3017_v17  ;;  %v3041_v20 = vcvt.s32.f32 %v3040_v30  ;;  %v3043_v37 = vand.u32 2147483648, %v1467_v29 }
 0x255   :  { %v3024_v46 = vcvt.f32.s32 %v1465_v59  ;;  %vm4904_vm12 = vcmp.lt.f32.partialorder %v3038_v32, 8388608.0  ;;  %v2154_v60 = vpack.c.bf16 %v2129_v7, %v2128_v42  ;;  %v3022_v3 = vand.u32 2147483647, %v1465_v59 }
 0x256   :  { %v3037_v38 = vsel %vm4887_vm8, %v3036_v9, %v1466_v19  ;;  %v3020_v0 = vor.u32 %v3019_v13, %v3018_v49  ;;  %v3042_v54 = vand.u32 2147483647, %v3041_v20  ;;  %v3027_v58 = vand.u32 2147483648, %v1465_v59 }
 0x257   :  { %v1530_v62 = vmul.f32 6.28125, %v3037_v38  ;;  %v3025_v24 = vcvt.s32.f32 %v3024_v46  ;;  %2578 = vmatprep.mubr.bf16.mxu1 %v2154_v60  ;;  %v1938_v51 = vmul.f32 %v1906_v21, %v4849_v28  ;;  %v1939_v6 = vmul.f32 %v1907_v35, %v4861_v8 }
 0x258   :  { %v3021_v39 = vsel %vm3015_vm11, %v3020_v0, %v1464_v56  ;;  %v1594_v19 = vmul.f32 0.0019353072, %v3037_v38  ;;  %v3044_v23 = vor.u32 %v3043_v37, %v3042_v54  ;;  %v2066_v12 = vmul.f32 %v4849_v28, %v4839_v43 }
 0x259   :  { %v1562_v63 = vsub.f32 %v4857_v40, %v1530_v62  ;;  %v1528_v48 = vmul.f32 6.28125, %v3021_v39  ;;  %v3026_v2 = vand.u32 2147483647, %v3025_v24  ;;  %v1970_v57 = vadd.f32 0.008333333, %v1938_v51 }
 0x25a   :  { %v1971_v11 = vadd.f32 0.008333333, %v1939_v6  ;;  %v1592_v34 = vmul.f32 0.0019353072, %v3021_v39  ;;  %v3045_v21 = vsel %vm4904_vm12, %v3044_v23, %v1467_v29  ;;  %v2067_v17 = vmul.f32 %v4861_v8, %v4845_v26 }
 0x25b   :  { %v4913_v4 = vsub.f32 %v1562_v63, %v1594_v19  ;;  %v1560_v56 = vsub.f32 %v4871_v22, %v1528_v48  ;;  %v1531_v35 = vmul.f32 6.28125, %v3045_v21  ;;  %v3028_v33 = vor.u32 %v3027_v58, %v3026_v2 }
 0x25c   :  { %v2002_v40 = vmul.f32 %v1970_v57, %v4849_v28  ;;  %v2544_v18 = vpop.f32.mrf.mxu0  ;;  %vm3023_vm13 = vcmp.lt.f32.partialorder %v3022_v3, 8388608.0  ;;  %v2003_v32 = vmul.f32 %v1971_v11, %v4861_v8  ;;  %v1595_v9 = vmul.f32 0.0019353072, %v3045_v21 }
 0x25d   :  { %v4921_v13 = vsub.f32 %v1560_v56, %v1592_v34  ;;  %v4925_v30 = vadd.f32 %v4854_v47, %v2544_v18  ;;  %v1563_v22 = vsub.f32 %v4881_v16, %v1531_v35  ;;  %v3029_v29 = vsel %vm3023_vm13, %v3028_v33, %v1465_v59 }
 0x25e   :  { %v2034_v49 = vadd.f32 -0.16666667, %v2002_v40  ;;  %v1413_v42 = vpop.f32.mrf.mxu0  ;;  %vm1722_vm14 = vcmp.ge.f32.partialorder %v4913_v4, 0.0  ;;  %v1529_v28 = vmul.f32 6.28125, %v3029_v29  ;;  %v4935_v7 = vsel %vm4894_vm9, %v1780_v10, %v4789_v14 }
 0x25f   :  { %v4943_v8 = vsel %vm4898_vm10, %v1781_v52, %v4811_v55  ;;  %vm1720_vm15 = vcmp.ge.f32.partialorder %v4921_v13, 0.0  ;;  %v4946_v16 = vsub.f32 %v1563_v22, %v1595_v9  ;;  %v2035_v59 = vadd.f32 -0.16666667, %v2003_v32 }
 0x260   :  { %v2098_v20 = vmul.f32 %v2066_v12, %v2034_v49  ;;  %v2545_v37 = vpop.f32.mrf.mxu0  ;;  %v1561_v44 = vsub.f32 %v4885_v61, %v1529_v28  ;;  %v1593_v41 = vmul.f32 0.0019353072, %v3029_v29  ;;  %v1470_v14 = vmul.f32 0.15915494, %v4925_v30 }
 0x261   :  { %v4951_v10 = vadd.f32 %v4854_v47, %v1413_v42  ;;  %v4954_v5 = vsel %vm1722_vm14, 3.1415927, %v3153_v36  ;;  %v2099_v55 = vmul.f32 %v2067_v17, %v2035_v59  ;;  %v4957_v52 = vadd.f32 %v4854_v47, %v2545_v37 }
 0x262   :  { %v4961_v45 = vmul.f32 %v4935_v7, %v4935_v7  ;;  %v4964_v46 = vsel %vm1720_vm15, 3.1415927, %v3153_v36  ;;  %v4966_v61 = vsub.f32 %v1561_v44, %v1593_v41  ;;  %v3062_v38 = vand.u32 2147483647, %v1470_v14  ;;  %v1416_v63 = vpop.f32.mrf.mxu0 }
 0x263   :  { %v3064_v0 = vcvt.f32.s32 %v1470_v14  ;;  %vm1723_vm0 = vcmp.ge.f32.partialorder %v4946_v16, 0.0  ;;  %v2130_v25 = vadd.f32 %v2098_v20, %v4839_v43  ;;  %v2131_v60 = vadd.f32 %v2099_v55, %v4845_v26 }
 0x264   :  { %v1468_v62 = vmul.f32 0.15915494, %v4951_v10  ;;  %v1786_v54 = vsub.f32 %v4954_v5, %v4913_v4  ;;  %vm1721_vm1 = vcmp.ge.f32.partialorder %v4966_v61, 0.0  ;;  %v1471_v58 = vmul.f32 0.15915494, %v4957_v52 }
 0x265   :  { %v3065_v3 = vcvt.s32.f32 %v3064_v0  ;;  %v1784_v39 = vsub.f32 %v4964_v46, %v4921_v13  ;;  %v2155_v24 = vpack.c.bf16 %v2131_v60, %v2130_v25  ;;  %v4979_v43 = vsel %vm1723_vm0, 3.1415927, %v3153_v36 }
 0x266   :  { %v3046_v51 = vand.u32 2147483647, %v1468_v62  ;;  %v3048_v6 = vcvt.f32.s32 %v1468_v62  ;;  %vm4981_vm2 = vcmp.lt.f32.partialorder %v3062_v38, 8388608.0  ;;  %v3067_v48 = vand.u32 2147483648, %v1470_v14 }
 0x267   :  { %v3066_v19 = vand.u32 2147483647, %v3065_v3  ;;  %v4986_v23 = vsel %vm1721_vm1, 3.1415927, %v3153_v36  ;;  %2579 = vmatmul.mubr.bf16.gmra.mxu1 %v2155_v24  ;;  %v3070_v57 = vand.u32 2147483647, %v1471_v58  ;;  %v3072_v11 = vcvt.f32.s32 %v1471_v58 }
 0x268   :  { %v3049_v2 = vcvt.s32.f32 %v3048_v6  ;;  %v3051_v56 = vand.u32 2147483648, %v1468_v62  ;;  %v4989_v34 = vadd.f32 %v4854_v47, %v1416_v63  ;;  %v1845_v21 = vmul.f32 %v4943_v8, %v4943_v8  ;;  %v2548_v63 = vpop.f32.mrf.mxu0 }
 0x269   :  { %v3068_v12 = vor.u32 %v3067_v48, %v3066_v19  ;;  %vm4993_vm3 = vcmp.lt.f32.partialorder %v3046_v51, 8388608.0  ;;  %v3073_v40 = vcvt.s32.f32 %v3072_v11  ;;  %v1876_v17 = vmul.f32 2.7557319e-06, %v4961_v45 }
 0x26a   :  { %v3050_v33 = vand.u32 2147483647, %v3049_v2  ;;  %v3075_v32 = vand.u32 2147483648, %v1471_v58  ;;  %v1469_v22 = vmul.f32 0.15915494, %v4989_v34  ;;  %vm3071_vm4 = vcmp.lt.f32.partialorder %v3070_v57, 8388608.0 }
 0x26b   :  { %v3069_v18 = vsel %vm4981_vm2, %v3068_v12, %v1470_v14  ;;  %v1877_v9 = vmul.f32 2.7557319e-06, %v1845_v21  ;;  %v3074_v42 = vand.u32 2147483647, %v3073_v40  ;;  %v1908_v20 = vadd.f32 -0.0001984127, %v1876_v17  ;;  %v1429_v40 = vpop.f32.mrf.mxu0 }
 0x26c   :  { %v1534_v29 = vmul.f32 6.28125, %v3069_v18  ;;  %v3052_v49 = vor.u32 %v3051_v56, %v3050_v33  ;;  %v1598_v28 = vmul.f32 0.0019353072, %v3069_v18  ;;  %v3056_v59 = vcvt.f32.s32 %v1469_v22 }
 0x26d   :  { %v2068_v37 = vmul.f32 %v4961_v45, %v4935_v7  ;;  %v3076_v14 = vor.u32 %v3075_v32, %v3074_v42  ;;  %v1909_v55 = vadd.f32 -0.0001984127, %v1877_v9  ;;  %v3054_v0 = vand.u32 2147483647, %v1469_v22 }
 0x26e   :  { %v1566_v44 = vsub.f32 %v4925_v30, %v1534_v29  ;;  %v3053_v41 = vsel %vm4993_vm3, %v3052_v49, %v1468_v62  ;;  %v3057_v25 = vcvt.s32.f32 %v3056_v59  ;;  %v3059_v60 = vand.u32 2147483648, %v1469_v22 }
 0x26f   :  { %v1532_v38 = vmul.f32 6.28125, %v3053_v41  ;;  %v3077_v24 = vsel %vm3071_vm4, %v3076_v14, %v1471_v58  ;;  %v1940_v51 = vmul.f32 %v1908_v20, %v4961_v45  ;;  %v1941_v6 = vmul.f32 %v1909_v55, %v1845_v21 }
 0x270   :  { %v5006_v3 = vsub.f32 %v1566_v44, %v1598_v28  ;;  %v1596_v19 = vmul.f32 0.0019353072, %v3053_v41  ;;  %v1535_v30 = vmul.f32 6.28125, %v3077_v24  ;;  %v3058_v48 = vand.u32 2147483647, %v3057_v25 }
 0x271   :  { %v1564_v26 = vsub.f32 %v4951_v10, %v1532_v38  ;;  %v1599_v2 = vmul.f32 0.0019353072, %v3077_v24  ;;  %v1972_v62 = vadd.f32 0.008333333, %v1940_v51  ;;  %v1973_v57 = vadd.f32 0.008333333, %v1941_v6  ;;  %v2549_v38 = vpop.f32.mrf.mxu0 }
 0x272   :  { %v2069_v11 = vmul.f32 %v1845_v21, %v4943_v8  ;;  %vm1726_vm5 = vcmp.ge.f32.partialorder %v5006_v3, 0.0  ;;  %v1567_v58 = vsub.f32 %v4957_v52, %v1535_v30  ;;  %v3060_v56 = vor.u32 %v3059_v60, %v3058_v48 }
 0x273   :  { %v5012_v12 = vsub.f32 %v1564_v26, %v1596_v19  ;;  %vm3055_vm6 = vcmp.lt.f32.partialorder %v3054_v0, 8388608.0  ;;  %v2004_v35 = vmul.f32 %v1972_v62, %v4961_v45  ;;  %v2005_v33 = vmul.f32 %v1973_v57, %v1845_v21  ;;  %v1432_v26 = vpop.f32.mrf.mxu0 }
 0x274   :  { %v1654_v10 = vand.u32 2147483647, %v4776_v31  ;;  %v5018_v17 = vsub.f32 %v1567_v58, %v1599_v2  ;;  %v3061_v18 = vsel %vm3055_vm6, %v3060_v56, %v1469_v22  ;;  %v1655_v32 = vand.u32 2147483647, %v4793_v50 }
 0x275   :  { %vm1724_vm7 = vcmp.ge.f32.partialorder %v5012_v12, 0.0  ;;  %v5022_v9 = vsel %vm1726_vm5, 3.1415927, %v3153_v36  ;;  %v1533_v29 = vmul.f32 6.28125, %v3061_v18  ;;  %v5028_v45 = vadd.f32 %v4854_v47, %v2548_v63 }
 0x276   :  { %v5025_v52 = vsel %vm1724_vm7, 3.1415927, %v3153_v36  ;;  %vm1727_vm8 = vcmp.ge.f32.partialorder %v5018_v17, 0.0  ;;  %v2036_v21 = vadd.f32 -0.16666667, %v2004_v35  ;;  %v5032_v42 = vadd.f32 %v4854_v47, %v1429_v40 }
 0x277   :  { %v2037_v49 = vadd.f32 -0.16666667, %v2005_v33  ;;  %v1565_v22 = vsub.f32 %v4989_v34, %v1533_v29  ;;  %v1597_v28 = vmul.f32 0.0019353072, %v3061_v18  ;;  %vm1686_vm9 = vcmp.gt.f32.partialorder %v1654_v10, 1.5707964 }
 0x278   :  { %vm1687_vm10 = vcmp.gt.f32.partialorder %v1655_v32, 1.5707964  ;;  %v5036_v59 = vsel %vm1727_vm8, 3.1415927, %v3153_v36  ;;  %v2100_v20 = vmul.f32 %v2068_v37, %v2036_v21  ;;  %v5042_v41 = vsel %vm1686_vm9, %v1782_v15, %v4776_v31 }
 0x279   :  { %v2101_v44 = vmul.f32 %v2069_v11, %v2037_v49  ;;  %v5044_v14 = vsub.f32 %v1565_v22, %v1597_v28  ;;  %v5050_v34 = vsel %vm1687_vm10, %v1783_v1, %v4793_v50  ;;  %v1846_v55 = vmul.f32 %v5042_v41, %v5042_v41 }
 0x27a   :  { %v1474_v37 = vmul.f32 0.15915494, %v5028_v45  ;;  %v2132_v0 = vadd.f32 %v2100_v20, %v4935_v7  ;;  %v1847_v31 = vmul.f32 %v5050_v34, %v5050_v34  ;;  %v1472_v15 = vmul.f32 0.15915494, %v5032_v42 }
 0x27b   :  { %v2133_v27 = vadd.f32 %v2101_v44, %v4943_v8  ;;  %v1787_v53 = vsub.f32 %v4979_v43, %v4946_v16  ;;  %v1785_v50 = vsub.f32 %v4986_v23, %v4966_v61  ;;  %vm1725_vm11 = vcmp.ge.f32.partialorder %v5044_v14, 0.0 }
 0x27c   :  { %v1878_v1 = vmul.f32 2.7557319e-06, %v1846_v55  ;;  %v1790_v25 = vsub.f32 %v5022_v9, %v5006_v3  ;;  %v1788_v7 = vsub.f32 %v5025_v52, %v5012_v12  ;;  %v1879_v60 = vmul.f32 2.7557319e-06, %v1847_v31 }
 0x27d   :  { %v2156_v8 = vpack.c.bf16 %v2133_v27, %v2132_v0  ;;  %v1791_v24 = vsub.f32 %v5036_v59, %v5018_v17  ;;  %v3094_v6 = vand.u32 2147483647, %v1474_v37  ;;  %v3096_v63 = vcvt.f32.s32 %v1474_v37 }
 0x27e   :  { %v1910_v51 = vadd.f32 -0.0001984127, %v1878_v1  ;;  %v5072_v19 = vsel %vm1725_vm11, 3.1415927, %v3153_v36  ;;  %v1911_v30 = vadd.f32 -0.0001984127, %v1879_v60  ;;  %v3080_v2 = vcvt.f32.s32 %v1472_v15 }
 0x27f   :  { %2582 = vmatprep.mubr.bf16.mxu1 %v2156_v8  ;;  %v3099_v48 = vand.u32 2147483648, %v1474_v37  ;;  %v3097_v57 = vcvt.s32.f32 %v3096_v63  ;;  %v3078_v11 = vand.u32 2147483647, %v1472_v15  ;;  %v5075_v58 = vadd.f32 %v4854_v47, %v2549_v38 }
 0x280   :  { %v1942_v62 = vmul.f32 %v1910_v51, %v1846_v55  ;;  %v1943_v56 = vmul.f32 %v1911_v30, %v1847_v31  ;;  %v3081_v35 = vcvt.s32.f32 %v3080_v2  ;;  %v3083_v33 = vand.u32 2147483648, %v1472_v15 }
 0x281   :  { %v5078_v10 = vadd.f32 %v4854_v47, %v1432_v26  ;;  %v2070_v18 = vmul.f32 %v1846_v55, %v5042_v41  ;;  %v3098_v32 = vand.u32 2147483647, %v3097_v57  ;;  %v1475_v29 = vmul.f32 0.15915494, %v5075_v58 }
 0x282   :  { %v1974_v40 = vadd.f32 0.008333333, %v1942_v62  ;;  %v1975_v21 = vadd.f32 0.008333333, %v1943_v56  ;;  %v2071_v49 = vmul.f32 %v1847_v31, %v5050_v34  ;;  %v3082_v22 = vand.u32 2147483647, %v3081_v35 }
 0x283   :  { %v1473_v28 = vmul.f32 0.15915494, %v5078_v10  ;;  %v3100_v44 = vor.u32 %v3099_v48, %v3098_v32  ;;  %v3102_v38 = vand.u32 2147483647, %v1475_v29  ;;  %v3104_v0 = vcvt.f32.s32 %v1475_v29 }
 0x284   :  { %v2006_v20 = vmul.f32 %v1974_v40, %v1846_v55  ;;  %v2007_v27 = vmul.f32 %v1975_v21, %v1847_v31  ;;  %vm3095_vm12 = vcmp.lt.f32.partialorder %v3094_v6, 8388608.0  ;;  %vm3079_vm13 = vcmp.lt.f32.partialorder %v3078_v11, 8388608.0 }
 0x285   :  { %v3084_v47 = vor.u32 %v3083_v33, %v3082_v22  ;;  %v3101_v8 = vsel %vm3095_vm12, %v3100_v44, %v1474_v37  ;;  %v3105_v60 = vcvt.s32.f32 %v3104_v0  ;;  %v3107_v51 = vand.u32 2147483648, %v1475_v29 }
 0x286   :  { %v2038_v1 = vadd.f32 -0.16666667, %v2006_v20  ;;  %v2039_v63 = vadd.f32 -0.16666667, %v2007_v27  ;;  %v1538_v26 = vmul.f32 6.28125, %v3101_v8  ;;  %vm5084_vm14 = vcmp.lt.f32.partialorder %v3102_v38, 8388608.0 }
 0x287   :  { %v3085_v30 = vsel %vm3079_vm13, %v3084_v47, %v1472_v15  ;;  %v3086_v2 = vand.u32 2147483647, %v1473_v28  ;;  %v3106_v55 = vand.u32 2147483647, %v3105_v60  ;;  %v1602_v6 = vmul.f32 0.0019353072, %v3101_v8 }
 0x288   :  { %v2102_v62 = vmul.f32 %v2070_v18, %v2038_v1  ;;  %v1536_v57 = vmul.f32 6.28125, %v3085_v30  ;;  %v2103_v48 = vmul.f32 %v2071_v49, %v2039_v63  ;;  %v1570_v31 = vsub.f32 %v5028_v45, %v1538_v26 }
 0x289   :  { %v3088_v11 = vcvt.f32.s32 %v1473_v28  ;;  %v1600_v33 = vmul.f32 0.0019353072, %v3085_v30  ;;  %v3108_v40 = vor.u32 %v3107_v51, %v3106_v55  ;;  %v1656_v21 = vand.u32 2147483647, %v4921_v13 }
 0x28a   :  { %v2134_v37 = vadd.f32 %v2102_v62, %v5042_v41  ;;  %v1568_v35 = vsub.f32 %v5032_v42, %v1536_v57  ;;  %v2135_v15 = vadd.f32 %v2103_v48, %v5050_v34  ;;  %v5092_v18 = vsub.f32 %v1570_v31, %v1602_v6 }
 0x28b   :  { %v3089_v32 = vcvt.s32.f32 %v3088_v11  ;;  %v1789_v49 = vsub.f32 %v5072_v19, %v5044_v14  ;;  %v3109_v45 = vsel %vm5084_vm14, %v3108_v40, %v1475_v29  ;;  %v1657_v41 = vand.u32 2147483647, %v4966_v61 }
 0x28c   :  { %v5097_v22 = vsub.f32 %v1568_v35, %v1600_v33  ;;  %v2157_v42 = vpack.c.bf16 %v2135_v15, %v2134_v37  ;;  %vm1730_vm15 = vcmp.ge.f32.partialorder %v5092_v18, 0.0  ;;  %v1539_v20 = vmul.f32 6.28125, %v3109_v45 }
 0x28d   :  { %vm5103_vm0 = vcmp.lt.f32.partialorder %v3086_v2, 8388608.0  ;;  %v3090_v44 = vand.u32 2147483647, %v3089_v32  ;;  %v3091_v38 = vand.u32 2147483648, %v1473_v28  ;;  %v1658_v0 = vand.u32 2147483647, %v4913_v4 }
 0x28e   :  { %vm1728_vm1 = vcmp.ge.f32.partialorder %v5097_v22, 0.0  ;;  %2583 = vmatmul.mubr.bf16.gmra.mxu1 %v2157_v42  ;;  %v5110_v27 = vsel %vm1730_vm15, 3.1415927, %v3153_v36  ;;  %v1571_v29 = vsub.f32 %v5075_v58, %v1539_v20  ;;  %v1603_v47 = vmul.f32 0.0019353072, %v3109_v45 }
 0x28f   :  { %vm1688_vm2 = vcmp.gt.f32.partialorder %v1656_v21, 1.5707964  ;;  %v5114_v1 = vsel %vm1728_vm1, 3.1415927, %v3153_v36  ;;  %v3092_v8 = vor.u32 %v3091_v38, %v3090_v44  ;;  %vm1689_vm3 = vcmp.gt.f32.partialorder %v1657_v41, 1.5707964 }
 0x290   :  { %v5120_v60 = vsel %vm1688_vm2, %v1784_v39, %v4921_v13  ;;  %v5122_v51 = vsub.f32 %v1571_v29, %v1603_v47  ;;  %v5128_v58 = vsel %vm1689_vm3, %v1785_v50, %v4966_v61  ;;  %v1659_v26 = vand.u32 2147483647, %v4946_v16 }
 0x291   :  { %v1848_v63 = vmul.f32 %v5120_v60, %v5120_v60  ;;  %v1794_v30 = vsub.f32 %v5110_v27, %v5092_v18  ;;  %v3093_v13 = vsel %vm5103_vm0, %v3092_v8, %v1473_v28  ;;  %v1849_v46 = vmul.f32 %v5128_v58, %v5128_v58 }
 0x292   :  { %vm1690_vm4 = vcmp.gt.f32.partialorder %v1658_v0, 1.5707964  ;;  %vm1731_vm5 = vcmp.ge.f32.partialorder %v5122_v51, 0.0  ;;  %v1537_v39 = vmul.f32 6.28125, %v3093_v13  ;;  %v1660_v23 = vand.u32 2147483647, %v5012_v12 }
 0x293   :  { %v1880_v61 = vmul.f32 2.7557319e-06, %v1848_v63  ;;  %v1792_v50 = vsub.f32 %v5114_v1, %v5097_v22  ;;  %v5144_v2 = vsel %vm1731_vm5, 3.1415927, %v3153_v36  ;;  %v1601_v62 = vmul.f32 0.0019353072, %v3093_v13 }
 0x294   :  { %v1881_v57 = vmul.f32 2.7557319e-06, %v1849_v46  ;;  %v1569_v28 = vsub.f32 %v5078_v10, %v1537_v39  ;;  %v2072_v55 = vmul.f32 %v1848_v63, %v5120_v60  ;;  %vm1691_vm6 = vcmp.gt.f32.partialorder %v1659_v26, 1.5707964 }
 0x295   :  { %v1912_v56 = vadd.f32 -0.0001984127, %v1880_v61  ;;  %v5152_v31 = vsel %vm1690_vm4, %v1786_v54, %v4913_v4  ;;  %v5158_v6 = vsel %vm1691_vm6, %v1787_v53, %v4946_v16  ;;  %v1661_v11 = vand.u32 2147483647, %v5044_v14 }
 0x296   :  { %v1913_v48 = vadd.f32 -0.0001984127, %v1881_v57  ;;  %v5161_v10 = vsub.f32 %v1569_v28, %v1601_v62  ;;  %v1850_v35 = vmul.f32 %v5152_v31, %v5152_v31  ;;  %v1851_v33 = vmul.f32 %v5158_v6, %v5158_v6 }
 0x297   :  { %v1944_v37 = vmul.f32 %v1912_v56, %v1848_v63  ;;  %v2073_v4 = vmul.f32 %v1849_v46, %v5128_v58  ;;  %vm1692_vm7 = vcmp.gt.f32.partialorder %v1660_v23, 1.5707964  ;;  %vm1693_vm8 = vcmp.gt.f32.partialorder %v1661_v11, 1.5707964 }
 0x298   :  { %v1945_v5 = vmul.f32 %v1913_v48, %v1849_v46  ;;  %v1795_v16 = vsub.f32 %v5144_v2, %v5122_v51  ;;  %vm1729_vm9 = vcmp.ge.f32.partialorder %v5161_v10, 0.0  ;;  %v1882_v43 = vmul.f32 2.7557319e-06, %v1850_v35 }
 0x299   :  { %v1976_v54 = vadd.f32 0.008333333, %v1944_v37  ;;  %v1883_v40 = vmul.f32 2.7557319e-06, %v1851_v33  ;;  %v2074_v15 = vmul.f32 %v1850_v35, %v5152_v31  ;;  %v1662_v32 = vand.u32 2147483647, %v5006_v3 }
 0x29a   :  { %v1977_v53 = vadd.f32 0.008333333, %v1945_v5  ;;  %v5174_v21 = vsel %vm1729_vm9, 3.1415927, %v3153_v36  ;;  %v1914_v41 = vadd.f32 -0.0001984127, %v1882_v43  ;;  %v5180_v42 = vsel %vm1692_vm7, %v1788_v7, %v5012_v12 }
 0x29b   :  { %v2008_v45 = vmul.f32 %v1976_v54, %v1848_v63  ;;  %v1915_v34 = vadd.f32 -0.0001984127, %v1883_v40  ;;  %v5186_v44 = vsel %vm1693_vm8, %v1789_v49, %v5044_v14  ;;  %v1852_v36 = vmul.f32 %v5180_v42, %v5180_v42 }
 0x29c   :  { %v2009_v20 = vmul.f32 %v1977_v53, %v1849_v46  ;;  %v1946_v0 = vmul.f32 %v1914_v41, %v1850_v35  ;;  %v1853_v29 = vmul.f32 %v5186_v44, %v5186_v44  ;;  %v1663_v52 = vand.u32 2147483647, %v5018_v17 }
 0x29d   :  { %v2040_v38 = vadd.f32 -0.16666667, %v2008_v45  ;;  %v1947_v7 = vmul.f32 %v1915_v34, %v1851_v33  ;;  %v2075_v47 = vmul.f32 %v1851_v33, %v5158_v6  ;;  %v1884_v8 = vmul.f32 2.7557319e-06, %v1852_v36 }
 0x29e   :  { %v2041_v12 = vadd.f32 -0.16666667, %v2009_v20  ;;  %v1793_v19 = vsub.f32 %v5174_v21, %v5161_v10  ;;  %v1978_v49 = vadd.f32 0.008333333, %v1946_v0  ;;  %v1885_v63 = vmul.f32 2.7557319e-06, %v1853_v29 }
 0x29f   :  { %v2104_v14 = vmul.f32 %v2072_v55, %v2040_v38  ;;  %v1979_v13 = vadd.f32 0.008333333, %v1947_v7  ;;  %v1916_v46 = vadd.f32 -0.0001984127, %v1884_v8  ;;  %vm1694_vm10 = vcmp.gt.f32.partialorder %v1662_v32, 1.5707964 }
 0x2a0   :  { %v2105_v26 = vmul.f32 %v2073_v4, %v2041_v12  ;;  %v2010_v61 = vmul.f32 %v1978_v49, %v1850_v35  ;;  %v1917_v23 = vadd.f32 -0.0001984127, %v1885_v63  ;;  %vm1695_vm11 = vcmp.gt.f32.partialorder %v1663_v52, 1.5707964 }
 0x2a1   :  { %v2136_v39 = vadd.f32 %v2104_v14, %v5120_v60  ;;  %v2011_v57 = vmul.f32 %v1979_v13, %v1851_v33  ;;  %v1948_v28 = vmul.f32 %v1916_v46, %v1852_v36  ;;  %v5202_v56 = vsel %vm1694_vm10, %v1790_v25, %v5006_v3 }
 0x2a2   :  { %v2137_v62 = vadd.f32 %v2105_v26, %v5128_v58  ;;  %v2042_v55 = vadd.f32 -0.16666667, %v2010_v61  ;;  %v1949_v48 = vmul.f32 %v1917_v23, %v1853_v29  ;;  %v5208_v60 = vsel %vm1695_vm11, %v1791_v24, %v5018_v17 }
 0x2a3   :  { %v1854_v11 = vmul.f32 %v5202_v56, %v5202_v56  ;;  %v2043_v37 = vadd.f32 -0.16666667, %v2011_v57  ;;  %v1980_v35 = vadd.f32 0.008333333, %v1948_v28  ;;  %v1855_v33 = vmul.f32 %v5208_v60, %v5208_v60 }
 0x2a4   :  { %v2158_v58 = vpack.c.bf16 %v2137_v62, %v2136_v39  ;;  %v2106_v9 = vmul.f32 %v2074_v15, %v2042_v55  ;;  %v1981_v3 = vadd.f32 0.008333333, %v1949_v48  ;;  %v2076_v25 = vmul.f32 %v1852_v36, %v5180_v42 }
 0x2a5   :  { %v1886_v5 = vmul.f32 2.7557319e-06, %v1854_v11  ;;  %v2107_v4 = vmul.f32 %v2075_v47, %v2043_v37  ;;  %v2012_v54 = vmul.f32 %v1980_v35, %v1852_v36  ;;  %v2077_v17 = vmul.f32 %v1853_v29, %v5186_v44 }
 0x2a6   :  { %2586 = vmatprep.mubr.bf16.mxu1 %v2158_v58  ;;  %v1887_v59 = vmul.f32 2.7557319e-06, %v1855_v33  ;;  %v2138_v24 = vadd.f32 %v2106_v9, %v5152_v31  ;;  %v2013_v43 = vmul.f32 %v1981_v3, %v1853_v29  ;;  %v1664_v40 = vand.u32 2147483647, %v5097_v22 }
 0x2a7   :  { %v1918_v53 = vadd.f32 -0.0001984127, %v1886_v5  ;;  %v2139_v32 = vadd.f32 %v2107_v4, %v5158_v6  ;;  %v2044_v21 = vadd.f32 -0.16666667, %v2012_v54  ;;  %v1665_v45 = vand.u32 2147483647, %v5161_v10 }
 0x2a8   :  { %v1919_v15 = vadd.f32 -0.0001984127, %v1887_v59  ;;  %v2045_v41 = vadd.f32 -0.16666667, %v2013_v43  ;;  %vm1696_vm12 = vcmp.gt.f32.partialorder %v1664_v40, 1.5707964  ;;  %v2078_v13 = vmul.f32 %v1854_v11, %v5202_v56 }
 0x2a9   :  { %v1950_v20 = vmul.f32 %v1918_v53, %v1854_v11  ;;  %v1666_v34 = vand.u32 2147483647, %v5092_v18  ;;  %v2159_v36 = vpack.c.bf16 %v2139_v32, %v2138_v24  ;;  %v2108_v38 = vmul.f32 %v2076_v25, %v2044_v21 }
 0x2aa   :  { %v1951_v0 = vmul.f32 %v1919_v15, %v1855_v33  ;;  %vm1697_vm13 = vcmp.gt.f32.partialorder %v1665_v45, 1.5707964  ;;  %v2109_v31 = vmul.f32 %v2077_v17, %v2045_v41  ;;  %v1824_v6 = vsel %vm1696_vm12, %v1792_v50, %v5097_v22 }
 0x2ab   :  { %v1982_v29 = vadd.f32 0.008333333, %v1950_v20  ;;  %v1825_v52 = vsel %vm1697_vm13, %v1793_v19, %v5161_v10  ;;  %2587 = vmatmul.mubr.bf16.gmra.mxu1 %v2159_v36  ;;  %v2140_v12 = vadd.f32 %v2108_v38, %v5180_v42  ;;  %v1856_v47 = vmul.f32 %v1824_v6, %v1824_v6 }
 0x2ac   :  { %v1983_v7 = vadd.f32 0.008333333, %v1951_v0  ;;  %v1857_v8 = vmul.f32 %v1825_v52, %v1825_v52  ;;  %v2141_v14 = vadd.f32 %v2109_v31, %v5186_v44  ;;  %v1667_v63 = vand.u32 2147483647, %v5122_v51  ;;  %v5244_v31 = vld [vmem:[%s5412_s6] ss:$0 sm:$0xff] }
 0x2ad   :  { %v2014_v49 = vmul.f32 %v1982_v29, %v1854_v11  ;;  %vm1698_vm14 = vcmp.gt.f32.partialorder %v1666_v34, 1.5707964  ;;  %v1888_v46 = vmul.f32 2.7557319e-06, %v1856_v47  ;;  %v2079_v10 = vmul.f32 %v1855_v33, %v5208_v60 }
 0x2ae   :  { %v2015_v26 = vmul.f32 %v1983_v7, %v1855_v33  ;;  %v1889_v1 = vmul.f32 2.7557319e-06, %v1857_v8  ;;  %v2160_v22 = vpack.c.bf16 %v2141_v14, %v2140_v12  ;;  %vm1699_vm15 = vcmp.gt.f32.partialorder %v1667_v63, 1.5707964 }
 0x2af   :  { %v2046_v50 = vadd.f32 -0.16666667, %v2014_v49  ;;  %v1920_v19 = vadd.f32 -0.0001984127, %v1888_v46  ;;  %v1826_v44 = vsel %vm1698_vm14, %v1794_v30, %v5092_v18  ;;  %v1827_v23 = vsel %vm1699_vm15, %v1795_v16, %v5122_v51 }
 0x2b0   :  { %v2047_v42 = vadd.f32 -0.16666667, %v2015_v26  ;;  %v1921_v39 = vadd.f32 -0.0001984127, %v1889_v1  ;;  %2590 = vmatprep.mubr.bf16.mxu1 %v2160_v22  ;;  %v1858_v62 = vmul.f32 %v1826_v44, %v1826_v44  ;;  %v1859_v48 = vmul.f32 %v1827_v23, %v1827_v23 }
 0x2b1   :  { %v2110_v61 = vmul.f32 %v2078_v13, %v2046_v50  ;;  %v1952_v28 = vmul.f32 %v1920_v19, %v1856_v47  ;;  %v2080_v2 = vmul.f32 %v1856_v47, %v1824_v6  ;;  %v2081_v4 = vmul.f32 %v1857_v8, %v1825_v52 }
 0x2b2   :  { %v2111_v57 = vmul.f32 %v2079_v10, %v2047_v42  ;;  %v1953_v55 = vmul.f32 %v1921_v39, %v1857_v8  ;;  %v1890_v58 = vmul.f32 2.7557319e-06, %v1858_v62  ;;  %v1891_v18 = vmul.f32 2.7557319e-06, %v1859_v48 }
 0x2b3   :  { %v2142_v11 = vadd.f32 %v2110_v61, %v5202_v56  ;;  %v1984_v35 = vadd.f32 0.008333333, %v1952_v28  ;;  %v2082_v21 = vmul.f32 %v1858_v62, %v1826_v44  ;;  %v2083_v41 = vmul.f32 %v1859_v48, %v1827_v23 }
 0x2b4   :  { %v2143_v37 = vadd.f32 %v2111_v57, %v5208_v60  ;;  %v1985_v27 = vadd.f32 0.008333333, %v1953_v55  ;;  %v1922_v30 = vadd.f32 -0.0001984127, %v1890_v58  ;;  %v1923_v25 = vadd.f32 -0.0001984127, %v1891_v18 }
 0x2b5   :  { %v2016_v9 = vmul.f32 %v1984_v35, %v1856_v47  ;;  %vm2396_vm0 = vcmask 23552  }
 0x2b6   :  { %v2161_v33 = vpack.c.bf16 %v2143_v37, %v2142_v11  ;;  %v2017_v3 = vmul.f32 %v1985_v27, %v1857_v8  ;;  %v1954_v51 = vmul.f32 %v1922_v30, %v1858_v62  ;;  %v1955_v54 = vmul.f32 %v1923_v25, %v1859_v48 }
 0x2b7   :  { %v2048_v16 = vadd.f32 -0.16666667, %v2016_v9 }
 0x2b8   :  { %2591 = vmatmul.mubr.bf16.gmra.mxu1 %v2161_v33  ;;  %v2049_v5 = vadd.f32 -0.16666667, %v2017_v3  ;;  %v1986_v17 = vadd.f32 0.008333333, %v1954_v51  ;;  %v1987_v24 = vadd.f32 0.008333333, %v1955_v54 }
 0x2b9   :  { %v2112_v56 = vmul.f32 %v2080_v2, %v2048_v16 }
 0x2ba   :  { %v2113_v59 = vmul.f32 %v2081_v4, %v2049_v5  ;;  %v2018_v60 = vmul.f32 %v1986_v17, %v1858_v62  ;;  %v2019_v40 = vmul.f32 %v1987_v24, %v1859_v48 }
 0x2bb   :  { %v2144_v43 = vadd.f32 %v2112_v56, %v1824_v6 }
 0x2bc   :  { %v2145_v53 = vadd.f32 %v2113_v59, %v1825_v52  ;;  %v2050_v32 = vadd.f32 -0.16666667, %v2018_v60  ;;  %v2051_v45 = vadd.f32 -0.16666667, %v2019_v40 }
 0x2be   :  { %v2162_v15 = vpack.c.bf16 %v2145_v53, %v2144_v43  ;;  %v2114_v20 = vmul.f32 %v2082_v21, %v2050_v32  ;;  %v2115_v34 = vmul.f32 %v2083_v41, %v2051_v45 }
 0x2c0   :  { %2594 = vmatprep.mubr.bf16.mxu1 %v2162_v15  ;;  %v2146_v36 = vadd.f32 %v2114_v20, %v1826_v44  ;;  %v2147_v38 = vadd.f32 %v2115_v34, %v1827_v23 }
 0x2c2   :  { %v2163_v0 = vpack.c.bf16 %v2147_v38, %v2146_v36 }
 0x2c4   :  { %2595 = vmatmul.mubr.bf16.gmra.mxu1 %v2163_v0 }
 0x2cb   :  { %v2568_v29 = vpop.f32.mrf.mxu1 }
 0x2cc   :  { %v2278_v6 = vadd.f32 %v2568_v29, %v5244_v31 }
 0x2cd   :  { %v2269_v52 = vpop.f32.mrf.mxu1 }
 0x2ce   :  { %2399 = vst.msk [vmem:[%s5413_s7 + $0x10] sm:$0xff] %vm2396_vm0, %v2278_v6  ;;  %v2270_v12 = vadd.f32 %v5244_v31, %v2269_v52 }
 0x2cf   :  { %v2569_v7 = vpop.f32.mrf.mxu1 }
 0x2d0   :  { %2397 = vst.msk [vmem:[%s5413_s7] sm:$0xff] %vm2396_vm0, %v2270_v12  ;;  %v2281_v47 = vadd.f32 %v2569_v7, %v5244_v31 }
 0x2d1   :  { %v2272_v8 = vpop.f32.mrf.mxu1 }
 0x2d2   :  { %2400 = vst.msk [vmem:[%s5413_s7 + $0x18] sm:$0xff] %vm2396_vm0, %v2281_v47  ;;  %v2273_v14 = vadd.f32 %v5244_v31, %v2272_v8 }
 0x2d4   :  { %2398 = vst.msk [vmem:[%s5413_s7 + $0x8] sm:$0xff] %vm2396_vm0, %v2273_v14 }
 0x2ea   :  { %v2572_v49 = vpop.f32.mrf.mxu1 }
 0x2eb   :  { %v2294_v63 = vadd.f32 %v2572_v49, %v5244_v31 }
 0x2ec   :  { %v2285_v26 = vpop.f32.mrf.mxu1 }
 0x2ed   :  { %2403 = vst.msk [vmem:[%s5413_s7 + $0x30] sm:$0xff] %vm2396_vm0, %v2294_v63  ;;  %v2286_v13 = vadd.f32 %v5244_v31, %v2285_v26 }
 0x2ee   :  { %v2573_v46 = vpop.f32.mrf.mxu1 }
 0x2ef   :  { %2401 = vst.msk [vmem:[%s5413_s7 + $0x20] sm:$0xff] %vm2396_vm0, %v2286_v13  ;;  %v2297_v1 = vadd.f32 %v2573_v46, %v5244_v31 }
 0x2f0   :  { %v2288_v22 = vpop.f32.mrf.mxu1 }
 0x2f1   :  { %2404 = vst.msk [vmem:[%s5413_s7 + $0x38] sm:$0xff] %vm2396_vm0, %v2297_v1  ;;  %v2289_v50 = vadd.f32 %v5244_v31, %v2288_v22 }
 0x2f3   :  { %2402 = vst.msk [vmem:[%s5413_s7 + $0x28] sm:$0xff] %vm2396_vm0, %v2289_v50 }
 0x30a   :  { %v2576_v10 = vpop.f32.mrf.mxu1 }
 0x30b   :  { %v2310_v42 = vadd.f32 %v2576_v10, %v5244_v31 }
 0x30c   :  { %v2301_v19 = vpop.f32.mrf.mxu1 }
 0x30d   :  { %2407 = vst.msk [vmem:[%s5413_s7 + $0x50] sm:$0xff] %vm2396_vm0, %v2310_v42  ;;  %v2302_v39 = vadd.f32 %v5244_v31, %v2301_v19 }
 0x30e   :  { %v2577_v44 = vpop.f32.mrf.mxu1 }
 0x30f   :  { %2405 = vst.msk [vmem:[%s5413_s7 + $0x40] sm:$0xff] %vm2396_vm0, %v2302_v39  ;;  %v2313_v61 = vadd.f32 %v2577_v44, %v5244_v31 }
 0x310   :  { %v2304_v23 = vpop.f32.mrf.mxu1 }
 0x311   :  { %2408 = vst.msk [vmem:[%s5413_s7 + $0x58] sm:$0xff] %vm2396_vm0, %v2313_v61  ;;  %v2305_v62 = vadd.f32 %v5244_v31, %v2304_v23 }
 0x313   :  { %2406 = vst.msk [vmem:[%s5413_s7 + $0x48] sm:$0xff] %vm2396_vm0, %v2305_v62 }
 0x327   :  { %v2580_v57 = vpop.f32.mrf.mxu1 }
 0x328   :  { %v2326_v28 = vadd.f32 %v2580_v57, %v5244_v31 }
 0x329   :  { %v2317_v55 = vpop.f32.mrf.mxu1 }
 0x32a   :  { %2411 = vst.msk [vmem:[%s5413_s7 + $0x70] sm:$0xff] %vm2396_vm0, %v2326_v28  ;;  %v2318_v48 = vadd.f32 %v5244_v31, %v2317_v55 }
 0x32b   :  { %v2581_v11 = vpop.f32.mrf.mxu1 }
 0x32c   :  { %2409 = vst.msk [vmem:[%s5413_s7 + $0x60] sm:$0xff] %vm2396_vm0, %v2318_v48  ;;  %v2329_v58 = vadd.f32 %v2581_v11, %v5244_v31 }
 0x32d   :  { %v2320_v37 = vpop.f32.mrf.mxu1 }
 0x32e   :  { %2412 = vst.msk [vmem:[%s5413_s7 + $0x78] sm:$0xff] %vm2396_vm0, %v2329_v58  ;;  %v2321_v35 = vadd.f32 %v5244_v31, %v2320_v37 }
 0x330   :  { %2410 = vst.msk [vmem:[%s5413_s7 + $0x68] sm:$0xff] %vm2396_vm0, %v2321_v35 }
 0x34e   :  { %v2584_v27 = vpop.f32.mrf.mxu1 }
 0x34f   :  { %v2342_v18 = vadd.f32 %v2584_v27, %v5244_v31 }
 0x350   :  { %v2333_v30 = vpop.f32.mrf.mxu1 }
 0x351   :  { %2415 = vst.msk [vmem:[%s5413_s7 + $0x90] sm:$0xff] %vm2396_vm0, %v2342_v18  ;;  %v2334_v33 = vadd.f32 %v5244_v31, %v2333_v30 }
 0x352   :  { %v2585_v9 = vpop.f32.mrf.mxu1 }
 0x353   :  { %2413 = vst.msk [vmem:[%s5413_s7 + $0x80] sm:$0xff] %vm2396_vm0, %v2334_v33  ;;  %v2345_v3 = vadd.f32 %v2585_v9, %v5244_v31 }
 0x354   :  { %v2336_v25 = vpop.f32.mrf.mxu1 }
 0x355   :  { %2416 = vst.msk [vmem:[%s5413_s7 + $0x98] sm:$0xff] %vm2396_vm0, %v2345_v3  ;;  %v2337_v2 = vadd.f32 %v5244_v31, %v2336_v25 }
 0x357   :  { %2414 = vst.msk [vmem:[%s5413_s7 + $0x88] sm:$0xff] %vm2396_vm0, %v2337_v2 }
 0x36b   :  { %v2588_v51 = vpop.f32.mrf.mxu1 }
 0x36c   :  { %v2358_v16 = vadd.f32 %v2588_v51, %v5244_v31 }
 0x36d   :  { %v2349_v5 = vpop.f32.mrf.mxu1 }
 0x36e   :  { %2419 = vst.msk [vmem:[%s5413_s7 + $0xb0] sm:$0xff] %vm2396_vm0, %v2358_v16  ;;  %v2350_v4 = vadd.f32 %v5244_v31, %v2349_v5 }
 0x36f   :  { %v2589_v54 = vpop.f32.mrf.mxu1 }
 0x370   :  { %2417 = vst.msk [vmem:[%s5413_s7 + $0xa0] sm:$0xff] %vm2396_vm0, %v2350_v4  ;;  %v2361_v17 = vadd.f32 %v2589_v54, %v5244_v31 }
 0x371   :  { %v2352_v56 = vpop.f32.mrf.mxu1 }
 0x372   :  { %2420 = vst.msk [vmem:[%s5413_s7 + $0xb8] sm:$0xff] %vm2396_vm0, %v2361_v17  ;;  %v2353_v59 = vadd.f32 %v5244_v31, %v2352_v56 }
 0x374   :  { %2418 = vst.msk [vmem:[%s5413_s7 + $0xa8] sm:$0xff] %vm2396_vm0, %v2353_v59 }
 0x378   :  { %v2592_v24 = vpop.f32.mrf.mxu1 }
 0x379   :  { %v2374_v60 = vadd.f32 %v2592_v24, %v5244_v31 }
 0x37a   :  { %v2365_v43 = vpop.f32.mrf.mxu1 }
 0x37b   :  { %2423 = vst.msk [vmem:[%s5413_s7 + $0xd0] sm:$0xff] %vm2396_vm0, %v2374_v60  ;;  %v2366_v53 = vadd.f32 %v5244_v31, %v2365_v43 }
 0x37c   :  { %v2593_v40 = vpop.f32.mrf.mxu1 }
 0x37d   :  { %2421 = vst.msk [vmem:[%s5413_s7 + $0xc0] sm:$0xff] %vm2396_vm0, %v2366_v53  ;;  %v2377_v32 = vadd.f32 %v2593_v40, %v5244_v31 }
 0x37e   :  { %v2368_v21 = vpop.f32.mrf.mxu1 }
 0x37f   :  { %2424 = vst.msk [vmem:[%s5413_s7 + $0xd8] sm:$0xff] %vm2396_vm0, %v2377_v32  ;;  %v2369_v15 = vadd.f32 %v5244_v31, %v2368_v21 }
 0x381   :  { %2422 = vst.msk [vmem:[%s5413_s7 + $0xc8] sm:$0xff] %vm2396_vm0, %v2369_v15 }
 0x384   :  { %v2596_v45 = vpop.f32.mrf.mxu1 }
 0x385   :  { %v2390_v41 = vadd.f32 %v2596_v45, %v5244_v31 }
 0x386   :  { %v2381_v20 = vpop.f32.mrf.mxu1 }
 0x387   :  { %2427 = vst.msk [vmem:[%s5413_s7 + $0xf0] sm:$0xff] %vm2396_vm0, %v2390_v41  ;;  %v2382_v34 = vadd.f32 %v5244_v31, %v2381_v20 }
 0x388   :  { %v2597_v36 = vpop.f32.mrf.mxu1 }
 0x389   :  { %2425 = vst.msk [vmem:[%s5413_s7 + $0xe0] sm:$0xff] %vm2396_vm0, %v2382_v34  ;;  %v2393_v38 = vadd.f32 %v2597_v36, %v5244_v31 }
 0x38a   :  { %v2384_v0 = vpop.f32.mrf.mxu1 }
 0x38b   :  { %2428 = vst.msk [vmem:[%s5413_s7 + $0xf8] sm:$0xff] %vm2396_vm0, %v2393_v38  ;;  %v2385_v29 = vadd.f32 %v5244_v31, %v2384_v0 }
 0x38d   :  { %2426 = vst.msk [vmem:[%s5413_s7 + $0xe8] sm:$0xff] %vm2396_vm0, %v2385_v29 }

</bundles_post_ra>
